<compile_context>
chip_gen: v7x
topology: tpu7x:2x2x1
jax: 0.10.0
libtpu: 0.0.40
codegen_flags: <defaults>
</compile_context>

<pallas_src>
import functools

import jax
import jax.numpy as jnp
from jax.experimental import pallas as pl
from jax.experimental.pallas import tpu as pltpu

LRELU_SLOPE = 0.01   # PyTorch nn.LeakyReLU default
BN_EPS = 1e-5        # PyTorch nn.BatchNorm2d default

_VMEM = pl.BlockSpec(memory_space=pltpu.MemorySpace.VMEM)


# ---------------------------------------------------------------------------
# Kernels
# ---------------------------------------------------------------------------
def _linear_kernel(z_ref, wt_ref, b_ref, o_ref):
    # z: (B, D) bf16, wt: (D, F) bf16 (columns pre-permuted to HWC-flat order),
    # b: (1, F) f32 -> o: (B, F) bf16
    y = jnp.dot(z_ref[...], wt_ref[...], preferred_element_type=jnp.float32)
    o_ref[...] = (y + b_ref[...]).astype(o_ref.dtype)


def _convt_bn_lrelu_kernel(x_ref, w_ref, gamma_ref, beta_ref, o_ref):
    """Fused ConvTranspose2d(k=3, s=2, p=1, op=1) + BatchNorm(train) + LeakyReLU.

    Sub-pixel (4-phase) decomposition: a single MXU matmul of im2col patches
    (B*H*W, 4*Cin) against a phase-packed weight (4*Cin, 4*Cout).

      x_ref:      (B, H+1, W+1, Cin) bf16  (one zero row/col of high-side pad)
      w_ref:      (4*Cin, 4*Cout)    bf16  phase-packed weight
      gamma_ref:  (1, 4*Cout)        f32   BN gamma tiled per phase
      beta_ref:   (1, 4*Cout)        f32   BN beta tiled per phase
      o_ref:      (B*H*W, 4*Cout)    bf16  phase-major output [ee | eo | oe | oo]

    NOTE: the ConvTranspose bias is intentionally omitted -- it is exactly
    cancelled by the training-mode BatchNorm mean subtraction.
    """
    B, Hp, Wp, Cin = x_ref.shape
    H, W = Hp - 1, Wp - 1
    C4 = o_ref.shape[-1]
    Cout = C4 // 4
    R = B * H * W

    # im2col over the 2x2 tap neighbourhood (ref-sliced per tap; no dilated
    # tensor, no repeated whole-buffer loads).
    t00 = x_ref[:, 0:H, 0:W, :]
    t01 = x_ref[:, 0:H, 1:W + 1, :]
    t10 = x_ref[:, 1:H + 1, 0:W, :]
    t11 = x_ref[:, 1:H + 1, 1:W + 1, :]
    patches = jnp.concatenate([t00, t01, t10, t11], axis=-1).reshape(R, 4 * Cin)

    # Single large-K matmul: K = 4*Cin, N = 4*Cout, f32 accumulation on the MXU.
    y = jnp.dot(patches, w_ref[...], preferred_element_type=jnp.float32)  # (R, 4*Cout) f32

    # BatchNorm2d, training mode (biased variance).  Per-channel statistics pool
    # over all rows AND all 4 phase column-blocks (= all B*2H*2W positions).
    s1 = jnp.sum(y, axis=0, keepdims=True)        # (1, 4*Cout)
    s2 = jnp.sum(y * y, axis=0, keepdims=True)    # (1, 4*Cout)

    def _phase_sum(v):  # (1, 4*Cout) -> (1, Cout)
        return (v[:, 0:Cout] + v[:, Cout:2 * Cout]
                + v[:, 2 * Cout:3 * Cout] + v[:, 3 * Cout:4 * Cout])

    cnt = jnp.float32(4 * R)
    mean_c = _phase_sum(s1) / cnt
    var_c = _phase_sum(s2) / cnt - mean_c * mean_c
    inv_c = jax.lax.rsqrt(var_c + BN_EPS)
    mean4 = jnp.concatenate([mean_c] * 4, axis=-1)   # (1, 4*Cout)
    inv4 = jnp.concatenate([inv_c] * 4, axis=-1)

    y = (y - mean4) * (inv4 * gamma_ref[...]) + beta_ref[...]
    y = jnp.where(y >= 0, y, LRELU_SLOPE * y)        # LeakyReLU
    o_ref[...] = y.astype(o_ref.dtype)


def _conv3x3_tanh_kernel(x_ref, w_ref, b_ref, o_ref):
    """Final Conv2d(k=3, p=1, Cout=3) + Tanh as one im2col matmul (K = 9*Cin).

      x_ref: (B, H+2, W+2, Cin) bf16
      w_ref: (9*Cin, 128) bf16   (3 real output channels, zero-padded to 128 lanes)
      b_ref: (1, 128) f32
      o_ref: (B*H*W, 128) f32    lane-dense store; real channels are [:, :3]
    """
    B, Hp, Wp, Cin = x_ref.shape
    H, W = Hp - 2, Wp - 2
    R = B * H * W
    taps = [x_ref[:, kh:kh + H, kw:kw + W, :]
            for kh in range(3) for kw in range(3)]
    patches = jnp.concatenate(taps, axis=-1).reshape(R, 9 * Cin)
    y = jnp.dot(patches, w_ref[...], preferred_element_type=jnp.float32) + b_ref[...]
    o_ref[...] = jnp.tanh(y)


# ---------------------------------------------------------------------------
# pallas_call wrappers (shapes here are tiny -> whole arrays resident in VMEM)
# ---------------------------------------------------------------------------
def pallas_linear(z_bf16, wt_hwc, b_hwc):
    B = z_bf16.shape[0]
    F = wt_hwc.shape[1]
    return pl.pallas_call(
        _linear_kernel,
        out_shape=jax.ShapeDtypeStruct((B, F), jnp.bfloat16),
        in_specs=[_VMEM, _VMEM, _VMEM],
        out_specs=_VMEM,
    )(z_bf16, wt_hwc, b_hwc)


def pallas_convt_bn_lrelu(x_nhwc, blk):
    """x_nhwc: (B, H, W, Cin) bf16 -> (B, 2H, 2W, Cout) bf16."""
    B, H, W, Cin = x_nhwc.shape
    C4 = blk["w_packed"].shape[1]
    Cout = C4 // 4
    # One zero row/col of high-side padding (compact; XLA fuses it with the
    # preceding depth-to-space copy).  No zero-dilated tensor is built.
    x_pad = jnp.pad(x_nhwc, ((0, 0), (0, 1), (0, 1), (0, 0)))
    y2 = pl.pallas_call(
        _convt_bn_lrelu_kernel,
        out_shape=jax.ShapeDtypeStruct((B * H * W, C4), jnp.bfloat16),
        in_specs=[_VMEM] * 4,
        out_specs=_VMEM,
    )(x_pad, blk["w_packed"], blk["gamma4"], blk["beta4"])
    # depth-to-space: phase-major (R, 4*Cout) -> interleaved (B, 2H, 2W, Cout)
    y = y2.reshape(B, H, W, 2, 2, Cout).transpose(0, 1, 3, 2, 4, 5)
    return y.reshape(B, 2 * H, 2 * W, Cout)


def pallas_conv_tanh(x_nhwc, w_packed, b_packed, n_out):
    B, H, W, Cin = x_nhwc.shape
    n_lanes = w_packed.shape[1]
    x_pad = jnp.pad(x_nhwc, ((0, 0), (1, 1), (1, 1), (0, 0)))
    y = pl.pallas_call(
        _conv3x3_tanh_kernel,
        out_shape=jax.ShapeDtypeStruct((B * H * W, n_lanes), jnp.float32),
        in_specs=[_VMEM] * 3,
        out_specs=_VMEM,
    )(x_pad, w_packed, b_packed)
    return y[:, :n_out].reshape(B, H, W, n_out)


# ---------------------------------------------------------------------------
# Parameters: PyTorch-layout init + one-time layout preparation
# ---------------------------------------------------------------------------
def init_decoder_params(key, latent_dim, hidden_dims_rev, h0, w0):
    """Deterministic synthetic parameters matching the PyTorch module's shapes."""
    params = {}
    c0 = hidden_dims_rev[0]
    feat = c0 * h0 * w0

    keys = jax.random.split(key, 32)
    ki = iter(range(32))

    # Linear(latent_dim -> C0*H0*W0): PyTorch weight shape (feat, latent_dim)
    params["lin_w"] = 0.1 * jax.random.normal(keys[next(ki)], (feat, latent_dim), jnp.float32)
    params["lin_b"] = 0.1 * jax.random.normal(keys[next(ki)], (feat,), jnp.float32)

    def convt_block(cin, cout):
        return {
            "w": 0.1 * jax.random.normal(keys[next(ki)], (cin, cout, 3, 3), jnp.float32),
            "b": 0.1 * jax.random.normal(keys[next(ki)], (cout,), jnp.float32),
            "gamma": jax.random.uniform(keys[next(ki)], (cout,), jnp.float32, 0.5, 1.5),
            "beta": 0.1 * jax.random.normal(keys[next(ki)], (cout,), jnp.float32),
        }

    blocks = []
    for i in range(len(hidden_dims_rev) - 1):
        blocks.append(convt_block(hidden_dims_rev[i], hidden_dims_rev[i + 1]))
    blocks.append(convt_block(hidden_dims_rev[-1], hidden_dims_rev[-1]))
    params["blocks"] = blocks

    # Final Conv2d(hidden[-1] -> 3, k=3, p=1)
    params["out_w"] = 0.1 * jax.random.normal(
        keys[next(ki)], (3, hidden_dims_rev[-1], 3, 3), jnp.float32)
    params["out_b"] = 0.1 * jax.random.normal(keys[next(ki)], (3,), jnp.float32)
    return params


def _pack_convt_weight(wt):
    """Phase-pack a PyTorch ConvTranspose2d weight (Cin, Cout, 3, 3) into
    (4*Cin, 4*Cout).  Row blocks = taps x[i+dh, j+dw] in order
    (0,0),(0,1),(1,0),(1,1); column blocks = output phases (ph,pw) in order
    ee, eo, oe, oo, where output (2i+ph, 2j+pw) = sum over contributing taps."""
    Cin, Cout = wt.shape[0], wt.shape[1]

    def k_idx(phase, delta):
        if phase == 0:                      # even output coord: only delta=0, k=1
            return 1 if delta == 0 else None
        return 2 if delta == 0 else 0       # odd output coord: delta=0 -> k=2, delta=1 -> k=0

    rows = []
    for (dh, dw) in ((0, 0), (0, 1), (1, 0), (1, 1)):
        cols = []
        for (ph, pw) in ((0, 0), (0, 1), (1, 0), (1, 1)):
            kh, kw = k_idx(ph, dh), k_idx(pw, dw)
            if kh is None or kw is None:
                cols.append(jnp.zeros((Cin, Cout), jnp.float32))
            else:
                cols.append(wt[:, :, kh, kw])
        rows.append(jnp.concatenate(cols, axis=1))      # (Cin, 4*Cout)
    return jnp.concatenate(rows, axis=0)                # (4*Cin, 4*Cout)


def prepare_params(params, c0, h0, w0):
    """One-time layout glue hoisted out of the per-forward path."""
    feat, D = params["lin_w"].shape
    # Permute Linear output features from NCHW-flat to NHWC-flat so the kernel's
    # (B, feat) output reshapes directly to (B, H0, W0, C0) with no transpose.
    lin_wT = params["lin_w"].T.reshape(D, c0, h0, w0).transpose(0, 2, 3, 1).reshape(D, feat)
    lin_b = params["lin_b"].reshape(c0, h0, w0).transpose(1, 2, 0).reshape(1, feat)

    prep = {
        "lin_wT": lin_wT.astype(jnp.bfloat16),
        "lin_b": lin_b.astype(jnp.float32),
        "blocks": [],
    }
    for blk in params["blocks"]:
        cout = blk["w"].shape[1]
        prep["blocks"].append({
            "w_packed": _pack_convt_weight(blk["w"]).astype(jnp.bfloat16),
            # conv bias dropped: exactly cancelled by training-mode BN mean subtraction
            "gamma4": jnp.tile(blk["gamma"], 4).reshape(1, 4 * cout).astype(jnp.float32),
            "beta4": jnp.tile(blk["beta"], 4).reshape(1, 4 * cout).astype(jnp.float32),
        })

    cin_last = params["out_w"].shape[1]
    n_lanes = 128   # lane-dense matmul N / output store (real channels = 3)
    w9 = params["out_w"].transpose(2, 3, 1, 0).reshape(9 * cin_last, 3)
    prep["out_w"] = jnp.pad(w9, ((0, 0), (0, n_lanes - 3))).astype(jnp.bfloat16)
    prep["out_b"] = jnp.pad(params["out_b"].reshape(1, 3),
                            ((0, 0), (0, n_lanes - 3))).astype(jnp.float32)
    return prep


# ---------------------------------------------------------------------------
# Forward
# ---------------------------------------------------------------------------
@functools.partial(jax.jit, static_argnames=("c0", "h0", "w0"))
def decoder_forward(z, prep, *, c0, h0, w0):
    """z: (B, latent_dim) f32 -> image (B, 3, H_out, W_out) f32 [NCHW]."""
    B = z.shape[0]
    feat = pallas_linear(z.astype(jnp.bfloat16), prep["lin_wT"], prep["lin_b"])
    x = feat.reshape(B, h0, w0, c0)          # NHWC directly (weights pre-permuted)
    for blk in prep["blocks"]:
        x = pallas_convt_bn_lrelu(x, blk)    # each block doubles H and W
    y = pallas_conv_tanh(x, prep["out_w"], prep["out_b"], n_out=3)
    return jnp.transpose(y, (0, 3, 1, 2))    # back to NCHW like PyTorch


# ---------------------------------------------------------------------------
# Pure-JAX reference (mirrors the kernel's mixed precision at block boundaries)
# ---------------------------------------------------------------------------
def _ref_forward(z, params, c0, h0, w0):
    f32 = jnp.float32
    B = z.shape[0]
    zb = z.astype(jnp.bfloat16).astype(f32)
    wl = params["lin_w"].astype(jnp.bfloat16).astype(f32)
    feat = zb @ wl.T + params["lin_b"]
    x = feat.reshape(B, c0, h0, w0).transpose(0, 2, 3, 1).astype(jnp.bfloat16)   # NHWC

    for blk in params["blocks"]:
        xin = x.astype(f32)
        wt = blk["w"].astype(jnp.bfloat16).astype(f32)
        w_eq = jnp.flip(wt, axis=(2, 3)).transpose(2, 3, 0, 1)   # (3,3,Cin,Cout) HWIO
        y = jax.lax.conv_general_dilated(
            xin, w_eq, window_strides=(1, 1), padding=((1, 2), (1, 2)),
            lhs_dilation=(2, 2), dimension_numbers=("NHWC", "HWIO", "NHWC"))
        y = y + blk["b"].reshape(1, 1, 1, -1)   # kept here; BN cancels it exactly
        mean = jnp.mean(y, axis=(0, 1, 2), keepdims=True)
        var = jnp.mean((y - mean) ** 2, axis=(0, 1, 2), keepdims=True)
        y = (y - mean) * jax.lax.rsqrt(var + BN_EPS)
        y = y * blk["gamma"].reshape(1, 1, 1, -1) + blk["beta"].reshape(1, 1, 1, -1)
        y = jnp.where(y >= 0, y, LRELU_SLOPE * y)
        x = y.astype(jnp.bfloat16)

    xin = x.astype(f32)
    wo = params["out_w"].astype(jnp.bfloat16).astype(f32)
    w_eq = wo.transpose(2, 3, 1, 0)   # (3,3,Cin,3)
    y = jax.lax.conv_general_dilated(
        xin, w_eq, window_strides=(1, 1), padding=((1, 1), (1, 1)),
        dimension_numbers=("NHWC", "HWIO", "NHWC"))
    y = jnp.tanh(y + params["out_b"].reshape(1, 1, 1, -1))
    return jnp.transpose(y, (0, 3, 1, 2))


if __name__ == "__main__":
    # Small config consistent with the module:
    #   encoder hidden_dims = [16, 32] -> reversed in the decoder: [32, 16]
    #   encoder final feature map: (32, 4, 4) => Linear(latent, 32*4*4)
    latent_dim = 32
    hidden_dims_rev = [32, 16]
    c0, h0, w0 = hidden_dims_rev[0], 4, 4
    batch = 2

    key = jax.random.PRNGKey(0)
    pkey, zkey = jax.random.split(key)
    params = init_decoder_params(pkey, latent_dim, hidden_dims_rev, h0, w0)
    prep = prepare_params(params, c0, h0, w0)
    z = jax.random.normal(zkey, (batch, latent_dim), jnp.float32)

    out = decoder_forward(z, prep, c0=c0, h0=h0, w0=w0)
    out = jax.block_until_ready(out)

    n_blocks = len(params["blocks"])
    expected_shape = (batch, 3, h0 * 2 ** n_blocks, w0 * 2 ** n_blocks)
    assert out.shape == expected_shape, (out.shape, expected_shape)
    assert bool(jnp.all(jnp.isfinite(out)))
    assert bool(jnp.all(jnp.abs(out) <= 1.0))   # Tanh output range

    ref = _ref_forward(z, params, c0, h0, w0)
    max_err = float(jnp.max(jnp.abs(out - ref)))
    assert max_err < 5e-2, f"max abs error vs reference: {max_err}"

    print("KERNEL_OK")
</pallas_src>

<mosaic_0001>
module attributes {stable_mosaic.version = 11 : i64} {
  func.func @_linear_kernel(%arg0: memref<2x32xbf16, #tpu.memory_space<vmem>>, %arg1: memref<32x512xbf16, #tpu.memory_space<vmem>>, %arg2: memref<1x512xf32, #tpu.memory_space<vmem>>, %arg3: memref<2x512xbf16, #tpu.memory_space<vmem>>) attributes {dimension_semantics = [], scalar_prefetch = 0 : i64, scratch_operands = 0 : i64, tpu.core_type = #tpu.core_type<tc>} {
    %c0 = arith.constant 0 : index
    %c0_0 = arith.constant 0 : index
    %0 = vector.load %arg0[%c0, %c0_0] : memref<2x32xbf16, #tpu.memory_space<vmem>>, vector<2x32xbf16>
    %c0_1 = arith.constant 0 : index
    %c0_2 = arith.constant 0 : index
    %1 = vector.load %arg1[%c0_1, %c0_2] : memref<32x512xbf16, #tpu.memory_space<vmem>>, vector<32x512xbf16>
    %cst = arith.constant dense<0.000000e+00> : vector<2x512xf32>
    %2 = tpu.matmul %0, %1, %cst {dimension_numbers = #tpu.dot_dimension_numbers<[1], [0], [0], [1], [0, 0, 1, 1], [], []>} : vector<2x32xbf16>, vector<32x512xbf16>, vector<2x512xf32> -> vector<2x512xf32>
    %c0_3 = arith.constant 0 : index
    %c0_4 = arith.constant 0 : index
    %3 = vector.load %arg2[%c0_3, %c0_4] : memref<1x512xf32, #tpu.memory_space<vmem>>, vector<1x512xf32>
    %4 = vector.broadcast %3 : vector<1x512xf32> to vector<2x512xf32>
    %5 = arith.addf %2, %4 : vector<2x512xf32>
    %6 = arith.truncf %5 : vector<2x512xf32> to vector<2x512xbf16>
    %c0_5 = arith.constant 0 : index
    %c0_6 = arith.constant 0 : index
    %7 = vector.load %arg3[%c0_5, %c0_6] : memref<2x512xbf16, #tpu.memory_space<vmem>>, vector<2x512xbf16>
    tpu.vector_store %arg3[%c0_5, %c0_6], %6 {strides = array<i32>} : memref<2x512xbf16, #tpu.memory_space<vmem>>, vector<2x512xbf16>,
    return
  }
}

module attributes {stable_mosaic.version = 11 : i64} {
  func.func @_convt_bn_lrelu_kernel(%arg0: memref<2x5x5x32xbf16, #tpu.memory_space<vmem>>, %arg1: memref<128x64xbf16, #tpu.memory_space<vmem>>, %arg2: memref<1x64xf32, #tpu.memory_space<vmem>>, %arg3: memref<1x64xf32, #tpu.memory_space<vmem>>, %arg4: memref<32x64xbf16, #tpu.memory_space<vmem>>) attributes {dimension_semantics = [], scalar_prefetch = 0 : i64, scratch_operands = 0 : i64, tpu.core_type = #tpu.core_type<tc>} {
    %c0 = arith.constant 0 : index
    %c0_0 = arith.constant 0 : index
    %c0_1 = arith.constant 0 : index
    %c0_2 = arith.constant 0 : index
    %0 = vector.load %arg0[%c0, %c0_0, %c0_1, %c0_2] : memref<2x5x5x32xbf16, #tpu.memory_space<vmem>>, vector<2x4x4x32xbf16>
    %c0_3 = arith.constant 0 : index
    %c0_4 = arith.constant 0 : index
    %c1 = arith.constant 1 : index
    %c0_5 = arith.constant 0 : index
    %1 = vector.load %arg0[%c0_3, %c0_4, %c1, %c0_5] : memref<2x5x5x32xbf16, #tpu.memory_space<vmem>>, vector<2x4x4x32xbf16>
    %c0_6 = arith.constant 0 : index
    %c1_7 = arith.constant 1 : index
    %c0_8 = arith.constant 0 : index
    %c0_9 = arith.constant 0 : index
    %2 = vector.load %arg0[%c0_6, %c1_7, %c0_8, %c0_9] : memref<2x5x5x32xbf16, #tpu.memory_space<vmem>>, vector<2x4x4x32xbf16>
    %c0_10 = arith.constant 0 : index
    %c1_11 = arith.constant 1 : index
    %c1_12 = arith.constant 1 : index
    %c0_13 = arith.constant 0 : index
    %3 = vector.load %arg0[%c0_10, %c1_11, %c1_12, %c0_13] : memref<2x5x5x32xbf16, #tpu.memory_space<vmem>>, vector<2x4x4x32xbf16>
    %4 = tpu.concatenate %0, %1, %2, %3 in 3 : vector<2x4x4x32xbf16>, vector<2x4x4x32xbf16>, vector<2x4x4x32xbf16>, vector<2x4x4x32xbf16> -> vector<2x4x4x128xbf16>
    %5 = vector.shape_cast %4 : vector<2x4x4x128xbf16> to vector<32x128xbf16>
    %c0_14 = arith.constant 0 : index
    %c0_15 = arith.constant 0 : index
    %6 = vector.load %arg1[%c0_14, %c0_15] : memref<128x64xbf16, #tpu.memory_space<vmem>>, vector<128x64xbf16>
    %cst = arith.constant dense<0.000000e+00> : vector<32x64xf32>
    %7 = tpu.matmul %5, %6, %cst {dimension_numbers = #tpu.dot_dimension_numbers<[1], [0], [0], [1], [0, 0, 1, 1], [], []>} : vector<32x128xbf16>, vector<128x64xbf16>, vector<32x64xf32> -> vector<32x64xf32>
    %cst_16 = arith.constant dense<0.000000e+00> : vector<64xf32>
    %8 = vector.multi_reduction <add>, %7, %cst_16 [0] : vector<32x64xf32> to vector<64xf32>
    %9 = vector.shape_cast %8 : vector<64xf32> to vector<1x64xf32>
    %10 = arith.mulf %7, %7 : vector<32x64xf32>
    %cst_17 = arith.constant dense<0.000000e+00> : vector<64xf32>
    %11 = vector.multi_reduction <add>, %10, %cst_17 [0] : vector<32x64xf32> to vector<64xf32>
    %12 = vector.shape_cast %11 : vector<64xf32> to vector<1x64xf32>
    %13 = vector.extract_strided_slice %9 {offsets = [0, 0], sizes = [1, 16], strides = [1, 1]} : vector<1x64xf32> to vector<1x16xf32>
    %14 = vector.extract_strided_slice %9 {offsets = [0, 16], sizes = [1, 16], strides = [1, 1]} : vector<1x64xf32> to vector<1x16xf32>
    %15 = arith.addf %13, %14 : vector<1x16xf32>
    %16 = vector.extract_strided_slice %9 {offsets = [0, 32], sizes = [1, 16], strides = [1, 1]} : vector<1x64xf32> to vector<1x16xf32>
    %17 = arith.addf %15, %16 : vector<1x16xf32>
    %18 = vector.extract_strided_slice %9 {offsets = [0, 48], sizes = [1, 16], strides = [1, 1]} : vector<1x64xf32> to vector<1x16xf32>
    %19 = arith.addf %17, %18 : vector<1x16xf32>
    %cst_18 = arith.constant 1.280000e+02 : f32
    %20 = vector.broadcast %cst_18 : f32 to vector<1x16xf32>
    %21 = arith.divf %19, %20 : vector<1x16xf32>
    %22 = vector.extract_strided_slice %12 {offsets = [0, 0], sizes = [1, 16], strides = [1, 1]} : vector<1x64xf32> to vector<1x16xf32>
    %23 = vector.extract_strided_slice %12 {offsets = [0, 16], sizes = [1, 16], strides = [1, 1]} : vector<1x64xf32> to vector<1x16xf32>
    %24 = arith.addf %22, %23 : vector<1x16xf32>
    %25 = vector.extract_strided_slice %12 {offsets = [0, 32], sizes = [1, 16], strides = [1, 1]} : vector<1x64xf32> to vector<1x16xf32>
    %26 = arith.addf %24, %25 : vector<1x16xf32>
    %27 = vector.extract_strided_slice %12 {offsets = [0, 48], sizes = [1, 16], strides = [1, 1]} : vector<1x64xf32> to vector<1x16xf32>
    %28 = arith.addf %26, %27 : vector<1x16xf32>
    %cst_19 = arith.constant 1.280000e+02 : f32
    %29 = vector.broadcast %cst_19 : f32 to vector<1x16xf32>
    %30 = arith.divf %28, %29 : vector<1x16xf32>
    %31 = arith.mulf %21, %21 : vector<1x16xf32>
    %32 = arith.subf %30, %31 : vector<1x16xf32>
    %cst_20 = arith.constant 9.99999974E-6 : f32
    %33 = vector.broadcast %cst_20 : f32 to vector<1x16xf32>
    %34 = arith.addf %32, %33 : vector<1x16xf32>
    %35 = math.rsqrt %34 : vector<1x16xf32>
    %36 = tpu.concatenate %21, %21, %21, %21 in 1 : vector<1x16xf32>, vector<1x16xf32>, vector<1x16xf32>, vector<1x16xf32> -> vector<1x64xf32>
    %37 = tpu.concatenate %35, %35, %35, %35 in 1 : vector<1x16xf32>, vector<1x16xf32>, vector<1x16xf32>, vector<1x16xf32> -> vector<1x64xf32>
    %38 = vector.broadcast %36 : vector<1x64xf32> to vector<32x64xf32>
    %39 = arith.subf %7, %38 : vector<32x64xf32>
    %c0_21 = arith.constant 0 : index
    %c0_22 = arith.constant 0 : index
    %40 = vector.load %arg2[%c0_21, %c0_22] : memref<1x64xf32, #tpu.memory_space<vmem>>, vector<1x64xf32>
    %41 = arith.mulf %37, %40 : vector<1x64xf32>
    %42 = vector.broadcast %41 : vector<1x64xf32> to vector<32x64xf32>
    %43 = arith.mulf %39, %42 : vector<32x64xf32>
    %c0_23 = arith.constant 0 : index
    %c0_24 = arith.constant 0 : index
    %44 = vector.load %arg3[%c0_23, %c0_24] : memref<1x64xf32, #tpu.memory_space<vmem>>, vector<1x64xf32>
    %45 = vector.broadcast %44 : vector<1x64xf32> to vector<32x64xf32>
    %46 = arith.addf %43, %45 : vector<32x64xf32>
    %cst_25 = arith.constant 0.000000e+00 : f32
    %47 = vector.broadcast %cst_25 : f32 to vector<32x64xf32>
    %48 = arith.cmpf oge, %46, %47 : vector<32x64xf32>
    %cst_26 = arith.constant 0.00999999977 : f32
    %49 = vector.broadcast %cst_26 : f32 to vector<32x64xf32>
    %50 = arith.mulf %49, %46 : vector<32x64xf32>
    %51 = arith.select %48, %46, %50 : vector<32x64xi1>, vector<32x64xf32>
    %52 = arith.truncf %51 : vector<32x64xf32> to vector<32x64xbf16>
    %c0_27 = arith.constant 0 : index
    %c0_28 = arith.constant 0 : index
    %53 = vector.load %arg4[%c0_27, %c0_28] : memref<32x64xbf16, #tpu.memory_space<vmem>>, vector<32x64xbf16>
    tpu.vector_store %arg4[%c0_27, %c0_28], %52 {strides = array<i32>} : memref<32x64xbf16, #tpu.memory_space<vmem>>, vector<32x64xbf16>,
    return
  }
}

module attributes {stable_mosaic.version = 11 : i64} {
  func.func @_convt_bn_lrelu_kernel(%arg0: memref<2x9x9x16xbf16, #tpu.memory_space<vmem>>, %arg1: memref<64x64xbf16, #tpu.memory_space<vmem>>, %arg2: memref<1x64xf32, #tpu.memory_space<vmem>>, %arg3: memref<1x64xf32, #tpu.memory_space<vmem>>, %arg4: memref<128x64xbf16, #tpu.memory_space<vmem>>) attributes {dimension_semantics = [], scalar_prefetch = 0 : i64, scratch_operands = 0 : i64, tpu.core_type = #tpu.core_type<tc>} {
    %c0 = arith.constant 0 : index
    %c0_0 = arith.constant 0 : index
    %c0_1 = arith.constant 0 : index
    %c0_2 = arith.constant 0 : index
    %0 = vector.load %arg0[%c0, %c0_0, %c0_1, %c0_2] : memref<2x9x9x16xbf16, #tpu.memory_space<vmem>>, vector<2x8x8x16xbf16>
    %c0_3 = arith.constant 0 : index
    %c0_4 = arith.constant 0 : index
    %c1 = arith.constant 1 : index
    %c0_5 = arith.constant 0 : index
    %1 = vector.load %arg0[%c0_3, %c0_4, %c1, %c0_5] : memref<2x9x9x16xbf16, #tpu.memory_space<vmem>>, vector<2x8x8x16xbf16>
    %c0_6 = arith.constant 0 : index
    %c1_7 = arith.constant 1 : index
    %c0_8 = arith.constant 0 : index
    %c0_9 = arith.constant 0 : index
    %2 = vector.load %arg0[%c0_6, %c1_7, %c0_8, %c0_9] : memref<2x9x9x16xbf16, #tpu.memory_space<vmem>>, vector<2x8x8x16xbf16>
    %c0_10 = arith.constant 0 : index
    %c1_11 = arith.constant 1 : index
    %c1_12 = arith.constant 1 : index
    %c0_13 = arith.constant 0 : index
    %3 = vector.load %arg0[%c0_10, %c1_11, %c1_12, %c0_13] : memref<2x9x9x16xbf16, #tpu.memory_space<vmem>>, vector<2x8x8x16xbf16>
    %4 = tpu.concatenate %0, %1, %2, %3 in 3 : vector<2x8x8x16xbf16>, vector<2x8x8x16xbf16>, vector<2x8x8x16xbf16>, vector<2x8x8x16xbf16> -> vector<2x8x8x64xbf16>
    %5 = vector.shape_cast %4 : vector<2x8x8x64xbf16> to vector<128x64xbf16>
    %c0_14 = arith.constant 0 : index
    %c0_15 = arith.constant 0 : index
    %6 = vector.load %arg1[%c0_14, %c0_15] : memref<64x64xbf16, #tpu.memory_space<vmem>>, vector<64x64xbf16>
    %cst = arith.constant dense<0.000000e+00> : vector<128x64xf32>
    %7 = tpu.matmul %5, %6, %cst {dimension_numbers = #tpu.dot_dimension_numbers<[1], [0], [0], [1], [0, 0, 1, 1], [], []>} : vector<128x64xbf16>, vector<64x64xbf16>, vector<128x64xf32> -> vector<128x64xf32>
    %cst_16 = arith.constant dense<0.000000e+00> : vector<64xf32>
    %8 = vector.multi_reduction <add>, %7, %cst_16 [0] : vector<128x64xf32> to vector<64xf32>
    %9 = vector.shape_cast %8 : vector<64xf32> to vector<1x64xf32>
    %10 = arith.mulf %7, %7 : vector<128x64xf32>
    %cst_17 = arith.constant dense<0.000000e+00> : vector<64xf32>
    %11 = vector.multi_reduction <add>, %10, %cst_17 [0] : vector<128x64xf32> to vector<64xf32>
    %12 = vector.shape_cast %11 : vector<64xf32> to vector<1x64xf32>
    %13 = vector.extract_strided_slice %9 {offsets = [0, 0], sizes = [1, 16], strides = [1, 1]} : vector<1x64xf32> to vector<1x16xf32>
    %14 = vector.extract_strided_slice %9 {offsets = [0, 16], sizes = [1, 16], strides = [1, 1]} : vector<1x64xf32> to vector<1x16xf32>
    %15 = arith.addf %13, %14 : vector<1x16xf32>
    %16 = vector.extract_strided_slice %9 {offsets = [0, 32], sizes = [1, 16], strides = [1, 1]} : vector<1x64xf32> to vector<1x16xf32>
    %17 = arith.addf %15, %16 : vector<1x16xf32>
    %18 = vector.extract_strided_slice %9 {offsets = [0, 48], sizes = [1, 16], strides = [1, 1]} : vector<1x64xf32> to vector<1x16xf32>
    %19 = arith.addf %17, %18 : vector<1x16xf32>
    %cst_18 = arith.constant 5.120000e+02 : f32
    %20 = vector.broadcast %cst_18 : f32 to vector<1x16xf32>
    %21 = arith.divf %19, %20 : vector<1x16xf32>
    %22 = vector.extract_strided_slice %12 {offsets = [0, 0], sizes = [1, 16], strides = [1, 1]} : vector<1x64xf32> to vector<1x16xf32>
    %23 = vector.extract_strided_slice %12 {offsets = [0, 16], sizes = [1, 16], strides = [1, 1]} : vector<1x64xf32> to vector<1x16xf32>
    %24 = arith.addf %22, %23 : vector<1x16xf32>
    %25 = vector.extract_strided_slice %12 {offsets = [0, 32], sizes = [1, 16], strides = [1, 1]} : vector<1x64xf32> to vector<1x16xf32>
    %26 = arith.addf %24, %25 : vector<1x16xf32>
    %27 = vector.extract_strided_slice %12 {offsets = [0, 48], sizes = [1, 16], strides = [1, 1]} : vector<1x64xf32> to vector<1x16xf32>
    %28 = arith.addf %26, %27 : vector<1x16xf32>
    %cst_19 = arith.constant 5.120000e+02 : f32
    %29 = vector.broadcast %cst_19 : f32 to vector<1x16xf32>
    %30 = arith.divf %28, %29 : vector<1x16xf32>
    %31 = arith.mulf %21, %21 : vector<1x16xf32>
    %32 = arith.subf %30, %31 : vector<1x16xf32>
    %cst_20 = arith.constant 9.99999974E-6 : f32
    %33 = vector.broadcast %cst_20 : f32 to vector<1x16xf32>
    %34 = arith.addf %32, %33 : vector<1x16xf32>
    %35 = math.rsqrt %34 : vector<1x16xf32>
    %36 = tpu.concatenate %21, %21, %21, %21 in 1 : vector<1x16xf32>, vector<1x16xf32>, vector<1x16xf32>, vector<1x16xf32> -> vector<1x64xf32>
    %37 = tpu.concatenate %35, %35, %35, %35 in 1 : vector<1x16xf32>, vector<1x16xf32>, vector<1x16xf32>, vector<1x16xf32> -> vector<1x64xf32>
    %38 = vector.broadcast %36 : vector<1x64xf32> to vector<128x64xf32>
    %39 = arith.subf %7, %38 : vector<128x64xf32>
    %c0_21 = arith.constant 0 : index
    %c0_22 = arith.constant 0 : index
    %40 = vector.load %arg2[%c0_21, %c0_22] : memref<1x64xf32, #tpu.memory_space<vmem>>, vector<1x64xf32>
    %41 = arith.mulf %37, %40 : vector<1x64xf32>
    %42 = vector.broadcast %41 : vector<1x64xf32> to vector<128x64xf32>
    %43 = arith.mulf %39, %42 : vector<128x64xf32>
    %c0_23 = arith.constant 0 : index
    %c0_24 = arith.constant 0 : index
    %44 = vector.load %arg3[%c0_23, %c0_24] : memref<1x64xf32, #tpu.memory_space<vmem>>, vector<1x64xf32>
    %45 = vector.broadcast %44 : vector<1x64xf32> to vector<128x64xf32>
    %46 = arith.addf %43, %45 : vector<128x64xf32>
    %cst_25 = arith.constant 0.000000e+00 : f32
    %47 = vector.broadcast %cst_25 : f32 to vector<128x64xf32>
    %48 = arith.cmpf oge, %46, %47 : vector<128x64xf32>
    %cst_26 = arith.constant 0.00999999977 : f32
    %49 = vector.broadcast %cst_26 : f32 to vector<128x64xf32>
    %50 = arith.mulf %49, %46 : vector<128x64xf32>
    %51 = arith.select %48, %46, %50 : vector<128x64xi1>, vector<128x64xf32>
    %52 = arith.truncf %51 : vector<128x64xf32> to vector<128x64xbf16>
    %c0_27 = arith.constant 0 : index
    %c0_28 = arith.constant 0 : index
    %53 = vector.load %arg4[%c0_27, %c0_28] : memref<128x64xbf16, #tpu.memory_space<vmem>>, vector<128x64xbf16>
    tpu.vector_store %arg4[%c0_27, %c0_28], %52 {strides = array<i32>} : memref<128x64xbf16, #tpu.memory_space<vmem>>, vector<128x64xbf16>,
    return
  }
}

module attributes {stable_mosaic.version = 11 : i64} {
  func.func @_conv3x3_tanh_kernel(%arg0: memref<2x18x18x16xbf16, #tpu.memory_space<vmem>>, %arg1: memref<144x128xbf16, #tpu.memory_space<vmem>>, %arg2: memref<1x128xf32, #tpu.memory_space<vmem>>, %arg3: memref<512x128xf32, #tpu.memory_space<vmem>>) attributes {dimension_semantics = [], scalar_prefetch = 0 : i64, scratch_operands = 0 : i64, tpu.core_type = #tpu.core_type<tc>} {
    %c0 = arith.constant 0 : index
    %c0_0 = arith.constant 0 : index
    %c0_1 = arith.constant 0 : index
    %c0_2 = arith.constant 0 : index
    %0 = vector.load %arg0[%c0, %c0_0, %c0_1, %c0_2] : memref<2x18x18x16xbf16, #tpu.memory_space<vmem>>, vector<2x16x16x16xbf16>
    %c0_3 = arith.constant 0 : index
    %c0_4 = arith.constant 0 : index
    %c1 = arith.constant 1 : index
    %c0_5 = arith.constant 0 : index
    %1 = vector.load %arg0[%c0_3, %c0_4, %c1, %c0_5] : memref<2x18x18x16xbf16, #tpu.memory_space<vmem>>, vector<2x16x16x16xbf16>
    %c0_6 = arith.constant 0 : index
    %c0_7 = arith.constant 0 : index
    %c2 = arith.constant 2 : index
    %c0_8 = arith.constant 0 : index
    %2 = vector.load %arg0[%c0_6, %c0_7, %c2, %c0_8] : memref<2x18x18x16xbf16, #tpu.memory_space<vmem>>, vector<2x16x16x16xbf16>
    %c0_9 = arith.constant 0 : index
    %c1_10 = arith.constant 1 : index
    %c0_11 = arith.constant 0 : index
    %c0_12 = arith.constant 0 : index
    %3 = vector.load %arg0[%c0_9, %c1_10, %c0_11, %c0_12] : memref<2x18x18x16xbf16, #tpu.memory_space<vmem>>, vector<2x16x16x16xbf16>
    %c0_13 = arith.constant 0 : index
    %c1_14 = arith.constant 1 : index
    %c1_15 = arith.constant 1 : index
    %c0_16 = arith.constant 0 : index
    %4 = vector.load %arg0[%c0_13, %c1_14, %c1_15, %c0_16] : memref<2x18x18x16xbf16, #tpu.memory_space<vmem>>, vector<2x16x16x16xbf16>
    %c0_17 = arith.constant 0 : index
    %c1_18 = arith.constant 1 : index
    %c2_19 = arith.constant 2 : index
    %c0_20 = arith.constant 0 : index
    %5 = vector.load %arg0[%c0_17, %c1_18, %c2_19, %c0_20] : memref<2x18x18x16xbf16, #tpu.memory_space<vmem>>, vector<2x16x16x16xbf16>
    %c0_21 = arith.constant 0 : index
    %c2_22 = arith.constant 2 : index
    %c0_23 = arith.constant 0 : index
    %c0_24 = arith.constant 0 : index
    %6 = vector.load %arg0[%c0_21, %c2_22, %c0_23, %c0_24] : memref<2x18x18x16xbf16, #tpu.memory_space<vmem>>, vector<2x16x16x16xbf16>
    %c0_25 = arith.constant 0 : index
    %c2_26 = arith.constant 2 : index
    %c1_27 = arith.constant 1 : index
    %c0_28 = arith.constant 0 : index
    %7 = vector.load %arg0[%c0_25, %c2_26, %c1_27, %c0_28] : memref<2x18x18x16xbf16, #tpu.memory_space<vmem>>, vector<2x16x16x16xbf16>
    %c0_29 = arith.constant 0 : index
    %c2_30 = arith.constant 2 : index
    %c2_31 = arith.constant 2 : index
    %c0_32 = arith.constant 0 : index
    %8 = vector.load %arg0[%c0_29, %c2_30, %c2_31, %c0_32] : memref<2x18x18x16xbf16, #tpu.memory_space<vmem>>, vector<2x16x16x16xbf16>
    %9 = tpu.concatenate %0, %1, %2, %3, %4, %5, %6, %7, %8 in 3 : vector<2x16x16x16xbf16>, vector<2x16x16x16xbf16>, vector<2x16x16x16xbf16>, vector<2x16x16x16xbf16>, vector<2x16x16x16xbf16>, vector<2x16x16x16xbf16>, vector<2x16x16x16xbf16>, vector<2x16x16x16xbf16>, vector<2x16x16x16xbf16> -> vector<2x16x16x144xbf16>
    %10 = vector.shape_cast %9 : vector<2x16x16x144xbf16> to vector<512x144xbf16>
    %c0_33 = arith.constant 0 : index
    %c0_34 = arith.constant 0 : index
    %11 = vector.load %arg1[%c0_33, %c0_34] : memref<144x128xbf16, #tpu.memory_space<vmem>>, vector<144x128xbf16>
    %cst = arith.constant dense<0.000000e+00> : vector<512x128xf32>
    %12 = tpu.matmul %10, %11, %cst {dimension_numbers = #tpu.dot_dimension_numbers<[1], [0], [0], [1], [0, 0, 1, 1], [], []>} : vector<512x144xbf16>, vector<144x128xbf16>, vector<512x128xf32> -> vector<512x128xf32>
    %c0_35 = arith.constant 0 : index
    %c0_36 = arith.constant 0 : index
    %13 = vector.load %arg2[%c0_35, %c0_36] : memref<1x128xf32, #tpu.memory_space<vmem>>, vector<1x128xf32>
    %14 = vector.broadcast %13 : vector<1x128xf32> to vector<512x128xf32>
    %15 = arith.addf %12, %14 : vector<512x128xf32>
    %16 = math.tanh %15 : vector<512x128xf32>
    %c0_37 = arith.constant 0 : index
    %c0_38 = arith.constant 0 : index
    %17 = vector.load %arg3[%c0_37, %c0_38] : memref<512x128xf32, #tpu.memory_space<vmem>>, vector<512x128xf32>
    tpu.vector_store %arg3[%c0_37, %c0_38], %16 {strides = array<i32>} : memref<512x128xf32, #tpu.memory_space<vmem>>, vector<512x128xf32>,
    return
  }
}

</mosaic_0001>

<bundles_post_ra>
// kernel: decoder_forward.4
= control target key start
LH: loop header
LB: loop body
LE: loop exit
PB: predicated region body
PF: predicated region fallthrough
CT: control target
= control target key end

     0   :  { %8 = vsyncpa [#allocation3], 0  ;;  %s279_s12 = smov [#allocation2]   ;;  %s325_s0 = inlined_call_operand.vmem [shape: bf16[2,32], index: 0, kind: input, shape index: {}]   ;;  %s326_s1 = inlined_call_operand.hbm [shape: bf16[32,512], index: 1, kind: input, shape index: {}]   ;;  %s327_s2 = inlined_call_operand.vmem [shape: f32[1,512], index: 2, kind: input, shape index: {}]   ;;  %s328_s3 = inlined_call_operand.vmem [shape: bf16[2,512], index: 3, kind: output, shape index: {}]  }
   0x1   :  { %s16_s13 = sshll.u32 %s279_s12, 4  ;;  %s255_s16 = scalar_lea.hbm %s326_s1, 1024  ;;  %s17_s13 = int_to_ptr.vmem [resolvable:$true] %s16_s13 }
   0x2   :  { %p256_p0 = scmp.ne.s32.totalorder %s326_s1, %s255_s16  ;;  %p259_p1 = scmp.lt.u32.totalorder %s255_s16, %s326_s1 }
   0x4   :  { %p261_p2 = pnand %p259_p1, %p256_p0 }
   0x6   :  { %264 = shalt.err (!%p261_p2)
}
   0x7   :  { %s265_s21 = scalar_lea.vmem %s17_s13, 1024  ;;  %p270_p4 = scmp.lt.s32.totalorder %s17_s13, %s17_s13 }
   0x8   :  { %p266_p3 = scmp.ne.s32.totalorder %s17_s13, %s265_s21  ;;  %p271_p5 = scmp.lt.s32.totalorder %s265_s21, %s265_s21 }
   0xa   :  { %p272_p6 = por %p271_p5, %p270_p4 }
   0xc   :  { %p273_p7 = pnand %p272_p6, %p266_p3 }
   0xe   :  { %276 = shalt.err (!%p273_p7)
}
   0xf   :  { %s280_s22 = smov 256   ;;  %s281_s23 = smov 16  }
  0x10   :  { %22 = dma.hbm_to_vmem [thread:$0]  %s326_s1, 1024, %s17_s13, [#allocation3], %s280_s22, %s280_s22, %s281_s23  }
  0x11   :  { %277 = dma.done.wait [#allocation3], 1024  }
  0x12   :  { %278 = vsyncadd [#allocation3], 4294966272  ;;  %v282_v0 = vmov 0   ;;  %v243_v1 = vld [vmem:[#allocation2 + $0x4] ss:$16 sps:$4 sm:$0xff]   ;;  %vm100_vm0 = vcmask 261120   ;;  %v40_v10 = vlaneseq }
  0x13   :  { %136 = vmatprep.mubr.bf16.mxu0 %v282_v0  ;;  %177 = vmatprep.mubr.bf16.mxu1 %v282_v0  ;;  %v245_v2 = vld [vmem:[#allocation2 + $0xc] ss:$16 sps:$4 sm:$0xff]   ;;  %v247_v3 = vld [vmem:[#allocation2] ss:$16 sps:$4 sm:$0xff]   ;;  %v248_v4 = vld [vmem:[#allocation2 + $0x8] ss:$16 sps:$4 sm:$0xff]  }
  0x14   :  { %104 = vmatprep.subr.bf16.mxu0 %v243_v1  ;;  %145 = vmatprep.subr.bf16.mxu1 %v245_v2  ;;  %v249_v5 = vld [vmem:[#allocation2 + $0x24] ss:$16 sps:$4 sm:$0xff]   ;;  %v251_v6 = vld [vmem:[#allocation2 + $0x2c] ss:$16 sps:$4 sm:$0xff]   ;;  %v253_v7 = vld [vmem:[#allocation2 + $0x20] ss:$16 sps:$4 sm:$0xff]  }
  0x15   :  { %105 = vmatpush1.bf16.msra.mxu0 %v247_v3  ;;  %146 = vmatpush1.bf16.msra.mxu1 %v248_v4  ;;  %v254_v8 = vld [vmem:[#allocation2 + $0x28] ss:$16 sps:$4 sm:$0xff]   ;;  %v29_v9 = vld [vmem:[%s325_s0] sm:$0x1]  ;;  %v41_v11 = vshrl.u32 %v40_v10, 7 }
  0x16   :  { %106 = vmatprep.subr.bf16.mxu0 %v249_v5  ;;  %147 = vmatprep.subr.bf16.mxu1 %v251_v6  ;;  %v38_v14 = vld [vmem:[%s327_s2] sm:$0xf]  ;;  %v283_v16 = vmov 1966171168  }
  0x17   :  { %v42_v12 = vsub.s32 0, %v41_v11  ;;  %v50_v13 = vsub.s32 2, %v41_v11  ;;  %v46_v15 = vsub.s32 1, %v41_v11  ;;  %v197_v17 = vunpack.c.l.s4 %v283_v16 }
  0x18   :  { %v54_v18 = vsub.s32 3, %v41_v11 }
  0x19   :  { %107 = vmatpush1.bf16.msra.mxu0 %v253_v7  ;;  %148 = vmatpush1.bf16.msra.mxu1 %v254_v8  ;;  %v43_v19 = vrot.slane %v38_v14, %v42_v12  ;;  %v51_v20 = vrot.slane %v38_v14, %v50_v13  ;;  %v47_v21 = vrot.slane %v38_v14, %v46_v15  ;;  %v198_v22 = vunpack.c.0.s8 %v197_v17 }
  0x1a   :  { %v55_v23 = vrot.slane %v38_v14, %v54_v18 }
  0x1b   :  { %v201_v31 = vsub.s32 %v198_v22, %v41_v11 }
  0x1c   :  { %233 = vmatmul.mubr.msk.bf16.vlgmr.msra.gmra.mrb[0].mxu0 %vm100_vm0, %v29_v9  ;;  %234 = vmatmul.mubr.msk.bf16.vlgmr.msra.gmra.mrb[0].mxu1 %vm100_vm0, %v29_v9 }
  0xef   :  { %v138_v24 = vpop.f32.mrb[0].mxu0  ;;  %v179_v25 = vpop.f32.mrb[0].mxu1 }
  0xf0   :  { %v139_v26 = vadd.f32 %v138_v24, %v43_v19  ;;  %v180_v27 = vadd.f32 %v179_v25, %v51_v20  ;;  %v140_v28 = vpop.f32.mrb[1].mxu0  ;;  %v181_v29 = vpop.f32.mrb[1].mxu1 }
  0xf1   :  { %v141_v30 = vadd.f32 %v140_v28, %v47_v21  ;;  %v182_v32 = vadd.f32 %v181_v29, %v55_v23  ;;  %v142_v33 = vpop.f32.mrb[2].mxu0  ;;  %v183_v34 = vpop.f32.mrb[2].mxu1 }
  0xf2   :  { %v143_v35 = vpop.f32.mrb[3].mxu0  ;;  %v184_v36 = vpop.f32.mrb[3].mxu1 }
  0xf3   :  { %v235_v37 = vpack.c.bf16 %v141_v30, %v139_v26  ;;  %v236_v38 = vpack.c.bf16 %v182_v32, %v180_v27 }
  0xf5   :  { %v202_v39 = vrot.slane %v235_v37, %v201_v31  ;;  %v209_v40 = vrot.slane %v236_v38, %v201_v31 }
  0xf7   :  { %v210_v41 = vcombine.low %v202_v39, %v209_v40 }
  0xf9   :  { %237 = vst.sshfl [vmem:[%s328_s3] sm:$0x55 pattern:$0x73625140] %v210_v41 }
  0xfa   :  { %224 = vsyncpa [#allocation3], 1 }

// kernel: decoder_forward.5
= control target key start
LH: loop header
LB: loop body
LE: loop exit
PB: predicated region body
PF: predicated region fallthrough
CT: control target
= control target key end

     0   :  { %s785_s27 = smov 32   ;;  %s786_s24 = smov 64   ;;  %vm283_vm0 = vcmask 261120   ;;  %vm308_vm1 = vcmask 523264   ;;  %vm325_vm2 = vcmask 785408   ;;  %vm572_vm3 = vcmask 130048   ;;  %s1046_s0 = inlined_call_operand.vmem [shape: bf16[2,5,5,32], index: 0, kind: input, shape index: {}]   ;;  %s1047_s1 = inlined_call_operand.vmem [shape: bf16[128,64], index: 1, kind: input, shape index: {}]   ;;  %s1048_s2 = inlined_call_operand.vmem [shape: f32[1,64], index: 2, kind: input, shape index: {}]   ;;  %s1049_s3 = inlined_call_operand.vmem [shape: f32[1,64], index: 3, kind: input, shape index: {}]   ;;  %s1050_s4 = inlined_call_operand.vmem [shape: bf16[32,64], index: 4, kind: output, shape index: {}]  }
   0x1   :  { %v751_v0 = vld [vmem:[%s1046_s0 + $0x8] ss:$0 sps:$4 sm:$0x77]   ;;  %v752_v1 = vld [vmem:[%s1046_s0] ss:$0 sps:$4 sm:$0x77]  }
   0x2   :  { %v90_v2 = vshrl.u32 %v751_v0, 16  ;;  %v92_v3 = vshll.u32 %v751_v0, 16  ;;  %v76_v4 = vshrl.u32 %v752_v1, 16  ;;  %v78_v5 = vshll.u32 %v752_v1, 16  ;;  %v775_v38 = vld [vmem:[%s1047_s1] sm:$0xff]   ;;  %v776_v40 = vld [vmem:[%s1047_s1 + $0x8] sm:$0xff]  }
   0x3   :  { %v753_v6 = vld [vmem:[%s1046_s0 + $0xc] ss:$0 sps:$4 sm:$0x77]   ;;  %v754_v8 = vld [vmem:[%s1046_s0 + $0x4] ss:$0 sps:$4 sm:$0x77]   ;;  %723 = vmatprep.subr.bf16.mxu0 %v775_v38 }
   0x4   :  { %v94_v7 = vrot.slane %v92_v3, 1  ;;  %v80_v9 = vrot.slane %v78_v5, 1  ;;  %v97_v10 = vshrl.u32 %v753_v6, 16  ;;  %v99_v11 = vshll.u32 %v753_v6, 16  ;;  %724 = vmatpush3.bf16.msra.mxu0 %v775_v38  ;;  %v777_v43 = vld [vmem:[%s1047_s1 + $0x10] sm:$0xff]   ;;  %v778_v59 = vld [vmem:[%s1047_s1 + $0x18] sm:$0xff]  }
   0x5   :  { %v755_v12 = vld [vmem:[%s1046_s0 + $0x18] ss:$0 sps:$4 sm:$0x77]   ;;  %v83_v14 = vshrl.u32 %v754_v8, 16  ;;  %v85_v15 = vshll.u32 %v754_v8, 16  ;;  %725 = vmatprep.subr.bf16.mxu0 %v776_v40  ;;  %v779_v8 = vld [vmem:[%s1047_s1 + $0x20] sm:$0xff]  }
   0x6   :  { %v95_v13 = vor.u32 %v94_v7, %v90_v2  ;;  %v81_v16 = vor.u32 %v80_v9, %v76_v4  ;;  %v101_v17 = vrot.slane %v99_v11, 1  ;;  %v111_v18 = vshrl.u32 %v755_v12, 16  ;;  %v756_v20 = vld [vmem:[%s1046_s0 + $0x14] ss:$0 sps:$4 sm:$0x77]   ;;  %s787_s30 = smov 96  }
   0x7   :  { %v113_v19 = vshll.u32 %v755_v12, 16  ;;  %v87_v21 = vrot.slane %v85_v15, 1  ;;  %v757_v22 = vld [vmem:[%s1046_s0 + $0x20] ss:$0 sps:$4 sm:$0x77]   ;;  %v104_v25 = vshrl.u32 %v756_v20, 16 }
   0x8   :  { %135 = vrot.lane.b32.xlu1 %v95_v13, %s785_s27  ;;  %131 = vrot.lane.b32.xlu0 %v81_v16, %s785_s27  ;;  %v102_v23 = vor.u32 %v101_v17, %v97_v10  ;;  %v106_v26 = vshll.u32 %v756_v20, 16  ;;  %v758_v27 = vld [vmem:[%s1046_s0 + $0x1c] ss:$0 sps:$4 sm:$0x77]   ;;  %v127_v29 = vshll.u32 %v757_v22, 16  ;;  %v125_v33 = vshrl.u32 %v757_v22, 16 }
   0x9   :  { %v115_v24 = vrot.slane %v113_v19, 1  ;;  %v88_v28 = vor.u32 %v87_v21, %v83_v14  ;;  %v120_v31 = vshll.u32 %v758_v27, 16  ;;  %v118_v36 = vshrl.u32 %v758_v27, 16  ;;  %v759_v42 = vld [vmem:[%s1046_s0 + $0x8] ss:$0 sps:$4 sm:$0x33]   ;;  %726 = vmatpush3.bf16.msra.mxu0 %v776_v40 }
   0xa   :  { %v108_v30 = vrot.slane %v106_v26, 1  ;;  %v129_v34 = vrot.slane %v127_v29, 1  ;;  %v760_v44 = vld [vmem:[%s1046_s0 + $0x4] ss:$0 sps:$4 sm:$0x33]   ;;  %727 = vmatprep.subr.bf16.mxu0 %v777_v43  ;;  %v780_v13 = vld [vmem:[%s1047_s1 + $0x28] sm:$0xff]  }
   0xb   :  { %v116_v32 = vor.u32 %v115_v24, %v111_v18  ;;  %v122_v37 = vrot.slane %v120_v31, 1  ;;  %v767_v45 = vld [vmem:[%s1046_s0 + $0x8] ss:$0 sps:$4 sm:$0x77]   ;;  %v781_v14 = vld [vmem:[%s1047_s1 + $0x30] sm:$0xff]   ;;  %s790_s21 = smov 80  }
   0xc   :  { %137 = vrot.lane.b32.xlu1 %v102_v23, %s785_s27  ;;  %133 = vrot.lane.b32.xlu0 %v88_v28, %s785_s27  ;;  %v109_v35 = vor.u32 %v108_v30, %v104_v25  ;;  %v130_v39 = vor.u32 %v129_v34, %v125_v33  ;;  %v761_v46 = vld [vmem:[%s1046_s0 + $0x10] ss:$0 sps:$4 sm:$0x33]   ;;  %v768_v47 = vld [vmem:[%s1046_s0 + $0x4] ss:$0 sps:$4 sm:$0x77]  }
   0xd   :  { %v123_v41 = vor.u32 %v122_v37, %v118_v36  ;;  %v769_v48 = vld [vmem:[%s1046_s0 + $0x10] ss:$0 sps:$4 sm:$0x77]   ;;  %v770_v49 = vld [vmem:[%s1046_s0 + $0xc] ss:$0 sps:$4 sm:$0x77]   ;;  %728 = vmatpush3.bf16.msra.mxu0 %v777_v43 }
   0xe   :  { %v762_v50 = vld [vmem:[%s1046_s0 + $0xc] ss:$0 sps:$4 sm:$0x33]   ;;  %v763_v51 = vld [vmem:[%s1046_s0 + $0x1c] ss:$0 sps:$4 sm:$0x33]   ;;  %729 = vmatprep.subr.bf16.mxu0 %v778_v59 }
   0xf   :  { %v221_v52 = vshll.u32 %v767_v45, 16  ;;  %v214_v53 = vshll.u32 %v768_v47, 16  ;;  %v235_v54 = vshll.u32 %v769_v48, 16  ;;  %v771_v55 = vld [vmem:[%s1046_s0 + $0x1c] ss:$0 sps:$4 sm:$0x77]  }
  0x10   :  { %141 = vrot.lane.b32.xlu1 %v116_v32, %s785_s27  ;;  %139 = vrot.lane.b32.xlu0 %v109_v35, %s785_s27  ;;  %v228_v56 = vshll.u32 %v770_v49, 16  ;;  %v772_v57 = vld [vmem:[%s1046_s0 + $0x18] ss:$0 sps:$4 sm:$0x77]   ;;  %v219_v61 = vshrl.u32 %v767_v45, 16  ;;  %v212_v62 = vshrl.u32 %v768_v47, 16 }
  0x11   :  { %v764_v58 = vld [vmem:[%s1046_s0 + $0x18] ss:$0 sps:$4 sm:$0x33]   ;;  %v765_v60 = vld [vmem:[%s1046_s0 + $0x24] ss:$0 sps:$4 sm:$0x33]   ;;  %730 = vmatpush3.bf16.msra.mxu0 %v778_v59 }
  0x12   :  { %v766_v63 = vld [vmem:[%s1046_s0 + $0x20] ss:$0 sps:$4 sm:$0x33]   ;;  %v223_v0 = vrot.slane %v221_v52, 1  ;;  %v216_v1 = vrot.slane %v214_v53, 1  ;;  %v233_v2 = vshrl.u32 %v769_v48, 16  ;;  %731 = vmatprep.subr.bf16.mxu0 %v779_v8  ;;  %v371_v52 = vlaneseq }
  0x13   :  { %v237_v3 = vrot.slane %v235_v54, 1  ;;  %v226_v4 = vshrl.u32 %v770_v49, 16  ;;  %v230_v5 = vrot.slane %v228_v56, 1  ;;  %v249_v6 = vshll.u32 %v771_v55, 16  ;;  %v782_v23 = vld [vmem:[%s1047_s1 + $0x38] sm:$0xff]   ;;  %s791_s22 = smov 16  }
  0x14   :  { %145 = vrot.lane.b32.xlu1 %v130_v39, %s785_s27  ;;  %143 = vrot.lane.b32.xlu0 %v123_v41, %s785_s27  ;;  %v242_v7 = vshll.u32 %v772_v57, 16  ;;  %v773_v9 = vld [vmem:[%s1046_s0 + $0x24] ss:$0 sps:$4 sm:$0x77]   ;;  %v224_v10 = vor.u32 %v223_v0, %v219_v61  ;;  %v217_v11 = vor.u32 %v216_v1, %v212_v62  ;;  %v247_v16 = vshrl.u32 %v771_v55, 16  ;;  %s792_s23 = smov 48  }
  0x15   :  { %732 = vmatpush3.bf16.msra.mxu0 %v779_v8  ;;  %v774_v12 = vld [vmem:[%s1046_s0 + $0x20] ss:$0 sps:$4 sm:$0x77]   ;;  %v238_v15 = vor.u32 %v237_v3, %v233_v2  ;;  %v251_v17 = vrot.slane %v249_v6, 1  ;;  %v263_v18 = vshll.u32 %v773_v9, 16  ;;  %v231_v19 = vor.u32 %v230_v5, %v226_v4 }
  0x16   :  { %733 = vmatprep.subr.bf16.mxu0 %v780_v13  ;;  %v240_v20 = vshrl.u32 %v772_v57, 16  ;;  %v244_v21 = vrot.slane %v242_v7, 1  ;;  %v256_v22 = vshll.u32 %v774_v12, 16  ;;  %v261_v25 = vshrl.u32 %v773_v9, 16  ;;  %v18_v47 = vld [vmem:[%s1046_s0] sm:$0x3] }
  0x17   :  { %v252_v24 = vor.u32 %v251_v17, %v247_v16  ;;  %v265_v26 = vrot.slane %v263_v18, 1  ;;  %v254_v28 = vshrl.u32 %v774_v12, 16  ;;  %v19_v48 = vld [vmem:[%s1046_s0 + $0x4] sm:$0x3]  ;;  %v21_v54 = vld [vmem:[%s1046_s0 + $0xc] sm:$0x3] }
  0x18   :  { %173 = vrot.lane.b32.xlu1 %v759_v42, %s786_s24  ;;  %171 = vrot.lane.b32.xlu0 %v760_v44, %s786_s24  ;;  %v245_v27 = vor.u32 %v244_v21, %v240_v20  ;;  %v258_v29 = vrot.slane %v256_v22, 1  ;;  %v20_v57 = vld [vmem:[%s1046_s0 + $0x8] sm:$0x3]  ;;  %v954_v62 = vshrl.u32 %v371_v52, 7  ;;  %v23_v5 = vld [vmem:[%s1046_s0 + $0x18] sm:$0x3] }
  0x19   :  { %734 = vmatpush3.bf16.msra.mxu0 %v780_v13  ;;  %v266_v30 = vor.u32 %v265_v26, %v261_v25  ;;  %v22_v6 = vld [vmem:[%s1046_s0 + $0x14] sm:$0x3]  ;;  %v25_v16 = vld [vmem:[%s1046_s0 + $0x20] sm:$0x3]  ;;  %v24_v18 = vld [vmem:[%s1046_s0 + $0x1c] sm:$0x3] }
  0x1a   :  { %735 = vmatprep.subr.bf16.mxu0 %v781_v14  ;;  %v259_v31 = vor.u32 %v258_v29, %v254_v28  ;;  %s789_s0 = smov 112   ;;  %vm575_vm4 = vcmask 392192   ;;  %vm647_vm9 = vcmask 519168  }
  0x1c   :  { %177 = vrot.lane.b32.xlu1 %v761_v46, %s786_s24  ;;  %175 = vrot.lane.b32.xlu0 %v762_v50, %s786_s24  ;;  %v788_v50 = vmov 1983009808  }
  0x1d   :  { %736 = vmatpush3.bf16.msra.mxu0 %v781_v14 }
  0x1e   :  { %737 = vmatprep.subr.bf16.mxu0 %v782_v23 }
  0x20   :  { %181 = vrot.lane.b32.xlu1 %v763_v51, %s786_s24  ;;  %179 = vrot.lane.b32.xlu0 %v764_v58, %s786_s24  ;;  %v369_v51 = vunpack.c.l.s4 %v788_v50 }
  0x21   :  { %738 = vmatpush3.bf16.msra.mxu0 %v782_v23 }
  0x22   :  { %v370_v61 = vunpack.c.0.s8 %v369_v51 }
  0x24   :  { %185 = vrot.lane.b32.xlu1 %v765_v60, %s786_s24  ;;  %183 = vrot.lane.b32.xlu0 %v766_v63, %s786_s24 }
  0x28   :  { %269 = vrot.lane.b32.xlu1 %v224_v10, %s787_s30  ;;  %267 = vrot.lane.b32.xlu0 %v217_v11, %s787_s30  ;;  %v373_v11 = vsub.s32 %v370_v61, %v954_v62 }
  0x2c   :  { %273 = vrot.lane.b32.xlu1 %v238_v15, %s787_s30  ;;  %271 = vrot.lane.b32.xlu0 %v231_v19, %s787_s30 }
  0x30   :  { %277 = vrot.lane.b32.xlu1 %v252_v24, %s787_s30  ;;  %275 = vrot.lane.b32.xlu0 %v245_v27, %s787_s30 }
  0x34   :  { %281 = vrot.lane.b32.xlu1 %v266_v30, %s787_s30  ;;  %279 = vrot.lane.b32.xlu0 %v259_v31, %s787_s30 }
  0x7a   :  { %v136_v32 = vpop.permute.xlu1 %135  ;;  %v132_v33 = vpop.permute.xlu0 %131 }
  0x7b   :  { %v286_v53 = vsel %vm283_vm0, %v18_v47, %v132_v33  ;;  %v292_v2 = vsel %vm283_vm0, %v20_v57, %v136_v32 }
  0x7e   :  { %v138_v34 = vpop.permute.xlu1 %137  ;;  %v134_v35 = vpop.permute.xlu0 %133 }
  0x7f   :  { %v289_v55 = vsel %vm283_vm0, %v19_v48, %v134_v35  ;;  %v295_v1 = vsel %vm283_vm0, %v21_v54, %v138_v34 }
  0x82   :  { %v142_v36 = vpop.permute.xlu1 %141  ;;  %v140_v37 = vpop.permute.xlu0 %139 }
  0x83   :  { %v301_v14 = vsel %vm283_vm0, %v23_v5, %v142_v36  ;;  %v298_v15 = vsel %vm283_vm0, %v22_v6, %v140_v37 }
  0x86   :  { %v146_v38 = vpop.permute.xlu1 %145  ;;  %v144_v39 = vpop.permute.xlu0 %143 }
  0x87   :  { %v307_v26 = vsel %vm283_vm0, %v25_v16, %v146_v38  ;;  %v304_v28 = vsel %vm283_vm0, %v24_v18, %v144_v39 }
  0x8a   :  { %v174_v40 = vpop.permute.xlu1 %173  ;;  %v172_v41 = vpop.permute.xlu0 %171 }
  0x8b   :  { %v312_v58 = vsel %vm308_vm1, %v289_v55, %v174_v40  ;;  %v310_v59 = vsel %vm308_vm1, %v286_v53, %v172_v41 }
  0x8e   :  { %v178_v42 = vpop.permute.xlu1 %177  ;;  %v176_v43 = vpop.permute.xlu0 %175 }
  0x8f   :  { %v316_v3 = vsel %vm308_vm1, %v295_v1, %v178_v42  ;;  %v314_v7 = vsel %vm308_vm1, %v292_v2, %v176_v43 }
  0x92   :  { %v182_v44 = vpop.permute.xlu1 %181  ;;  %v180_v45 = vpop.permute.xlu0 %179 }
  0x93   :  { %v320_v19 = vsel %vm308_vm1, %v301_v14, %v182_v44  ;;  %v318_v20 = vsel %vm308_vm1, %v298_v15, %v180_v45 }
  0x96   :  { %v186_v46 = vpop.permute.xlu1 %185  ;;  %v184_v49 = vpop.permute.xlu0 %183 }
  0x97   :  { %v324_v29 = vsel %vm308_vm1, %v307_v26, %v186_v46  ;;  %v322_v31 = vsel %vm308_vm1, %v304_v28, %v184_v49 }
  0x9a   :  { %v270_v56 = vpop.permute.xlu1 %269  ;;  %v268_v60 = vpop.permute.xlu0 %267 }
  0x9b   :  { %v329_v63 = vsel %vm325_vm2, %v312_v58, %v270_v56  ;;  %v327_v0 = vsel %vm325_vm2, %v310_v59, %v268_v60 }
  0x9c   :  { %v366_v8 = vcombine.low %v327_v0, %v329_v63 }
  0x9e   :  { %v274_v4 = vpop.permute.xlu1 %273  ;;  %v272_v10 = vpop.permute.xlu0 %271  ;;  %v374_v22 = vrot.slane %v366_v8, %v373_v11 }
  0x9f   :  { %v333_v9 = vsel %vm325_vm2, %v316_v3, %v274_v4  ;;  %v331_v12 = vsel %vm325_vm2, %v314_v7, %v272_v10 }
  0xa0   :  { %v367_v13 = vcombine.low %v331_v12, %v333_v9 }
  0xa2   :  { %v278_v17 = vpop.permute.xlu1 %277  ;;  %v276_v21 = vpop.permute.xlu0 %275  ;;  %v381_v23 = vrot.slane %v367_v13, %v373_v11 }
  0xa3   :  { %v337_v24 = vsel %vm325_vm2, %v320_v19, %v278_v17  ;;  %v335_v25 = vsel %vm325_vm2, %v318_v20, %v276_v21 }
  0xa4   :  { %v382_v27 = vcombine.low %v374_v22, %v381_v23  ;;  %v383_v32 = vcombine.low %v335_v25, %v337_v24 }
  0xa6   :  { %v282_v30 = vpop.permute.xlu1 %281  ;;  %v280_v34 = vpop.permute.xlu0 %279  ;;  %739 = vmatprep.mubr.bf16.mxu0 %v382_v27  ;;  %v391_v37 = vrot.slane %v383_v32, %v373_v11 }
  0xa7   :  { %v341_v33 = vsel %vm325_vm2, %v324_v29, %v282_v30  ;;  %v339_v35 = vsel %vm325_vm2, %v322_v31, %v280_v34 }
  0xa8   :  { %v384_v36 = vcombine.low %v339_v35, %v341_v33  ;;  %v592_v35 = vsub.s32 0, %v954_v62 }
  0xaa   :  { %v398_v40 = vrot.slane %v384_v36, %v373_v11 }
  0xac   :  { %v399_v41 = vcombine.low %v391_v37, %v398_v40 }
  0xae   :  { %740 = vmatmul.mubr.bf16.vlgmr.msra.gmra.mrb[0].mxu0 %v399_v41 }
 0x181   :  { %v989_v38 = vpop.f32.mrb[0].mxu0 }
 0x182   :  { %v991_v39 = vpop.f32.mrb[1].mxu0  ;;  %v514_v45 = vmul.f32 %v989_v38, %v989_v38  ;;  %v502_v50 = vsel %vm308_vm1, %v989_v38, 0.0 }
 0x183   :  { %v512_v42 = vmul.f32 %v991_v39, %v991_v39  ;;  %v995_v43 = vpop.f32.mrb[2].mxu0  ;;  %v499_v46 = vsel %vm308_vm1, %v991_v39, 0.0 }
 0x184   :  { %v997_v44 = vpop.f32.mrb[3].mxu0  ;;  %v515_v52 = vmul.f32 %v995_v43, %v995_v43  ;;  %v519_v56 = vsel %vm308_vm1, %v514_v45, 0.0  ;;  %v504_v57 = vsel %vm308_vm1, %v995_v43, 0.0 }
 0x185   :  { %v500_v47 = vsel %vm308_vm1, %v997_v44, 0.0  ;;  %v513_v48 = vmul.f32 %v997_v44, %v997_v44  ;;  %v516_v51 = vsel %vm308_vm1, %v512_v42, 0.0  ;;  %v598_v42 = vld [vmem:[%s1048_s2] sm:$0x1] }
 0x186   :  { %v501_v49 = vadd.f32 %v500_v47, %v499_v46  ;;  %v521_v60 = vsel %vm308_vm1, %v515_v52, 0.0 }
 0x187   :  { %v517_v53 = vsel %vm308_vm1, %v513_v48, 0.0 }
 0x188   :  { %v503_v54 = vadd.f32 %v502_v50, %v501_v49  ;;  %v518_v55 = vadd.f32 %v517_v53, %v516_v51  ;;  %v704_v53 = vld [vmem:[%s1049_s3] ss:$0 sm:$0xff] }
 0x18a   :  { %v505_v58 = vadd.f32 %v504_v57, %v503_v54  ;;  %v520_v59 = vadd.f32 %v519_v56, %v518_v55 }
 0x18c   :  { %v506_v61 = vrot.slane %v505_v58, 4  ;;  %v522_v63 = vadd.f32 %v521_v60, %v520_v59 }
 0x18e   :  { %v507_v0 = vadd.f32 %v506_v61, %v505_v58  ;;  %v523_v1 = vrot.slane %v522_v63, 4 }
 0x190   :  { %v508_v2 = vrot.slane %v507_v0, 2  ;;  %v524_v3 = vadd.f32 %v523_v1, %v522_v63 }
 0x192   :  { %v509_v4 = vadd.f32 %v508_v2, %v507_v0  ;;  %v525_v5 = vrot.slane %v524_v3, 2 }
 0x194   :  { %v510_v6 = vrot.slane %v509_v4, 1  ;;  %v526_v7 = vadd.f32 %v525_v5, %v524_v3 }
 0x196   :  { %v511_v8 = vadd.f32 %v510_v6, %v509_v4  ;;  %v527_v9 = vrot.slane %v526_v7, 1 }
 0x198   :  { %534 = vrot.lane.b32.xlu1 %v511_v8, %s787_s30  ;;  %530 = vrot.lane.b32.xlu0 %v511_v8, %s789_s0  ;;  %v528_v10 = vadd.f32 %v527_v9, %v526_v7 }
 0x19c   :  { %538 = vrot.lane.b32.xlu1 %v511_v8, %s790_s21  ;;  %545 = vrot.lane.b32.xlu0 %v528_v10, %s789_s0 }
 0x1a0   :  { %553 = vrot.lane.b32.xlu1 %v528_v10, %s790_s21  ;;  %549 = vrot.lane.b32.xlu0 %v528_v10, %s787_s30 }
 0x20a   :  { %v535_v11 = vpop.permute.xlu1 %534  ;;  %v531_v12 = vpop.permute.xlu0 %530 }
 0x20b   :  { %v533_v13 = vadd.f32 %v531_v12, %v511_v8 }
 0x20d   :  { %v537_v14 = vadd.f32 %v535_v11, %v533_v13 }
 0x20e   :  { %v539_v15 = vpop.permute.xlu1 %538  ;;  %v546_v16 = vpop.permute.xlu0 %545 }
 0x20f   :  { %v541_v17 = vadd.f32 %v539_v15, %v537_v14  ;;  %v548_v19 = vadd.f32 %v546_v16, %v528_v10 }
 0x211   :  { %v543_v18 = vmul.f32 0.0078125, %v541_v17 }
 0x212   :  { %v550_v20 = vpop.permute.xlu0 %549  ;;  %v554_v22 = vpop.permute.xlu1 %553 }
 0x213   :  { %v552_v21 = vadd.f32 %v550_v20, %v548_v19  ;;  %563 = vrot.lane.b32.xlu0 %v543_v18, %s791_s22  ;;  %v558_v24 = vmul.f32 %v543_v18, %v543_v18 }
 0x215   :  { %v556_v23 = vadd.f32 %v554_v22, %v552_v21 }
 0x217   :  { %v557_v25 = vmul.f32 0.0078125, %v556_v23  ;;  %566 = vrot.lane.b32.xlu0 %v543_v18, %s785_s27 }
 0x219   :  { %v559_v26 = vsub.f32 %v557_v25, %v558_v24 }
 0x21b   :  { %v560_v27 = vadd.f32 1e-05, %v559_v26  ;;  %569 = vrot.lane.b32.xlu0 %v543_v18, %s792_s23 }
 0x21d   :  { %783 = vrsqrt.f32 %v560_v27 }
 0x227   :  { %v784_v28 = vpop.eup %783 }
 0x228   :  { %578 = vrot.lane.b32.xlu1 %v784_v28, %s791_s22 }
 0x22c   :  { %581 = vrot.lane.b32.xlu1 %v784_v28, %s785_s27 }
 0x230   :  { %584 = vrot.lane.b32.xlu1 %v784_v28, %s792_s23 }
 0x285   :  { %v564_v29 = vpop.permute.xlu0 %563 }
 0x286   :  { %v573_v33 = vsel %vm572_vm3, %v543_v18, %v564_v29 }
 0x289   :  { %v567_v30 = vpop.permute.xlu0 %566 }
 0x28a   :  { %v574_v34 = vsel %vm283_vm0, %v573_v33, %v567_v30 }
 0x28d   :  { %v570_v32 = vpop.permute.xlu0 %569 }
 0x28e   :  { %v576_v36 = vsel %vm575_vm4, %v574_v34, %v570_v32 }
 0x28f   :  { %v593_v40 = vrot.slane %v576_v36, %v592_v35 }
 0x291   :  { %v594_v49 = vsub.f32 %v991_v39, %v593_v40  ;;  %v595_v50 = vsub.f32 %v997_v44, %v593_v40  ;;  %v596_v51 = vsub.f32 %v989_v38, %v593_v40  ;;  %v597_v62 = vsub.f32 %v995_v43, %v593_v40 }
 0x29a   :  { %v579_v31 = vpop.permute.xlu1 %578 }
 0x29b   :  { %v587_v41 = vsel %vm572_vm3, %v784_v28, %v579_v31 }
 0x29e   :  { %v582_v37 = vpop.permute.xlu1 %581 }
 0x29f   :  { %v588_v45 = vsel %vm283_vm0, %v587_v41, %v582_v37 }
 0x2a2   :  { %v585_v46 = vpop.permute.xlu1 %584 }
 0x2a3   :  { %v589_v47 = vsel %vm575_vm4, %v588_v45, %v585_v46 }
 0x2a4   :  { %v599_v48 = vmul.f32 %v598_v42, %v589_v47 }
 0x2a6   :  { %v603_v52 = vrot.slane %v599_v48, %v592_v35 }
 0x2a8   :  { %v604_v54 = vmul.f32 %v603_v52, %v594_v49  ;;  %v605_v55 = vmul.f32 %v603_v52, %v595_v50  ;;  %v606_v56 = vmul.f32 %v603_v52, %v596_v51  ;;  %v607_v57 = vmul.f32 %v603_v52, %v597_v62 }
 0x2aa   :  { %v615_v58 = vadd.f32 %v704_v53, %v604_v54  ;;  %v616_v59 = vadd.f32 %v704_v53, %v605_v55  ;;  %v617_v60 = vadd.f32 %v704_v53, %v606_v56  ;;  %v618_v61 = vadd.f32 %v704_v53, %v607_v57 }
 0x2ac   :  { %vm619_vm5 = vcmp.ge.f32.partialorder %v615_v58, 0.0  ;;  %vm620_vm6 = vcmp.ge.f32.partialorder %v616_v59, 0.0  ;;  %vm621_vm7 = vcmp.ge.f32.partialorder %v617_v60, 0.0  ;;  %vm622_vm8 = vcmp.ge.f32.partialorder %v618_v61, 0.0 }
 0x2ad   :  { %v623_v38 = vmul.f32 0.01, %v615_v58  ;;  %v624_v39 = vmul.f32 0.01, %v616_v59  ;;  %v625_v43 = vmul.f32 0.01, %v617_v60 }
 0x2ae   :  { %v626_v44 = vmul.f32 0.01, %v618_v61 }
 0x2af   :  { %v627_v63 = vsel %vm619_vm5, %v615_v58, %v623_v38  ;;  %v628_v0 = vsel %vm620_vm6, %v616_v59, %v624_v39  ;;  %v629_v1 = vsel %vm621_vm7, %v617_v60, %v625_v43 }
 0x2b0   :  { %v630_v2 = vsel %vm622_vm8, %v618_v61, %v626_v44  ;;  %v709_v3 = vpack.c.bf16 %v627_v63, %v627_v63  ;;  %v710_v4 = vpack.c.bf16 %v628_v0, %v628_v0  ;;  %v711_v5 = vpack.c.bf16 %v629_v1, %v629_v1 }
 0x2b1   :  { %v712_v6 = vpack.c.bf16 %v630_v2, %v630_v2 }
 0x2b2   :  { %648 = vst.msk [vmem:[%s1050_s4] sm:$0xf] %vm647_vm9, %v709_v3  ;;  %649 = vst.msk [vmem:[%s1050_s4 + $0x4] sm:$0xf] %vm647_vm9, %v710_v4 }
 0x2b3   :  { %650 = vst.msk [vmem:[%s1050_s4 + $0x8] sm:$0xf] %vm647_vm9, %v711_v5  ;;  %651 = vst.msk [vmem:[%s1050_s4 + $0xc] sm:$0xf] %vm647_vm9, %v712_v6 }

// kernel: decoder_forward.6
= control target key start
LH: loop header
LB: loop body
LE: loop exit
PB: predicated region body
PF: predicated region fallthrough
CT: control target
= control target key end

     0   :  { %s1472_s7 = smov 32   ;;  %s1473_s24 = smov 16   ;;  %vm579_vm0 = vcmask 130048   ;;  %vm628_vm1 = vcmask 261120   ;;  %vm661_vm2 = vcmask 392192   ;;  %vm766_vm3 = vcmask 523264   ;;  %s2109_s0 = inlined_call_operand.vmem [shape: bf16[2,9,9,16], index: 0, kind: input, shape index: {}]   ;;  %s2110_s1 = inlined_call_operand.vmem [shape: bf16[64,64], index: 1, kind: input, shape index: {}]   ;;  %s2111_s2 = inlined_call_operand.vmem [shape: f32[1,64], index: 2, kind: input, shape index: {}]   ;;  %s2112_s3 = inlined_call_operand.vmem [shape: f32[1,64], index: 3, kind: input, shape index: {}]   ;;  %s2113_s4 = inlined_call_operand.vmem [shape: bf16[128,64], index: 4, kind: output, shape index: {}]  }
   0x1   :  { %v1236_v0 = vld [vmem:[%s2109_s0 + $0x10] sm:$0xf]  ;;  %v1252_v1 = vld [vmem:[%s2109_s0 + $0x14] sm:$0x1]  ;;  %v1235_v2 = vld [vmem:[%s2109_s0 + $0x8] sm:$0xf] }
   0x2   :  { %v1284_v3 = vcombine.low %v1236_v0, %v1236_v0  ;;  %v1251_v4 = vld [vmem:[%s2109_s0 + $0xc] sm:$0x1]  ;;  %v1283_v5 = vcombine.low %v1235_v2, %v1235_v2  ;;  %v1518_v6 = vld [vmem:[%s2109_s0 + $0x10] sm:$0xf]  ;;  %v36_v7 = vld [vmem:[%s2109_s0 + $0x14] sm:$0x1]  ;;  %v1548_v15 = vcombine.low %v1236_v0, %v1252_v1 }
   0x3   :  { %v1269_v8 = vcombine.low %v1518_v6, %v36_v7  ;;  %v1527_v9 = vld [vmem:[%s2109_s0] sm:$0xf]  ;;  %v34_v10 = vld [vmem:[%s2109_s0 + $0x4] sm:$0x1]  ;;  %v1535_v11 = vld [vmem:[%s2109_s0 + $0x18] sm:$0xf]  ;;  %v1555_v23 = vcombine.low %v1235_v2, %v1251_v4 }
   0x4   :  { %357 = vrot.lane.b32.xlu1 %v1284_v3, %s1472_s7  ;;  %355 = vrot.lane.b32.xlu0 %v1283_v5, %s1472_s7  ;;  %v1267_v12 = vcombine.low %v1527_v9, %v34_v10  ;;  %v37_v13 = vld [vmem:[%s2109_s0 + $0x1c] sm:$0x1]  ;;  %v1546_v14 = vld [vmem:[%s2109_s0 + $0x8] sm:$0xf]  ;;  %v445_v35 = vshll.u32 %v1548_v15, 16  ;;  %v443_v51 = vshrl.u32 %v1548_v15, 16 }
   0x5   :  { %v178_v16 = vshrl.u32 %v1269_v8, 16  ;;  %v180_v17 = vshll.u32 %v1269_v8, 16  ;;  %v35_v18 = vld [vmem:[%s2109_s0 + $0xc] sm:$0x1]  ;;  %v1270_v21 = vcombine.low %v1535_v11, %v37_v13  ;;  %v1254_v28 = vld [vmem:[%s2109_s0 + $0x24] sm:$0x1] }
   0x6   :  { %v164_v19 = vshrl.u32 %v1267_v12, 16  ;;  %v166_v20 = vshll.u32 %v1267_v12, 16  ;;  %v1268_v22 = vcombine.low %v1546_v14, %v35_v18  ;;  %v1466_v29 = vld [vmem:[%s2110_s1] sm:$0xff]   ;;  %v1253_v33 = vld [vmem:[%s2109_s0 + $0x1c] sm:$0x1]  ;;  %v1467_v34 = vld [vmem:[%s2110_s1 + $0x8] sm:$0xff]  }
   0x7   :  { %v182_v24 = vrot.slane %v180_v17, 1  ;;  %v185_v26 = vshrl.u32 %v1270_v21, 16  ;;  %v187_v27 = vshll.u32 %v1270_v21, 16  ;;  %v1238_v38 = vld [vmem:[%s2109_s0 + $0x20] sm:$0xf]  ;;  %1380 = vmatprep.subr.bf16.mxu0 %v1466_v29  ;;  %1404 = vmatprep.subr.bf16.mxu1 %v1466_v29  ;;  %v438_v39 = vshll.u32 %v1555_v23, 16 }
   0x8   :  { %v168_v25 = vrot.slane %v166_v20, 1  ;;  %v171_v31 = vshrl.u32 %v1268_v22, 16  ;;  %v173_v32 = vshll.u32 %v1268_v22, 16  ;;  %v1302_v41 = vcombine.low %v1238_v38, %v1254_v28  ;;  %v1237_v42 = vld [vmem:[%s2109_s0 + $0x18] sm:$0xf]  ;;  %1381 = vmatpush3.bf16.msra.mxu0 %v1466_v29  ;;  %v1468_v47 = vld [vmem:[%s2110_s1 + $0x10] sm:$0xff]   ;;  %1408 = vmatpush3.bf16.msra.mxu1 %v1466_v29 }
   0x9   :  { %v183_v30 = vor.u32 %v182_v24, %v178_v16  ;;  %v189_v37 = vrot.slane %v187_v27, 1  ;;  %v1301_v44 = vcombine.low %v1237_v42, %v1253_v33  ;;  %v1582_v45 = vld [vmem:[%s2109_s0 + $0x28] sm:$0xf]  ;;  %v39_v46 = vld [vmem:[%s2109_s0 + $0x2c] sm:$0x1]  ;;  %1382 = vmatprep.subr.bf16.mxu0 %v1467_v34  ;;  %v436_v52 = vshrl.u32 %v1555_v23, 16  ;;  %1405 = vmatprep.subr.bf16.mxu1 %v1467_v34 }
   0xa   :  { %v169_v36 = vor.u32 %v168_v25, %v164_v19  ;;  %v175_v40 = vrot.slane %v173_v32, 1  ;;  %v1593_v49 = vld [vmem:[%s2109_s0 + $0x20] sm:$0xf]  ;;  %v38_v50 = vld [vmem:[%s2109_s0 + $0x24] sm:$0x1]  ;;  %v447_v53 = vrot.slane %v445_v35, 1  ;;  %v1286_v54 = vcombine.low %v1238_v38, %v1238_v38 }
   0xb   :  { %279 = vrot.lane.b32.xlu1 %v183_v30, %s1473_s24  ;;  %v190_v43 = vor.u32 %v189_v37, %v185_v26  ;;  %v440_v55 = vrot.slane %v438_v39, 1  ;;  %v459_v56 = vshll.u32 %v1302_v41, 16  ;;  %v1272_v57 = vcombine.low %v1582_v45, %v39_v46  ;;  %v1607_v61 = vld [vmem:[%s2109_s0 + $0x38] sm:$0xf]  ;;  %v41_v62 = vld [vmem:[%s2109_s0 + $0x3c] sm:$0x1] }
   0xc   :  { %275 = vrot.lane.b32.xlu0 %v169_v36, %s1473_s24  ;;  %v176_v48 = vor.u32 %v175_v40, %v171_v31  ;;  %1383 = vmatpush3.bf16.msra.mxu0 %v1467_v34  ;;  %v1285_v58 = vcombine.low %v1237_v42, %v1237_v42  ;;  %v452_v59 = vshll.u32 %v1301_v44, 16  ;;  %v1271_v60 = vcombine.low %v1593_v49, %v38_v50  ;;  %v1469_v63 = vld [vmem:[%s2110_s1 + $0x18] sm:$0xff]   ;;  %v1618_v0 = vld [vmem:[%s2109_s0 + $0x30] sm:$0xf]  ;;  %v40_v1 = vld [vmem:[%s2109_s0 + $0x34] sm:$0x1] }
   0xd   :  { %1384 = vmatprep.subr.bf16.mxu0 %v1468_v47  ;;  %1409 = vmatpush3.bf16.msra.mxu1 %v1467_v34  ;;  %v448_v2 = vor.u32 %v447_v53, %v443_v51  ;;  %v457_v3 = vshrl.u32 %v1302_v41, 16  ;;  %v461_v4 = vrot.slane %v459_v56, 1  ;;  %v450_v5 = vshrl.u32 %v1301_v44, 16  ;;  %s1474_s1 = smov 48   ;;  %v1256_v30 = vld [vmem:[%s2109_s0 + $0x34] sm:$0x1] }
   0xe   :  { %1406 = vmatprep.subr.bf16.mxu1 %v1468_v47  ;;  %v201_v7 = vshll.u32 %v1272_v57, 16  ;;  %v1274_v8 = vcombine.low %v1607_v61, %v41_v62  ;;  %v441_v10 = vor.u32 %v440_v55, %v436_v52  ;;  %v454_v12 = vrot.slane %v452_v59, 1  ;;  %v1255_v31 = vld [vmem:[%s2109_s0 + $0x2c] sm:$0x1]  ;;  %v1240_v32 = vld [vmem:[%s2109_s0 + $0x30] sm:$0xf] }
   0xf   :  { %281 = vrot.lane.b32.xlu1 %v190_v43, %s1473_s24  ;;  %v194_v13 = vshll.u32 %v1271_v60, 16  ;;  %v1273_v15 = vcombine.low %v1618_v0, %v40_v1  ;;  %v462_v16 = vor.u32 %v461_v4, %v457_v3  ;;  %v199_v17 = vshrl.u32 %v1272_v57, 16  ;;  %v1239_v33 = vld [vmem:[%s2109_s0 + $0x28] sm:$0xf]  ;;  %v1258_v37 = vld [vmem:[%s2109_s0 + $0x44] sm:$0x1] }
  0x10   :  { %277 = vrot.lane.b32.xlu0 %v176_v48, %s1473_s24  ;;  %1385 = vmatpush3.bf16.msra.mxu0 %v1468_v47  ;;  %v203_v18 = vrot.slane %v201_v7, 1  ;;  %v215_v19 = vshll.u32 %v1274_v8, 16  ;;  %v455_v20 = vor.u32 %v454_v12, %v450_v5  ;;  %v192_v21 = vshrl.u32 %v1271_v60, 16  ;;  %v1257_v38 = vld [vmem:[%s2109_s0 + $0x3c] sm:$0x1]  ;;  %s1476_s5 = smov 112  }
  0x11   :  { %1386 = vmatprep.subr.bf16.mxu0 %v1469_v63  ;;  %1410 = vmatpush3.bf16.msra.mxu1 %v1468_v47  ;;  %v196_v22 = vrot.slane %v194_v13, 1  ;;  %v208_v23 = vshll.u32 %v1273_v15, 16  ;;  %v213_v25 = vshrl.u32 %v1274_v8, 16  ;;  %v206_v28 = vshrl.u32 %v1273_v15, 16  ;;  %v1242_v40 = vld [vmem:[%s2109_s0 + $0x40] sm:$0xf] }
  0x12   :  { %1407 = vmatprep.subr.bf16.mxu1 %v1469_v63  ;;  %v204_v24 = vor.u32 %v203_v18, %v199_v17  ;;  %v217_v26 = vrot.slane %v215_v19, 1  ;;  %v1304_v35 = vcombine.low %v1240_v32, %v1256_v30  ;;  %v1303_v36 = vcombine.low %v1239_v33, %v1255_v31  ;;  %v1241_v41 = vld [vmem:[%s2109_s0 + $0x38] sm:$0xf]  ;;  %v1662_v50 = vld [vmem:[%s2109_s0 + $0x50] sm:$0xf]  ;;  %s1477_s6 = smov 80  }
  0x13   :  { %361 = vrot.lane.b32.xlu1 %v1286_v54, %s1472_s7  ;;  %v197_v27 = vor.u32 %v196_v22, %v192_v21  ;;  %v210_v29 = vrot.slane %v208_v23, 1  ;;  %v1306_v42 = vcombine.low %v1242_v40, %v1258_v37  ;;  %v1305_v43 = vcombine.low %v1241_v41, %v1257_v38  ;;  %v43_v51 = vld [vmem:[%s2109_s0 + $0x54] sm:$0x1]  ;;  %v1670_v52 = vld [vmem:[%s2109_s0 + $0x48] sm:$0xf] }
  0x14   :  { %359 = vrot.lane.b32.xlu0 %v1285_v58, %s1472_s7  ;;  %1387 = vmatpush3.bf16.msra.mxu0 %v1469_v63  ;;  %v218_v34 = vor.u32 %v217_v26, %v213_v25  ;;  %v1288_v44 = vcombine.low %v1240_v32, %v1240_v32  ;;  %v473_v46 = vshll.u32 %v1304_v35, 16  ;;  %v466_v47 = vshll.u32 %v1303_v36, 16  ;;  %v42_v55 = vld [vmem:[%s2109_s0 + $0x4c] sm:$0x1]  ;;  %v1678_v58 = vld [vmem:[%s2109_s0 + $0x60] sm:$0xf] }
  0x15   :  { %1411 = vmatpush3.bf16.msra.mxu1 %v1469_v63  ;;  %v211_v39 = vor.u32 %v210_v29, %v206_v28  ;;  %v1287_v48 = vcombine.low %v1239_v33, %v1239_v33  ;;  %v471_v53 = vshrl.u32 %v1304_v35, 16  ;;  %v464_v54 = vshrl.u32 %v1303_v36, 16  ;;  %v45_v59 = vld [vmem:[%s2109_s0 + $0x64] sm:$0x1]  ;;  %v1690_v4 = vld [vmem:[%s2109_s0 + $0x58] sm:$0xf] }
  0x16   :  { %v487_v56 = vshll.u32 %v1306_v42, 16  ;;  %v480_v57 = vshll.u32 %v1305_v43, 16  ;;  %v1290_v60 = vcombine.low %v1242_v40, %v1242_v40  ;;  %v475_v62 = vrot.slane %v473_v46, 1  ;;  %v44_v5 = vld [vmem:[%s2109_s0 + $0x5c] sm:$0x1] }
  0x17   :  { %549 = vrot.lane.b32.xlu1 %v448_v2, %s1474_s1  ;;  %v468_v63 = vrot.slane %v466_v47, 1  ;;  %v1276_v1 = vcombine.low %v1662_v50, %v43_v51  ;;  %v1289_v2 = vcombine.low %v1241_v41, %v1241_v41  ;;  %v1275_v3 = vcombine.low %v1670_v52, %v42_v55  ;;  %v1259_v35 = vld [vmem:[%s2109_s0 + $0x54] sm:$0x1]  ;;  %v1244_v36 = vld [vmem:[%s2109_s0 + $0x58] sm:$0xf] }
  0x18   :  { %547 = vrot.lane.b32.xlu0 %v441_v10, %s1474_s1  ;;  %v485_v7 = vshrl.u32 %v1306_v42, 16  ;;  %v478_v8 = vshrl.u32 %v1305_v43, 16  ;;  %v476_v10 = vor.u32 %v475_v62, %v471_v53  ;;  %v489_v12 = vrot.slane %v487_v56, 1  ;;  %v1262_v42 = vld [vmem:[%s2109_s0 + $0x6c] sm:$0x1] }
  0x19   :  { %v229_v13 = vshll.u32 %v1276_v1, 16  ;;  %v1278_v15 = vcombine.low %v1678_v58, %v45_v59  ;;  %v482_v17 = vrot.slane %v480_v57, 1  ;;  %v222_v18 = vshll.u32 %v1275_v3, 16  ;;  %v1261_v43 = vld [vmem:[%s2109_s0 + $0x64] sm:$0x1] }
  0x1a   :  { %v1277_v19 = vcombine.low %v1690_v4, %v44_v5  ;;  %v227_v21 = vshrl.u32 %v1276_v1, 16  ;;  %v220_v25 = vshrl.u32 %v1275_v3, 16  ;;  %v1292_v46 = vcombine.low %v1244_v36, %v1244_v36  ;;  %v1734_v56 = vld [vmem:[%s2109_s0 + $0x70] sm:$0xf]  ;;  %v47_v57 = vld [vmem:[%s2109_s0 + $0x74] sm:$0x1] }
  0x1b   :  { %553 = vrot.lane.b32.xlu1 %v462_v16, %s1474_s1  ;;  %v469_v16 = vor.u32 %v468_v63, %v464_v54  ;;  %v231_v22 = vrot.slane %v229_v13, 1  ;;  %v243_v23 = vshll.u32 %v1278_v15, 16  ;;  %v224_v26 = vrot.slane %v222_v18, 1  ;;  %v1742_v59 = vld [vmem:[%s2109_s0 + $0x68] sm:$0xf] }
  0x1c   :  { %551 = vrot.lane.b32.xlu0 %v455_v20, %s1474_s1  ;;  %v490_v20 = vor.u32 %v489_v12, %v485_v7  ;;  %v241_v29 = vshrl.u32 %v1278_v15, 16  ;;  %v234_v32 = vshrl.u32 %v1277_v19, 16  ;;  %v1280_v5 = vcombine.low %v1734_v56, %v47_v57  ;;  %v1752_v7 = vld [vmem:[%s2109_s0 + $0x80] sm:$0xf]  ;;  %v49_v15 = vld [vmem:[%s2109_s0 + $0x84] sm:$0x1] }
  0x1d   :  { %v232_v28 = vor.u32 %v231_v22, %v227_v21  ;;  %v245_v30 = vrot.slane %v243_v23, 1  ;;  %v225_v31 = vor.u32 %v224_v26, %v220_v25  ;;  %v1282_v23 = vcombine.low %v1752_v7, %v49_v15  ;;  %v1250_v57 = vld [vmem:[%s2109_s0 + $0x88] sm:$0xf] }
  0x1e   :  { %v257_v22 = vshll.u32 %v1280_v5, 16 }
  0x1f   :  { %285 = vrot.lane.b32.xlu1 %v204_v24, %s1473_s24  ;;  %v483_v24 = vor.u32 %v482_v17, %v478_v8  ;;  %v246_v37 = vor.u32 %v245_v30, %v241_v29  ;;  %v48_v17 = vld [vmem:[%s2109_s0 + $0x7c] sm:$0x1]  ;;  %v255_v29 = vshrl.u32 %v1280_v5, 16 }
  0x20   :  { %283 = vrot.lane.b32.xlu0 %v197_v27, %s1473_s24  ;;  %v236_v27 = vshll.u32 %v1277_v19, 16  ;;  %v259_v30 = vrot.slane %v257_v22, 1 }
  0x22   :  { %v238_v33 = vrot.slane %v236_v27, 1 }
  0x23   :  { %289 = vrot.lane.b32.xlu1 %v218_v34, %s1473_s24  ;;  %v1260_v34 = vld [vmem:[%s2109_s0 + $0x5c] sm:$0x1] }
  0x24   :  { %287 = vrot.lane.b32.xlu0 %v211_v39, %s1473_s24  ;;  %v1308_v38 = vcombine.low %v1244_v36, %v1260_v34  ;;  %v1243_v39 = vld [vmem:[%s2109_s0 + $0x50] sm:$0xf]  ;;  %v239_v40 = vor.u32 %v238_v33, %v234_v32  ;;  %v260_v36 = vor.u32 %v259_v30, %v255_v29 }
  0x25   :  { %v1307_v41 = vcombine.low %v1243_v39, %v1259_v35  ;;  %v1291_v53 = vcombine.low %v1243_v39, %v1243_v39 }
  0x26   :  { %v501_v51 = vshll.u32 %v1308_v38, 16  ;;  %v499_v1 = vshrl.u32 %v1308_v38, 16 }
  0x27   :  { %365 = vrot.lane.b32.xlu1 %v1288_v44, %s1472_s7  ;;  %v1246_v44 = vld [vmem:[%s2109_s0 + $0x68] sm:$0xf]  ;;  %v494_v55 = vshll.u32 %v1307_v41, 16  ;;  %v492_v8 = vshrl.u32 %v1307_v41, 16 }
  0x28   :  { %363 = vrot.lane.b32.xlu0 %v1287_v48, %s1472_s7  ;;  %v1310_v47 = vcombine.low %v1246_v44, %v1262_v42  ;;  %v1245_v48 = vld [vmem:[%s2109_s0 + $0x60] sm:$0xf]  ;;  %v1294_v62 = vcombine.low %v1246_v44, %v1246_v44  ;;  %v1264_v42 = vld [vmem:[%s2109_s0 + $0x7c] sm:$0x1]  ;;  %v1248_v44 = vld [vmem:[%s2109_s0 + $0x78] sm:$0xf] }
  0x29   :  { %v1309_v54 = vcombine.low %v1245_v48, %v1261_v43  ;;  %v1293_v63 = vcombine.low %v1245_v48, %v1245_v48  ;;  %v1263_v43 = vld [vmem:[%s2109_s0 + $0x74] sm:$0x1]  ;;  %v1247_v48 = vld [vmem:[%s2109_s0 + $0x70] sm:$0xf] }
  0x2a   :  { %v515_v3 = vshll.u32 %v1310_v47, 16  ;;  %v513_v18 = vshrl.u32 %v1310_v47, 16  ;;  %v1312_v47 = vcombine.low %v1248_v44, %v1264_v42 }
  0x2b   :  { %369 = vrot.lane.b32.xlu1 %v1290_v60, %s1472_s7  ;;  %v46_v60 = vld [vmem:[%s2109_s0 + $0x6c] sm:$0x1]  ;;  %v508_v12 = vshll.u32 %v1309_v54, 16  ;;  %v506_v19 = vshrl.u32 %v1309_v54, 16 }
  0x2c   :  { %367 = vrot.lane.b32.xlu0 %v1289_v2, %s1472_s7  ;;  %v503_v2 = vrot.slane %v501_v51, 1  ;;  %v1279_v13 = vcombine.low %v1742_v59, %v46_v60  ;;  %v517_v21 = vrot.slane %v515_v3, 1  ;;  %v1266_v54 = vld [vmem:[%s2109_s0 + $0x8c] sm:$0x1]  ;;  %v1296_v60 = vcombine.low %v1248_v44, %v1248_v44 }
  0x2d   :  { %v510_v25 = vrot.slane %v508_v12, 1 }
  0x2e   :  { %v250_v26 = vshll.u32 %v1279_v13, 16  ;;  %v248_v33 = vshrl.u32 %v1279_v13, 16 }
  0x2f   :  { %557 = vrot.lane.b32.xlu1 %v476_v10, %s1474_s1  ;;  %v496_v10 = vrot.slane %v494_v55, 1  ;;  %v511_v32 = vor.u32 %v510_v25, %v506_v19  ;;  %v1265_v55 = vld [vmem:[%s2109_s0 + $0x84] sm:$0x1] }
  0x30   :  { %555 = vrot.lane.b32.xlu0 %v469_v16, %s1474_s1  ;;  %v1762_v16 = vld [vmem:[%s2109_s0 + $0x78] sm:$0xf]  ;;  %v252_v34 = vrot.slane %v250_v26, 1 }
  0x31   :  { %v1281_v27 = vcombine.low %v1762_v16, %v48_v17 }
  0x32   :  { %v253_v39 = vor.u32 %v252_v34, %v248_v33 }
  0x33   :  { %561 = vrot.lane.b32.xlu1 %v490_v20, %s1474_s1  ;;  %v504_v20 = vor.u32 %v503_v2, %v499_v1  ;;  %v264_v35 = vshll.u32 %v1281_v27, 16  ;;  %v529_v1 = vshll.u32 %v1312_v47, 16  ;;  %v1295_v2 = vcombine.low %v1247_v48, %v1247_v48 }
  0x34   :  { %559 = vrot.lane.b32.xlu0 %v483_v24, %s1474_s1  ;;  %v497_v24 = vor.u32 %v496_v10, %v492_v8  ;;  %v1298_v8 = vcombine.low %v1250_v57, %v1250_v57  ;;  %v527_v10 = vshrl.u32 %v1312_v47, 16 }
  0x35   :  { %v266_v41 = vrot.slane %v264_v35, 1  ;;  %v531_v12 = vrot.slane %v529_v1, 1 }
  0x37   :  { %293 = vrot.lane.b32.xlu1 %v232_v28, %s1473_s24  ;;  %v518_v28 = vor.u32 %v517_v21, %v513_v18 }
  0x38   :  { %291 = vrot.lane.b32.xlu0 %v225_v31, %s1473_s24  ;;  %v271_v31 = vshll.u32 %v1282_v23, 16 }
  0x3a   :  { %v273_v38 = vrot.slane %v271_v31, 1 }
  0x3b   :  { %297 = vrot.lane.b32.xlu1 %v246_v37, %s1473_s24  ;;  %v269_v37 = vshrl.u32 %v1282_v23, 16 }
  0x3c   :  { %295 = vrot.lane.b32.xlu0 %v239_v40, %s1473_s24  ;;  %v262_v40 = vshrl.u32 %v1281_v27, 16 }
  0x3e   :  { %v267_v51 = vor.u32 %v266_v41, %v262_v40 }
  0x3f   :  { %373 = vrot.lane.b32.xlu1 %v1292_v46, %s1472_s7  ;;  %v274_v46 = vor.u32 %v273_v38, %v269_v37 }
  0x40   :  { %371 = vrot.lane.b32.xlu0 %v1291_v53, %s1472_s7  ;;  %v1311_v53 = vcombine.low %v1247_v48, %v1263_v43 }
  0x42   :  { %v522_v5 = vshll.u32 %v1311_v53, 16  ;;  %v520_v17 = vshrl.u32 %v1311_v53, 16 }
  0x43   :  { %377 = vrot.lane.b32.xlu1 %v1294_v62, %s1472_s7  ;;  %v1314_v62 = vcombine.low %v1250_v57, %v1266_v54 }
  0x44   :  { %375 = vrot.lane.b32.xlu0 %v1293_v63, %s1472_s7  ;;  %v1249_v63 = vld [vmem:[%s2109_s0 + $0x80] sm:$0xf]  ;;  %v524_v18 = vrot.slane %v522_v5, 1  ;;  %s1475_s0 = smov 96  }
  0x45   :  { %v1313_v3 = vcombine.low %v1249_v63, %v1265_v55  ;;  %v543_v13 = vshll.u32 %v1314_v62, 16  ;;  %v1297_v15 = vcombine.low %v1249_v63, %v1249_v63  ;;  %v541_v21 = vshrl.u32 %v1314_v62, 16 }
  0x46   :  { %v525_v23 = vor.u32 %v524_v18, %v520_v17 }
  0x47   :  { %565 = vrot.lane.b32.xlu1 %v504_v20, %s1474_s1  ;;  %v536_v19 = vshll.u32 %v1313_v3, 16  ;;  %v532_v20 = vor.u32 %v531_v12, %v527_v10  ;;  %v545_v22 = vrot.slane %v543_v13, 1 }
  0x48   :  { %563 = vrot.lane.b32.xlu0 %v497_v24, %s1474_s1  ;;  %v534_v24 = vshrl.u32 %v1313_v3, 16 }
  0x49   :  { %v538_v25 = vrot.slane %v536_v19, 1  ;;  %v546_v26 = vor.u32 %v545_v22, %v541_v21 }
  0x4b   :  { %569 = vrot.lane.b32.xlu1 %v518_v28, %s1474_s1  ;;  %v539_v27 = vor.u32 %v538_v25, %v534_v24 }
  0x4c   :  { %567 = vrot.lane.b32.xlu0 %v511_v32, %s1474_s1 }
  0x4f   :  { %301 = vrot.lane.b32.xlu1 %v260_v36, %s1473_s24 }
  0x50   :  { %299 = vrot.lane.b32.xlu0 %v253_v39, %s1473_s24 }
  0x53   :  { %305 = vrot.lane.b32.xlu1 %v274_v46, %s1473_s24 }
  0x54   :  { %303 = vrot.lane.b32.xlu0 %v267_v51, %s1473_s24 }
  0x57   :  { %381 = vrot.lane.b32.xlu1 %v1296_v60, %s1472_s7 }
  0x58   :  { %379 = vrot.lane.b32.xlu0 %v1295_v2, %s1472_s7 }
  0x5b   :  { %385 = vrot.lane.b32.xlu1 %v1298_v8, %s1472_s7 }
  0x5c   :  { %383 = vrot.lane.b32.xlu0 %v1297_v15, %s1472_s7 }
  0x5f   :  { %573 = vrot.lane.b32.xlu1 %v532_v20, %s1474_s1 }
  0x60   :  { %571 = vrot.lane.b32.xlu0 %v525_v23, %s1474_s1 }
  0x63   :  { %577 = vrot.lane.b32.xlu1 %v546_v26, %s1474_s1 }
  0x64   :  { %575 = vrot.lane.b32.xlu0 %v539_v27, %s1474_s1 }
  0x76   :  { %v358_v28 = vpop.permute.xlu1 %357  ;;  %v356_v29 = vpop.permute.xlu0 %355 }
  0x7d   :  { %v280_v30 = vpop.permute.xlu1 %279 }
  0x7e   :  { %v276_v31 = vpop.permute.xlu0 %275 }
  0x7f   :  { %v582_v37 = vsel %vm579_vm0, %v1527_v9, %v276_v31  ;;  %v588_v9 = vsel %vm579_vm0, %v1518_v6, %v280_v30 }
  0x80   :  { %v630_v41 = vsel %vm628_vm1, %v582_v37, %v356_v29 }
  0x81   :  { %v282_v32 = vpop.permute.xlu1 %281 }
  0x82   :  { %v278_v33 = vpop.permute.xlu0 %277 }
  0x83   :  { %v585_v35 = vsel %vm579_vm0, %v1546_v14, %v278_v33  ;;  %v591_v14 = vsel %vm579_vm0, %v1535_v11, %v282_v32 }
  0x84   :  { %v632_v39 = vsel %vm628_vm1, %v585_v35, %v358_v28 }
  0x85   :  { %v362_v34 = vpop.permute.xlu1 %361 }
  0x86   :  { %v360_v36 = vpop.permute.xlu0 %359  ;;  %v636_v46 = vsel %vm628_vm1, %v591_v14, %v362_v34 }
  0x87   :  { %v634_v48 = vsel %vm628_vm1, %v588_v9, %v360_v36 }
  0x89   :  { %v550_v38 = vpop.permute.xlu1 %549 }
  0x8a   :  { %v665_v40 = vsel %vm661_vm2, %v632_v39, %v550_v38  ;;  %v548_v42 = vpop.permute.xlu0 %547 }
  0x8b   :  { %v663_v43 = vsel %vm661_vm2, %v630_v41, %v548_v42 }
  0x8c   :  { %v1315_v44 = vcombine.low %v663_v43, %v665_v40 }
  0x8d   :  { %v554_v47 = vpop.permute.xlu1 %553 }
  0x8e   :  { %v669_v51 = vsel %vm661_vm2, %v636_v46, %v554_v47  ;;  %1388 = vmatprep.mubr.msk.bf16.mxu0 %vm766_vm3, %v1315_v44  ;;  %v552_v53 = vpop.permute.xlu0 %551 }
  0x8f   :  { %v667_v54 = vsel %vm661_vm2, %v634_v48, %v552_v53 }
  0x90   :  { %v1316_v55 = vcombine.low %v667_v54, %v669_v51 }
  0x91   :  { %v286_v57 = vpop.permute.xlu1 %285 }
  0x92   :  { %1389 = vmatmul.mubr.msk.bf16.vlgmr.msra.gmra.mrb[0].mxu0 %vm766_vm3, %v1316_v55  ;;  %v284_v11 = vpop.permute.xlu0 %283  ;;  %v597_v3 = vsel %vm579_vm0, %v1582_v45, %v286_v57 }
  0x93   :  { %v594_v5 = vsel %vm579_vm0, %v1593_v49, %v284_v11 }
  0x95   :  { %v290_v60 = vpop.permute.xlu1 %289 }
  0x96   :  { %v288_v62 = vpop.permute.xlu0 %287  ;;  %v603_v18 = vsel %vm579_vm0, %v1607_v61, %v290_v60 }
  0x97   :  { %v600_v45 = vsel %vm579_vm0, %v1618_v0, %v288_v62 }
  0x99   :  { %v366_v6 = vpop.permute.xlu1 %365 }
  0x9a   :  { %v364_v63 = vpop.permute.xlu0 %363  ;;  %v640_v8 = vsel %vm628_vm1, %v597_v3, %v366_v6 }
  0x9b   :  { %v638_v12 = vsel %vm628_vm1, %v594_v5, %v364_v63 }
  0x9d   :  { %v370_v1 = vpop.permute.xlu1 %369 }
  0x9e   :  { %v368_v2 = vpop.permute.xlu0 %367  ;;  %v644_v20 = vsel %vm628_vm1, %v603_v18, %v370_v1 }
  0x9f   :  { %v642_v21 = vsel %vm628_vm1, %v600_v45, %v368_v2 }
  0xa1   :  { %v558_v10 = vpop.permute.xlu1 %557 }
  0xa2   :  { %v673_v13 = vsel %vm661_vm2, %v640_v8, %v558_v10  ;;  %v556_v15 = vpop.permute.xlu0 %555 }
  0xa3   :  { %v671_v17 = vsel %vm661_vm2, %v638_v12, %v556_v15 }
  0xa4   :  { %v1317_v19 = vcombine.low %v671_v17, %v673_v13 }
  0xa5   :  { %v562_v49 = vpop.permute.xlu1 %561 }
  0xa6   :  { %v677_v22 = vsel %vm661_vm2, %v644_v20, %v562_v49  ;;  %1392 = vmatprep.mubr.msk.bf16.mxu0 %vm766_vm3, %v1317_v19  ;;  %v560_v23 = vpop.permute.xlu0 %559 }
  0xa7   :  { %v675_v24 = vsel %vm661_vm2, %v642_v21, %v560_v23 }
  0xa8   :  { %v1318_v25 = vcombine.low %v675_v24, %v677_v22 }
  0xa9   :  { %v294_v26 = vpop.permute.xlu1 %293 }
  0xaa   :  { %1393 = vmatmul.mubr.msk.bf16.gmra.mrb[4].mxu0 %vm766_vm3, %v1318_v25  ;;  %v292_v61 = vpop.permute.xlu0 %291  ;;  %v609_v32 = vsel %vm579_vm0, %v1662_v50, %v294_v26 }
  0xab   :  { %v606_v33 = vsel %vm579_vm0, %v1670_v52, %v292_v61 }
  0xad   :  { %v298_v27 = vpop.permute.xlu1 %297 }
  0xae   :  { %v296_v28 = vpop.permute.xlu0 %295  ;;  %v615_v40 = vsel %vm579_vm0, %v1678_v58, %v298_v27 }
  0xaf   :  { %v612_v50 = vsel %vm579_vm0, %v1690_v4, %v296_v28 }
  0xb1   :  { %v374_v0 = vpop.permute.xlu1 %373 }
  0xb2   :  { %v372_v29 = vpop.permute.xlu0 %371  ;;  %v648_v34 = vsel %vm628_vm1, %v609_v32, %v374_v0 }
  0xb3   :  { %v646_v36 = vsel %vm628_vm1, %v606_v33, %v372_v29 }
  0xb5   :  { %v378_v30 = vpop.permute.xlu1 %377 }
  0xb6   :  { %v376_v31 = vpop.permute.xlu0 %375  ;;  %v652_v42 = vsel %vm628_vm1, %v615_v40, %v378_v30 }
  0xb7   :  { %v650_v43 = vsel %vm628_vm1, %v612_v50, %v376_v31 }
  0xb9   :  { %v566_v35 = vpop.permute.xlu1 %565 }
  0xba   :  { %v681_v37 = vsel %vm661_vm2, %v648_v34, %v566_v35  ;;  %v564_v38 = vpop.permute.xlu0 %563 }
  0xbb   :  { %v679_v39 = vsel %vm661_vm2, %v646_v36, %v564_v38 }
  0xbc   :  { %v1319_v41 = vcombine.low %v679_v39, %v681_v37 }
  0xbd   :  { %v570_v52 = vpop.permute.xlu1 %569 }
  0xbe   :  { %v685_v14 = vsel %vm661_vm2, %v652_v42, %v570_v52  ;;  %1396 = vmatprep.mubr.msk.bf16.mxu1 %vm766_vm3, %v1319_v41  ;;  %v568_v44 = vpop.permute.xlu0 %567 }
  0xbf   :  { %v683_v9 = vsel %vm661_vm2, %v650_v43, %v568_v44 }
  0xc0   :  { %v1320_v46 = vcombine.low %v683_v9, %v685_v14 }
  0xc1   :  { %v302_v47 = vpop.permute.xlu1 %301 }
  0xc2   :  { %1397 = vmatmul.mubr.msk.bf16.vlgmr.msra.gmra.mrb[0].mxu1 %vm766_vm3, %v1320_v46  ;;  %v300_v58 = vpop.permute.xlu0 %299  ;;  %v621_v57 = vsel %vm579_vm0, %v1734_v56, %v302_v47 }
  0xc3   :  { %v618_v11 = vsel %vm579_vm0, %v1742_v59, %v300_v58 }
  0xc5   :  { %v306_v48 = vpop.permute.xlu1 %305 }
  0xc6   :  { %v304_v51 = vpop.permute.xlu0 %303  ;;  %v627_v3 = vsel %vm579_vm0, %v1752_v7, %v306_v48 }
  0xc7   :  { %v624_v56 = vsel %vm579_vm0, %v1762_v16, %v304_v51 }
  0xc9   :  { %v382_v4 = vpop.permute.xlu1 %381 }
  0xca   :  { %v380_v53 = vpop.permute.xlu0 %379  ;;  %v656_v60 = vsel %vm628_vm1, %v621_v57, %v382_v4 }
  0xcb   :  { %v654_v6 = vsel %vm628_vm1, %v618_v11, %v380_v53 }
  0xcd   :  { %v386_v54 = vpop.permute.xlu1 %385 }
  0xce   :  { %v384_v55 = vpop.permute.xlu0 %383  ;;  %v660_v8 = vsel %vm628_vm1, %v627_v3, %v386_v54 }
  0xcf   :  { %v658_v10 = vsel %vm628_vm1, %v624_v56, %v384_v55 }
  0xd1   :  { %v574_v62 = vpop.permute.xlu1 %573 }
  0xd2   :  { %v689_v63 = vsel %vm661_vm2, %v656_v60, %v574_v62  ;;  %v572_v1 = vpop.permute.xlu0 %571 }
  0xd3   :  { %v687_v2 = vsel %vm661_vm2, %v654_v6, %v572_v1 }
  0xd4   :  { %v1321_v5 = vcombine.low %v687_v2, %v689_v63 }
  0xd5   :  { %v578_v59 = vpop.permute.xlu1 %577 }
  0xd6   :  { %v693_v12 = vsel %vm661_vm2, %v660_v8, %v578_v59  ;;  %1400 = vmatprep.mubr.msk.bf16.mxu1 %vm766_vm3, %v1321_v5  ;;  %v576_v13 = vpop.permute.xlu0 %575 }
  0xd7   :  { %v691_v15 = vsel %vm661_vm2, %v658_v10, %v576_v13 }
  0xd8   :  { %v1322_v17 = vcombine.low %v691_v15, %v693_v12 }
  0xda   :  { %1401 = vmatmul.mubr.msk.bf16.gmra.mrb[4].mxu1 %vm766_vm3, %v1322_v17 }
 0x165   :  { %v1883_v7 = vpop.f32.mrb[0].mxu0 }
 0x166   :  { %v1885_v18 = vpop.f32.mrb[1].mxu0  ;;  %v927_v20 = vmul.f32 %v1883_v7, %v1883_v7  ;;  %v891_v24 = vsel %vm766_vm3, %v1883_v7, 0.0 }
 0x167   :  { %v925_v16 = vmul.f32 %v1885_v18, %v1885_v18  ;;  %v1889_v19 = vpop.f32.mrb[2].mxu0  ;;  %v888_v49 = vsel %vm766_vm3, %v1885_v18, 0.0 }
 0x168   :  { %v1891_v45 = vpop.f32.mrb[3].mxu0  ;;  %v928_v26 = vmul.f32 %v1889_v19, %v1889_v19  ;;  %v944_v0 = vsel %vm766_vm3, %v927_v20, 0.0  ;;  %v893_v29 = vsel %vm766_vm3, %v1889_v19, 0.0 }
 0x169   :  { %v889_v21 = vsel %vm766_vm3, %v1891_v45, 0.0  ;;  %v926_v22 = vmul.f32 %v1891_v45, %v1891_v45  ;;  %v941_v25 = vsel %vm766_vm3, %v925_v16, 0.0 }
 0x16a   :  { %v890_v23 = vadd.f32 %v889_v21, %v888_v49  ;;  %v946_v32 = vsel %vm766_vm3, %v928_v26, 0.0 }
 0x16b   :  { %v942_v61 = vsel %vm766_vm3, %v926_v22, 0.0 }
 0x16c   :  { %v892_v27 = vadd.f32 %v891_v24, %v890_v23  ;;  %v943_v28 = vadd.f32 %v942_v61, %v941_v25 }
 0x16e   :  { %v945_v30 = vadd.f32 %v944_v0, %v943_v28  ;;  %v894_v31 = vadd.f32 %v893_v29, %v892_v27 }
 0x170   :  { %v947_v33 = vadd.f32 %v946_v32, %v945_v30 }
 0x17d   :  { %v1911_v34 = vpop.f32.mrb[4].mxu0 }
 0x17e   :  { %v1913_v35 = vpop.f32.mrb[5].mxu0  ;;  %v931_v41 = vmul.f32 %v1911_v34, %v1911_v34  ;;  %v899_v44 = vsel %vm766_vm3, %v1911_v34, 0.0 }
 0x17f   :  { %v895_v36 = vsel %vm766_vm3, %v1913_v35, 0.0  ;;  %v929_v37 = vmul.f32 %v1913_v35, %v1913_v35  ;;  %v1919_v38 = vpop.f32.mrb[6].mxu0 }
 0x180   :  { %v896_v39 = vadd.f32 %v895_v36, %v894_v31  ;;  %v1921_v40 = vpop.f32.mrb[7].mxu0  ;;  %v932_v9 = vmul.f32 %v1919_v38, %v1919_v38  ;;  %v952_v48 = vsel %vm766_vm3, %v931_v41, 0.0  ;;  %v901_v51 = vsel %vm766_vm3, %v1919_v38, 0.0 }
 0x181   :  { %v948_v50 = vsel %vm766_vm3, %v929_v37, 0.0  ;;  %v897_v42 = vsel %vm766_vm3, %v1921_v40, 0.0  ;;  %v930_v52 = vmul.f32 %v1921_v40, %v1921_v40 }
 0x182   :  { %v949_v43 = vadd.f32 %v948_v50, %v947_v33  ;;  %v898_v14 = vadd.f32 %v897_v42, %v896_v39  ;;  %v954_v54 = vsel %vm766_vm3, %v932_v9, 0.0 }
 0x183   :  { %v950_v46 = vsel %vm766_vm3, %v930_v52, 0.0 }
 0x184   :  { %v900_v47 = vadd.f32 %v899_v44, %v898_v14  ;;  %v951_v58 = vadd.f32 %v950_v46, %v949_v43 }
 0x186   :  { %v953_v4 = vadd.f32 %v952_v48, %v951_v58  ;;  %v902_v53 = vadd.f32 %v901_v51, %v900_v47 }
 0x188   :  { %v955_v55 = vadd.f32 %v954_v54, %v953_v4 }
 0x195   :  { %v1939_v57 = vpop.f32.mrb[0].mxu1 }
 0x196   :  { %v1941_v11 = vpop.f32.mrb[1].mxu1  ;;  %v935_v2 = vmul.f32 %v1939_v57, %v1939_v57  ;;  %v907_v10 = vsel %vm766_vm3, %v1939_v57, 0.0 }
 0x197   :  { %v903_v60 = vsel %vm766_vm3, %v1941_v11, 0.0  ;;  %v933_v62 = vmul.f32 %v1941_v11, %v1941_v11  ;;  %v1947_v6 = vpop.f32.mrb[2].mxu1 }
 0x198   :  { %v904_v63 = vadd.f32 %v903_v60, %v902_v53  ;;  %v1949_v1 = vpop.f32.mrb[3].mxu1  ;;  %v936_v12 = vmul.f32 %v1947_v6, %v1947_v6  ;;  %v960_v16 = vsel %vm766_vm3, %v935_v2, 0.0  ;;  %v909_v20 = vsel %vm766_vm3, %v1947_v6, 0.0 }
 0x199   :  { %v956_v3 = vsel %vm766_vm3, %v933_v62, 0.0  ;;  %v905_v5 = vsel %vm766_vm3, %v1949_v1, 0.0  ;;  %v934_v56 = vmul.f32 %v1949_v1, %v1949_v1 }
 0x19a   :  { %v957_v8 = vadd.f32 %v956_v3, %v955_v55  ;;  %v906_v59 = vadd.f32 %v905_v5, %v904_v63  ;;  %v962_v22 = vsel %vm766_vm3, %v936_v12, 0.0 }
 0x19b   :  { %v958_v13 = vsel %vm766_vm3, %v934_v56, 0.0 }
 0x19c   :  { %v908_v15 = vadd.f32 %v907_v10, %v906_v59  ;;  %v959_v17 = vadd.f32 %v958_v13, %v957_v8 }
 0x19e   :  { %v961_v49 = vadd.f32 %v960_v16, %v959_v17  ;;  %v910_v21 = vadd.f32 %v909_v20, %v908_v15 }
 0x1a0   :  { %v963_v23 = vadd.f32 %v962_v22, %v961_v49 }
 0x1ad   :  { %v1967_v24 = vpop.f32.mrb[4].mxu1 }
 0x1ae   :  { %v1969_v25 = vpop.f32.mrb[5].mxu1  ;;  %v939_v29 = vmul.f32 %v1967_v24, %v1967_v24  ;;  %v915_v37 = vsel %vm766_vm3, %v1967_v24, 0.0 }
 0x1af   :  { %v911_v26 = vsel %vm766_vm3, %v1969_v25, 0.0  ;;  %v937_v61 = vmul.f32 %v1969_v25, %v1969_v25  ;;  %v1975_v27 = vpop.f32.mrb[6].mxu1 }
 0x1b0   :  { %v912_v28 = vadd.f32 %v911_v26, %v910_v21  ;;  %v1977_v0 = vpop.f32.mrb[7].mxu1  ;;  %v940_v39 = vmul.f32 %v1975_v27, %v1975_v27  ;;  %v968_v52 = vsel %vm766_vm3, %v939_v29, 0.0  ;;  %v917_v43 = vsel %vm766_vm3, %v1975_v27, 0.0 }
 0x1b1   :  { %v964_v30 = vsel %vm766_vm3, %v937_v61, 0.0  ;;  %v913_v31 = vsel %vm766_vm3, %v1977_v0, 0.0  ;;  %v938_v32 = vmul.f32 %v1977_v0, %v1977_v0 }
 0x1b2   :  { %v965_v33 = vadd.f32 %v964_v30, %v963_v23  ;;  %v914_v36 = vadd.f32 %v913_v31, %v912_v28  ;;  %v970_v9 = vsel %vm766_vm3, %v940_v39, 0.0  ;;  %v1037_v30 = vlaneseq }
 0x1b3   :  { %v966_v41 = vsel %vm766_vm3, %v938_v32, 0.0 }
 0x1b4   :  { %v916_v50 = vadd.f32 %v915_v37, %v914_v36  ;;  %v967_v42 = vadd.f32 %v966_v41, %v965_v33  ;;  %v1038_v31 = vshrl.u32 %v1037_v30, 7 }
 0x1b6   :  { %v918_v14 = vadd.f32 %v917_v43, %v916_v50  ;;  %v969_v44 = vadd.f32 %v968_v52, %v967_v42  ;;  %v1039_v39 = vsub.s32 0, %v1038_v31  ;;  %v1057_v43 = vld [vmem:[%s2111_s2] sm:$0x1] }
 0x1b8   :  { %v919_v46 = vrot.slane %v918_v14, 4  ;;  %v971_v47 = vadd.f32 %v970_v9, %v969_v44 }
 0x1ba   :  { %v920_v58 = vadd.f32 %v919_v46, %v918_v14  ;;  %v972_v48 = vrot.slane %v971_v47, 4 }
 0x1bc   :  { %v921_v51 = vrot.slane %v920_v58, 2  ;;  %v973_v4 = vadd.f32 %v972_v48, %v971_v47 }
 0x1be   :  { %v922_v53 = vadd.f32 %v921_v51, %v920_v58  ;;  %v974_v54 = vrot.slane %v973_v4, 2 }
 0x1c0   :  { %v923_v55 = vrot.slane %v922_v53, 1  ;;  %v975_v60 = vadd.f32 %v974_v54, %v973_v4 }
 0x1c2   :  { %v924_v62 = vadd.f32 %v923_v55, %v922_v53  ;;  %v976_v63 = vrot.slane %v975_v60, 1 }
 0x1c4   :  { %983 = vrot.lane.b32.xlu1 %v924_v62, %s1475_s0  ;;  %979 = vrot.lane.b32.xlu0 %v924_v62, %s1476_s5  ;;  %v977_v2 = vadd.f32 %v976_v63, %v975_v60 }
 0x1c8   :  { %987 = vrot.lane.b32.xlu1 %v924_v62, %s1477_s6  ;;  %994 = vrot.lane.b32.xlu0 %v977_v2, %s1476_s5 }
 0x1cc   :  { %1002 = vrot.lane.b32.xlu1 %v977_v2, %s1477_s6  ;;  %998 = vrot.lane.b32.xlu0 %v977_v2, %s1475_s0 }
 0x236   :  { %v984_v3 = vpop.permute.xlu1 %983  ;;  %v980_v5 = vpop.permute.xlu0 %979 }
 0x237   :  { %v982_v56 = vadd.f32 %v980_v5, %v924_v62 }
 0x239   :  { %v986_v8 = vadd.f32 %v984_v3, %v982_v56 }
 0x23a   :  { %v988_v59 = vpop.permute.xlu1 %987  ;;  %v995_v10 = vpop.permute.xlu0 %994 }
 0x23b   :  { %v990_v12 = vadd.f32 %v988_v59, %v986_v8  ;;  %v997_v15 = vadd.f32 %v995_v10, %v977_v2 }
 0x23d   :  { %v992_v13 = vmul.f32 0.001953125, %v990_v12 }
 0x23e   :  { %v999_v17 = vpop.permute.xlu0 %998  ;;  %v1003_v20 = vpop.permute.xlu1 %1002 }
 0x23f   :  { %v1001_v16 = vadd.f32 %v999_v17, %v997_v15  ;;  %1012 = vrot.lane.b32.xlu0 %v992_v13, %s1473_s24  ;;  %v1007_v21 = vmul.f32 %v992_v13, %v992_v13 }
 0x241   :  { %v1005_v49 = vadd.f32 %v1003_v20, %v1001_v16 }
 0x243   :  { %v1006_v22 = vmul.f32 0.001953125, %v1005_v49  ;;  %1015 = vrot.lane.b32.xlu0 %v992_v13, %s1472_s7 }
 0x245   :  { %v1008_v23 = vsub.f32 %v1006_v22, %v1007_v21 }
 0x247   :  { %v1009_v26 = vadd.f32 1e-05, %v1008_v23  ;;  %1018 = vrot.lane.b32.xlu0 %v992_v13, %s1474_s1 }
 0x249   :  { %1470 = vrsqrt.f32 %v1009_v26 }
 0x253   :  { %v1471_v61 = vpop.eup %1470 }
 0x254   :  { %1025 = vrot.lane.b32.xlu1 %v1471_v61, %s1473_s24 }
 0x258   :  { %1028 = vrot.lane.b32.xlu1 %v1471_v61, %s1472_s7 }
 0x25c   :  { %1031 = vrot.lane.b32.xlu1 %v1471_v61, %s1474_s1 }
 0x2b1   :  { %v1013_v28 = vpop.permute.xlu0 %1012 }
 0x2b2   :  { %v1021_v33 = vsel %vm579_vm0, %v992_v13, %v1013_v28 }
 0x2b5   :  { %v1016_v29 = vpop.permute.xlu0 %1015 }
 0x2b6   :  { %v1022_v37 = vsel %vm628_vm1, %v1021_v33, %v1016_v29 }
 0x2b9   :  { %v1019_v32 = vpop.permute.xlu0 %1018 }
 0x2ba   :  { %v1023_v41 = vsel %vm661_vm2, %v1022_v37, %v1019_v32 }
 0x2bb   :  { %v1040_v42 = vrot.slane %v1023_v41, %v1039_v39 }
 0x2bd   :  { %v1041_v9 = vsub.f32 %v1885_v18, %v1040_v42  ;;  %v1042_v46 = vsub.f32 %v1891_v45, %v1040_v42  ;;  %v1043_v58 = vsub.f32 %v1883_v7, %v1040_v42  ;;  %v1044_v48 = vsub.f32 %v1889_v19, %v1040_v42 }
 0x2be   :  { %v1045_v51 = vsub.f32 %v1913_v35, %v1040_v42  ;;  %v1046_v53 = vsub.f32 %v1921_v40, %v1040_v42  ;;  %v1047_v54 = vsub.f32 %v1911_v34, %v1040_v42  ;;  %v1048_v55 = vsub.f32 %v1919_v38, %v1040_v42 }
 0x2bf   :  { %v1049_v60 = vsub.f32 %v1941_v11, %v1040_v42  ;;  %v1050_v18 = vsub.f32 %v1949_v1, %v1040_v42  ;;  %v1051_v45 = vsub.f32 %v1939_v57, %v1040_v42  ;;  %v1052_v62 = vsub.f32 %v1947_v6, %v1040_v42  ;;  %v1335_v11 = vld [vmem:[%s2112_s3] ss:$0 sm:$0xff] }
 0x2c0   :  { %v1053_v19 = vsub.f32 %v1969_v25, %v1040_v42  ;;  %v1054_v35 = vsub.f32 %v1977_v0, %v1040_v42  ;;  %v1055_v63 = vsub.f32 %v1967_v24, %v1040_v42  ;;  %v1056_v40 = vsub.f32 %v1975_v27, %v1040_v42 }
 0x2c6   :  { %v1026_v36 = vpop.permute.xlu1 %1025 }
 0x2c7   :  { %v1034_v52 = vsel %vm579_vm0, %v1471_v61, %v1026_v36 }
 0x2ca   :  { %v1029_v50 = vpop.permute.xlu1 %1028 }
 0x2cb   :  { %v1035_v14 = vsel %vm628_vm1, %v1034_v52, %v1029_v50 }
 0x2ce   :  { %v1032_v44 = vpop.permute.xlu1 %1031 }
 0x2cf   :  { %v1036_v47 = vsel %vm661_vm2, %v1035_v14, %v1032_v44 }
 0x2d0   :  { %v1058_v4 = vmul.f32 %v1057_v43, %v1036_v47 }
 0x2d2   :  { %v1062_v7 = vrot.slane %v1058_v4, %v1039_v39 }
 0x2d4   :  { %v1063_v34 = vmul.f32 %v1062_v7, %v1041_v9  ;;  %v1064_v2 = vmul.f32 %v1062_v7, %v1042_v46  ;;  %v1065_v38 = vmul.f32 %v1062_v7, %v1043_v58  ;;  %v1066_v3 = vmul.f32 %v1062_v7, %v1044_v48 }
 0x2d5   :  { %v1067_v57 = vmul.f32 %v1062_v7, %v1045_v51  ;;  %v1068_v1 = vmul.f32 %v1062_v7, %v1046_v53  ;;  %v1069_v6 = vmul.f32 %v1062_v7, %v1047_v54  ;;  %v1070_v5 = vmul.f32 %v1062_v7, %v1048_v55 }
 0x2d6   :  { %v1071_v56 = vmul.f32 %v1062_v7, %v1049_v60  ;;  %v1072_v25 = vmul.f32 %v1062_v7, %v1050_v18  ;;  %v1073_v8 = vmul.f32 %v1062_v7, %v1051_v45  ;;  %v1074_v0 = vmul.f32 %v1062_v7, %v1052_v62 }
 0x2d7   :  { %v1075_v59 = vmul.f32 %v1062_v7, %v1053_v19  ;;  %v1076_v24 = vmul.f32 %v1062_v7, %v1054_v35  ;;  %v1077_v10 = vmul.f32 %v1062_v7, %v1055_v63  ;;  %v1078_v27 = vmul.f32 %v1062_v7, %v1056_v40 }
 0x2d8   :  { %v1086_v12 = vadd.f32 %v1335_v11, %v1063_v34  ;;  %v1087_v13 = vadd.f32 %v1335_v11, %v1064_v2  ;;  %v1088_v15 = vadd.f32 %v1335_v11, %v1065_v38  ;;  %v1089_v17 = vadd.f32 %v1335_v11, %v1066_v3 }
 0x2d9   :  { %v1090_v16 = vadd.f32 %v1335_v11, %v1067_v57  ;;  %v1091_v20 = vadd.f32 %v1335_v11, %v1068_v1  ;;  %v1092_v49 = vadd.f32 %v1335_v11, %v1069_v6  ;;  %v1093_v21 = vadd.f32 %v1335_v11, %v1070_v5 }
 0x2da   :  { %v1094_v22 = vadd.f32 %v1335_v11, %v1071_v56  ;;  %v1095_v23 = vadd.f32 %v1335_v11, %v1072_v25  ;;  %v1096_v26 = vadd.f32 %v1335_v11, %v1073_v8  ;;  %v1097_v61 = vadd.f32 %v1335_v11, %v1074_v0 }
 0x2db   :  { %v1098_v28 = vadd.f32 %v1335_v11, %v1075_v59  ;;  %v1099_v29 = vadd.f32 %v1335_v11, %v1076_v24  ;;  %v1100_v30 = vadd.f32 %v1335_v11, %v1077_v10  ;;  %v1101_v31 = vadd.f32 %v1335_v11, %v1078_v27 }
 0x2dc   :  { %vm1103_vm5 = vcmp.ge.f32.partialorder %v1087_v13, 0.0  ;;  %vm1104_vm6 = vcmp.ge.f32.partialorder %v1088_v15, 0.0  ;;  %vm1105_vm7 = vcmp.ge.f32.partialorder %v1089_v17, 0.0  ;;  %vm1106_vm8 = vcmp.ge.f32.partialorder %v1090_v16, 0.0 }
 0x2dd   :  { %vm1107_vm9 = vcmp.ge.f32.partialorder %v1091_v20, 0.0  ;;  %vm1109_vm11 = vcmp.ge.f32.partialorder %v1093_v21, 0.0  ;;  %vm1110_vm12 = vcmp.ge.f32.partialorder %v1094_v22, 0.0  ;;  %vm1111_vm13 = vcmp.ge.f32.partialorder %v1095_v23, 0.0 }
 0x2de   :  { %vm1112_vm14 = vcmp.ge.f32.partialorder %v1096_v26, 0.0  ;;  %vm1113_vm15 = vcmp.ge.f32.partialorder %v1097_v61, 0.0  ;;  %vm1114_vm1 = vcmp.ge.f32.partialorder %v1098_v28, 0.0  ;;  %vm1115_vm2 = vcmp.ge.f32.partialorder %v1099_v29, 0.0 }
 0x2df   :  { %vm1116_vm3 = vcmp.ge.f32.partialorder %v1100_v30, 0.0  ;;  %vm1117_vm4 = vcmp.ge.f32.partialorder %v1101_v31, 0.0  ;;  %v1118_v32 = vmul.f32 0.01, %v1086_v12  ;;  %v1119_v33 = vmul.f32 0.01, %v1087_v13 }
 0x2e0   :  { %v1120_v36 = vmul.f32 0.01, %v1088_v15  ;;  %v1121_v37 = vmul.f32 0.01, %v1089_v17  ;;  %v1122_v39 = vmul.f32 0.01, %v1090_v16 }
 0x2e1   :  { %v1123_v41 = vmul.f32 0.01, %v1091_v20  ;;  %v1124_v50 = vmul.f32 0.01, %v1092_v49  ;;  %v1125_v42 = vmul.f32 0.01, %v1093_v21  ;;  %v1135_v46 = vsel %vm1103_vm5, %v1087_v13, %v1119_v33 }
 0x2e2   :  { %v1126_v52 = vmul.f32 0.01, %v1094_v22  ;;  %vm2114_vm10 = vcmp.ge.f32.partialorder %v1086_v12, 0.0  ;;  %v1127_v14 = vmul.f32 0.01, %v1095_v23  ;;  %v1136_v51 = vsel %vm1104_vm6, %v1088_v15, %v1120_v36 }
 0x2e3   :  { %v1134_v43 = vsel %vm2114_vm10, %v1086_v12, %v1118_v32  ;;  %v1128_v44 = vmul.f32 0.01, %v1096_v26  ;;  %v1129_v9 = vmul.f32 0.01, %v1097_v61  ;;  %v1130_v47 = vmul.f32 0.01, %v1098_v28 }
 0x2e4   :  { %v1131_v58 = vmul.f32 0.01, %v1099_v29  ;;  %v1132_v48 = vmul.f32 0.01, %v1100_v30  ;;  %v1133_v4 = vmul.f32 0.01, %v1101_v31  ;;  %v1137_v53 = vsel %vm1105_vm7, %v1089_v17, %v1121_v37 }
 0x2e5   :  { %v1138_v54 = vsel %vm1106_vm8, %v1090_v16, %v1122_v39  ;;  %v1139_v55 = vsel %vm1107_vm9, %v1091_v20, %v1123_v41  ;;  %vm2115_vm0 = vcmp.ge.f32.partialorder %v1092_v49, 0.0  ;;  %v1141_v18 = vsel %vm1109_vm11, %v1093_v21, %v1125_v42 }
 0x2e6   :  { %v1140_v60 = vsel %vm2115_vm0, %v1092_v49, %v1124_v50  ;;  %v1142_v45 = vsel %vm1110_vm12, %v1094_v22, %v1126_v52  ;;  %v1143_v62 = vsel %vm1111_vm13, %v1095_v23, %v1127_v14  ;;  %v1144_v7 = vsel %vm1112_vm14, %v1096_v26, %v1128_v44 }
 0x2e7   :  { %v1145_v19 = vsel %vm1113_vm15, %v1097_v61, %v1129_v9  ;;  %v1146_v35 = vsel %vm1114_vm1, %v1098_v28, %v1130_v47  ;;  %v1147_v63 = vsel %vm1115_vm2, %v1099_v29, %v1131_v58  ;;  %v1148_v40 = vsel %vm1116_vm3, %v1100_v30, %v1132_v48 }
 0x2e8   :  { %v1149_v34 = vsel %vm1117_vm4, %v1101_v31, %v1133_v4  ;;  %v1352_v2 = vpack.c.bf16 %v1134_v43, %v1134_v43  ;;  %v1353_v38 = vpack.c.bf16 %v1135_v46, %v1135_v46  ;;  %v1354_v3 = vpack.c.bf16 %v1136_v51, %v1136_v51 }
 0x2e9   :  { %v1355_v11 = vpack.c.bf16 %v1137_v53, %v1137_v53  ;;  %v1356_v57 = vpack.c.bf16 %v1138_v54, %v1138_v54  ;;  %v1357_v1 = vpack.c.bf16 %v1139_v55, %v1139_v55  ;;  %v1358_v6 = vpack.c.bf16 %v1140_v60, %v1140_v60 }
 0x2ea   :  { %v1359_v5 = vpack.c.bf16 %v1141_v18, %v1141_v18  ;;  %v1360_v56 = vpack.c.bf16 %v1142_v45, %v1142_v45  ;;  %v1361_v25 = vpack.c.bf16 %v1143_v62, %v1143_v62  ;;  %vm2116_vm5 = vcmask 519168  }
 0x2eb   :  { %1215 = vst.msk [vmem:[%s2113_s4] sm:$0xf] %vm2116_vm5, %v1352_v2  ;;  %vm2117_vm6 = vmmov %vm2116_vm5  ;;  %v1362_v8 = vpack.c.bf16 %v1144_v7, %v1144_v7  ;;  %v1363_v0 = vpack.c.bf16 %v1145_v19, %v1145_v19  ;;  %v1364_v59 = vpack.c.bf16 %v1146_v35, %v1146_v35  ;;  %v1365_v24 = vpack.c.bf16 %v1147_v63, %v1147_v63 }
 0x2ec   :  { %1216 = vst.msk [vmem:[%s2113_s4 + $0x4] sm:$0xf] %vm2117_vm6, %v1353_v38  ;;  %vm2118_vm4 = vmmov %vm2116_vm5  ;;  %v1366_v10 = vpack.c.bf16 %v1148_v40, %v1148_v40  ;;  %v1367_v27 = vpack.c.bf16 %v1149_v34, %v1149_v34 }
 0x2ed   :  { %1217 = vst.msk [vmem:[%s2113_s4 + $0x8] sm:$0xf] %vm2118_vm4, %v1354_v3  ;;  %vm2119_vm7 = vmmov %vm2118_vm4 }
 0x2ee   :  { %1218 = vst.msk [vmem:[%s2113_s4 + $0xc] sm:$0xf] %vm2119_vm7, %v1355_v11  ;;  %vm2120_vm8 = vmmov %vm2118_vm4 }
 0x2ef   :  { %1219 = vst.msk [vmem:[%s2113_s4 + $0x10] sm:$0xf] %vm2120_vm8, %v1356_v57  ;;  %vm2121_vm9 = vmmov %vm2118_vm4 }
 0x2f0   :  { %1220 = vst.msk [vmem:[%s2113_s4 + $0x14] sm:$0xf] %vm2121_vm9, %v1357_v1  ;;  %vm2122_vm10 = vmmov %vm2118_vm4 }
 0x2f1   :  { %1221 = vst.msk [vmem:[%s2113_s4 + $0x18] sm:$0xf] %vm2122_vm10, %v1358_v6  ;;  %vm2123_vm11 = vmmov %vm2118_vm4 }
 0x2f2   :  { %1222 = vst.msk [vmem:[%s2113_s4 + $0x1c] sm:$0xf] %vm2123_vm11, %v1359_v5  ;;  %vm2124_vm12 = vmmov %vm2118_vm4 }
 0x2f3   :  { %1223 = vst.msk [vmem:[%s2113_s4 + $0x20] sm:$0xf] %vm2124_vm12, %v1360_v56  ;;  %vm2125_vm13 = vmmov %vm2118_vm4 }
 0x2f4   :  { %1224 = vst.msk [vmem:[%s2113_s4 + $0x24] sm:$0xf] %vm2125_vm13, %v1361_v25  ;;  %vm2126_vm14 = vmmov %vm2118_vm4 }
 0x2f5   :  { %1225 = vst.msk [vmem:[%s2113_s4 + $0x28] sm:$0xf] %vm2126_vm14, %v1362_v8  ;;  %vm2127_vm15 = vmmov %vm2118_vm4 }
 0x2f6   :  { %1226 = vst.msk [vmem:[%s2113_s4 + $0x2c] sm:$0xf] %vm2127_vm15, %v1363_v0  ;;  %vm2128_vm0 = vmmov %vm2118_vm4 }
 0x2f7   :  { %1227 = vst.msk [vmem:[%s2113_s4 + $0x30] sm:$0xf] %vm2128_vm0, %v1364_v59  ;;  %vm2129_vm1 = vmmov %vm2128_vm0 }
 0x2f8   :  { %1228 = vst.msk [vmem:[%s2113_s4 + $0x34] sm:$0xf] %vm2129_vm1, %v1365_v24  ;;  %vm2130_vm2 = vmmov %vm2128_vm0 }
 0x2f9   :  { %1229 = vst.msk [vmem:[%s2113_s4 + $0x38] sm:$0xf] %vm2130_vm2, %v1366_v10  ;;  %vm2131_vm3 = vmmov %vm2128_vm0 }
 0x2fa   :  { %1230 = vst.msk [vmem:[%s2113_s4 + $0x3c] sm:$0xf] %vm2131_vm3, %v1367_v27 }

// kernel: decoder_forward.7
= control target key start
LH: loop header
LB: loop body
LE: loop exit
PB: predicated region body
PF: predicated region fallthrough
CT: control target
= control target key end

     0   :  { %vm657_vm0 = vsmask.f32 7424  ;;  %s5516_s15 = smov 16   ;;  %vm1202_vm1 = vcmask 1046528   ;;  %s5517_s11 = smov 32   ;;  %vm3347_vm2 = vcmask 130048   ;;  %s8973_s0 = inlined_call_operand.vmem [shape: bf16[2,18,18,16], index: 0, kind: input, shape index: {}]   ;;  %s8974_s1 = inlined_call_operand.vmem [shape: bf16[144,128], index: 1, kind: input, shape index: {}]   ;;  %s8975_s2 = inlined_call_operand.vmem [shape: f32[1,128], index: 2, kind: input, shape index: {}]   ;;  %s8976_s3 = inlined_call_operand.vmem [shape: f32[512,128], index: 3, kind: output, shape index: {}]  }
   0x1   :  { %v19_v0 = vld [vmem:[%s8973_s0 + $0x18] sm:$0xf]  ;;  %v5550_v1 = vld [vmem:[%s8973_s0 + $0x1c] sm:$0xf]  ;;  %v15_v4 = vld [vmem:[%s8973_s0] sm:$0xf] }
   0x2   :  { %v5553_v2 = vcombine.low %v19_v0, %v5550_v1  ;;  %v5558_v3 = vld [vmem:[%s8973_s0 + $0x20] ss:$0 sps:$4 sm:$0x11]   ;;  %v5566_v5 = vld [vmem:[%s8973_s0 + $0x4] sm:$0xf]  ;;  %s5518_s25 = smov 48  }
   0x3   :  { %v21_v6 = vld [vmem:[%s8973_s0 + $0x24] sm:$0xf]  ;;  %v690_v9 = vshll.u32 %v5558_v3, 16  ;;  %v5575_v10 = vcombine.low %v15_v4, %v5566_v5  ;;  %v5580_v11 = vld [vmem:[%s8973_s0 + $0x8] ss:$0 sps:$4 sm:$0x11]  }
   0x4   :  { %v683_v7 = vshrl.u32 %v5553_v2, 16  ;;  %v685_v8 = vshll.u32 %v5553_v2, 16  ;;  %v22_v12 = vld [vmem:[%s8973_s0 + $0x28] sm:$0xf]  ;;  %v17_v13 = vld [vmem:[%s8973_s0 + $0xc] sm:$0xf] }
   0x5   :  { %v692_v15 = vrot.slane %v690_v9, 1  ;;  %v659_v16 = vshrl.u32 %v5575_v10, 16  ;;  %v661_v17 = vshll.u32 %v5575_v10, 16  ;;  %v5593_v18 = vld [vmem:[%s8973_s0 + $0x10] sm:$0xf]  ;;  %v666_v19 = vshll.u32 %v5580_v11, 16 }
   0x6   :  { %v687_v14 = vrot.slane %v685_v8, 1  ;;  %v5596_v20 = vcombine.low %v21_v6, %v22_v12  ;;  %v5047_v21 = vld [vmem:[%s8973_s0 + $0x2c] ss:$0 sps:$4 sm:$0x11]   ;;  %v5602_v22 = vcombine.low %v17_v13, %v5593_v18  ;;  %v25_v26 = vld [vmem:[%s8973_s0 + $0x3c] sm:$0xf] }
   0x7   :  { %v663_v24 = vrot.slane %v661_v17, 1  ;;  %v5607_v25 = vld [vmem:[%s8973_s0 + $0x14] ss:$0 sps:$4 sm:$0x11]   ;;  %v668_v27 = vrot.slane %v666_v19, 1  ;;  %v702_v30 = vshll.u32 %v5047_v21, 16 }
   0x8   :  { %v688_v23 = vor.u32 %v687_v14, %v683_v7  ;;  %v695_v28 = vshrl.u32 %v5596_v20, 16  ;;  %v697_v29 = vshll.u32 %v5596_v20, 16  ;;  %v26_v31 = vld [vmem:[%s8973_s0 + $0x40] sm:$0xf]  ;;  %v671_v34 = vshrl.u32 %v5602_v22, 16  ;;  %s5520_s7 = smov 64  }
   0x9   :  { %v664_v33 = vor.u32 %v663_v24, %v659_v16  ;;  %v673_v35 = vshll.u32 %v5602_v22, 16  ;;  %v23_v36 = vld [vmem:[%s8973_s0 + $0x30] sm:$0xf]  ;;  %v704_v38 = vrot.slane %v702_v30, 1  ;;  %v678_v39 = vshll.u32 %v5607_v25, 16  ;;  %s5521_s16 = smov 80  }
   0xa   :  { %v693_v32 = vsel %vm657_vm0, %v688_v23, %v692_v15  ;;  %v699_v37 = vrot.slane %v697_v29, 1  ;;  %v5625_v40 = vcombine.low %v25_v26, %v26_v31  ;;  %v5051_v41 = vld [vmem:[%s8973_s0 + $0x44] ss:$0 sps:$4 sm:$0x11]   ;;  %v24_v44 = vld [vmem:[%s8973_s0 + $0x34] sm:$0xf] }
   0xb   :  { %1046 = vrot.lane.b32.xlu1 %v693_v32, %s5516_s15  ;;  %v669_v42 = vsel %vm657_vm0, %v664_v33, %v668_v27  ;;  %v675_v43 = vrot.slane %v673_v35, 1  ;;  %v680_v46 = vrot.slane %v678_v39, 1  ;;  %v5053_v49 = vld [vmem:[%s8973_s0 + $0x38] ss:$0 sps:$4 sm:$0x11]   ;;  %v726_v51 = vshll.u32 %v5051_v41, 16 }
   0xc   :  { %1042 = vrot.lane.b32.xlu0 %v669_v42, %s5516_s15  ;;  %v700_v45 = vor.u32 %v699_v37, %v695_v28  ;;  %v719_v47 = vshrl.u32 %v5625_v40, 16  ;;  %v721_v48 = vshll.u32 %v5625_v40, 16  ;;  %v5640_v52 = vcombine.low %v23_v36, %v24_v44  ;;  %v29_v53 = vld [vmem:[%s8973_s0 + $0x54] sm:$0xf]  ;;  %v30_v54 = vld [vmem:[%s8973_s0 + $0x58] sm:$0xf] }
   0xd   :  { %v676_v50 = vor.u32 %v675_v43, %v671_v34  ;;  %v714_v57 = vshll.u32 %v5053_v49, 16  ;;  %v5649_v58 = vcombine.low %v29_v53, %v30_v54  ;;  %v27_v59 = vld [vmem:[%s8973_s0 + $0x48] sm:$0xf]  ;;  %v728_v61 = vrot.slane %v726_v51, 1  ;;  %v28_v9 = vld [vmem:[%s8973_s0 + $0x4c] sm:$0xf] }
   0xe   :  { %v705_v55 = vsel %vm657_vm0, %v700_v45, %v704_v38  ;;  %v723_v56 = vrot.slane %v721_v48, 1  ;;  %v707_v62 = vshrl.u32 %v5640_v52, 16  ;;  %v709_v63 = vshll.u32 %v5640_v52, 16  ;;  %v5055_v0 = vld [vmem:[%s8973_s0 + $0x5c] ss:$0 sps:$4 sm:$0x11]  }
   0xf   :  { %8988 = vst [vmem:[#allocation2_spill] sm:$0xff] %v5649_v58  ;;  %1048 = vrot.lane.b32.xlu1 %v705_v55, %s5516_s15  ;;  %v681_v60 = vsel %vm657_vm0, %v676_v50, %v680_v46  ;;  %v716_v6 = vrot.slane %v714_v57, 1  ;;  %v743_v7 = vshrl.u32 %v5649_v58, 16  ;;  %v745_v8 = vshll.u32 %v5649_v58, 16  ;;  %v33_v15 = vld [vmem:[%s8973_s0 + $0x6c] sm:$0xf] }
  0x10   :  { %1044 = vrot.lane.b32.xlu0 %v681_v60, %s5516_s15  ;;  %v724_v4 = vor.u32 %v723_v56, %v719_v47  ;;  %v711_v12 = vrot.slane %v709_v63, 1  ;;  %v750_v13 = vshll.u32 %v5055_v0, 16  ;;  %v5667_v14 = vcombine.low %v27_v59, %v28_v9  ;;  %v5057_v19 = vld [vmem:[%s8973_s0 + $0x50] ss:$0 sps:$4 sm:$0x11]   ;;  %s5522_s21 = smov 96  }
  0x11   :  { %v747_v17 = vrot.slane %v745_v8, 1  ;;  %v34_v21 = vld [vmem:[%s8973_s0 + $0x70] sm:$0xf]  ;;  %v738_v29 = vshll.u32 %v5057_v19, 16  ;;  %v31_v32 = vld [vmem:[%s8973_s0 + $0x60] sm:$0xf] }
  0x12   :  { %8989 = vst [vmem:[#allocation3_spill] sm:$0xff] %v5667_v14  ;;  %v729_v16 = vsel %vm657_vm0, %v724_v4, %v728_v61  ;;  %v712_v23 = vor.u32 %v711_v12, %v707_v62  ;;  %v752_v24 = vrot.slane %v750_v13, 1  ;;  %v731_v26 = vshrl.u32 %v5667_v14, 16  ;;  %v5059_v31 = vld [vmem:[%s8973_s0 + $0x74] ss:$0 sps:$4 sm:$0x11]  }
  0x13   :  { %1052 = vrot.lane.b32.xlu1 %v729_v16, %s5516_s15  ;;  %v733_v27 = vshll.u32 %v5667_v14, 16  ;;  %v748_v28 = vor.u32 %v747_v17, %v743_v7  ;;  %v5682_v30 = vcombine.low %v33_v15, %v34_v21  ;;  %v32_v35 = vld [vmem:[%s8973_s0 + $0x64] sm:$0xf]  ;;  %v740_v37 = vrot.slane %v738_v29, 1  ;;  %v38_v46 = vld [vmem:[%s8973_s0 + $0x88] sm:$0xf] }
  0x14   :  { %v717_v33 = vsel %vm657_vm0, %v712_v23, %v716_v6  ;;  %v5061_v41 = vld [vmem:[%s8973_s0 + $0x68] ss:$0 sps:$4 sm:$0x11]   ;;  %v774_v43 = vshll.u32 %v5059_v31, 16  ;;  %v5702_v44 = vcombine.low %v31_v32, %v32_v35  ;;  %v37_v45 = vld [vmem:[%s8973_s0 + $0x84] sm:$0xf] }
  0x15   :  { %8990 = vst [vmem:[#allocation4_spill] sm:$0xff] %v5682_v30  ;;  %v735_v34 = vrot.slane %v733_v27, 1  ;;  %1050 = vrot.lane.b32.xlu0 %v717_v33, %s5516_s15  ;;  %v753_v36 = vsel %vm657_vm0, %v748_v28, %v752_v24  ;;  %v767_v38 = vshrl.u32 %v5682_v30, 16  ;;  %v769_v39 = vshll.u32 %v5682_v30, 16  ;;  %v35_v50 = vld [vmem:[%s8973_s0 + $0x78] sm:$0xf] }
  0x16   :  { %8991 = vst [vmem:[#allocation5_spill] sm:$0xff] %v5702_v44  ;;  %v762_v48 = vshll.u32 %v5061_v41, 16  ;;  %v5710_v49 = vcombine.low %v37_v45, %v38_v46  ;;  %v776_v53 = vrot.slane %v774_v43, 1  ;;  %v755_v54 = vshrl.u32 %v5702_v44, 16  ;;  %v36_v62 = vld [vmem:[%s8973_s0 + $0x7c] sm:$0xf] }
  0x17   :  { %1056 = vrot.lane.b32.xlu1 %v753_v36, %s5516_s15  ;;  %v736_v42 = vor.u32 %v735_v34, %v731_v26  ;;  %v771_v47 = vrot.slane %v769_v39, 1  ;;  %v757_v55 = vshll.u32 %v5702_v44, 16  ;;  %v5063_v56 = vld [vmem:[%s8973_s0 + $0x8c] ss:$0 sps:$4 sm:$0x11]   ;;  %v5727_v4 = vcombine.low %v35_v50, %v36_v62  ;;  %s5523_s6 = smov 112  }
  0x18   :  { %8992 = vst [vmem:[#allocation6_spill] sm:$0xff] %v5710_v49  ;;  %v764_v59 = vrot.slane %v762_v48, 1  ;;  %v791_v60 = vshrl.u32 %v5710_v49, 16  ;;  %v793_v61 = vshll.u32 %v5710_v49, 16  ;;  %v798_v0 = vshll.u32 %v5063_v56, 16 }
  0x19   :  { %v741_v51 = vsel %vm657_vm0, %v736_v42, %v740_v37  ;;  %v772_v57 = vor.u32 %v771_v47, %v767_v38  ;;  %v759_v63 = vrot.slane %v757_v55, 1  ;;  %8993 = vst [vmem:[#allocation7_spill] sm:$0xff] %v5727_v4  ;;  %v41_v6 = vld [vmem:[%s8973_s0 + $0x9c] sm:$0xf]  ;;  %v42_v12 = vld [vmem:[%s8973_s0 + $0xa0] sm:$0xf] }
  0x1a   :  { %1054 = vrot.lane.b32.xlu0 %v741_v51, %s5516_s15  ;;  %v795_v8 = vrot.slane %v793_v61, 1  ;;  %v5065_v9 = vld [vmem:[%s8973_s0 + $0x80] ss:$0 sps:$4 sm:$0x11]   ;;  %v800_v15 = vrot.slane %v798_v0, 1  ;;  %v779_v16 = vshrl.u32 %v5727_v4, 16  ;;  %v5742_v23 = vcombine.low %v41_v6, %v42_v12 }
  0x1b   :  { %v777_v7 = vsel %vm657_vm0, %v772_v57, %v776_v53  ;;  %v760_v13 = vor.u32 %v759_v63, %v755_v54  ;;  %v781_v17 = vshll.u32 %v5727_v4, 16  ;;  %v786_v21 = vshll.u32 %v5065_v9, 16  ;;  %v5067_v24 = vld [vmem:[%s8973_s0 + $0xa4] ss:$0 sps:$4 sm:$0x11]  }
  0x1c   :  { %1060 = vrot.lane.b32.xlu1 %v777_v7, %s5516_s15  ;;  %v796_v19 = vor.u32 %v795_v8, %v791_v60  ;;  %8994 = vst [vmem:[#allocation8_spill] sm:$0xff] %v5742_v23  ;;  %v39_v26 = vld [vmem:[%s8973_s0 + $0x90] sm:$0xf]  ;;  %v40_v29 = vld [vmem:[%s8973_s0 + $0x94] sm:$0xf]  ;;  %v815_v33 = vshrl.u32 %v5742_v23, 16 }
  0x1d   :  { %v765_v27 = vsel %vm657_vm0, %v760_v13, %v764_v59  ;;  %v783_v28 = vrot.slane %v781_v17, 1  ;;  %v788_v32 = vrot.slane %v786_v21, 1  ;;  %v817_v34 = vshll.u32 %v5742_v23, 16  ;;  %v5069_v35 = vld [vmem:[%s8973_s0 + $0x98] ss:$0 sps:$4 sm:$0x11]  }
  0x1e   :  { %1058 = vrot.lane.b32.xlu0 %v765_v27, %s5516_s15  ;;  %v801_v31 = vsel %vm657_vm0, %v796_v19, %v800_v15  ;;  %v822_v37 = vshll.u32 %v5067_v24, 16  ;;  %v5762_v38 = vcombine.low %v39_v26, %v40_v29  ;;  %v45_v39 = vld [vmem:[%s8973_s0 + $0xb4] sm:$0xf]  ;;  %v46_v41 = vld [vmem:[%s8973_s0 + $0xb8] sm:$0xf]  ;;  %v810_v43 = vshll.u32 %v5069_v35, 16 }
  0x1f   :  { %v784_v36 = vor.u32 %v783_v28, %v779_v16  ;;  %v819_v42 = vrot.slane %v817_v34, 1  ;;  %v5770_v45 = vcombine.low %v45_v39, %v46_v41  ;;  %v43_v46 = vld [vmem:[%s8973_s0 + $0xa8] sm:$0xf]  ;;  %v5071_v53 = vld [vmem:[%s8973_s0 + $0xbc] ss:$0 sps:$4 sm:$0x11]  }
  0x20   :  { %1064 = vrot.lane.b32.xlu1 %v801_v31, %s5516_s15  ;;  %8995 = vst [vmem:[#allocation9_spill] sm:$0xff] %v5762_v38  ;;  %v824_v48 = vrot.slane %v822_v37, 1  ;;  %v803_v50 = vshrl.u32 %v5762_v38, 16  ;;  %v805_v51 = vshll.u32 %v5762_v38, 16  ;;  %v812_v55 = vrot.slane %v810_v43, 1 }
  0x21   :  { %8996 = vst [vmem:[#allocation10_spill] sm:$0xff] %v5770_v45  ;;  %v789_v47 = vsel %vm657_vm0, %v784_v36, %v788_v32  ;;  %v820_v54 = vor.u32 %v819_v42, %v815_v33  ;;  %v839_v56 = vshrl.u32 %v5770_v45, 16  ;;  %v841_v57 = vshll.u32 %v5770_v45, 16  ;;  %v44_v59 = vld [vmem:[%s8973_s0 + $0xac] sm:$0xf] }
  0x22   :  { %1062 = vrot.lane.b32.xlu0 %v789_v47, %s5516_s15  ;;  %v807_v60 = vrot.slane %v805_v51, 1  ;;  %v846_v61 = vshll.u32 %v5071_v53, 16  ;;  %v5787_v62 = vcombine.low %v43_v46, %v44_v59  ;;  %v49_v63 = vld [vmem:[%s8973_s0 + $0xe4] sm:$0xf]  ;;  %v5799_v8 = vld [vmem:[%s8973_s0 + $0xe8] sm:$0xf] }
  0x23   :  { %v825_v0 = vsel %vm657_vm0, %v820_v54, %v824_v48  ;;  %v843_v6 = vrot.slane %v841_v57, 1  ;;  %v5073_v7 = vld [vmem:[%s8973_s0 + $0xb0] ss:$0 sps:$4 sm:$0x11]   ;;  %v5805_v19 = vcombine.low %v49_v63, %v5799_v8  ;;  %v47_v24 = vld [vmem:[%s8973_s0 + $0xd8] sm:$0xf] }
  0x24   :  { %8997 = vst [vmem:[#allocation11_spill] sm:$0xff] %v5787_v62  ;;  %1068 = vrot.lane.b32.xlu1 %v825_v0, %s5516_s15  ;;  %v808_v9 = vor.u32 %v807_v60, %v803_v50  ;;  %v848_v12 = vrot.slane %v846_v61, 1  ;;  %v827_v13 = vshrl.u32 %v5787_v62, 16  ;;  %v829_v15 = vshll.u32 %v5787_v62, 16  ;;  %v48_v28 = vld [vmem:[%s8973_s0 + $0xdc] sm:$0xf] }
  0x25   :  { %v844_v16 = vor.u32 %v843_v6, %v839_v56  ;;  %v834_v17 = vshll.u32 %v5073_v7, 16  ;;  %v5810_v21 = vld [vmem:[%s8973_s0 + $0xec] ss:$0 sps:$4 sm:$0x11]   ;;  %v863_v32 = vshrl.u32 %v5805_v19, 16  ;;  %v865_v33 = vshll.u32 %v5805_v19, 16 }
  0x26   :  { %v813_v26 = vsel %vm657_vm0, %v808_v9, %v812_v55  ;;  %v831_v27 = vrot.slane %v829_v15, 1  ;;  %v5826_v34 = vld [vmem:[%s8973_s0 + $0xe0] ss:$0 sps:$4 sm:$0x11]   ;;  %v870_v36 = vshll.u32 %v5810_v21, 16  ;;  %v5830_v37 = vcombine.low %v47_v24, %v48_v28 }
  0x27   :  { %1066 = vrot.lane.b32.xlu0 %v813_v26, %s5516_s15  ;;  %v849_v29 = vsel %vm657_vm0, %v844_v16, %v848_v12  ;;  %v836_v31 = vrot.slane %v834_v17, 1  ;;  %v111_v39 = vld [vmem:[%s8973_s0] sm:$0xe]  ;;  %v1204_v41 = vrot.slane %v5580_v11, 1  ;;  %v51_v42 = vld [vmem:[%s8973_s0 + $0xf0] sm:$0xf] }
  0x28   :  { %1072 = vrot.lane.b32.xlu1 %v849_v29, %s5516_s15  ;;  %v832_v35 = vor.u32 %v831_v27, %v827_v13  ;;  %v867_v43 = vrot.slane %v865_v33, 1  ;;  %v858_v46 = vshll.u32 %v5826_v34, 16  ;;  %v4750_v47 = vcombine.low %v111_v39, %v5566_v5  ;;  %v5844_v48 = vld [vmem:[%s8973_s0 + $0xf4] sm:$0xf]  ;;  %v4430_v57 = vld [vmem:[%s8973_s0 + $0xc] sm:$0xf] }
  0x29   :  { %v872_v51 = vrot.slane %v870_v36, 1  ;;  %v851_v53 = vshrl.u32 %v5830_v37, 16  ;;  %v853_v11 = vshll.u32 %v5830_v37, 16  ;;  %v5852_v54 = vld [vmem:[%s8973_s0 + $0xf8] ss:$0 sps:$4 sm:$0x11]   ;;  %v5856_v56 = vcombine.low %v51_v42, %v5844_v48 }
  0x2a   :  { %v837_v50 = vsel %vm657_vm0, %v832_v35, %v836_v31  ;;  %v868_v5 = vor.u32 %v867_v43, %v863_v32  ;;  %v1203_v55 = vrot.slane %v4750_v47, 1  ;;  %v4431_v59 = vld [vmem:[%s8973_s0 + $0x10] sm:$0xf]  ;;  %v860_v61 = vrot.slane %v858_v46, 1  ;;  %v127_v6 = vld [vmem:[%s8973_s0 + $0xd8] sm:$0xe] }
  0x2b   :  { %1070 = vrot.lane.b32.xlu0 %v837_v50, %s5516_s15  ;;  %v855_v60 = vrot.slane %v853_v11, 1  ;;  %v882_v63 = vshll.u32 %v5852_v54, 16  ;;  %v4782_v0 = vcombine.low %v4430_v57, %v4431_v59  ;;  %v875_v9 = vshrl.u32 %v5856_v56, 16  ;;  %v4462_v13 = vld [vmem:[%s8973_s0 + $0xe4] sm:$0xf] }
  0x2c   :  { %v873_v7 = vsel %vm657_vm0, %v868_v5, %v872_v51  ;;  %v877_v12 = vshll.u32 %v5856_v56, 16  ;;  %v1205_v16 = vsel %vm1202_vm1, %v1203_v55, %v1204_v41  ;;  %v4526_v17 = vld [vmem:[%s8973_s0 + $0xc] sm:$0xe]  ;;  %v5084_v26 = vld [vmem:[%s8973_s0 + $0x14] ss:$0 sps:$4 sm:$0x11]   ;;  %v4766_v31 = vcombine.low %v127_v6, %v48_v28 }
  0x2d   :  { %1076 = vrot.lane.b32.xlu1 %v873_v7, %s5516_s15  ;;  %v856_v15 = vor.u32 %v855_v60, %v851_v53  ;;  %v1686_v24 = vshll.u32 %v4782_v0, 16  ;;  %v884_v29 = vrot.slane %v882_v63, 1  ;;  %v1684_v32 = vshrl.u32 %v4782_v0, 16  ;;  %v5885_v33 = vld [vmem:[%s8973_s0 + $0xe8] sm:$0xf]  ;;  %v5139_v60 = vld [vmem:[%s8974_s1] sm:$0xff]  }
  0x2e   :  { %v879_v27 = vrot.slane %v877_v12, 1  ;;  %v1691_v39 = vshll.u32 %v5084_v26, 16  ;;  %v4798_v41 = vcombine.low %v4462_v13, %v5885_v33  ;;  %v4846_v43 = vcombine.low %v4526_v17, %v4431_v59  ;;  %v5895_v50 = vld [vmem:[%s8973_s0 + $0xec] ss:$0 sps:$4 sm:$0x11]  }
  0x2f   :  { %v861_v35 = vsel %vm657_vm0, %v856_v15, %v860_v61  ;;  %v1688_v36 = vrot.slane %v1686_v24, 1  ;;  %v1251_v46 = vrot.slane %v4766_v31, 1  ;;  %v1252_v47 = vrot.slane %v5826_v34, 1  ;;  %v4558_v51 = vld [vmem:[%s8973_s0 + $0x18] sm:$0xf]  ;;  %v5143_v31 = vld [vmem:[%s8974_s1 + $0x8] sm:$0xff]  }
  0x30   :  { %1074 = vrot.lane.b32.xlu0 %v861_v35, %s5516_s15  ;;  %v880_v42 = vor.u32 %v879_v27, %v875_v9  ;;  %v1878_v28 = vshll.u32 %v4798_v41, 16  ;;  %v1693_v5 = vrot.slane %v1691_v39, 1  ;;  %v5904_v34 = vld [vmem:[%s8973_s0 + $0x1c] sm:$0xf]  ;;  %v4542_v55 = vld [vmem:[%s8973_s0 + $0xe4] sm:$0xe] }
  0x31   :  { %1299 = vrot.lane.b32.xlu1 %v1205_v16, %s5517_s11  ;;  %v1689_v11 = vor.u32 %v1688_v36, %v1684_v32  ;;  %v4878_v57 = vcombine.low %v4558_v51, %v5904_v34  ;;  %v1207_v59 = vrot.slane %v5607_v25, 1  ;;  %v2227_v61 = vrot.slane %v4846_v43, 1  ;;  %v5918_v7 = vld [vmem:[%s8973_s0 + $0x20] ss:$0 sps:$4 sm:$0x11]  }
  0x32   :  { %v885_v53 = vsel %vm657_vm0, %v880_v42, %v884_v29  ;;  %v2228_v63 = vrot.slane %v5084_v26, 1  ;;  %v1876_v6 = vshrl.u32 %v4798_v41, 16  ;;  %v1253_v9 = vsel %vm1202_vm1, %v1251_v46, %v1252_v47  ;;  %v4590_v13 = vld [vmem:[%s8973_s0 + $0xf0] sm:$0xf]  ;;  %v112_v15 = vld [vmem:[%s8973_s0 + $0xc] sm:$0xe] }
  0x33   :  { %v1880_v25 = vrot.slane %v1878_v28, 1  ;;  %v1883_v12 = vshll.u32 %v5895_v50, 16  ;;  %v1694_v16 = vsel %vm657_vm0, %v1689_v11, %v1693_v5  ;;  %v2710_v17 = vshll.u32 %v4878_v57, 16  ;;  %v4432_v46 = vld [vmem:[%s8973_s0 + $0x18] sm:$0xf]  ;;  %v5147_v28 = vld [vmem:[%s8974_s1 + $0x10] sm:$0xff]  }
  0x34   :  { %1078 = vrot.lane.b32.xlu0 %v885_v53, %s5516_s15  ;;  %v4751_v24 = vcombine.low %v112_v15, %v5593_v18  ;;  %v5519_v26 = vmov 0   ;;  %v4862_v27 = vcombine.low %v4542_v55, %v5885_v33  ;;  %v2229_v18 = vsel %vm1202_vm1, %v2227_v61, %v2228_v63  ;;  %v5955_v47 = vld [vmem:[%s8973_s0 + $0x1c] sm:$0xf]  ;;  %v5968_v55 = vld [vmem:[%s8973_s0 + $0xf8] ss:$0 sps:$4 sm:$0x11]  }
  0x35   :  { %1523 = vrot.lane.b32.xlu1 %v4782_v0, %s5518_s25  ;;  %v5933_v0 = vld [vmem:[%s8973_s0 + $0xf4] sm:$0xf]  ;;  %4009 = vmatprep.subr.bf16.mxu0 %v5519_v26  ;;  %v1881_v32 = vor.u32 %v1880_v25, %v1876_v6  ;;  %v1885_v35 = vrot.slane %v1883_v12, 1  ;;  %v2708_v39 = vshrl.u32 %v4878_v57, 16  ;;  %v2712_v42 = vrot.slane %v2710_v17, 1 }
  0x36   :  { %5016 = vmatprep.subr.bf16.mxu1 %v5519_v26  ;;  %v1206_v29 = vrot.slane %v4751_v24, 1  ;;  %4010 = vmatpush1.bf16.msra.mxu0 %v5139_v60  ;;  %v4894_v36 = vcombine.low %v4590_v13, %v5933_v0  ;;  %v2715_v33 = vshll.u32 %v5918_v7, 16  ;;  %v2275_v53 = vrot.slane %v4862_v27, 1  ;;  %v128_v25 = vld [vmem:[%s8973_s0 + $0xe4] sm:$0xe] }
  0x37   :  { %4011 = vmatprep.subr.bf16.mxu0 %v5519_v26  ;;  %5025 = vmatpush1.bf16.msra.mxu1 %v5139_v60  ;;  %v1886_v51 = vsel %vm657_vm0, %v1881_v32, %v1885_v35  ;;  %v2276_v11 = vrot.slane %v5895_v50, 1  ;;  %v4783_v60 = vcombine.low %v4432_v46, %v5955_v47  ;;  %v5149_v50 = vld [vmem:[%s8974_s1 + $0x18] sm:$0xff]   ;;  %v4464_v12 = vld [vmem:[%s8973_s0 + $0xf0] sm:$0xf]  ;;  %v4767_v17 = vcombine.low %v128_v25, %v5799_v8  ;;  %v5152_v24 = vld [vmem:[%s8974_s1 + $0x20] sm:$0xff]  }
  0x38   :  { %1331 = vrot.lane.b32.xlu0 %v1253_v9, %s5517_s11  ;;  %v1208_v43 = vsel %vm1202_vm1, %v1206_v29, %v1207_v59  ;;  %5017 = vmatprep.subr.bf16.mxu1 %v5519_v26  ;;  %v2902_v5 = vshll.u32 %v4894_v36, 16  ;;  %v2717_v59 = vrot.slane %v2715_v33, 1  ;;  %v2900_v61 = vshrl.u32 %v4894_v36, 16  ;;  %v4592_v25 = vld [vmem:[%s8973_s0 + $0xfc] sm:$0xf] }
  0x39   :  { %2067 = vrot.lane.b32.xlu1 %v1694_v16, %s5520_s7  ;;  %v2277_v63 = vsel %vm1202_vm1, %v2275_v53, %v2276_v11  ;;  %v2907_v9 = vshll.u32 %v5968_v55, 16  ;;  %v1698_v15 = vshll.u32 %v4783_v60, 16  ;;  %v5996_v16 = vld [vmem:[%s8973_s0 + $0xf4] sm:$0xf]  ;;  %v1696_v32 = vshrl.u32 %v4783_v60, 16 }
  0x3a   :  { %4012 = vmatpush1.bf16.msra.mxu0 %v5143_v31  ;;  %v2904_v6 = vrot.slane %v2902_v5, 1  ;;  %v1254_v46 = vrot.slane %v4767_v17, 1  ;;  %v6031_v5 = vld [vmem:[%s8973_s0 + $0xf8] ss:$0 sps:$4 sm:$0x11]   ;;  %vm3412_vm3 = vcmask 261120  }
  0x3b   :  { %4013 = vmatprep.subr.bf16.mxu0 %v5519_v26  ;;  %5026 = vmatpush1.bf16.msra.mxu1 %v5143_v31  ;;  %v2909_v29 = vrot.slane %v2907_v9, 1  ;;  %v4527_v31 = vld [vmem:[%s8973_s0 + $0x18] sm:$0xe]  ;;  %v1700_v8 = vrot.slane %v1698_v15, 1  ;;  %v1895_v9 = vshll.u32 %v6031_v5, 16  ;;  %vm3477_vm4 = vcmask 392192  }
  0x3c   :  { %1555 = vrot.lane.b32.xlu0 %v4798_v41, %s5518_s25  ;;  %v2713_v41 = vor.u32 %v2712_v42, %v2708_v39  ;;  %5018 = vmatprep.subr.bf16.mxu1 %v5519_v26  ;;  %v2905_v27 = vor.u32 %v2904_v6, %v2900_v61  ;;  %v4560_v39 = vld [vmem:[%s8973_s0 + $0x24] sm:$0xf]  ;;  %v6017_v42 = vld [vmem:[%s8973_s0 + $0x28] sm:$0xf]  ;;  %v4847_v33 = vcombine.low %v4527_v31, %v5955_v47  ;;  %vm3542_vm5 = vcmask 523264  }
  0x3d   :  { %2323 = vrot.lane.b32.xlu1 %v2229_v18, %s5521_s16  ;;  %v4799_v18 = vcombine.low %v4464_v12, %v5996_v16  ;;  %v6055_v15 = vld [vmem:[%s8973_s0 + $0x2c] ss:$0 sps:$4 sm:$0x11]   ;;  %vm3607_vm6 = vcmask 654336   ;;  %vm3672_vm7 = vcmask 785408   ;;  %vm3737_vm8 = vcmask 916480  }
  0x3e   :  { %4014 = vmatpush1.bf16.msra.mxu0 %v5147_v28  ;;  %v2718_v13 = vsel %vm657_vm0, %v2713_v41, %v2717_v59  ;;  %v2910_v53 = vsel %vm657_vm0, %v2905_v27, %v2909_v29  ;;  %v2230_v41 = vrot.slane %v4847_v33, 1  ;;  %v1897_v27 = vrot.slane %v1895_v9, 1  ;;  %v6082_v33 = vld [vmem:[%s8973_s0 + $0x28] sm:$0xf] }
  0x3f   :  { %4015 = vmatprep.subr.bf16.mxu0 %v5519_v26  ;;  %5027 = vmatpush1.bf16.msra.mxu1 %v5147_v28  ;;  %v1255_v28 = vrot.slane %v5810_v21, 1  ;;  %v1890_v11 = vshll.u32 %v4799_v18, 16  ;;  %v4879_v21 = vcombine.low %v4560_v39, %v6017_v42  ;;  %v1888_v61 = vshrl.u32 %v4799_v18, 16  ;;  %v113_v39 = vld [vmem:[%s8973_s0 + $0x18] sm:$0xe] }
  0x40   :  { %2099 = vrot.lane.b32.xlu0 %v1886_v51, %s5520_s7  ;;  %5019 = vmatprep.subr.bf16.mxu1 %v5519_v26  ;;  %v5156_v51 = vld [vmem:[%s8974_s1 + $0x28] sm:$0xff]  }
  0x41   :  { %2547 = vrot.lane.b32.xlu1 %v4878_v57, %s5522_s21  ;;  %v5991_v57 = vld [vmem:[%s8973_s0 + $0x20] ss:$0 sps:$4 sm:$0x11]   ;;  %v1892_v6 = vrot.slane %v1890_v11, 1  ;;  %v2279_v11 = vrot.slane %v6031_v5, 1 }
  0x42   :  { %4016 = vmatpush1.bf16.msra.mxu0 %v5149_v50  ;;  %v1703_v35 = vshll.u32 %v5991_v57, 16  ;;  %v2231_v59 = vrot.slane %v5991_v57, 1  ;;  %v5163_v57 = vld [vmem:[%s8974_s1 + $0x38] sm:$0xff]   ;;  %v129_v5 = vld [vmem:[%s8973_s0 + $0xf0] sm:$0xe] }
  0x43   :  { %4017 = vmatprep.subr.bf16.mxu0 %v5519_v26  ;;  %5028 = vmatpush1.bf16.msra.mxu1 %v5149_v50  ;;  %v5160_v50 = vld [vmem:[%s8974_s1 + $0x30] sm:$0xff]  }
  0x44   :  { %2355 = vrot.lane.b32.xlu0 %v2277_v63, %s5521_s16  ;;  %5020 = vmatprep.subr.bf16.mxu1 %v5519_v26  ;;  %v1705_v47 = vrot.slane %v1703_v35, 1  ;;  %v1256_v63 = vsel %vm1202_vm1, %v1254_v46, %v1255_v28  ;;  %v2232_v31 = vsel %vm1202_vm1, %v2230_v41, %v2231_v59  ;;  %v2727_v35 = vshll.u32 %v6055_v15, 16  ;;  %v6089_v46 = vld [vmem:[%s8973_s0 + $0x104] ss:$0 sps:$4 sm:$0x11]  }
  0x45   :  { %3091 = vrot.lane.b32.xlu1 %v2718_v13, %s5523_s6  ;;  %v2722_v13 = vshll.u32 %v4879_v21, 16  ;;  %v5168_v28 = vld [vmem:[%s8974_s1 + $0x40] sm:$0xff]   ;;  %v1210_v59 = vrot.slane %v5558_v3, 1  ;;  %v5110_v3 = vld [vmem:[%s8973_s0 + $0x2c] ss:$0 sps:$4 sm:$0x11]  }
  0x46   :  { %4018 = vmatpush1.bf16.msra.mxu0 %v5152_v24 }
  0x47   :  { %4019 = vmatprep.subr.bf16.mxu0 %v5519_v26  ;;  %5029 = vmatpush1.bf16.msra.mxu1 %v5152_v24  ;;  %v1893_v24 = vor.u32 %v1892_v6, %v1888_v61 }
  0x48   :  { %2579 = vrot.lane.b32.xlu0 %v4894_v36, %s5522_s21  ;;  %v1701_v36 = vor.u32 %v1700_v8, %v1696_v32  ;;  %5021 = vmatprep.subr.bf16.mxu1 %v5519_v26  ;;  %v2720_v32 = vshrl.u32 %v4879_v21, 16  ;;  %v2724_v8 = vrot.slane %v2722_v13, 1 }
  0x49   :  { %1301 = vrot.lane.b32.xlu1 %v1208_v43, %s5517_s11  ;;  %v4543_v43 = vld [vmem:[%s8973_s0 + $0xf0] sm:$0xe] }
  0x4a   :  { %4020 = vmatpush1.bf16.msra.mxu0 %v5156_v51  ;;  %v1706_v12 = vsel %vm657_vm0, %v1701_v36, %v1705_v47  ;;  %v4863_v17 = vcombine.low %v4543_v43, %v5996_v16  ;;  %v4434_v16 = vld [vmem:[%s8973_s0 + $0x24] sm:$0xf]  ;;  %v2729_v47 = vrot.slane %v2727_v35, 1  ;;  %v4752_v43 = vcombine.low %v113_v39, %v5550_v1  ;;  %v6129_v35 = vld [vmem:[%s8973_s0 + $0x34] sm:$0xf] }
  0x4b   :  { %4021 = vmatprep.subr.bf16.mxu0 %v5519_v26  ;;  %5030 = vmatpush1.bf16.msra.mxu1 %v5156_v51  ;;  %v1898_v51 = vsel %vm657_vm0, %v1893_v24, %v1897_v27  ;;  %v4784_v41 = vcombine.low %v4434_v16, %v6082_v33  ;;  %v1258_v39 = vrot.slane %v5852_v54, 1  ;;  %v5113_v16 = vld [vmem:[%s8973_s0 + $0x104] ss:$0 sps:$4 sm:$0x11]   ;;  %v4544_v54 = vld [vmem:[%s8973_s0 + $0xfc] sm:$0xe] }
  0x4c   :  { %3123 = vrot.lane.b32.xlu0 %v2910_v53, %s5523_s6  ;;  %5022 = vmatprep.subr.bf16.mxu1 %v5519_v26  ;;  %v2278_v53 = vrot.slane %v4863_v17, 1  ;;  %v1209_v6 = vrot.slane %v4752_v43, 1  ;;  %v53_v43 = vld [vmem:[%s8973_s0 + $0xfc] sm:$0xf] }
  0x4d   :  { %1525 = vrot.lane.b32.xlu1 %v4783_v60, %s5518_s25  ;;  %v6060_v60 = vld [vmem:[%s8973_s0 + $0x100] sm:$0xf]  ;;  %v1710_v9 = vshll.u32 %v4784_v41, 16  ;;  %v1708_v17 = vshrl.u32 %v4784_v41, 16 }
  0x4e   :  { %4022 = vmatpush1.bf16.msra.mxu0 %v5160_v50  ;;  %v4895_v29 = vcombine.low %v4592_v25, %v6060_v60  ;;  %v2280_v1 = vsel %vm1202_vm1, %v2278_v53, %v2279_v11  ;;  %v4466_v25 = vld [vmem:[%s8973_s0 + $0xfc] sm:$0xf]  ;;  %v1211_v27 = vsel %vm1202_vm1, %v1209_v6, %v1210_v59  ;;  %v6157_v59 = vld [vmem:[%s8973_s0 + $0x100] sm:$0xf] }
  0x4f   :  { %4023 = vmatprep.subr.bf16.mxu0 %v5519_v26  ;;  %5031 = vmatpush1.bf16.msra.mxu1 %v5160_v50  ;;  %v2919_v50 = vshll.u32 %v6089_v46, 16 }
  0x50   :  { %1333 = vrot.lane.b32.xlu0 %v1256_v63, %s5517_s11  ;;  %5023 = vmatprep.subr.bf16.mxu1 %v5519_v26  ;;  %v2914_v36 = vshll.u32 %v4895_v29, 16  ;;  %v2912_v61 = vshrl.u32 %v4895_v29, 16 }
  0x51   :  { %2069 = vrot.lane.b32.xlu1 %v1706_v12, %s5520_s7  ;;  %v4467_v12 = vld [vmem:[%s8973_s0 + $0x100] sm:$0xf] }
  0x52   :  { %4024 = vmatpush1.bf16.msra.mxu0 %v5163_v57  ;;  %v2916_v63 = vrot.slane %v2914_v36, 1  ;;  %v4800_v24 = vcombine.low %v4466_v25, %v4467_v12  ;;  %v2234_v25 = vrot.slane %v5110_v3, 1 }
  0x53   :  { %4025 = vmatprep.subr.bf16.mxu0 %v5519_v26  ;;  %5032 = vmatpush1.bf16.msra.mxu1 %v5163_v57  ;;  %v2921_v57 = vrot.slane %v2919_v50, 1  ;;  %v4594_v50 = vld [vmem:[%s8973_s0 + $0x108] sm:$0xf] }
  0x54   :  { %1557 = vrot.lane.b32.xlu0 %v4799_v18, %s5518_s25  ;;  %v2725_v18 = vor.u32 %v2724_v8, %v2720_v32  ;;  %5024 = vmatprep.subr.bf16.mxu1 %v5519_v26  ;;  %v2917_v13 = vor.u32 %v2916_v63, %v2912_v61  ;;  %v1715_v32 = vshll.u32 %v5110_v3, 16  ;;  %v4562_v8 = vld [vmem:[%s8973_s0 + $0x30] sm:$0xf]  ;;  %v1902_v53 = vshll.u32 %v4800_v24, 16 }
  0x55   :  { %2325 = vrot.lane.b32.xlu1 %v2232_v31, %s5521_s16  ;;  %v1712_v31 = vrot.slane %v1710_v9, 1  ;;  %v4880_v11 = vcombine.low %v4562_v8, %v6129_v35  ;;  %v1907_v61 = vshll.u32 %v5113_v16, 16  ;;  %v6182_v3 = vld [vmem:[%s8973_s0 + $0x104] ss:$0 sps:$4 sm:$0x11]  }
  0x56   :  { %4026 = vmatpush1.bf16.msra.mxu0 %v5168_v28  ;;  %v2730_v26 = vsel %vm657_vm0, %v2725_v18, %v2729_v47  ;;  %v1717_v47 = vrot.slane %v1715_v32, 1 }
  0x57   :  { %5033 = vmatpush1.bf16.msra.mxu1 %v5168_v28  ;;  %v2922_v28 = vsel %vm657_vm0, %v2917_v13, %v2921_v57  ;;  %v1713_v18 = vor.u32 %v1712_v31, %v1708_v17  ;;  %v2734_v63 = vshll.u32 %v4880_v11, 16  ;;  %v4864_v13 = vcombine.low %v4544_v54, %v4467_v12 }
  0x58   :  { %2101 = vrot.lane.b32.xlu0 %v1898_v51, %s5520_s7 }
  0x59   :  { %2549 = vrot.lane.b32.xlu1 %v4879_v21, %s5522_s21  ;;  %v4768_v21 = vcombine.low %v129_v5, %v5844_v48  ;;  %v4528_v48 = vld [vmem:[%s8973_s0 + $0x24] sm:$0xe]  ;;  %v1718_v6 = vsel %vm657_vm0, %v1713_v18, %v1717_v47  ;;  %v2736_v31 = vrot.slane %v2734_v63, 1 }
  0x5a   :  { %v4848_v36 = vcombine.low %v4528_v48, %v6082_v33  ;;  %v1900_v33 = vshrl.u32 %v4800_v24, 16  ;;  %v2281_v48 = vrot.slane %v4864_v13, 1 }
  0x5b   :  { %v1257_v51 = vrot.slane %v4768_v21, 1  ;;  %v6172_v21 = vcombine.low %v53_v43, %v6157_v59 }
  0x5c   :  { %2357 = vrot.lane.b32.xlu0 %v2280_v1, %s5521_s16  ;;  %v1904_v1 = vrot.slane %v1902_v53, 1  ;;  %v2233_v9 = vrot.slane %v4848_v36, 1  ;;  %v4655_v53 = vld [vmem:[%s8973_s0 + $0x24] sm:$0xe] }
  0x5d   :  { %3093 = vrot.lane.b32.xlu1 %v2730_v26, %s5523_s6  ;;  %v1259_v5 = vsel %vm1202_vm1, %v1257_v51, %v1258_v39  ;;  %v6168_v26 = vld [vmem:[%s8973_s0 + $0x10c] sm:$0xf]  ;;  %v889_v12 = vshll.u32 %v6172_v21, 16  ;;  %v6188_v39 = vld [vmem:[%s8973_s0 + $0x110] ss:$0 sps:$4 sm:$0x11]  }
  0x5e   :  { %v4896_v57 = vcombine.low %v4594_v50, %v6168_v26  ;;  %v1905_v17 = vor.u32 %v1904_v1, %v1900_v33  ;;  %v2235_v8 = vsel %vm1202_vm1, %v2233_v9, %v2234_v25  ;;  %v887_v54 = vshrl.u32 %v6172_v21, 16  ;;  %v114_v25 = vld [vmem:[%s8973_s0 + $0x24] sm:$0xe] }
  0x5f   :  { %v891_v43 = vrot.slane %v889_v12, 1  ;;  %v894_v33 = vshll.u32 %v6182_v3, 16  ;;  %v4943_v50 = vcombine.low %v4655_v53, %v6017_v42  ;;  %v2931_v63 = vshll.u32 %v6188_v39, 16  ;;  %v6243_v53 = vld [vmem:[%s8973_s0 + $0x110] ss:$0 sps:$4 sm:$0x11]  }
  0x60   :  { %2581 = vrot.lane.b32.xlu0 %v4895_v29, %s5522_s21  ;;  %v6149_v29 = vld [vmem:[%s8973_s0 + $0x38] ss:$0 sps:$4 sm:$0x11]   ;;  %v2926_v51 = vshll.u32 %v4896_v57, 16 }
  0x61   :  { %1303 = vrot.lane.b32.xlu1 %v1211_v27, %s5517_s11  ;;  %v2732_v27 = vshrl.u32 %v4880_v11, 16  ;;  %v2739_v32 = vshll.u32 %v6149_v29, 16  ;;  %v892_v13 = vor.u32 %v891_v43, %v887_v54  ;;  %v3255_v43 = vrot.slane %v6055_v15, 1 }
  0x62   :  { %v2928_v1 = vrot.slane %v2926_v51, 1 }
  0x63   :  { %v2737_v18 = vor.u32 %v2736_v31, %v2732_v27  ;;  %v2741_v47 = vrot.slane %v2739_v32, 1  ;;  %v4436_v27 = vld [vmem:[%s8973_s0 + $0x30] sm:$0xf]  ;;  %v3254_v31 = vrot.slane %v4943_v50, 1  ;;  %v4671_v32 = vld [vmem:[%s8973_s0 + $0xfc] sm:$0xe] }
  0x64   :  { %3125 = vrot.lane.b32.xlu0 %v2922_v28, %s5523_s6  ;;  %v2282_v28 = vrot.slane %v5113_v16, 1  ;;  %v4468_v16 = vld [vmem:[%s8973_s0 + $0x108] sm:$0xf] }
  0x65   :  { %1527 = vrot.lane.b32.xlu1 %v4784_v41, %s5518_s25  ;;  %v1909_v41 = vrot.slane %v1907_v61, 1  ;;  %v6207_v61 = vld [vmem:[%s8973_s0 + $0x10c] sm:$0xf]  ;;  %v2742_v9 = vsel %vm657_vm0, %v2737_v18, %v2741_v47  ;;  %v4545_v50 = vld [vmem:[%s8973_s0 + $0x108] sm:$0xe] }
  0x66   :  { %v5468_v47 = vld [vmem:[%s8973_s0 + $0x2c] ss:$0 sps:$4 sm:$0x11]  }
  0x67   :  { %v1910_v36 = vsel %vm657_vm0, %v1905_v17, %v1909_v41  ;;  %v896_v41 = vrot.slane %v894_v33, 1  ;;  %v4801_v17 = vcombine.low %v4468_v16, %v6207_v61  ;;  %v1213_v54 = vrot.slane %v5468_v47, 1  ;;  %v4564_v47 = vld [vmem:[%s8973_s0 + $0x3c] sm:$0xf] }
  0x68   :  { %1335 = vrot.lane.b32.xlu0 %v1259_v5, %s5517_s11  ;;  %v2924_v5 = vshrl.u32 %v4896_v57, 16  ;;  %v4959_v33 = vcombine.low %v4671_v32, %v6060_v60 }
  0x69   :  { %2071 = vrot.lane.b32.xlu1 %v1718_v6, %s5520_s7  ;;  %v2283_v6 = vsel %vm1202_vm1, %v2281_v48, %v2282_v28  ;;  %v2933_v28 = vrot.slane %v2931_v63, 1  ;;  %v1914_v18 = vshll.u32 %v4801_v17, 16 }
  0x6a   :  { %v2929_v48 = vor.u32 %v2928_v1, %v2924_v5  ;;  %v6260_v5 = vld [vmem:[%s8973_s0 + $0x38] ss:$0 sps:$4 sm:$0x11]   ;;  %v6267_v1 = vsel %vm1202_vm1, %v3254_v31, %v3255_v43 }
  0x6c   :  { %1559 = vrot.lane.b32.xlu0 %v4800_v24, %s5518_s25  ;;  %v130_v24 = vld [vmem:[%s8973_s0 + $0xfc] sm:$0xe]  ;;  %v2934_v15 = vsel %vm657_vm0, %v2929_v48, %v2933_v28  ;;  %v1727_v48 = vshll.u32 %v6260_v5, 16  ;;  %v3303_v28 = vrot.slane %v6089_v46, 1  ;;  %v4654_v46 = vld [vmem:[%s8973_s0 + $0x18] sm:$0xe] }
  0x6d   :  { %2327 = vrot.lane.b32.xlu1 %v2235_v8, %s5521_s16  ;;  %v4769_v42 = vcombine.low %v130_v24, %v6157_v59  ;;  %v1261_v59 = vrot.slane %v6182_v3, 1  ;;  %v5467_v8 = vld [vmem:[%s8973_s0 + $0x28] sm:$0xf] }
  0x6e   :  { %v4753_v12 = vcombine.low %v114_v25, %v5467_v8  ;;  %v1916_v25 = vrot.slane %v1914_v18, 1 }
  0x6f   :  { %v1260_v3 = vrot.slane %v4769_v42, 1  ;;  %v6279_v42 = vld [vmem:[%s8973_s0 + $0x118] sm:$0xf] }
  0x70   :  { %2103 = vrot.lane.b32.xlu0 %v1910_v36, %s5520_s7  ;;  %v897_v36 = vsel %vm657_vm0, %v892_v13, %v896_v41  ;;  %v1212_v24 = vrot.slane %v4753_v12, 1  ;;  %v4596_v13 = vld [vmem:[%s8973_s0 + $0x114] sm:$0xf]  ;;  %v4865_v41 = vcombine.low %v4545_v50, %v6207_v61  ;;  %v5134_v50 = vld [vmem:[%s8973_s0 + $0x11c] ss:$0 sps:$4 sm:$0x11]  }
  0x71   :  { %2551 = vrot.lane.b32.xlu1 %v4880_v11, %s5522_s21  ;;  %v6226_v11 = vld [vmem:[%s8973_s0 + $0x34] sm:$0xf]  ;;  %v1262_v63 = vsel %vm1202_vm1, %v1260_v3, %v1261_v59  ;;  %v4529_v59 = vld [vmem:[%s8973_s0 + $0x30] sm:$0xe]  ;;  %v6295_v18 = vcombine.low %v4596_v13, %v6279_v42 }
  0x72   :  { %v6238_v51 = vcombine.low %v4436_v27, %v6226_v11  ;;  %v3302_v27 = vrot.slane %v4959_v33, 1  ;;  %v1214_v31 = vsel %vm1202_vm1, %v1212_v24, %v1213_v54  ;;  %v6303_v54 = vld [vmem:[%s8973_s0 + $0x40] sm:$0xf]  ;;  %v2284_v43 = vrot.slane %v4865_v41, 1  ;;  %v4670_v41 = vld [vmem:[%s8973_s0 + $0xf0] sm:$0xe] }
  0x73   :  { %v2285_v33 = vrot.slane %v6243_v53, 1  ;;  %v4849_v24 = vcombine.low %v4529_v59, %v6226_v11  ;;  %v55_v11 = vld [vmem:[%s8973_s0 + $0x108] sm:$0xf] }
  0x74   :  { %2359 = vrot.lane.b32.xlu0 %v2283_v6, %s5521_s16  ;;  %v1722_v60 = vshll.u32 %v6238_v51, 16  ;;  %v1720_v32 = vshrl.u32 %v6238_v51, 16 }
  0x75   :  { %3095 = vrot.lane.b32.xlu1 %v2742_v9, %s5523_s6  ;;  %v1912_v9 = vshrl.u32 %v4801_v17, 16  ;;  %v2236_v59 = vrot.slane %v4849_v24, 1 }
  0x76   :  { %v1724_v12 = vrot.slane %v1722_v60, 1  ;;  %v3252_v60 = vrot.slane %v5918_v7, 1  ;;  %v2938_v7 = vshll.u32 %v6295_v18, 16 }
  0x77   :  { %v1917_v3 = vor.u32 %v1916_v25, %v1912_v9  ;;  %v6320_v9 = vcombine.low %v4564_v47, %v6303_v54  ;;  %v6326_v25 = vsel %vm1202_vm1, %v3302_v27, %v3303_v28  ;;  %v115_v28 = vld [vmem:[%s8973_s0 + $0x30] sm:$0xe]  ;;  %v2286_v47 = vsel %vm1202_vm1, %v2284_v43, %v2285_v33  ;;  %v5469_v33 = vld [vmem:[%s8973_s0 + $0x34] sm:$0xf] }
  0x78   :  { %2583 = vrot.lane.b32.xlu0 %v4896_v57, %s5522_s21  ;;  %v1919_v57 = vshll.u32 %v6243_v53, 16  ;;  %v1729_v53 = vrot.slane %v1727_v48, 1  ;;  %v2940_v24 = vrot.slane %v2938_v7, 1 }
  0x79   :  { %1080 = vrot.lane.b32.xlu1 %v897_v36, %s5516_s15  ;;  %v2744_v7 = vshrl.u32 %v6320_v9, 16 }
  0x7a   :  { %v1921_v61 = vrot.slane %v1919_v57, 1  ;;  %v1725_v57 = vor.u32 %v1724_v12, %v1720_v32  ;;  %v3300_v32 = vrot.slane %v5968_v55, 1  ;;  %v6348_v12 = vld [vmem:[%s8973_s0 + $0x44] ss:$0 sps:$4 sm:$0x11]  }
  0x7b   :  { %v2751_v43 = vshll.u32 %v6348_v12, 16 }
  0x7c   :  { %3127 = vrot.lane.b32.xlu0 %v2934_v15, %s5523_s6  ;;  %v4942_v15 = vcombine.low %v4654_v46, %v5904_v34  ;;  %v1922_v34 = vsel %vm657_vm0, %v1917_v3, %v1921_v61  ;;  %v2237_v61 = vrot.slane %v6260_v5, 1  ;;  %v2936_v46 = vshrl.u32 %v6295_v18, 16 }
  0x7d   :  { %v6252_v16 = vpop.permute.xlu1 %1046  ;;  %1337 = vrot.lane.b32.xlu1 %v1262_v63, %s5517_s11 }
  0x7e   :  { %v6270_v6 = vpop.permute.xlu0 %1042  ;;  %v3251_v13 = vrot.slane %v4942_v15, 1  ;;  %v2943_v15 = vshll.u32 %v5134_v50, 16  ;;  %v4754_v50 = vcombine.low %v115_v28, %v5469_v33 }
  0x80   :  { %1305 = vrot.lane.b32.xlu0 %v1214_v31, %s5517_s11  ;;  %v4958_v31 = vcombine.low %v4670_v41, %v5933_v0  ;;  %v3253_v48 = vsel %vm1202_vm1, %v3251_v13, %v3252_v60  ;;  %v1730_v0 = vsel %vm657_vm0, %v1725_v57, %v1729_v53  ;;  %v4438_v60 = vld [vmem:[%s8973_s0 + $0x3c] sm:$0xf]  ;;  %v6371_v57 = vld [vmem:[%s8973_s0 + $0x40] sm:$0xf] }
  0x81   :  { %v6288_v8 = vpop.permute.xlu1 %1048  ;;  %1561 = vrot.lane.b32.xlu1 %v4801_v17, %s5518_s25  ;;  %v6333_v17 = vld [vmem:[%s8973_s0 + $0x10c] sm:$0xf]  ;;  %4984 = vmatprep.mubr.msk.bf16.mxu0 %vm3347_vm2, %v3253_v48  ;;  %v6388_v41 = vld [vmem:[%s8973_s0 + $0x110] ss:$0 sps:$4 sm:$0x11]   ;;  %v2945_v48 = vrot.slane %v2943_v15, 1 }
  0x82   :  { %v6292_v36 = vpop.permute.xlu0 %1044  ;;  %v6360_v5 = vcombine.low %v55_v11, %v6333_v17  ;;  %v3299_v3 = vrot.slane %v4958_v31, 1  ;;  %v906_v15 = vshll.u32 %v6388_v41, 16 }
  0x84   :  { %1529 = vrot.lane.b32.xlu0 %v6238_v51, %s5518_s25  ;;  %v2746_v51 = vshll.u32 %v6320_v9, 16  ;;  %v3301_v53 = vsel %vm1202_vm1, %v3299_v3, %v3300_v32  ;;  %v901_v31 = vshll.u32 %v6360_v5, 16  ;;  %v2941_v32 = vor.u32 %v2940_v24, %v2936_v46 }
  0x85   :  { %v6317_v63 = vpop.permute.xlu1 %1052  ;;  %2105 = vrot.lane.b32.xlu1 %v1922_v34, %s5520_s7  ;;  %5000 = vmatprep.mubr.msk.bf16.mxu1 %vm3347_vm2, %v3301_v53  ;;  %v2238_v34 = vsel %vm1202_vm1, %v2236_v59, %v2237_v61  ;;  %v2753_v3 = vrot.slane %v2751_v43, 1  ;;  %v1215_v59 = vrot.slane %v4754_v50, 1  ;;  %v5470_v61 = vld [vmem:[%s8973_s0 + $0x38] ss:$0 sps:$4 sm:$0x11]  }
  0x86   :  { %v2748_v13 = vrot.slane %v2746_v51, 1  ;;  %v1216_v51 = vrot.slane %v5470_v61, 1  ;;  %v903_v24 = vrot.slane %v901_v31, 1  ;;  %v6408_v53 = vld [vmem:[%s8973_s0 + $0x118] sm:$0xf]  ;;  %v2946_v33 = vsel %vm657_vm0, %v2941_v32, %v2945_v48 }
  0x87   :  { %v6342_v27 = vpop.permute.xlu0 %1050  ;;  %v908_v48 = vrot.slane %v906_v15, 1  ;;  %v4530_v61 = vld [vmem:[%s8973_s0 + $0x3c] sm:$0xe] }
  0x88   :  { %2073 = vrot.lane.b32.xlu0 %v1730_v0, %s5520_s7  ;;  %v4786_v0 = vcombine.low %v4438_v60, %v6371_v57  ;;  %v2749_v46 = vor.u32 %v2748_v13, %v2744_v7  ;;  %v4470_v60 = vld [vmem:[%s8973_s0 + $0x114] sm:$0xf]  ;;  %v1217_v23 = vsel %vm1202_vm1, %v1215_v59, %v1216_v51  ;;  %v4850_v59 = vcombine.low %v4530_v61, %v6371_v57 }
  0x89   :  { %v6353_v55 = vpop.permute.xlu1 %1056  ;;  %2361 = vrot.lane.b32.xlu1 %v2286_v47, %s5521_s16  ;;  %v899_v47 = vshrl.u32 %v6360_v5, 16  ;;  %v6424_v13 = vcombine.low %v4470_v60, %v6408_v53  ;;  %v1264_v51 = vrot.slane %v6388_v41, 1  ;;  %v4546_v41 = vld [vmem:[%s8973_s0 + $0x114] sm:$0xe] }
  0x8a   :  { %8998 = vst [vmem:[#allocation12_spill] sm:$0xff] %v6353_v55  ;;  %v1734_v50 = vshll.u32 %v4786_v0, 16  ;;  %v2754_v31 = vsel %vm657_vm0, %v2749_v46, %v2753_v3  ;;  %v6441_v3 = vld [vmem:[%s8973_s0 + $0x4c] sm:$0xf] }
  0x8b   :  { %v904_v32 = vor.u32 %v903_v24, %v899_v47  ;;  %v1926_v47 = vshll.u32 %v6424_v13, 16 }
  0x8c   :  { %v6375_v11 = vpop.permute.xlu0 %1054  ;;  %2329 = vrot.lane.b32.xlu0 %v2238_v34, %s5521_s16  ;;  %v5144_v34 = vld [vmem:[%s8973_s0 + $0x44] ss:$0 sps:$4 sm:$0x11]   ;;  %v1736_v38 = vrot.slane %v1734_v50, 1 }
  0x8d   :  { %8999 = vst [vmem:[#allocation13_spill] sm:$0xff] %v6375_v11  ;;  %2585 = vrot.lane.b32.xlu1 %v6295_v18, %s5522_s21  ;;  %v131_v18 = vld [vmem:[%s8973_s0 + $0x108] sm:$0xe]  ;;  %v1739_v60 = vshll.u32 %v5144_v34, 16  ;;  %v909_v46 = vsel %vm657_vm0, %v904_v32, %v908_v48  ;;  %v2239_v32 = vrot.slane %v4850_v59, 1  ;;  %v2240_v48 = vrot.slane %v5144_v34, 1 }
  0x8e   :  { %v6392_v28 = vpop.permute.xlu1 %1060  ;;  %v4770_v45 = vcombine.low %v131_v18, %v6333_v17  ;;  %v4656_v17 = vld [vmem:[%s8973_s0 + $0x30] sm:$0xe]  ;;  %v5148_v50 = vld [vmem:[%s8973_s0 + $0x11c] ss:$0 sps:$4 sm:$0x11]   ;;  %v1928_v61 = vrot.slane %v1926_v47, 1 }
  0x8f   :  { %9000 = vst [vmem:[#allocation14_spill] sm:$0xff] %v6392_v28  ;;  %v1741_v49 = vrot.slane %v1739_v60, 1  ;;  %v4944_v57 = vcombine.low %v4656_v17, %v6129_v35  ;;  %v1924_v35 = vshrl.u32 %v6424_v13, 16  ;;  %v5153_v17 = vld [vmem:[%s8973_s0 + $0x50] ss:$0 sps:$4 sm:$0x11]  }
  0x90   :  { %v6410_v43 = vpop.permute.xlu0 %1058  ;;  %2553 = vrot.lane.b32.xlu0 %v6320_v9, %s5522_s21  ;;  %v1732_v9 = vshrl.u32 %v4786_v0, 16  ;;  %v1263_v15 = vrot.slane %v4770_v45, 1  ;;  %v6468_v45 = vld [vmem:[%s8973_s0 + $0x118] sm:$0xf]  ;;  %v4598_v34 = vld [vmem:[%s8973_s0 + $0x120] sm:$0xf] }
  0x91   :  { %9001 = vst [vmem:[#allocation15_spill] sm:$0xff] %v6410_v43  ;;  %3129 = vrot.lane.b32.xlu1 %v2946_v33, %s5523_s6  ;;  %v4566_v33 = vld [vmem:[%s8973_s0 + $0x48] sm:$0xf]  ;;  %v3258_v47 = vrot.slane %v6149_v29, 1 }
  0x92   :  { %v6419_v7 = vpop.permute.xlu1 %1064  ;;  %v1737_v18 = vor.u32 %v1736_v38, %v1732_v9  ;;  %v1265_v9 = vsel %vm1202_vm1, %v1263_v15, %v1264_v51  ;;  %v3257_v51 = vrot.slane %v4944_v57, 1  ;;  %v6504_v57 = vld [vmem:[%s8973_s0 + $0x11c] ss:$0 sps:$4 sm:$0x11]  }
  0x93   :  { %9002 = vst [vmem:[#allocation16_spill] sm:$0xff] %v6419_v7  ;;  %v1267_v28 = vrot.slane %v6504_v57, 1 }
  0x94   :  { %v6432_v62 = vpop.permute.xlu0 %1062  ;;  %3097 = vrot.lane.b32.xlu0 %v2754_v31, %s5523_s6  ;;  %v4882_v31 = vcombine.low %v4566_v33, %v6441_v3  ;;  %v1931_v33 = vshll.u32 %v5148_v50, 16 }
  0x95   :  { %9003 = vst [vmem:[#allocation17_spill] sm:$0xff] %v6432_v62  ;;  %1307 = vrot.lane.b32.xlu1 %v1217_v23, %s5517_s11  ;;  %v57_v23 = vld [vmem:[%s8973_s0 + $0x114] sm:$0xf] }
  0x96   :  { %v6452_v24 = vpop.permute.xlu1 %1068  ;;  %v6491_v59 = vcombine.low %v57_v23, %v6468_v45  ;;  %v2756_v29 = vshrl.u32 %v4882_v31, 16 }
  0x97   :  { %9004 = vst [vmem:[#allocation18_spill] sm:$0xff] %v6452_v24  ;;  %v2758_v24 = vshll.u32 %v4882_v31, 16 }
  0x98   :  { %1082 = vrot.lane.b32.xlu0 %v909_v46, %s5516_s15  ;;  %v1742_v46 = vsel %vm657_vm0, %v1737_v18, %v1741_v49  ;;  %9007 = vst [vmem:[#allocation21_spill] sm:$0xff] %v6491_v59  ;;  %v4866_v49 = vcombine.low %v4546_v41, %v6408_v53  ;;  %v2241_v18 = vsel %vm1202_vm1, %v2239_v32, %v2240_v48  ;;  %v2288_v32 = vrot.slane %v5148_v50, 1 }
  0x99   :  { %v6471_v38 = vpop.permute.xlu0 %1066  ;;  %1531 = vrot.lane.b32.xlu1 %v4786_v0, %s5518_s25  ;;  %v6488_v0 = vld [vmem:[%s8973_s0 + $0x124] sm:$0xf]  ;;  %v2760_v23 = vrot.slane %v2758_v24, 1  ;;  %v6510_v53 = vsel %vm1202_vm1, %v3257_v51, %v3258_v47  ;;  %v918_v24 = vshll.u32 %v6504_v57, 16 }
  0x9a   :  { %9005 = vst [vmem:[#allocation19_spill] sm:$0xff] %v6471_v38  ;;  %v6476_v60 = vpop.permute.xlu1 %1072  ;;  %v1933_v38 = vrot.slane %v1931_v33, 1  ;;  %v4898_v7 = vcombine.low %v4598_v34, %v6488_v0  ;;  %v2287_v41 = vrot.slane %v4866_v49, 1  ;;  %v6536_v51 = vld [vmem:[%s8973_s0 + $0x124] sm:$0xf] }
  0x9b   :  { %9006 = vst [vmem:[#allocation20_spill] sm:$0xff] %v6476_v60  ;;  %v1929_v60 = vor.u32 %v1928_v61, %v1924_v35  ;;  %v6520_v61 = vld [vmem:[%s8973_s0 + $0x128] ss:$0 sps:$4 sm:$0x11]  }
  0x9c   :  { %1339 = vrot.lane.b32.xlu0 %v1265_v9, %s5517_s11  ;;  %v2763_v9 = vshll.u32 %v5153_v17, 16  ;;  %v2950_v35 = vshll.u32 %v4898_v7, 16  ;;  %v2761_v17 = vor.u32 %v2760_v23, %v2756_v29  ;;  %v2289_v47 = vsel %vm1202_vm1, %v2287_v41, %v2288_v32  ;;  %v116_v23 = vld [vmem:[%s8973_s0 + $0x3c] sm:$0xe]  ;;  %v6558_v32 = vld [vmem:[%s8973_s0 + $0x4c] sm:$0xf] }
  0x9d   :  { %v6495_v15 = vpop.permute.xlu0 %1070  ;;  %2075 = vrot.lane.b32.xlu1 %v1742_v46, %s5520_s7  ;;  %v1934_v48 = vsel %vm657_vm0, %v1929_v60, %v1933_v38  ;;  %v132_v38 = vld [vmem:[%s8973_s0 + $0x114] sm:$0xe]  ;;  %v4472_v60 = vld [vmem:[%s8973_s0 + $0x120] sm:$0xf]  ;;  %v2948_v49 = vshrl.u32 %v4898_v7, 16  ;;  %v2955_v29 = vshll.u32 %v6520_v61, 16 }
  0x9e   :  { %9008 = vst [vmem:[#allocation22_spill] sm:$0xff] %v6495_v15  ;;  %v913_v15 = vshll.u32 %v6491_v59, 16  ;;  %v2765_v46 = vrot.slane %v2763_v9, 1  ;;  %v6550_v41 = vcombine.low %v4472_v60, %v6536_v51 }
  0x9f   :  { %v6507_v4 = vpop.permute.xlu1 %1076 }
  0xa0   :  { %1563 = vrot.lane.b32.xlu0 %v6424_v13, %s5518_s25  ;;  %v911_v13 = vshrl.u32 %v6491_v59, 16  ;;  %v915_v34 = vrot.slane %v913_v15, 1  ;;  %v920_v15 = vrot.slane %v918_v24, 1  ;;  %v2766_v62 = vsel %vm657_vm0, %v2761_v17, %v2765_v46 }
  0xa1   :  { %2331 = vrot.lane.b32.xlu1 %v2241_v18, %s5521_s16  ;;  %v2952_v18 = vrot.slane %v2950_v35, 1  ;;  %v2957_v17 = vrot.slane %v2955_v29, 1 }
  0xa2   :  { %v6522_v33 = vpop.permute.xlu0 %1074  ;;  %v916_v30 = vor.u32 %v915_v34, %v911_v13 }
  0xa3   :  { %v6525_v50 = vpop.permute.xlu1 %1299  ;;  %v2953_v24 = vor.u32 %v2952_v18, %v2948_v49  ;;  %v5472_v18 = vld [vmem:[%s8973_s0 + $0x44] ss:$0 sps:$4 sm:$0x11]  }
  0xa4   :  { %2107 = vrot.lane.b32.xlu0 %v1934_v48, %s5520_s7  ;;  %v4771_v48 = vcombine.low %v132_v38, %v6468_v45  ;;  %v5471_v45 = vld [vmem:[%s8973_s0 + $0x40] sm:$0xf]  ;;  %v921_v38 = vsel %vm657_vm0, %v916_v30, %v920_v15  ;;  %v1219_v29 = vrot.slane %v5472_v18, 1 }
  0xa5   :  { %2555 = vrot.lane.b32.xlu1 %v4882_v31, %s5522_s21  ;;  %v4440_v31 = vld [vmem:[%s8973_s0 + $0x48] sm:$0xf]  ;;  %v4755_v46 = vcombine.low %v116_v23, %v5471_v45  ;;  %v4547_v30 = vld [vmem:[%s8973_s0 + $0x120] sm:$0xe]  ;;  %v2958_v57 = vsel %vm657_vm0, %v2953_v24, %v2957_v17  ;;  %v4600_v24 = vld [vmem:[%s8973_s0 + $0x12c] sm:$0xf] }
  0xa6   :  { %v6545_v9 = vpop.permute.xlu0 %1078  ;;  %v6566_v13 = vcombine.low %v4440_v31, %v6558_v32  ;;  %v1266_v60 = vrot.slane %v4771_v48, 1  ;;  %v1936_v48 = vshrl.u32 %v6550_v41, 16  ;;  %v4601_v17 = vld [vmem:[%s8973_s0 + $0x130] sm:$0xf] }
  0xa7   :  { %v1524_v35 = vpop.permute.xlu1 %1523  ;;  %v1218_v15 = vrot.slane %v4755_v46, 1  ;;  %v6613_v55 = vcombine.low %v4600_v24, %v4601_v17 }
  0xa8   :  { %2363 = vrot.lane.b32.xlu0 %v2289_v47, %s5521_s16  ;;  %v1938_v47 = vshll.u32 %v6550_v41, 16  ;;  %v1746_v23 = vshll.u32 %v6566_v13, 16  ;;  %v1268_v45 = vsel %vm1202_vm1, %v1266_v60, %v1267_v28  ;;  %v4531_v28 = vld [vmem:[%s8973_s0 + $0x48] sm:$0xe]  ;;  %v1744_v60 = vshrl.u32 %v6566_v13, 16 }
  0xa9   :  { %3099 = vrot.lane.b32.xlu1 %v2766_v62, %s5523_s6  ;;  %v6576_v62 = vld [vmem:[%s8973_s0 + $0x128] ss:$0 sps:$4 sm:$0x11]   ;;  %v4851_v17 = vcombine.low %v4531_v28, %v6558_v32  ;;  %v5177_v32 = vld [vmem:[%s8973_s0 + $0x134] ss:$0 sps:$4 sm:$0x11]  }
  0xaa   :  { %v6568_v34 = vpop.permute.xlu0 %1331  ;;  %v1940_v18 = vrot.slane %v1938_v47, 1  ;;  %v1943_v44 = vshll.u32 %v6576_v62, 16  ;;  %v1220_v47 = vsel %vm1202_vm1, %v1218_v15, %v1219_v29  ;;  %v1748_v43 = vrot.slane %v1746_v23, 1 }
  0xab   :  { %v2068_v49 = vpop.permute.xlu1 %2067  ;;  %v2291_v59 = vrot.slane %v6576_v62, 1 }
  0xac   :  { %2587 = vrot.lane.b32.xlu0 %v4898_v7, %s5522_s21  ;;  %v6592_v7 = vld [vmem:[%s8973_s0 + $0x50] ss:$0 sps:$4 sm:$0x11]   ;;  %v1941_v29 = vor.u32 %v1940_v18, %v1936_v48  ;;  %v1945_v15 = vrot.slane %v1943_v44, 1  ;;  %v1749_v44 = vor.u32 %v1748_v43, %v1744_v60  ;;  %v2962_v48 = vshll.u32 %v6613_v55, 16 }
  0xad   :  { %1084 = vrot.lane.b32.xlu1 %v921_v38, %s5516_s15  ;;  %v4867_v38 = vcombine.low %v4547_v30, %v6536_v51  ;;  %v1751_v58 = vshll.u32 %v6592_v7, 16  ;;  %v4569_v51 = vld [vmem:[%s8973_s0 + $0x58] sm:$0xf]  ;;  %v3349_v30 = vsel %vm3347_vm2, %v5575_v10, %v6270_v6  ;;  %v6647_v43 = vld [vmem:[%s8973_s0 + $0x124] sm:$0xf] }
  0xae   :  { %v6594_v31 = vpop.permute.xlu0 %1555  ;;  %v3414_v23 = vsel %vm3412_vm3, %v3349_v30, %v6525_v50  ;;  %v1946_v62 = vsel %vm657_vm0, %v1941_v29, %v1945_v15  ;;  %v6658_v60 = vld [vmem:[%s8973_s0 + $0x5c] ss:$0 sps:$4 sm:$0x11]   ;;  %v2967_v29 = vshll.u32 %v5177_v32, 16 }
  0xaf   :  { %v2324_v46 = vpop.permute.xlu1 %2323  ;;  %v3479_v14 = vsel %vm3477_vm4, %v3414_v23, %v1524_v35  ;;  %v2290_v11 = vrot.slane %v4867_v38, 1  ;;  %v1753_v50 = vrot.slane %v1751_v58, 1 }
  0xb0   :  { %3131 = vrot.lane.b32.xlu0 %v2958_v57, %s5523_s6  ;;  %v4568_v57 = vld [vmem:[%s8973_s0 + $0x54] sm:$0xf]  ;;  %v3544_v6 = vsel %vm3542_vm5, %v3479_v14, %v2068_v49  ;;  %v59_v14 = vld [vmem:[%s8973_s0 + $0x120] sm:$0xf]  ;;  %v2242_v49 = vrot.slane %v4851_v17, 1 }
  0xb1   :  { %1341 = vrot.lane.b32.xlu1 %v1268_v45, %s5517_s11  ;;  %v6630_v10 = vcombine.low %v4568_v57, %v4569_v51  ;;  %v3609_v35 = vsel %vm3607_vm6, %v3544_v6, %v2324_v46  ;;  %v2292_v38 = vsel %vm1202_vm1, %v2290_v11, %v2291_v59  ;;  %v1754_v57 = vsel %vm657_vm0, %v1749_v44, %v1753_v50  ;;  %v117_v11 = vld [vmem:[%s8973_s0 + $0x48] sm:$0xe]  ;;  %v5473_v6 = vld [vmem:[%s8973_s0 + $0x4c] sm:$0xf] }
  0xb2   :  { %v2100_v45 = vpop.permute.xlu0 %2099  ;;  %v6670_v59 = vcombine.low %v59_v14, %v6647_v43  ;;  %v4756_v44 = vcombine.low %v117_v11, %v5473_v6  ;;  %v6699_v50 = vld [vmem:[%s8973_s0 + $0x128] ss:$0 sps:$4 sm:$0x11]  }
  0xb3   :  { %v2548_v24 = vpop.permute.xlu1 %2547  ;;  %v2770_v28 = vshll.u32 %v6630_v10, 16  ;;  %v2768_v23 = vshrl.u32 %v6630_v10, 16 }
  0xb4   :  { %1309 = vrot.lane.b32.xlu0 %v1220_v47, %s5517_s11  ;;  %v3674_v58 = vsel %vm3672_vm7, %v3609_v35, %v2548_v24  ;;  %v3381_v47 = vsel %vm3347_vm2, %v5830_v37, %v6522_v33  ;;  %v2960_v37 = vshrl.u32 %v6613_v55, 16  ;;  %v2964_v33 = vrot.slane %v2962_v48, 1  ;;  %v4442_v24 = vld [vmem:[%s8973_s0 + $0x54] sm:$0xf] }
  0xb5   :  { %1565 = vrot.lane.b32.xlu1 %v6550_v41, %s5518_s25  ;;  %v3446_v51 = vsel %vm3412_vm3, %v3381_v47, %v6568_v34  ;;  %v6688_v34 = vld [vmem:[%s8973_s0 + $0x58] sm:$0xf]  ;;  %v925_v32 = vshll.u32 %v6670_v59, 16  ;;  %v923_v11 = vshrl.u32 %v6670_v59, 16 }
  0xb6   :  { %v2356_v18 = vpop.permute.xlu0 %2355  ;;  %v2965_v14 = vor.u32 %v2964_v33, %v2960_v37  ;;  %v6724_v37 = vld [vmem:[%s8973_s0 + $0x130] sm:$0xf] }
  0xb7   :  { %v3092_v41 = vpop.permute.xlu1 %3091 }
  0xb8   :  { %1533 = vrot.lane.b32.xlu0 %v6566_v13, %s5518_s25  ;;  %v3739_v46 = vsel %vm3737_vm8, %v3674_v58, %v3092_v41  ;;  %v2243_v13 = vrot.slane %v6592_v7, 1  ;;  %v3511_v7 = vsel %vm3477_vm4, %v3446_v51, %v6594_v31  ;;  %v2775_v31 = vshll.u32 %v6658_v60, 16 }
  0xb9   :  { %2109 = vrot.lane.b32.xlu1 %v1946_v62, %s5520_s7  ;;  %4042 = vmatmul.mubr.bf16.vlgmr.msra.gmra.mrb[0].mxu0 %v3739_v46  ;;  %v3576_v17 = vsel %vm3542_vm5, %v3511_v7, %v2100_v45  ;;  %v2969_v58 = vrot.slane %v2967_v29, 1  ;;  %v6707_v41 = vcombine.low %v4442_v24, %v6688_v34  ;;  %v927_v51 = vrot.slane %v925_v32, 1  ;;  %v133_v7 = vld [vmem:[%s8973_s0 + $0x120] sm:$0xe] }
  0xba   :  { %v2580_v30 = vpop.permute.xlu0 %2579  ;;  %4985 = vmatprep.mubr.msk.bf16.mxu0 %vm3347_vm2, %v6267_v1  ;;  %v2772_v1 = vrot.slane %v2770_v28, 1  ;;  %v3641_v48 = vsel %vm3607_vm6, %v3576_v17, %v2356_v18  ;;  %v2244_v45 = vsel %vm1202_vm1, %v2242_v49, %v2243_v13  ;;  %v5474_v18 = vld [vmem:[%s8973_s0 + $0x50] ss:$0 sps:$4 sm:$0x11]   ;;  %v2777_v47 = vrot.slane %v2775_v31, 1 }
  0xbb   :  { %v6679_v15 = vpop.permute.xlu1 %1301  ;;  %v3706_v35 = vsel %vm3672_vm7, %v3641_v48, %v2580_v30  ;;  %v930_v13 = vshll.u32 %v6699_v50, 16  ;;  %v4474_v30 = vld [vmem:[%s8973_s0 + $0x12c] sm:$0xf]  ;;  %v2970_v29 = vsel %vm657_vm0, %v2965_v14, %v2969_v58  ;;  %v4532_v17 = vld [vmem:[%s8973_s0 + $0x54] sm:$0xe]  ;;  %v928_v31 = vor.u32 %v927_v51, %v923_v11 }
  0xbc   :  { %2077 = vrot.lane.b32.xlu0 %v1754_v57, %s5520_s7  ;;  %v2773_v49 = vor.u32 %v2772_v1, %v2768_v23  ;;  %v1221_v57 = vrot.slane %v4756_v44, 1  ;;  %v6738_v23 = vld [vmem:[%s8973_s0 + $0x5c] ss:$0 sps:$4 sm:$0x11]   ;;  %v6747_v1 = vcombine.low %v4474_v30, %v6724_v37  ;;  %v1756_v44 = vshrl.u32 %v6707_v41, 16 }
  0xbd   :  { %2365 = vrot.lane.b32.xlu1 %v2292_v38, %s5521_s16  ;;  %v1222_v38 = vrot.slane %v5474_v18, 1  ;;  %v932_v6 = vrot.slane %v930_v13, 1  ;;  %v4772_v48 = vcombine.low %v133_v7, %v6647_v43  ;;  %v4570_v14 = vld [vmem:[%s8973_s0 + $0x60] sm:$0xf]  ;;  %v4571_v43 = vld [vmem:[%s8973_s0 + $0x64] sm:$0xf]  ;;  %v4852_v18 = vcombine.low %v4532_v17, %v6688_v34 }
  0xbe   :  { %v3124_v62 = vpop.permute.xlu0 %3123  ;;  %v6776_v13 = vcombine.low %v4570_v14, %v4571_v43  ;;  %v3351_v11 = vsel %vm3347_vm2, %v5602_v22, %v6292_v36  ;;  %v6791_v17 = vld [vmem:[%s8973_s0 + $0x130] sm:$0xf]  ;;  %v1948_v36 = vshrl.u32 %v6747_v1, 16  ;;  %v2246_v14 = vrot.slane %v6738_v23, 1 }
  0xbf   :  { %v3787_v46 = vsel %vm3737_vm8, %v3706_v35, %v3124_v62  ;;  %v1526_v28 = vpop.permute.xlu1 %1525  ;;  %v1223_v32 = vsel %vm1202_vm1, %v1221_v57, %v1222_v38  ;;  %v1763_v62 = vshll.u32 %v6738_v23, 16  ;;  %v1950_v38 = vshll.u32 %v6747_v1, 16 }
  0xc0   :  { %2333 = vrot.lane.b32.xlu0 %v2244_v45, %s5521_s16  ;;  %4170 = vmatmul.mubr.bf16.vlgmr.msra.gmra.mrb[0].mxu1 %v3787_v46  ;;  %v4672_v46 = vld [vmem:[%s8973_s0 + $0x108] sm:$0xe]  ;;  %v1270_v57 = vrot.slane %v6699_v50, 1  ;;  %v3416_v7 = vsel %vm3412_vm3, %v3351_v11, %v6679_v15  ;;  %v61_v50 = vld [vmem:[%s8973_s0 + $0x12c] sm:$0xf]  ;;  %v3383_v11 = vsel %vm3347_vm2, %v5805_v19, %v6507_v4 }
  0xc1   :  { %2589 = vrot.lane.b32.xlu1 %v6613_v55, %s5522_s21  ;;  %5001 = vmatprep.mubr.msk.bf16.mxu1 %vm3347_vm2, %v6326_v25  ;;  %v1758_v55 = vshll.u32 %v6707_v41, 16  ;;  %v2778_v25 = vsel %vm657_vm0, %v2773_v49, %v2777_v47  ;;  %v933_v49 = vsel %vm657_vm0, %v928_v31, %v932_v6  ;;  %v1269_v47 = vrot.slane %v4772_v48, 1  ;;  %v5190_v15 = vld [vmem:[%s8973_s0 + $0x68] ss:$0 sps:$4 sm:$0x11]  }
  0xc2   :  { %v6728_v33 = vpop.permute.xlu0 %1333  ;;  %v3481_v22 = vsel %vm3477_vm4, %v3416_v7, %v1526_v28  ;;  %v2245_v6 = vrot.slane %v4852_v18, 1  ;;  %v4548_v28 = vld [vmem:[%s8973_s0 + $0x12c] sm:$0xe]  ;;  %v2782_v48 = vshll.u32 %v6776_v13, 16  ;;  %v6819_v43 = vcombine.low %v61_v50, %v6791_v17 }
  0xc3   :  { %v2070_v24 = vpop.permute.xlu1 %2069  ;;  %v1760_v35 = vrot.slane %v1758_v55, 1  ;;  %v4960_v55 = vcombine.low %v4672_v46, %v6168_v26  ;;  %v1952_v26 = vrot.slane %v1950_v38, 1 }
  0xc4   :  { %2557 = vrot.lane.b32.xlu0 %v6630_v10, %s5522_s21  ;;  %v6755_v10 = vld [vmem:[%s8973_s0 + $0x134] ss:$0 sps:$4 sm:$0x11]   ;;  %v3546_v31 = vsel %vm3542_vm5, %v3481_v22, %v2070_v24  ;;  %v4602_v24 = vld [vmem:[%s8973_s0 + $0x138] sm:$0xf]  ;;  %v2247_v4 = vsel %vm1202_vm1, %v2245_v6, %v2246_v14  ;;  %v937_v19 = vshll.u32 %v6819_v43, 16 }
  0xc5   :  { %3133 = vrot.lane.b32.xlu1 %v2970_v29, %s5523_s6  ;;  %v1761_v30 = vor.u32 %v1760_v35, %v1756_v44  ;;  %v1765_v29 = vrot.slane %v1763_v62, 1  ;;  %v1955_v34 = vshll.u32 %v6755_v10, 16  ;;  %v1271_v44 = vsel %vm1202_vm1, %v1269_v47, %v1270_v57  ;;  %v4476_v14 = vld [vmem:[%s8973_s0 + $0x138] sm:$0xf] }
  0xc6   :  { %v6757_v45 = vpop.permute.xlu0 %1557  ;;  %v3305_v46 = vrot.slane %v4960_v55, 1  ;;  %v4868_v47 = vcombine.low %v4548_v28, %v6724_v37  ;;  %v2787_v57 = vshll.u32 %v5190_v15, 16  ;;  %v6836_v55 = vld [vmem:[%s8973_s0 + $0x134] ss:$0 sps:$4 sm:$0x11]   ;;  %v3448_v37 = vsel %vm3412_vm3, %v3383_v11, %v6728_v33 }
  0xc7   :  { %v2326_v58 = vpop.permute.xlu1 %2325  ;;  %v1766_v62 = vsel %vm657_vm0, %v1761_v30, %v1765_v29  ;;  %v1957_v38 = vrot.slane %v1955_v34, 1  ;;  %v2780_v30 = vshrl.u32 %v6776_v13, 16  ;;  %v2784_v29 = vrot.slane %v2782_v48, 1 }
  0xc8   :  { %3101 = vrot.lane.b32.xlu0 %v2778_v25, %s5523_s6  ;;  %v3513_v50 = vsel %vm3477_vm4, %v3448_v37, %v6757_v45  ;;  %v2293_v15 = vrot.slane %v4868_v47, 1  ;;  %v942_v45 = vshll.u32 %v6836_v55, 16  ;;  %v939_v28 = vrot.slane %v937_v19, 1  ;;  %v6901_v37 = vld [vmem:[%s8973_s0 + $0x64] sm:$0xf] }
  0xc9   :  { %1311 = vrot.lane.b32.xlu1 %v1223_v32, %s5517_s11  ;;  %v3611_v32 = vsel %vm3607_vm6, %v3546_v31, %v2326_v58  ;;  %v2789_v31 = vrot.slane %v2787_v57, 1 }
  0xca   :  { %v2102_v51 = vpop.permute.xlu0 %2101 }
  0xcb   :  { %v2550_v25 = vpop.permute.xlu1 %2549 }
  0xcc   :  { %1086 = vrot.lane.b32.xlu0 %v933_v49, %s5516_s15  ;;  %v3676_v58 = vsel %vm3672_vm7, %v3611_v32, %v2550_v25  ;;  %v1953_v49 = vor.u32 %v1952_v26, %v1948_v36  ;;  %v3306_v25 = vrot.slane %v6188_v39, 1  ;;  %v2294_v36 = vrot.slane %v6755_v10, 1  ;;  %v6860_v10 = vld [vmem:[%s8973_s0 + $0x140] ss:$0 sps:$4 sm:$0x11]  }
  0xcd   :  { %1535 = vrot.lane.b32.xlu1 %v6707_v41, %s5518_s25  ;;  %v6816_v41 = vld [vmem:[%s8973_s0 + $0x13c] sm:$0xf]  ;;  %v3578_v26 = vsel %vm3542_vm5, %v3513_v50, %v2102_v51  ;;  %v2785_v39 = vor.u32 %v2784_v29, %v2780_v30  ;;  %v4444_v29 = vld [vmem:[%s8973_s0 + $0x60] sm:$0xf] }
  0xce   :  { %v2358_v35 = vpop.permute.xlu0 %2357  ;;  %v6831_v34 = vcombine.low %v4602_v24, %v6816_v41  ;;  %v1958_v33 = vsel %vm657_vm0, %v1953_v49, %v1957_v38  ;;  %v3307_v48 = vsel %vm1202_vm1, %v3305_v46, %v3306_v25  ;;  %v6876_v24 = vld [vmem:[%s8973_s0 + $0x13c] sm:$0xf]  ;;  %v2295_v46 = vsel %vm1202_vm1, %v2293_v15, %v2294_v36  ;;  %v118_v49 = vld [vmem:[%s8973_s0 + $0x54] sm:$0xe] }
  0xcf   :  { %v3094_v18 = vpop.permute.xlu1 %3093  ;;  %v2790_v57 = vsel %vm657_vm0, %v2785_v39, %v2789_v31  ;;  %v1273_v36 = vrot.slane %v6836_v55, 1  ;;  %v4673_v55 = vld [vmem:[%s8973_s0 + $0x114] sm:$0xe] }
  0xd0   :  { %1343 = vrot.lane.b32.xlu0 %v1271_v44, %s5517_s11  ;;  %v3742_v23 = vsel %vm3737_vm8, %v3676_v58, %v3094_v18  ;;  %v2974_v51 = vshll.u32 %v6831_v34, 16  ;;  %v935_v44 = vshrl.u32 %v6819_v43, 16  ;;  %v944_v58 = vrot.slane %v942_v45, 1 }
  0xd1   :  { %2079 = vrot.lane.b32.xlu1 %v1766_v62, %s5520_s7  ;;  %4050 = vmatmul.mubr.bf16.gmra.mrb[4].mxu0 %v3742_v23  ;;  %v134_v62 = vld [vmem:[%s8973_s0 + $0x12c] sm:$0xe]  ;;  %v2972_v18 = vshrl.u32 %v6831_v34, 16  ;;  %v2979_v23 = vshll.u32 %v6860_v10, 16 }
  0xd2   :  { %v2582_v7 = vpop.permute.xlu0 %2581  ;;  %4986 = vmatprep.mubr.msk.bf16.mxu0 %vm3347_vm2, %v6510_v53  ;;  %v3643_v53 = vsel %vm3607_vm6, %v3578_v26, %v2358_v35  ;;  %v2976_v38 = vrot.slane %v2974_v51, 1  ;;  %v940_v11 = vor.u32 %v939_v28, %v935_v44  ;;  %v4773_v30 = vcombine.low %v134_v62, %v6791_v17  ;;  %v5475_v17 = vld [vmem:[%s8973_s0 + $0x58] sm:$0xf] }
  0xd3   :  { %v6847_v22 = vpop.permute.xlu1 %1303  ;;  %v4757_v19 = vcombine.low %v118_v49, %v5475_v17  ;;  %v2981_v50 = vrot.slane %v2979_v23, 1  ;;  %v6913_v26 = vcombine.low %v4444_v29, %v6901_v37  ;;  %v3353_v28 = vsel %vm3347_vm2, %v5553_v2, %v6252_v16  ;;  %v4604_v49 = vld [vmem:[%s8973_s0 + $0x144] sm:$0xf] }
  0xd4   :  { %1567 = vrot.lane.b32.xlu0 %v6747_v1, %s5518_s25  ;;  %v3708_v1 = vsel %vm3672_vm7, %v3643_v53, %v2582_v7  ;;  %v2977_v25 = vor.u32 %v2976_v38, %v2972_v18  ;;  %v945_v31 = vsel %vm657_vm0, %v940_v11, %v944_v58  ;;  %v1272_v53 = vrot.slane %v4773_v30, 1 }
  0xd5   :  { %2335 = vrot.lane.b32.xlu1 %v2247_v4, %s5521_s16  ;;  %v4657_v4 = vld [vmem:[%s8973_s0 + $0x3c] sm:$0xe]  ;;  %v4961_v58 = vcombine.low %v4673_v55, %v6279_v42  ;;  %v3418_v38 = vsel %vm3412_vm3, %v3353_v28, %v6847_v22  ;;  %v3261_v11 = vrot.slane %v6348_v12, 1  ;;  %v4533_v22 = vld [vmem:[%s8973_s0 + $0x60] sm:$0xe]  ;;  %v1768_v17 = vshrl.u32 %v6913_v26, 16 }
  0xd6   :  { %v3126_v6 = vpop.permute.xlu0 %3125  ;;  %v4945_v45 = vcombine.low %v4657_v4, %v6303_v54  ;;  %v2982_v54 = vsel %vm657_vm0, %v2977_v25, %v2981_v50  ;;  %v3385_v28 = vsel %vm3347_vm2, %v5856_v56, %v6545_v9  ;;  %v63_v9 = vld [vmem:[%s8973_s0 + $0x138] sm:$0xf] }
  0xd7   :  { %v3790_v32 = vsel %vm3737_vm8, %v3708_v1, %v3126_v6  ;;  %v1528_v35 = vpop.permute.xlu1 %1527  ;;  %v1224_v1 = vrot.slane %v4757_v19, 1  ;;  %v5476_v6 = vld [vmem:[%s8973_s0 + $0x5c] ss:$0 sps:$4 sm:$0x11]  }
  0xd8   :  { %2111 = vrot.lane.b32.xlu0 %v1958_v33, %s5520_s7  ;;  %4178 = vmatmul.mubr.bf16.gmra.mrb[4].mxu1 %v3790_v32  ;;  %v6918_v33 = vld [vmem:[%s8973_s0 + $0x140] ss:$0 sps:$4 sm:$0x11]   ;;  %v1225_v44 = vrot.slane %v5476_v6, 1  ;;  %v4549_v32 = vld [vmem:[%s8973_s0 + $0x138] sm:$0xe]  ;;  %v3483_v30 = vsel %vm3477_vm4, %v3418_v38, %v1528_v35 }
  0xd9   :  { %2559 = vrot.lane.b32.xlu1 %v6776_v13, %s5522_s21  ;;  %5002 = vmatprep.mubr.msk.bf16.mxu1 %vm3347_vm2, %v3307_v48  ;;  %v6893_v13 = vcombine.low %v4476_v14, %v6876_v24  ;;  %v6941_v48 = vld [vmem:[%s8973_s0 + $0x68] ss:$0 sps:$4 sm:$0x11]   ;;  %v1274_v14 = vsel %vm1202_vm1, %v1272_v53, %v1273_v36  ;;  %v3260_v18 = vrot.slane %v4945_v45, 1  ;;  %v4869_v29 = vcombine.low %v4549_v32, %v6876_v24  ;;  %v4572_v24 = vld [vmem:[%s8973_s0 + $0x6c] sm:$0xf] }
  0xda   :  { %v6888_v47 = vpop.permute.xlu0 %1335  ;;  %v1226_v42 = vsel %vm1202_vm1, %v1224_v1, %v1225_v44  ;;  %v1775_v12 = vshll.u32 %v6941_v48, 16  ;;  %v3308_v53 = vrot.slane %v4961_v58, 1  ;;  %v2297_v6 = vrot.slane %v6918_v33, 1  ;;  %v7023_v38 = vld [vmem:[%s8973_s0 + $0x74] ss:$0 sps:$4 sm:$0x11]  }
  0xdb   :  { %v2072_v7 = vpop.permute.xlu1 %2071  ;;  %v1962_v39 = vshll.u32 %v6893_v13, 16  ;;  %v1960_v2 = vshrl.u32 %v6893_v13, 16  ;;  %v2296_v1 = vrot.slane %v4869_v29, 1  ;;  %v4853_v44 = vcombine.low %v4533_v22, %v6901_v37 }
  0xdc   :  { %2367 = vrot.lane.b32.xlu0 %v2295_v46, %s5521_s16  ;;  %v1967_v46 = vshll.u32 %v6918_v33, 16  ;;  %v3548_v4 = vsel %vm3542_vm5, %v3483_v30, %v2072_v7  ;;  %v6980_v7 = vld [vmem:[%s8973_s0 + $0x70] sm:$0xf]  ;;  %v3450_v37 = vsel %vm3412_vm3, %v3385_v28, %v6888_v47  ;;  %v5477_v47 = vld [vmem:[%s8973_s0 + $0x11c] ss:$0 sps:$4 sm:$0x11]  }
  0xdd   :  { %3103 = vrot.lane.b32.xlu1 %v2790_v57, %s5523_s6  ;;  %v1964_v16 = vrot.slane %v1962_v39, 1  ;;  %v4605_v57 = vld [vmem:[%s8973_s0 + $0x148] sm:$0xf]  ;;  %v6994_v32 = vcombine.low %v4572_v24, %v6980_v7  ;;  %v7059_v24 = vld [vmem:[%s8973_s0 + $0x140] ss:$0 sps:$4 sm:$0x11]  }
  0xde   :  { %v6920_v15 = vpop.permute.xlu0 %1559  ;;  %v1969_v36 = vrot.slane %v1967_v46, 1  ;;  %v5478_v28 = vld [vmem:[%s8973_s0 + $0x64] sm:$0xf] }
  0xdf   :  { %v2328_v51 = vpop.permute.xlu1 %2327  ;;  %v1965_v50 = vor.u32 %v1964_v16, %v1960_v2  ;;  %v3309_v16 = vrot.slane %v5477_v47, 1  ;;  %v3515_v46 = vsel %vm3477_vm4, %v3450_v37, %v6920_v15  ;;  %v2794_v30 = vshll.u32 %v6994_v32, 16 }
  0xe0   :  { %2591 = vrot.lane.b32.xlu0 %v6831_v34, %s5522_s21  ;;  %v1770_v34 = vshll.u32 %v6913_v26, 16  ;;  %v3613_v35 = vsel %vm3607_vm6, %v3548_v4, %v2328_v51  ;;  %v3262_v51 = vsel %vm1202_vm1, %v3260_v18, %v3261_v11  ;;  %v2249_v18 = vrot.slane %v6941_v48, 1 }
  0xe1   :  { %1088 = vrot.lane.b32.xlu1 %v945_v31, %s5516_s15  ;;  %v6972_v31 = vcombine.low %v4604_v49, %v4605_v57  ;;  %v1970_v2 = vsel %vm657_vm0, %v1965_v50, %v1969_v36  ;;  %v2298_v49 = vsel %vm1202_vm1, %v2296_v1, %v2297_v6  ;;  %v2248_v57 = vrot.slane %v4853_v44, 1 }
  0xe2   :  { %v2104_v62 = vpop.permute.xlu0 %2103  ;;  %v1772_v19 = vrot.slane %v1770_v34, 1  ;;  %v1777_v34 = vrot.slane %v1775_v12, 1  ;;  %v3310_v12 = vsel %vm1202_vm1, %v3308_v53, %v3309_v16  ;;  %v2799_v50 = vshll.u32 %v7023_v38, 16 }
  0xe3   :  { %v2552_v23 = vpop.permute.xlu1 %2551  ;;  %v2986_v56 = vshll.u32 %v6972_v31, 16  ;;  %v2984_v11 = vshrl.u32 %v6972_v31, 16  ;;  %v2792_v36 = vshrl.u32 %v6994_v32, 16  ;;  %v2250_v53 = vsel %vm1202_vm1, %v2248_v57, %v2249_v18  ;;  %v5479_v57 = vld [vmem:[%s8973_s0 + $0x68] ss:$0 sps:$4 sm:$0x11]  }
  0xe4   :  { %3135 = vrot.lane.b32.xlu0 %v2982_v54, %s5523_s6  ;;  %v3678_v39 = vsel %vm3672_vm7, %v3613_v35, %v2552_v23  ;;  %v1773_v54 = vor.u32 %v1772_v19, %v1768_v17  ;;  %v3580_v23 = vsel %vm3542_vm5, %v3515_v46, %v2104_v62  ;;  %v7043_v62 = vld [vmem:[%s8973_s0 + $0x70] sm:$0xf]  ;;  %v119_v19 = vld [vmem:[%s8973_s0 + $0x60] sm:$0xe]  ;;  %v2801_v37 = vrot.slane %v2799_v50, 1 }
  0xe5   :  { %1345 = vrot.lane.b32.xlu1 %v1274_v14, %s5517_s11  ;;  %v5205_v14 = vld [vmem:[%s8973_s0 + $0x14c] ss:$0 sps:$4 sm:$0x11]   ;;  %v2988_v4 = vrot.slane %v2986_v56, 1  ;;  %v954_v46 = vshll.u32 %v7059_v24, 16 }
  0xe6   :  { %v2360_v25 = vpop.permute.xlu0 %2359  ;;  %v1778_v48 = vsel %vm657_vm0, %v1773_v54, %v1777_v34  ;;  %v2991_v17 = vshll.u32 %v5205_v14, 16  ;;  %v4758_v54 = vcombine.low %v119_v19, %v5478_v28  ;;  %v4674_v34 = vld [vmem:[%s8973_s0 + $0x120] sm:$0xe]  ;;  %v7127_v50 = vld [vmem:[%s8973_s0 + $0x14c] ss:$0 sps:$4 sm:$0x11]  }
  0xe7   :  { %v3096_v45 = vpop.permute.xlu1 %3095  ;;  %v3645_v15 = vsel %vm3607_vm6, %v3580_v23, %v2360_v25  ;;  %v2989_v6 = vor.u32 %v2988_v4, %v2984_v11  ;;  %v1228_v11 = vrot.slane %v5479_v57, 1  ;;  %v4962_v4 = vcombine.low %v4674_v34, %v6488_v0 }
  0xe8   :  { %1313 = vrot.lane.b32.xlu0 %v1226_v42, %s5517_s11  ;;  %v3745_v55 = vsel %vm3737_vm8, %v3678_v39, %v3096_v45  ;;  %v2796_v45 = vrot.slane %v2794_v30, 1  ;;  %v2993_v44 = vrot.slane %v2991_v17, 1 }
  0xe9   :  { %1569 = vrot.lane.b32.xlu1 %v6893_v13, %s5518_s25  ;;  %4058 = vmatmul.mubr.bf16.gmra.mrb[8].mxu0 %v3745_v55  ;;  %v7009_v13 = vld [vmem:[%s8973_s0 + $0x13c] sm:$0xf]  ;;  %v4658_v55 = vld [vmem:[%s8973_s0 + $0x48] sm:$0xe] }
  0xea   :  { %v2584_v33 = vpop.permute.xlu0 %2583  ;;  %4987 = vmatprep.mubr.msk.bf16.mxu0 %vm3347_vm2, %v3262_v51  ;;  %v7035_v42 = vcombine.low %v63_v9, %v7009_v13  ;;  %v2797_v9 = vor.u32 %v2796_v45, %v2792_v36  ;;  %v2994_v23 = vsel %vm657_vm0, %v2989_v6, %v2993_v44  ;;  %v4574_v36 = vld [vmem:[%s8973_s0 + $0x78] sm:$0xf]  ;;  %v1276_v6 = vrot.slane %v7059_v24, 1 }
  0xeb   :  { %v7017_v58 = vpop.permute.xlu1 %1080  ;;  %v3710_v29 = vsel %vm3672_vm7, %v3645_v15, %v2584_v33  ;;  %v135_v33 = vld [vmem:[%s8973_s0 + $0x138] sm:$0xe]  ;;  %v7107_v15 = vld [vmem:[%s8973_s0 + $0x148] sm:$0xf]  ;;  %v3311_v44 = vrot.slane %v4962_v4, 1  ;;  %v3355_v24 = vsel %vm3347_vm2, %v5596_v20, %v6288_v8 }
  0xec   :  { %1537 = vrot.lane.b32.xlu0 %v6913_v26, %s5518_s25  ;;  %v4446_v26 = vld [vmem:[%s8973_s0 + $0x6c] sm:$0xf]  ;;  %v949_v51 = vshll.u32 %v7035_v42, 16  ;;  %v947_v47 = vshrl.u32 %v7035_v42, 16 }
  0xed   :  { %2113 = vrot.lane.b32.xlu1 %v1970_v2, %s5520_s7  ;;  %v7062_v39 = vcombine.low %v4446_v26, %v7043_v62  ;;  %v7088_v2 = vld [vmem:[%s8973_s0 + $0x74] ss:$0 sps:$4 sm:$0x11]   ;;  %v4774_v26 = vcombine.low %v135_v33, %v7009_v13  ;;  %v956_v13 = vrot.slane %v954_v46, 1  ;;  %v65_v46 = vld [vmem:[%s8973_s0 + $0x144] sm:$0xf] }
  0xee   :  { %v3128_v22 = vpop.permute.xlu0 %3127  ;;  %v951_v16 = vrot.slane %v949_v51, 1  ;;  %v1787_v19 = vshll.u32 %v7088_v2, 16 }
  0xef   :  { %v3793_v35 = vsel %vm3737_vm8, %v3710_v29, %v3128_v22  ;;  %v7051_v25 = vpop.permute.xlu1 %1337  ;;  %v1782_v56 = vshll.u32 %v7062_v39, 16  ;;  %v1780_v29 = vshrl.u32 %v7062_v39, 16  ;;  %v4534_v22 = vld [vmem:[%s8973_s0 + $0x6c] sm:$0xe] }
  0xf0   :  { %2081 = vrot.lane.b32.xlu0 %v1778_v48, %s5520_s7  ;;  %4186 = vmatmul.mubr.bf16.gmra.mrb[8].mxu1 %v3793_v35  ;;  %v4946_v48 = vcombine.low %v4658_v55, %v6441_v3  ;;  %v2802_v3 = vsel %vm657_vm0, %v2797_v9, %v2801_v37  ;;  %v1275_v55 = vrot.slane %v4774_v26, 1  ;;  %v4854_v34 = vcombine.low %v4534_v22, %v7043_v62  ;;  %v4550_v62 = vld [vmem:[%s8973_s0 + $0x144] sm:$0xe] }
  0xf1   :  { %2369 = vrot.lane.b32.xlu1 %v2298_v49, %s5521_s16  ;;  %5003 = vmatprep.mubr.msk.bf16.mxu1 %vm3347_vm2, %v3310_v12  ;;  %v1227_v49 = vrot.slane %v4758_v54, 1  ;;  %v1784_v17 = vrot.slane %v1782_v56, 1  ;;  %v952_v12 = vor.u32 %v951_v16, %v947_v47  ;;  %v1789_v54 = vrot.slane %v1787_v19, 1  ;;  %v5480_v19 = vld [vmem:[%s8973_s0 + $0x50] ss:$0 sps:$4 sm:$0x11]  }
  0xf2   :  { %v7071_v1 = vpop.permute.xlu0 %1305  ;;  %v7136_v45 = vrot.slane %v4946_v48, 1  ;;  %v1979_v56 = vshll.u32 %v7127_v50, 16  ;;  %v3387_v47 = vsel %vm3347_vm2, %v6172_v21, %v7017_v58  ;;  %v1277_v21 = vsel %vm1202_vm1, %v1275_v55, %v1276_v6 }
  0xf3   :  { %v7079_v14 = vpop.permute.xlu1 %1561  ;;  %v1785_v28 = vor.u32 %v1784_v17, %v1780_v29  ;;  %v957_v37 = vsel %vm657_vm0, %v952_v12, %v956_v13  ;;  %v3452_v20 = vsel %vm3412_vm3, %v3387_v47, %v7051_v25  ;;  %v2252_v58 = vrot.slane %v7088_v2, 1 }
  0xf4   :  { %2337 = vrot.lane.b32.xlu0 %v2250_v53, %s5521_s16  ;;  %v4575_v53 = vld [vmem:[%s8973_s0 + $0x7c] sm:$0xf]  ;;  %v3517_v57 = vsel %vm3477_vm4, %v3452_v20, %v7079_v14  ;;  %v1981_v29 = vrot.slane %v1979_v56, 1  ;;  %v3420_v2 = vsel %vm3412_vm3, %v3355_v24, %v7071_v1  ;;  %v3264_v1 = vrot.slane %v5480_v19, 1 }
  0xf5   :  { %2593 = vrot.lane.b32.xlu1 %v6972_v31, %s5522_s21  ;;  %v4478_v31 = vld [vmem:[%s8973_s0 + $0x144] sm:$0xf]  ;;  %v7145_v9 = vcombine.low %v4574_v36, %v4575_v53 }
  0xf6   :  { %v7095_v18 = vpop.permute.xlu0 %1529  ;;  %v7122_v35 = vcombine.low %v4478_v31, %v7107_v15  ;;  %v2251_v31 = vrot.slane %v4854_v34, 1  ;;  %v3265_v56 = vsel %vm1202_vm1, %v7136_v45, %v3264_v1  ;;  %v7233_v45 = vld [vmem:[%s8973_s0 + $0x158] ss:$0 sps:$4 sm:$0x11]  }
  0xf7   :  { %v2106_v30 = vpop.permute.xlu1 %2105  ;;  %v2806_v14 = vshll.u32 %v7145_v9, 16  ;;  %v2804_v6 = vshrl.u32 %v7145_v9, 16 }
  0xf8   :  { %2561 = vrot.lane.b32.xlu0 %v6994_v32, %s5522_s21  ;;  %v1229_v32 = vsel %vm1202_vm1, %v1227_v49, %v1228_v11  ;;  %v1974_v33 = vshll.u32 %v7122_v35, 16  ;;  %v3312_v49 = vrot.slane %v6520_v61, 1  ;;  %v1790_v11 = vsel %vm657_vm0, %v1785_v28, %v1789_v54  ;;  %v5218_v61 = vld [vmem:[%s8973_s0 + $0x80] ss:$0 sps:$4 sm:$0x11]  }
  0xf9   :  { %3137 = vrot.lane.b32.xlu1 %v2994_v23, %s5523_s6  ;;  %v7162_v23 = vld [vmem:[%s8973_s0 + $0x148] sm:$0xf]  ;;  %v1972_v48 = vshrl.u32 %v7122_v35, 16  ;;  %v3582_v26 = vsel %vm3542_vm5, %v3517_v57, %v2106_v30  ;;  %v4606_v30 = vld [vmem:[%s8973_s0 + $0x150] sm:$0xf]  ;;  %v2253_v55 = vsel %vm1202_vm1, %v2251_v31, %v2252_v58  ;;  %v2811_v54 = vshll.u32 %v5218_v61, 16 }
  0xfa   :  { %v2074_v0 = vpop.permute.xlu0 %2073  ;;  %v1976_v25 = vrot.slane %v1974_v33, 1  ;;  %v7193_v17 = vcombine.low %v65_v46, %v7162_v23  ;;  %v3313_v36 = vsel %vm1202_vm1, %v3311_v44, %v3312_v49  ;;  %v4480_v31 = vld [vmem:[%s8973_s0 + $0x150] sm:$0xf] }
  0xfb   :  { %v2362_v51 = vpop.permute.xlu1 %2361  ;;  %v2813_v58 = vrot.slane %v2811_v54, 1  ;;  %v7291_v54 = vld [vmem:[%s8973_s0 + $0x158] ss:$0 sps:$4 sm:$0x11]  }
  0xfc   :  { %3105 = vrot.lane.b32.xlu0 %v2802_v3, %s5523_s6  ;;  %v3647_v22 = vsel %vm3607_vm6, %v3582_v26, %v2362_v51  ;;  %v3485_v3 = vsel %vm3477_vm4, %v3420_v2, %v7095_v18  ;;  %v1977_v18 = vor.u32 %v1976_v25, %v1972_v48  ;;  %v961_v33 = vshll.u32 %v7193_v17, 16  ;;  %v7248_v48 = vld [vmem:[%s8973_s0 + $0x154] sm:$0xf]  ;;  %v120_v2 = vld [vmem:[%s8973_s0 + $0x6c] sm:$0xe] }
  0xfd   :  { %1315 = vrot.lane.b32.xlu1 %v1229_v32, %s5517_s11  ;;  %v4870_v32 = vcombine.low %v4550_v62, %v7107_v15  ;;  %v3550_v53 = vsel %vm3542_vm5, %v3485_v3, %v2074_v0  ;;  %v7214_v0 = vld [vmem:[%s8973_s0 + $0x14c] ss:$0 sps:$4 sm:$0x11]   ;;  %v2300_v62 = vrot.slane %v7127_v50, 1  ;;  %v959_v50 = vshrl.u32 %v7193_v17, 16 }
  0xfe   :  { %v2330_v16 = vpop.permute.xlu0 %2329  ;;  %v1982_v46 = vsel %vm657_vm0, %v1977_v18, %v1981_v29  ;;  %v966_v20 = vshll.u32 %v7214_v0, 16  ;;  %v963_v49 = vrot.slane %v961_v33, 1  ;;  %v7263_v1 = vcombine.low %v4480_v31, %v7248_v48  ;;  %v7271_v3 = vld [vmem:[%s8973_s0 + $0x7c] sm:$0xf] }
  0xff   :  { %v2586_v8 = vpop.permute.xlu1 %2585  ;;  %v3615_v28 = vsel %vm3607_vm6, %v3550_v53, %v2330_v16  ;;  %v2299_v16 = vrot.slane %v4870_v32, 1  ;;  %v1279_v18 = vrot.slane %v7214_v0, 1 }
 0x100   :  { %1090 = vrot.lane.b32.xlu0 %v957_v37, %s5516_s15  ;;  %v3712_v12 = vsel %vm3672_vm7, %v3647_v22, %v2586_v8  ;;  %v2808_v37 = vrot.slane %v2806_v14, 1  ;;  %v968_v25 = vrot.slane %v966_v20, 1  ;;  %v3003_v14 = vshll.u32 %v7233_v45, 16  ;;  %v7312_v20 = vld [vmem:[%s8973_s0 + $0x80] ss:$0 sps:$4 sm:$0x11]  }
 0x101   :  { %1539 = vrot.lane.b32.xlu1 %v7062_v39, %s5518_s25  ;;  %v7190_v39 = vld [vmem:[%s8973_s0 + $0x154] sm:$0xf]  ;;  %v2301_v26 = vsel %vm1202_vm1, %v2299_v16, %v2300_v62  ;;  %v3357_v62 = vsel %vm3347_vm2, %v5640_v52, %v6342_v27  ;;  %v1984_v52 = vshrl.u32 %v7263_v1, 16 }
 0x102   :  { %v2554_v4 = vpop.permute.xlu0 %2553  ;;  %v4902_v15 = vcombine.low %v4606_v30, %v7190_v39  ;;  %v964_v30 = vor.u32 %v963_v49, %v959_v50  ;;  %v3005_v53 = vrot.slane %v3003_v14, 1  ;;  %v1991_v50 = vshll.u32 %v7291_v54, 16  ;;  %v5484_v49 = vld [vmem:[%s8973_s0 + $0x130] sm:$0xf] }
 0x103   :  { %v3130_v13 = vpop.permute.xlu1 %3129  ;;  %v3680_v44 = vsel %vm3672_vm7, %v3615_v28, %v2554_v4  ;;  %v3267_v14 = vrot.slane %v6658_v60, 1  ;;  %v1799_v60 = vshll.u32 %v7312_v20, 16 }
 0x104   :  { %1347 = vrot.lane.b32.xlu0 %v1277_v21, %s5517_s11  ;;  %v3796_v51 = vsel %vm3737_vm8, %v3712_v12, %v3130_v13  ;;  %v2998_v8 = vshll.u32 %v4902_v15, 16  ;;  %v2996_v29 = vshrl.u32 %v4902_v15, 16  ;;  %v4659_v13 = vld [vmem:[%s8973_s0 + $0x54] sm:$0xe] }
 0x105   :  { %2083 = vrot.lane.b32.xlu1 %v1790_v11, %s5520_s7  ;;  %4194 = vmatmul.mubr.bf16.gmra.mrb[12].mxu1 %v3796_v51  ;;  %v136_v11 = vld [vmem:[%s8973_s0 + $0x144] sm:$0xe] }
 0x106   :  { %v3098_v34 = vpop.permute.xlu0 %3097  ;;  %5004 = vmatprep.mubr.msk.bf16.mxu1 %vm3347_vm2, %v3313_v36  ;;  %v3000_v61 = vrot.slane %v2998_v8, 1  ;;  %v4775_v19 = vcombine.low %v136_v11, %v7162_v23  ;;  %v5481_v23 = vld [vmem:[%s8973_s0 + $0x70] sm:$0xf] }
 0x107   :  { %v3748_v24 = vsel %vm3737_vm8, %v3680_v44, %v3098_v34  ;;  %v7222_v47 = vpop.permute.xlu1 %1307  ;;  %v4759_v32 = vcombine.low %v120_v2, %v5481_v23  ;;  %v1986_v44 = vshll.u32 %v7263_v1, 16  ;;  %v5482_v34 = vld [vmem:[%s8973_s0 + $0x58] sm:$0xf]  ;;  %v4551_v8 = vld [vmem:[%s8973_s0 + $0x150] sm:$0xe] }
 0x108   :  { %1571 = vrot.lane.b32.xlu0 %v7122_v35, %s5518_s25  ;;  %4066 = vmatmul.mubr.bf16.gmra.mrb[12].mxu0 %v3748_v24  ;;  %v2809_v35 = vor.u32 %v2808_v37, %v2804_v6  ;;  %v3001_v36 = vor.u32 %v3000_v61, %v2996_v29  ;;  %v969_v6 = vsel %vm657_vm0, %v964_v30, %v968_v25  ;;  %v1278_v28 = vrot.slane %v4775_v19, 1  ;;  %v5483_v24 = vld [vmem:[%s8973_s0 + $0x74] ss:$0 sps:$4 sm:$0x11]   ;;  %v4608_v29 = vld [vmem:[%s8973_s0 + $0x15c] sm:$0xf] }
 0x109   :  { %2339 = vrot.lane.b32.xlu1 %v2253_v55, %s5521_s16  ;;  %4988 = vmatprep.mubr.msk.bf16.mxu0 %vm3347_vm2, %v3265_v56  ;;  %v4947_v37 = vcombine.low %v4659_v13, %v5482_v34  ;;  %v4675_v56 = vld [vmem:[%s8973_s0 + $0x12c] sm:$0xe]  ;;  %v1230_v0 = vrot.slane %v4759_v32, 1  ;;  %v1231_v16 = vrot.slane %v5483_v24, 1  ;;  %v1988_v27 = vrot.slane %v1986_v44, 1 }
 0x10a   :  { %v7236_v21 = vpop.permute.xlu0 %1082  ;;  %v2814_v4 = vsel %vm657_vm0, %v2809_v35, %v2813_v58  ;;  %v1280_v58 = vsel %vm1202_vm1, %v1278_v28, %v1279_v18  ;;  %v4963_v11 = vcombine.low %v4675_v56, %v5484_v49  ;;  %v4609_v61 = vld [vmem:[%s8973_s0 + $0x160] sm:$0xf]  ;;  %v4871_v30 = vcombine.low %v4551_v8, %v7248_v48 }
 0x10b   :  { %v1532_v57 = vpop.permute.xlu1 %1531  ;;  %v3266_v31 = vrot.slane %v4947_v37, 1  ;;  %v1989_v32 = vor.u32 %v1988_v27, %v1984_v52  ;;  %v3389_v24 = vsel %vm3347_vm2, %v6360_v5, %v7236_v21  ;;  %v67_v5 = vld [vmem:[%s8973_s0 + $0x150] sm:$0xf]  ;;  %v7382_v21 = vld [vmem:[%s8973_s0 + $0x154] sm:$0xf]  ;;  %v2255_v27 = vrot.slane %v7312_v20, 1 }
 0x10c   :  { %2115 = vrot.lane.b32.xlu0 %v1982_v46, %s5520_s7  ;;  %v3006_v46 = vsel %vm657_vm0, %v3001_v36, %v3005_v53  ;;  %v1993_v36 = vrot.slane %v1991_v50, 1  ;;  %v7353_v53 = vcombine.low %v4608_v29, %v4609_v61  ;;  %v2302_v37 = vrot.slane %v4871_v30, 1  ;;  %v7415_v29 = vld [vmem:[%s8973_s0 + $0x88] sm:$0xf] }
 0x10d   :  { %2563 = vrot.lane.b32.xlu1 %v7145_v9, %s5522_s21  ;;  %v4448_v9 = vld [vmem:[%s8973_s0 + $0x78] sm:$0xf]  ;;  %v3268_v44 = vsel %vm1202_vm1, %v3266_v31, %v3267_v14  ;;  %v7400_v31 = vld [vmem:[%s8973_s0 + $0x8c] ss:$0 sps:$4 sm:$0x11]  }
 0x10e   :  { %v7258_v22 = vpop.permute.xlu0 %1339  ;;  %v7282_v51 = vcombine.low %v4448_v9, %v7271_v3  ;;  %v1994_v8 = vsel %vm657_vm0, %v1989_v32, %v1993_v36 }
 0x10f   :  { %v2076_v12 = vpop.permute.xlu1 %2075 }
 0x110   :  { %2371 = vrot.lane.b32.xlu0 %v2301_v26, %s5521_s16  ;;  %v3422_v26 = vsel %vm3412_vm3, %v3357_v62, %v7222_v47  ;;  %v4576_v47 = vld [vmem:[%s8973_s0 + $0x84] sm:$0xf]  ;;  %v1792_v9 = vshrl.u32 %v7282_v51, 16  ;;  %v1801_v62 = vrot.slane %v1799_v60, 1 }
 0x111   :  { %3107 = vrot.lane.b32.xlu1 %v2814_v4, %s5523_s6  ;;  %v3487_v2 = vsel %vm3477_vm4, %v3422_v26, %v1532_v57  ;;  %v1232_v4 = vsel %vm1202_vm1, %v1230_v0, %v1231_v16  ;;  %v7347_v57 = vld [vmem:[%s8973_s0 + $0x88] sm:$0xf]  ;;  %v5233_v0 = vld [vmem:[%s8973_s0 + $0x164] ss:$0 sps:$4 sm:$0x11]  }
 0x112   :  { %v7284_v55 = vpop.permute.xlu0 %1563  ;;  %v3552_v19 = vsel %vm3542_vm5, %v3487_v2, %v2076_v12  ;;  %v4535_v12 = vld [vmem:[%s8973_s0 + $0x78] sm:$0xe]  ;;  %v7361_v56 = vcombine.low %v4576_v47, %v7347_v57  ;;  %v3008_v2 = vshrl.u32 %v7353_v53, 16 }
 0x113   :  { %v2332_v33 = vpop.permute.xlu1 %2331 }
 0x114   :  { %2595 = vrot.lane.b32.xlu0 %v4902_v15, %s5522_s21  ;;  %v1794_v15 = vshll.u32 %v7282_v51, 16  ;;  %v3617_v48 = vsel %vm3607_vm6, %v3552_v19, %v2332_v33  ;;  %v2303_v33 = vrot.slane %v7291_v54, 1  ;;  %v3454_v54 = vsel %vm3412_vm3, %v3389_v24, %v7258_v22  ;;  %v5485_v22 = vld [vmem:[%s8973_s0 + $0x134] ss:$0 sps:$4 sm:$0x11]  }
 0x115   :  { %1092 = vrot.lane.b32.xlu1 %v969_v6, %s5516_s15  ;;  %v3314_v6 = vrot.slane %v4963_v11, 1  ;;  %v3015_v11 = vshll.u32 %v5233_v0, 16  ;;  %v2818_v26 = vshll.u32 %v7361_v56, 16  ;;  %v2816_v60 = vshrl.u32 %v7361_v56, 16 }
 0x116   :  { %v2108_v35 = vpop.permute.xlu0 %2107  ;;  %v1796_v13 = vrot.slane %v1794_v15, 1  ;;  %v2304_v49 = vsel %vm1202_vm1, %v2302_v37, %v2303_v33  ;;  %v137_v37 = vld [vmem:[%s8973_s0 + $0x150] sm:$0xe] }
 0x117   :  { %v2556_v25 = vpop.permute.xlu1 %2555 }
 0x118   :  { %3139 = vrot.lane.b32.xlu0 %v3006_v46, %s5523_s6  ;;  %v3682_v28 = vsel %vm3672_vm7, %v3617_v48, %v2556_v25  ;;  %v1797_v16 = vor.u32 %v1796_v13, %v1792_v9  ;;  %v4855_v46 = vcombine.low %v4535_v12, %v7271_v3  ;;  %v3519_v3 = vsel %vm3477_vm4, %v3454_v54, %v7284_v55  ;;  %v121_v9 = vld [vmem:[%s8973_s0 + $0x78] sm:$0xe]  ;;  %v7429_v13 = vld [vmem:[%s8973_s0 + $0x158] ss:$0 sps:$4 sm:$0x11]  }
 0x119   :  { %1349 = vrot.lane.b32.xlu1 %v1280_v58, %s5517_s11  ;;  %v3010_v58 = vshll.u32 %v7353_v53, 16  ;;  %v3584_v50 = vsel %vm3542_vm5, %v3519_v3, %v2108_v35  ;;  %v7407_v25 = vcombine.low %v67_v5, %v7382_v21  ;;  %v2820_v48 = vrot.slane %v2818_v26, 1 }
 0x11a   :  { %v2364_v23 = vpop.permute.xlu0 %2363  ;;  %v1802_v20 = vsel %vm657_vm0, %v1797_v16, %v1801_v62  ;;  %v2254_v35 = vrot.slane %v4855_v46, 1  ;;  %v978_v0 = vshll.u32 %v7429_v13, 16  ;;  %v7456_v62 = vld [vmem:[%s8973_s0 + $0x8c] ss:$0 sps:$4 sm:$0x11]  }
 0x11b   :  { %v3100_v18 = vpop.permute.xlu1 %3099  ;;  %v3649_v55 = vsel %vm3607_vm6, %v3584_v50, %v2364_v23  ;;  %v2823_v23 = vshll.u32 %v7400_v31, 16  ;;  %v973_v12 = vshll.u32 %v7407_v25, 16  ;;  %v2821_v24 = vor.u32 %v2820_v48, %v2816_v60  ;;  %v4660_v60 = vld [vmem:[%s8973_s0 + $0x60] sm:$0xe] }
 0x11c   :  { %1317 = vrot.lane.b32.xlu0 %v1232_v4, %s5517_s11  ;;  %v3751_v34 = vsel %vm3737_vm8, %v3682_v28, %v3100_v18  ;;  %v3012_v4 = vrot.slane %v3010_v58, 1  ;;  %v2256_v36 = vsel %vm1202_vm1, %v2254_v35, %v2255_v27  ;;  %v3017_v18 = vrot.slane %v3015_v11, 1  ;;  %v4482_v27 = vld [vmem:[%s8973_s0 + $0x15c] sm:$0xf] }
 0x11d   :  { %1573 = vrot.lane.b32.xlu1 %v7263_v1, %s5518_s25  ;;  %4074 = vmatmul.mubr.bf16.gmra.mrb[16].mxu0 %v3751_v34  ;;  %v3315_v1 = vrot.slane %v5485_v22, 1  ;;  %v2825_v16 = vrot.slane %v2823_v23, 1  ;;  %v971_v54 = vshrl.u32 %v7407_v25, 16  ;;  %v980_v50 = vrot.slane %v978_v0, 1 }
 0x11e   :  { %v2588_v15 = vpop.permute.xlu0 %2587  ;;  %4989 = vmatprep.mubr.msk.bf16.mxu0 %vm3347_vm2, %v3268_v44  ;;  %v3013_v28 = vor.u32 %v3012_v4, %v3008_v2  ;;  %v5486_v44 = vld [vmem:[%s8973_s0 + $0x7c] sm:$0xf]  ;;  %v3359_v23 = vsel %vm3347_vm2, %v5625_v40, %v6317_v63 }
 0x11f   :  { %v7390_v52 = vpop.permute.xlu1 %1084  ;;  %v3714_v61 = vsel %vm3672_vm7, %v3649_v55, %v2588_v15  ;;  %v3316_v30 = vsel %vm1202_vm1, %v3314_v6, %v3315_v1  ;;  %v4760_v34 = vcombine.low %v121_v9, %v5486_v44  ;;  %v975_v15 = vrot.slane %v973_v12, 1  ;;  %v5487_v1 = vld [vmem:[%s8973_s0 + $0x80] ss:$0 sps:$4 sm:$0x11]   ;;  %v4552_v40 = vld [vmem:[%s8973_s0 + $0x15c] sm:$0xe] }
 0x120   :  { %1541 = vrot.lane.b32.xlu0 %v7282_v51, %s5518_s25  ;;  %v4450_v51 = vld [vmem:[%s8973_s0 + $0x84] sm:$0xf]  ;;  %v3018_v5 = vsel %vm657_vm0, %v3013_v28, %v3017_v18  ;;  %v1234_v3 = vrot.slane %v5487_v1, 1  ;;  %v1811_v55 = vshll.u32 %v7456_v62, 16  ;;  %v9009_v63 = vld [vmem:[#allocation21_spill] sm:$0xff]  ;;  %v3318_v1 = vrot.slane %v6860_v10, 1 }
 0x121   :  { %2117 = vrot.lane.b32.xlu1 %v1994_v8, %s5520_s7  ;;  %v7435_v32 = vcombine.low %v4450_v51, %v7415_v29  ;;  %v4776_v8 = vcombine.low %v137_v37, %v7382_v21  ;;  %v1233_v22 = vrot.slane %v4760_v34, 1  ;;  %v976_v35 = vor.u32 %v975_v15, %v971_v54  ;;  %v5488_v54 = vld [vmem:[%s8973_s0 + $0x64] sm:$0xf] }
 0x122   :  { %v3132_v14 = vpop.permute.xlu0 %3131  ;;  %v1813_v12 = vrot.slane %v1811_v55, 1  ;;  %v4948_v15 = vcombine.low %v4660_v60, %v5488_v54 }
 0x123   :  { %v3799_v47 = vsel %vm3737_vm8, %v3714_v61, %v3132_v14  ;;  %v7421_v19 = vpop.permute.xlu1 %1341  ;;  %v1806_v46 = vshll.u32 %v7435_v32, 16  ;;  %v1804_v11 = vshrl.u32 %v7435_v32, 16  ;;  %v1281_v51 = vrot.slane %v4776_v8, 1 }
 0x124   :  { %2085 = vrot.lane.b32.xlu0 %v1802_v20, %s5520_s7  ;;  %4202 = vmatmul.mubr.bf16.gmra.mrb[16].mxu1 %v3799_v47  ;;  %v4676_v20 = vld [vmem:[%s8973_s0 + $0x138] sm:$0xe]  ;;  %v1282_v61 = vrot.slane %v7429_v13, 1  ;;  %v1235_v4 = vsel %vm1202_vm1, %v1233_v22, %v1234_v3  ;;  %v4579_v47 = vld [vmem:[%s8973_s0 + $0x94] sm:$0xf]  ;;  %v981_v18 = vsel %vm657_vm0, %v976_v35, %v980_v50 }
 0x125   :  { %2373 = vrot.lane.b32.xlu1 %v2304_v49, %s5521_s16  ;;  %5005 = vmatprep.mubr.msk.bf16.mxu1 %vm3347_vm2, %v3316_v30  ;;  %v2826_v49 = vsel %vm657_vm0, %v2821_v24, %v2825_v16  ;;  %v1808_v26 = vrot.slane %v1806_v46, 1  ;;  %v4578_v30 = vld [vmem:[%s8973_s0 + $0x90] sm:$0xf]  ;;  %v7503_v13 = vld [vmem:[%s8973_s0 + $0x164] ss:$0 sps:$4 sm:$0x11]   ;;  %v4964_v48 = vcombine.low %v4676_v20, %v6816_v41  ;;  %v3391_v41 = vsel %vm3347_vm2, %v9009_v63, %v7390_v52 }
 0x126   :  { %v7441_v6 = vpop.permute.xlu0 %1309  ;;  %v1283_v44 = vsel %vm1202_vm1, %v1281_v51, %v1282_v61  ;;  %v7518_v37 = vcombine.low %v4578_v30, %v4579_v47  ;;  %v69_v16 = vld [vmem:[%s8973_s0 + $0x15c] sm:$0xf]  ;;  %v7534_v46 = vld [vmem:[%s8973_s0 + $0x160] sm:$0xf]  ;;  %v3456_v52 = vsel %vm3412_vm3, %v3391_v41, %v7421_v19  ;;  %v2003_v8 = vshll.u32 %v7503_v13, 16 }
 0x127   :  { %v7449_v33 = vpop.permute.xlu1 %1565  ;;  %v3317_v22 = vrot.slane %v4964_v48, 1  ;;  %v7556_v10 = vcombine.low %v69_v16, %v7534_v46  ;;  %v5489_v35 = vld [vmem:[%s8973_s0 + $0x68] ss:$0 sps:$4 sm:$0x11]  }
 0x128   :  { %2341 = vrot.lane.b32.xlu0 %v2256_v36, %s5521_s16  ;;  %v1809_v36 = vor.u32 %v1808_v26, %v1804_v11  ;;  %v3521_v3 = vsel %vm3477_vm4, %v3456_v52, %v7449_v33  ;;  %v2830_v26 = vshll.u32 %v7518_v37, 16  ;;  %v3424_v33 = vsel %vm3412_vm3, %v3359_v23, %v7441_v6 }
 0x129   :  { %2597 = vrot.lane.b32.xlu1 %v7353_v53, %s5522_s21  ;;  %v7475_v53 = vld [vmem:[%s8973_s0 + $0x160] sm:$0xf]  ;;  %v3270_v51 = vrot.slane %v5489_v35, 1  ;;  %v3319_v30 = vsel %vm1202_vm1, %v3317_v22, %v3318_v1  ;;  %v2005_v48 = vrot.slane %v2003_v8, 1  ;;  %v7620_v22 = vld [vmem:[%s8973_s0 + $0x16c] sm:$0xf] }
 0x12a   :  { %v7463_v58 = vpop.permute.xlu0 %1533  ;;  %v7488_v14 = vcombine.low %v4482_v27, %v7475_v53  ;;  %v1814_v27 = vsel %vm657_vm0, %v1809_v36, %v1813_v12  ;;  %v4872_v19 = vcombine.low %v4552_v40, %v7475_v53  ;;  %v4610_v53 = vld [vmem:[%s8973_s0 + $0x168] sm:$0xf]  ;;  %v2828_v36 = vshrl.u32 %v7518_v37, 16 }
 0x12b   :  { %v2110_v21 = vpop.permute.xlu1 %2109  ;;  %v3489_v6 = vsel %vm3477_vm4, %v3424_v33, %v7463_v58 }
 0x12c   :  { %2565 = vrot.lane.b32.xlu0 %v7361_v56, %s5522_s21  ;;  %v4536_v56 = vld [vmem:[%s8973_s0 + $0x84] sm:$0xe]  ;;  %v1998_v34 = vshll.u32 %v7488_v14, 16  ;;  %v1996_v24 = vshrl.u32 %v7488_v14, 16 }
 0x12d   :  { %3141 = vrot.lane.b32.xlu1 %v3018_v5, %s5523_s6  ;;  %v4856_v28 = vcombine.low %v4536_v56, %v7415_v29  ;;  %v2258_v29 = vrot.slane %v7456_v62, 1  ;;  %v5246_v5 = vld [vmem:[%s8973_s0 + $0x98] ss:$0 sps:$4 sm:$0x11]  }
 0x12e   :  { %v2078_v2 = vpop.permute.xlu0 %2077  ;;  %v2000_v11 = vrot.slane %v1998_v34, 1  ;;  %v985_v34 = vshll.u32 %v7556_v10, 16 }
 0x12f   :  { %v2366_v9 = vpop.permute.xlu1 %2365  ;;  %v2257_v50 = vrot.slane %v4856_v28, 1  ;;  %v3554_v47 = vsel %vm3542_vm5, %v3489_v6, %v2078_v2  ;;  %v5490_v6 = vld [vmem:[%s8973_s0 + $0x88] sm:$0xf] }
 0x130   :  { %3109 = vrot.lane.b32.xlu0 %v2826_v49, %s5523_s6  ;;  %v3586_v49 = vsel %vm3542_vm5, %v3521_v3, %v2110_v21  ;;  %v3269_v21 = vrot.slane %v4948_v15, 1  ;;  %v2001_v58 = vor.u32 %v2000_v11, %v1996_v24  ;;  %v7604_v24 = vld [vmem:[%s8973_s0 + $0x170] ss:$0 sps:$4 sm:$0x11]   ;;  %v987_v8 = vrot.slane %v985_v34, 1 }
 0x131   :  { %1319 = vrot.lane.b32.xlu1 %v1235_v4, %s5517_s11  ;;  %v3651_v55 = vsel %vm3607_vm6, %v3586_v49, %v2366_v9  ;;  %v2835_v4 = vshll.u32 %v5246_v5, 16  ;;  %v2259_v60 = vsel %vm1202_vm1, %v2257_v50, %v2258_v29  ;;  %v2306_v29 = vrot.slane %v7503_v13, 1  ;;  %v138_v3 = vld [vmem:[%s8973_s0 + $0x15c] sm:$0xe]  ;;  %v122_v50 = vld [vmem:[%s8973_s0 + $0x84] sm:$0xe] }
 0x132   :  { %v2334_v0 = vpop.permute.xlu0 %2333  ;;  %v3271_v40 = vsel %vm1202_vm1, %v3269_v21, %v3270_v51  ;;  %v2006_v16 = vsel %vm657_vm0, %v2001_v58, %v2005_v48 }
 0x133   :  { %v2590_v62 = vpop.permute.xlu1 %2589  ;;  %v3619_v23 = vsel %vm3607_vm6, %v3554_v47, %v2334_v0  ;;  %v2305_v0 = vrot.slane %v4872_v19, 1  ;;  %v2837_v54 = vrot.slane %v2835_v4, 1  ;;  %v4452_v19 = vld [vmem:[%s8973_s0 + $0x90] sm:$0xf]  ;;  %v4661_v4 = vld [vmem:[%s8973_s0 + $0x6c] sm:$0xe] }
 0x134   :  { %1094 = vrot.lane.b32.xlu0 %v981_v18, %s5516_s15  ;;  %v3716_v61 = vsel %vm3672_vm7, %v3651_v55, %v2590_v62  ;;  %v2832_v18 = vrot.slane %v2830_v26, 1  ;;  %v983_v62 = vshrl.u32 %v7556_v10, 16  ;;  %v3027_v26 = vshll.u32 %v7604_v24, 16  ;;  %v7643_v55 = vld [vmem:[%s8973_s0 + $0x94] sm:$0xf] }
 0x135   :  { %1543 = vrot.lane.b32.xlu1 %v7435_v32, %s5518_s25  ;;  %v7567_v32 = vld [vmem:[%s8973_s0 + $0x16c] sm:$0xf]  ;;  %v4949_v34 = vcombine.low %v4661_v4, %v6980_v7  ;;  %v4553_v7 = vld [vmem:[%s8973_s0 + $0x168] sm:$0xe] }
 0x136   :  { %v2558_v20 = vpop.permute.xlu0 %2557  ;;  %v7584_v12 = vcombine.low %v4610_v53, %v7567_v32  ;;  %v2833_v13 = vor.u32 %v2832_v18, %v2828_v36  ;;  %v988_v21 = vor.u32 %v987_v8, %v983_v62  ;;  %v3029_v47 = vrot.slane %v3027_v26, 1  ;;  %v4612_v62 = vld [vmem:[%s8973_s0 + $0x174] sm:$0xf] }
 0x137   :  { %v3134_v56 = vpop.permute.xlu1 %3133  ;;  %v3684_v2 = vsel %vm3672_vm7, %v3619_v23, %v2558_v20 }
 0x138   :  { %1351 = vrot.lane.b32.xlu0 %v1283_v44, %s5517_s11  ;;  %v3802_v9 = vsel %vm3737_vm8, %v3716_v61, %v3134_v56  ;;  %v7590_v44 = vld [vmem:[%s8973_s0 + $0x164] ss:$0 sps:$4 sm:$0x11]   ;;  %v3022_v15 = vshll.u32 %v7584_v12, 16  ;;  %v3020_v49 = vshrl.u32 %v7584_v12, 16  ;;  %v2838_v53 = vsel %vm657_vm0, %v2833_v13, %v2837_v54  ;;  %v9011_v54 = vld [vmem:[#allocation3_spill] sm:$0xff] }
 0x139   :  { %2087 = vrot.lane.b32.xlu1 %v1814_v27, %s5520_s7  ;;  %4210 = vmatmul.mubr.bf16.gmra.mrb[20].mxu1 %v3802_v9  ;;  %v990_v5 = vshll.u32 %v7590_v44, 16  ;;  %v2307_v27 = vsel %vm1202_vm1, %v2305_v0, %v2306_v29  ;;  %v4761_v61 = vcombine.low %v122_v50, %v5490_v6  ;;  %v7654_v56 = vcombine.low %v4452_v19, %v7643_v55  ;;  %v4580_v6 = vld [vmem:[%s8973_s0 + $0x9c] sm:$0xf] }
 0x13a   :  { %v3102_v28 = vpop.permute.xlu0 %3101  ;;  %5006 = vmatprep.mubr.msk.bf16.mxu1 %vm3347_vm2, %v3319_v30  ;;  %v3024_v11 = vrot.slane %v3022_v15, 1  ;;  %v1285_v58 = vrot.slane %v7590_v44, 1  ;;  %v3272_v50 = vrot.slane %v4949_v34, 1  ;;  %v3273_v19 = vrot.slane %v7023_v38, 1 }
 0x13b   :  { %v3754_v63 = vsel %vm3737_vm8, %v3684_v2, %v3102_v28  ;;  %v7596_v41 = vpop.permute.xlu1 %1311  ;;  %v992_v35 = vrot.slane %v990_v5, 1  ;;  %v1236_v2 = vrot.slane %v4761_v61, 1  ;;  %v5491_v28 = vld [vmem:[%s8973_s0 + $0x8c] ss:$0 sps:$4 sm:$0x11]  }
 0x13c   :  { %1575 = vrot.lane.b32.xlu0 %v7488_v14, %s5518_s25  ;;  %4082 = vmatmul.mubr.bf16.gmra.mrb[20].mxu0 %v3754_v63  ;;  %v4484_v14 = vld [vmem:[%s8973_s0 + $0x168] sm:$0xf]  ;;  %v3025_v30 = vor.u32 %v3024_v11, %v3020_v49  ;;  %v1237_v18 = vrot.slane %v5491_v28, 1  ;;  %v1818_v63 = vshll.u32 %v7654_v56, 16  ;;  %v4677_v49 = vld [vmem:[%s8973_s0 + $0x144] sm:$0xe] }
 0x13d   :  { %2343 = vrot.lane.b32.xlu1 %v2259_v60, %s5521_s16  ;;  %4990 = vmatprep.mubr.msk.bf16.mxu0 %vm3347_vm2, %v3271_v40  ;;  %v7638_v33 = vcombine.low %v4484_v14, %v7620_v22  ;;  %v993_v48 = vsel %vm657_vm0, %v988_v21, %v992_v35  ;;  %v7679_v40 = vld [vmem:[%s8973_s0 + $0x98] ss:$0 sps:$4 sm:$0x11]   ;;  %v5263_v34 = vld [vmem:[%s8973_s0 + $0x17c] ss:$0 sps:$4 sm:$0x11]  }
 0x13e   :  { %v7613_v52 = vpop.permute.xlu0 %1086  ;;  %v3030_v44 = vsel %vm657_vm0, %v3025_v30, %v3029_v47  ;;  %v1820_v26 = vrot.slane %v1818_v63, 1  ;;  %v1823_v38 = vshll.u32 %v7679_v40, 16  ;;  %v5492_v30 = vld [vmem:[%s8973_s0 + $0x148] sm:$0xf] }
 0x13f   :  { %v1536_v1 = vpop.permute.xlu1 %1535  ;;  %v2010_v9 = vshll.u32 %v7638_v33, 16  ;;  %v2008_v0 = vshrl.u32 %v7638_v33, 16  ;;  %v4965_v47 = vcombine.low %v4677_v49, %v5492_v30  ;;  %v3393_v63 = vsel %vm3347_vm2, %v6670_v59, %v7613_v52 }
 0x140   :  { %2119 = vrot.lane.b32.xlu0 %v2006_v16, %s5520_s7 }
 0x141   :  { %2567 = vrot.lane.b32.xlu1 %v7518_v37, %s5522_s21  ;;  %v4777_v37 = vcombine.low %v138_v3, %v7534_v46  ;;  %v7663_v46 = vld [vmem:[%s8973_s0 + $0x170] ss:$0 sps:$4 sm:$0x11]   ;;  %v2012_v29 = vrot.slane %v2010_v9, 1  ;;  %v1238_v3 = vsel %vm1202_vm1, %v1236_v2, %v1237_v18 }
 0x142   :  { %v7645_v20 = vpop.permute.xlu0 %1343  ;;  %v2015_v16 = vshll.u32 %v7663_v46, 16 }
 0x143   :  { %v2080_v51 = vpop.permute.xlu1 %2079  ;;  %v1284_v23 = vrot.slane %v4777_v37, 1  ;;  %v2013_v35 = vor.u32 %v2012_v29, %v2008_v0  ;;  %v71_v29 = vld [vmem:[%s8973_s0 + $0x168] sm:$0xf]  ;;  %v3458_v59 = vsel %vm3412_vm3, %v3393_v63, %v7645_v20 }
 0x144   :  { %2375 = vrot.lane.b32.xlu0 %v2307_v27, %s5521_s16  ;;  %v4613_v27 = vld [vmem:[%s8973_s0 + $0x178] sm:$0xf]  ;;  %v2017_v37 = vrot.slane %v2015_v16, 1  ;;  %v7751_v16 = vld [vmem:[%s8973_s0 + $0x16c] sm:$0xf] }
 0x145   :  { %3111 = vrot.lane.b32.xlu1 %v2838_v53, %s5523_s6  ;;  %v1286_v13 = vsel %vm1202_vm1, %v1284_v23, %v1285_v58  ;;  %v4873_v53 = vcombine.low %v4553_v7, %v7620_v22  ;;  %v4537_v22 = vld [vmem:[%s8973_s0 + $0x90] sm:$0xe]  ;;  %v2309_v23 = vrot.slane %v7663_v46, 1  ;;  %v3274_v58 = vsel %vm1202_vm1, %v3272_v50, %v3273_v19 }
 0x146   :  { %v7666_v60 = vpop.permute.xlu0 %1567  ;;  %v2018_v46 = vsel %vm657_vm0, %v2013_v35, %v2017_v37  ;;  %v4857_v0 = vcombine.low %v4537_v22, %v7643_v55  ;;  %v3320_v7 = vrot.slane %v4965_v47, 1  ;;  %v5493_v55 = vld [vmem:[%s8973_s0 + $0x14c] ss:$0 sps:$4 sm:$0x11]   ;;  %v123_v35 = vld [vmem:[%s8973_s0 + $0x90] sm:$0xe] }
 0x147   :  { %v2336_v36 = vpop.permute.xlu1 %2335  ;;  %v2308_v28 = vrot.slane %v4873_v53, 1  ;;  %v7799_v37 = vld [vmem:[%s8973_s0 + $0x170] ss:$0 sps:$4 sm:$0x11]  }
 0x148   :  { %2599 = vrot.lane.b32.xlu0 %v7584_v12, %s5522_s21  ;;  %v9010_v12 = vld [vmem:[#allocation13_spill] sm:$0xff] }
 0x149   :  { %1096 = vrot.lane.b32.xlu1 %v993_v48, %s5516_s15  ;;  %v3361_v15 = vsel %vm3347_vm2, %v9011_v54, %v9010_v12  ;;  %v3321_v12 = vrot.slane %v5493_v55, 1  ;;  %v3523_v54 = vsel %vm3477_vm4, %v3458_v59, %v7666_v60  ;;  %v4486_v59 = vld [vmem:[%s8973_s0 + $0x174] sm:$0xf] }
 0x14a   :  { %v2112_v14 = vpop.permute.xlu0 %2111  ;;  %v3426_v8 = vsel %vm3412_vm3, %v3361_v15, %v7596_v41  ;;  %v1816_v41 = vshrl.u32 %v7654_v56, 16 }
 0x14b   :  { %v2560_v5 = vpop.permute.xlu1 %2559  ;;  %v3491_v11 = vsel %vm3477_vm4, %v3426_v8, %v1536_v1  ;;  %v4581_v1 = vld [vmem:[%s8973_s0 + $0xa0] sm:$0xf]  ;;  %v3588_v20 = vsel %vm3542_vm5, %v3523_v54, %v2112_v14  ;;  %v5264_v8 = vld [vmem:[%s8973_s0 + $0xa4] ss:$0 sps:$4 sm:$0x11]   ;;  %v2260_v14 = vrot.slane %v4857_v0, 1 }
 0x14c   :  { %3143 = vrot.lane.b32.xlu0 %v3030_v44, %s5523_s6  ;;  %v3556_v21 = vsel %vm3542_vm5, %v3491_v11, %v2080_v51  ;;  %v7723_v51 = vcombine.low %v4612_v62, %v4613_v27  ;;  %v1821_v2 = vor.u32 %v1820_v26, %v1816_v41  ;;  %v7733_v18 = vcombine.low %v4580_v6, %v4581_v1  ;;  %v4454_v11 = vld [vmem:[%s8973_s0 + $0x9c] sm:$0xf]  ;;  %v7787_v41 = vld [vmem:[%s8973_s0 + $0xa0] sm:$0xf] }
 0x14d   :  { %1353 = vrot.lane.b32.xlu1 %v1286_v13, %s5517_s11  ;;  %v3621_v61 = vsel %vm3607_vm6, %v3556_v21, %v2336_v36  ;;  %v1825_v44 = vrot.slane %v1823_v38, 1  ;;  %v2261_v13 = vrot.slane %v7679_v40, 1  ;;  %v2310_v62 = vsel %vm1202_vm1, %v2308_v28, %v2309_v23 }
 0x14e   :  { %v2368_v4 = vpop.permute.xlu0 %2367  ;;  %v3686_v9 = vsel %vm3672_vm7, %v3621_v61, %v2560_v5  ;;  %v2842_v5 = vshll.u32 %v7733_v18, 16  ;;  %v3039_v27 = vshll.u32 %v5263_v34, 16  ;;  %v3032_v19 = vshrl.u32 %v7723_v51, 16 }
 0x14f   :  { %v3104_v48 = vpop.permute.xlu1 %3103  ;;  %v3653_v60 = vsel %vm3607_vm6, %v3588_v20, %v2368_v4  ;;  %v1826_v40 = vsel %vm657_vm0, %v1821_v2, %v1825_v44  ;;  %v3322_v26 = vsel %vm1202_vm1, %v3320_v7, %v3321_v12  ;;  %v2840_v38 = vshrl.u32 %v7733_v18, 16  ;;  %v7826_v44 = vld [vmem:[%s8973_s0 + $0xa4] ss:$0 sps:$4 sm:$0x11]  }
 0x150   :  { %1321 = vrot.lane.b32.xlu0 %v1238_v3, %s5517_s11  ;;  %v3757_v36 = vsel %vm3737_vm8, %v3686_v9, %v3104_v48  ;;  %v7774_v3 = vcombine.low %v71_v29, %v7751_v16  ;;  %v2844_v6 = vrot.slane %v2842_v5, 1  ;;  %v2847_v1 = vshll.u32 %v5264_v8, 16  ;;  %v5494_v48 = vld [vmem:[%s8973_s0 + $0x94] sm:$0xf]  ;;  %v4538_v5 = vld [vmem:[%s8973_s0 + $0x9c] sm:$0xe] }
 0x151   :  { %1577 = vrot.lane.b32.xlu1 %v7638_v33, %s5518_s25  ;;  %4090 = vmatmul.mubr.bf16.gmra.mrb[24].mxu0 %v3757_v36  ;;  %v3034_v33 = vshll.u32 %v7723_v51, 16  ;;  %v2262_v4 = vsel %vm1202_vm1, %v2260_v14, %v2261_v13  ;;  %v7807_v22 = vcombine.low %v4454_v11, %v7787_v41  ;;  %v3041_v9 = vrot.slane %v3039_v27, 1 }
 0x152   :  { %v2592_v52 = vpop.permute.xlu0 %2591  ;;  %4991 = vmatprep.mubr.msk.bf16.mxu0 %vm3347_vm2, %v3274_v58  ;;  %v997_v61 = vshll.u32 %v7774_v3, 16  ;;  %v4762_v23 = vcombine.low %v123_v35, %v5494_v48  ;;  %v139_v58 = vld [vmem:[%s8973_s0 + $0x168] sm:$0xe]  ;;  %v1002_v2 = vshll.u32 %v7799_v37, 16  ;;  %v2845_v28 = vor.u32 %v2844_v6, %v2840_v38  ;;  %v9013_v38 = vld [vmem:[#allocation2_spill] sm:$0xff] }
 0x153   :  { %v7762_v15 = vpop.permute.xlu1 %1088  ;;  %v3036_v49 = vrot.slane %v3034_v33, 1  ;;  %v2849_v34 = vrot.slane %v2847_v1, 1  ;;  %v995_v63 = vshrl.u32 %v7774_v3, 16  ;;  %v4778_v0 = vcombine.low %v139_v58, %v7751_v16  ;;  %v4554_v48 = vld [vmem:[%s8973_s0 + $0x174] sm:$0xe] }
 0x154   :  { %1545 = vrot.lane.b32.xlu0 %v7654_v56, %s5518_s25  ;;  %v3718_v56 = vsel %vm3672_vm7, %v3653_v60, %v2592_v52  ;;  %v1830_v29 = vshll.u32 %v7807_v22, 16  ;;  %v7838_v52 = vld [vmem:[%s8973_s0 + $0x178] sm:$0xf]  ;;  %v1239_v55 = vrot.slane %v4762_v23, 1  ;;  %v1004_v54 = vrot.slane %v1002_v2, 1 }
 0x155   :  { %2121 = vrot.lane.b32.xlu1 %v2018_v46, %s5520_s7  ;;  %v3037_v47 = vor.u32 %v3036_v49, %v3032_v19  ;;  %v999_v46 = vrot.slane %v997_v61, 1  ;;  %v2850_v13 = vsel %vm657_vm0, %v2845_v28, %v2849_v34  ;;  %v7851_v8 = vcombine.low %v4486_v59, %v7838_v52  ;;  %v4678_v60 = vld [vmem:[%s8973_s0 + $0x150] sm:$0xe]  ;;  %v4582_v19 = vld [vmem:[%s8973_s0 + $0xa8] sm:$0xf] }
 0x156   :  { %v3136_v50 = vpop.permute.xlu0 %3135  ;;  %v1832_v14 = vrot.slane %v1830_v29, 1  ;;  %v1835_v27 = vshll.u32 %v7826_v44, 16  ;;  %v4583_v49 = vld [vmem:[%s8973_s0 + $0xac] sm:$0xf]  ;;  %v4966_v35 = vcombine.low %v4678_v60, %v7190_v39  ;;  %v3395_v23 = vsel %vm3347_vm2, %v6819_v43, %v7762_v15  ;;  %v73_v34 = vld [vmem:[%s8973_s0 + $0x174] sm:$0xf] }
 0x157   :  { %v3805_v53 = vsel %vm3737_vm8, %v3718_v56, %v3136_v50  ;;  %v7791_v21 = vpop.permute.xlu1 %1345  ;;  %v3042_v7 = vsel %vm657_vm0, %v3037_v47, %v3041_v9  ;;  %v1000_v20 = vor.u32 %v999_v46, %v995_v63  ;;  %v7882_v61 = vld [vmem:[%s8973_s0 + $0x17c] ss:$0 sps:$4 sm:$0x11]   ;;  %v7887_v9 = vcombine.low %v4582_v19, %v4583_v49  ;;  %v7903_v63 = vld [vmem:[%s8973_s0 + $0x178] sm:$0xf] }
 0x158   :  { %2089 = vrot.lane.b32.xlu0 %v1826_v40, %s5520_s7  ;;  %4218 = vmatmul.mubr.bf16.gmra.mrb[24].mxu1 %v3805_v53  ;;  %v1287_v40 = vrot.slane %v4778_v0, 1  ;;  %v4662_v53 = vld [vmem:[%s8973_s0 + $0x78] sm:$0xe]  ;;  %v1837_v47 = vrot.slane %v1835_v27, 1  ;;  %v2264_v2 = vrot.slane %v7826_v44, 1  ;;  %v2020_v28 = vshrl.u32 %v7851_v8, 16 }
 0x159   :  { %2377 = vrot.lane.b32.xlu1 %v2310_v62, %s5521_s16  ;;  %5007 = vmatprep.mubr.msk.bf16.mxu1 %vm3347_vm2, %v3322_v26  ;;  %v1288_v62 = vrot.slane %v7799_v37, 1  ;;  %v4858_v26 = vcombine.low %v4538_v5, %v7787_v41  ;;  %v9012_v37 = vld [vmem:[#allocation12_spill] sm:$0xff]  ;;  %v1005_v1 = vsel %vm657_vm0, %v1000_v20, %v1004_v54  ;;  %v2022_v41 = vshll.u32 %v7851_v8, 16  ;;  %v5496_v46 = vld [vmem:[%s8973_s0 + $0x7c] sm:$0xf] }
 0x15a   :  { %v7810_v30 = vpop.permute.xlu0 %1313  ;;  %v3363_v6 = vsel %vm3347_vm2, %v9013_v38, %v9012_v37  ;;  %v4950_v0 = vcombine.low %v4662_v53, %v5496_v46  ;;  %v3460_v43 = vsel %vm3412_vm3, %v3395_v23, %v7791_v21  ;;  %v3323_v29 = vrot.slane %v4966_v35, 1  ;;  %v5497_v60 = vld [vmem:[%s8973_s0 + $0x80] ss:$0 sps:$4 sm:$0x11]  }
 0x15b   :  { %v7818_v36 = vpop.permute.xlu1 %1569  ;;  %v2263_v44 = vrot.slane %v4858_v26, 1  ;;  %v3324_v59 = vrot.slane %v7233_v45, 1  ;;  %v5278_v45 = vld [vmem:[%s8973_s0 + $0xb0] ss:$0 sps:$4 sm:$0x11]   ;;  %v3428_v20 = vsel %vm3412_vm3, %v3363_v6, %v7810_v30  ;;  %v2312_v23 = vrot.slane %v7882_v61, 1 }
 0x15c   :  { %2345 = vrot.lane.b32.xlu0 %v2262_v4, %s5521_s16  ;;  %v1289_v4 = vsel %vm1202_vm1, %v1287_v40, %v1288_v62  ;;  %v4615_v62 = vld [vmem:[%s8973_s0 + $0x184] sm:$0xf]  ;;  %v3275_v5 = vrot.slane %v4950_v0, 1  ;;  %v3276_v40 = vrot.slane %v5497_v60, 1  ;;  %v2859_v35 = vshll.u32 %v5278_v45, 16 }
 0x15d   :  { %2601 = vrot.lane.b32.xlu1 %v7723_v51, %s5522_s21  ;;  %v5495_v51 = vld [vmem:[%s8973_s0 + $0x98] ss:$0 sps:$4 sm:$0x11]   ;;  %v2265_v27 = vsel %vm1202_vm1, %v2263_v44, %v2264_v2  ;;  %v7953_v38 = vld [vmem:[%s8973_s0 + $0x17c] ss:$0 sps:$4 sm:$0x11]  }
 0x15e   :  { %v7840_v33 = vpop.permute.xlu0 %1537  ;;  %v1240_v16 = vrot.slane %v5495_v51, 1  ;;  %v2027_v51 = vshll.u32 %v7882_v61, 16  ;;  %v2861_v0 = vrot.slane %v2859_v35, 1  ;;  %v7983_v44 = vld [vmem:[%s8973_s0 + $0x184] sm:$0xf] }
 0x15f   :  { %v2114_v12 = vpop.permute.xlu1 %2113  ;;  %v3493_v30 = vsel %vm3477_vm4, %v3428_v20, %v7840_v33  ;;  %v2852_v33 = vshrl.u32 %v7887_v9, 16 }
 0x160   :  { %2569 = vrot.lane.b32.xlu0 %v7733_v18, %s5522_s21  ;;  %v1828_v18 = vshrl.u32 %v7807_v22, 16  ;;  %v1241_v50 = vsel %vm1202_vm1, %v1239_v55, %v1240_v16  ;;  %v2024_v55 = vrot.slane %v2022_v41, 1  ;;  %v4874_v16 = vcombine.low %v4554_v48, %v7838_v52 }
 0x161   :  { %3145 = vrot.lane.b32.xlu1 %v3042_v7, %s5523_s6  ;;  %v3525_v7 = vsel %vm3477_vm4, %v3460_v43, %v7818_v36  ;;  %v2854_v36 = vshll.u32 %v7887_v9, 16  ;;  %v2029_v26 = vrot.slane %v2027_v51, 1  ;;  %v4456_v51 = vld [vmem:[%s8973_s0 + $0xa8] sm:$0xf] }
 0x162   :  { %v2082_v56 = vpop.permute.xlu0 %2081  ;;  %v1833_v39 = vor.u32 %v1832_v14, %v1828_v18  ;;  %v3590_v54 = vsel %vm3542_vm5, %v3525_v7, %v2114_v12  ;;  %v2311_v48 = vrot.slane %v4874_v16, 1 }
 0x163   :  { %v2370_v11 = vpop.permute.xlu1 %2369  ;;  %v3558_v19 = vsel %vm3542_vm5, %v3493_v30, %v2082_v56  ;;  %v4663_v30 = vld [vmem:[%s8973_s0 + $0x84] sm:$0xe] }
 0x164   :  { %3113 = vrot.lane.b32.xlu0 %v2850_v13, %s5523_s6  ;;  %v1838_v21 = vsel %vm657_vm0, %v1833_v39, %v1837_v47  ;;  %v7925_v13 = vcombine.low %v73_v34, %v7903_v63  ;;  %v3655_v52 = vsel %vm3607_vm6, %v3590_v54, %v2370_v11  ;;  %v2025_v11 = vor.u32 %v2024_v55, %v2020_v28  ;;  %v124_v55 = vld [vmem:[%s8973_s0 + $0x9c] sm:$0xe] }
 0x165   :  { %1323 = vrot.lane.b32.xlu1 %v1241_v50, %s5517_s11  ;;  %v3325_v50 = vsel %vm1202_vm1, %v3323_v29, %v3324_v59  ;;  %v1014_v28 = vshll.u32 %v7953_v38, 16  ;;  %v140_v59 = vld [vmem:[%s8973_s0 + $0x174] sm:$0xe]  ;;  %v2313_v7 = vsel %vm1202_vm1, %v2311_v48, %v2312_v23  ;;  %v9015_v48 = vld [vmem:[#allocation5_spill] sm:$0xff] }
 0x166   :  { %v2338_v58 = vpop.permute.xlu0 %2337  ;;  %v1009_v41 = vshll.u32 %v7925_v13, 16  ;;  %v2030_v2 = vsel %vm657_vm0, %v2025_v11, %v2029_v26  ;;  %v1007_v43 = vshrl.u32 %v7925_v13, 16  ;;  %v1291_v11 = vrot.slane %v7953_v38, 1  ;;  %v8035_v26 = vld [vmem:[%s8973_s0 + $0xb0] ss:$0 sps:$4 sm:$0x11]  }
 0x167   :  { %v2594_v15 = vpop.permute.xlu1 %2593  ;;  %v3623_v53 = vsel %vm3607_vm6, %v3558_v19, %v2338_v58  ;;  %v7968_v58 = vld [vmem:[%s8973_s0 + $0x188] ss:$0 sps:$4 sm:$0x11]  }
 0x168   :  { %1098 = vrot.lane.b32.xlu0 %v1005_v1, %s5516_s15  ;;  %v3720_v18 = vsel %vm3672_vm7, %v3655_v52, %v2594_v15  ;;  %v2856_v1 = vrot.slane %v2854_v36, 1  ;;  %v1011_v15 = vrot.slane %v1009_v41, 1  ;;  %v8005_v36 = vld [vmem:[%s8973_s0 + $0xac] sm:$0xf] }
 0x169   :  { %1547 = vrot.lane.b32.xlu1 %v7807_v22, %s5518_s25  ;;  %v4614_v22 = vld [vmem:[%s8973_s0 + $0x180] sm:$0xf] }
 0x16a   :  { %v2562_v12 = vpop.permute.xlu0 %2561  ;;  %v4906_v37 = vcombine.low %v4614_v22, %v4615_v62  ;;  %v2857_v61 = vor.u32 %v2856_v1, %v2852_v33  ;;  %v1016_v22 = vrot.slane %v1014_v28, 1  ;;  %v4951_v33 = vcombine.low %v4663_v30, %v7347_v57  ;;  %v4555_v57 = vld [vmem:[%s8973_s0 + $0x180] sm:$0xe] }
 0x16b   :  { %v3138_v14 = vpop.permute.xlu1 %3137  ;;  %v3688_v56 = vsel %vm3672_vm7, %v3623_v53, %v2562_v12  ;;  %v1012_v12 = vor.u32 %v1011_v15, %v1007_v43  ;;  %v8063_v43 = vld [vmem:[%s8973_s0 + $0x190] sm:$0xf] }
 0x16c   :  { %1355 = vrot.lane.b32.xlu0 %v1289_v4, %s5517_s11  ;;  %v3808_v49 = vsel %vm3737_vm8, %v3720_v18, %v3138_v14  ;;  %v3277_v4 = vsel %vm1202_vm1, %v3275_v5, %v3276_v40  ;;  %v3046_v34 = vshll.u32 %v4906_v37, 16  ;;  %v3044_v16 = vshrl.u32 %v4906_v37, 16  ;;  %v5498_v5 = vld [vmem:[%s8973_s0 + $0xa0] sm:$0xf] }
 0x16d   :  { %2091 = vrot.lane.b32.xlu1 %v1838_v21, %s5520_s7  ;;  %4226 = vmatmul.mubr.bf16.gmra.mrb[28].mxu1 %v3808_v49  ;;  %v3051_v21 = vshll.u32 %v7968_v58, 16  ;;  %v2862_v52 = vsel %vm657_vm0, %v2857_v61, %v2861_v0  ;;  %v4763_v60 = vcombine.low %v124_v55, %v5498_v5  ;;  %v8016_v40 = vcombine.low %v4456_v51, %v8005_v36  ;;  %v5500_v5 = vld [vmem:[%s8973_s0 + $0x160] sm:$0xf] }
 0x16e   :  { %v3106_v6 = vpop.permute.xlu0 %3105  ;;  %5008 = vmatprep.mubr.msk.bf16.mxu1 %vm3347_vm2, %v3325_v50  ;;  %v3048_v54 = vrot.slane %v3046_v34, 1  ;;  %v1017_v19 = vsel %vm657_vm0, %v1012_v12, %v1016_v22  ;;  %v1847_v34 = vshll.u32 %v8035_v26, 16  ;;  %v3278_v15 = vrot.slane %v4951_v33, 1  ;;  %v4539_v12 = vld [vmem:[%s8973_s0 + $0xa8] sm:$0xe] }
 0x16f   :  { %v3760_v39 = vsel %vm3737_vm8, %v3688_v56, %v3106_v6  ;;  %v7960_v47 = vpop.permute.xlu1 %1315  ;;  %v3053_v14 = vrot.slane %v3051_v21, 1  ;;  %v1242_v35 = vrot.slane %v4763_v60, 1  ;;  %v5499_v56 = vld [vmem:[%s8973_s0 + $0xa4] ss:$0 sps:$4 sm:$0x11]   ;;  %v1842_v1 = vshll.u32 %v8016_v40, 16 }
 0x170   :  { %1579 = vrot.lane.b32.xlu0 %v7851_v8, %s5518_s25  ;;  %4098 = vmatmul.mubr.bf16.gmra.mrb[28].mxu0 %v3760_v39  ;;  %v4488_v8 = vld [vmem:[%s8973_s0 + $0x180] sm:$0xf]  ;;  %v3049_v18 = vor.u32 %v3048_v54, %v3044_v16  ;;  %v1243_v6 = vrot.slane %v5499_v56, 1  ;;  %v1840_v51 = vshrl.u32 %v8016_v40, 16  ;;  %v4875_v16 = vcombine.low %v4555_v57, %v7983_v44 }
 0x171   :  { %2347 = vrot.lane.b32.xlu1 %v2265_v27, %s5521_s16  ;;  %4992 = vmatprep.mubr.msk.bf16.mxu0 %vm3347_vm2, %v3277_v4  ;;  %v8000_v45 = vcombine.low %v4488_v8, %v7983_v44  ;;  %v4616_v8 = vld [vmem:[%s8973_s0 + $0x18c] sm:$0xf]  ;;  %v4584_v44 = vld [vmem:[%s8973_s0 + $0xb4] sm:$0xf]  ;;  %v4859_v33 = vcombine.low %v4539_v12, %v8005_v36  ;;  %v75_v36 = vld [vmem:[%s8973_s0 + $0x180] sm:$0xf] }
 0x172   :  { %v7977_v46 = vpop.permute.xlu0 %1090  ;;  %v3054_v38 = vsel %vm657_vm0, %v3049_v18, %v3053_v14  ;;  %v1244_v21 = vsel %vm1202_vm1, %v1242_v35, %v1243_v6  ;;  %v1849_v14 = vrot.slane %v1847_v34, 1  ;;  %v8112_v6 = vld [vmem:[%s8973_s0 + $0x194] ss:$0 sps:$4 sm:$0x11]   ;;  %v2267_v57 = vrot.slane %v8035_v26, 1 }
 0x173   :  { %v1540_v29 = vpop.permute.xlu1 %1539  ;;  %v2034_v27 = vshll.u32 %v8000_v45, 16  ;;  %v2032_v41 = vshrl.u32 %v8000_v45, 16  ;;  %v3397_v35 = vsel %vm3347_vm2, %v7035_v42, %v7977_v46  ;;  %v2266_v34 = vrot.slane %v4859_v33, 1  ;;  %v8150_v26 = vld [vmem:[%s8973_s0 + $0xb8] sm:$0xf] }
 0x174   :  { %2123 = vrot.lane.b32.xlu0 %v2030_v2, %s5520_s7 }
 0x175   :  { %2571 = vrot.lane.b32.xlu1 %v7887_v9, %s5522_s21  ;;  %v4779_v9 = vcombine.low %v140_v59, %v7903_v63  ;;  %v8025_v63 = vld [vmem:[%s8973_s0 + $0x188] ss:$0 sps:$4 sm:$0x11]   ;;  %v2036_v4 = vrot.slane %v2034_v27, 1  ;;  %v3279_v59 = vrot.slane %v7400_v31, 1  ;;  %v2268_v12 = vsel %vm1202_vm1, %v2266_v34, %v2267_v57 }
 0x176   :  { %v8007_v20 = vpop.permute.xlu0 %1347  ;;  %v2039_v39 = vshll.u32 %v8025_v63, 16  ;;  %v2315_v27 = vrot.slane %v8025_v63, 1  ;;  %v8217_v57 = vld [vmem:[%s8973_s0 + $0x190] sm:$0xf] }
 0x177   :  { %v2084_v62 = vpop.permute.xlu1 %2083  ;;  %v1290_v49 = vrot.slane %v4779_v9, 1  ;;  %v2037_v31 = vor.u32 %v2036_v4, %v2032_v41  ;;  %v8081_v9 = vcombine.low %v4616_v8, %v8063_v43  ;;  %v3462_v42 = vsel %vm3412_vm3, %v3397_v35, %v8007_v20  ;;  %v5501_v41 = vld [vmem:[%s8973_s0 + $0x164] ss:$0 sps:$4 sm:$0x11]  }
 0x178   :  { %2379 = vrot.lane.b32.xlu0 %v2313_v7, %s5521_s16  ;;  %v4679_v7 = vld [vmem:[%s8973_s0 + $0x15c] sm:$0xe]  ;;  %v3327_v4 = vrot.slane %v5501_v41, 1 }
 0x179   :  { %3115 = vrot.lane.b32.xlu1 %v2862_v52, %s5523_s6  ;;  %v1292_v28 = vsel %vm1202_vm1, %v1290_v49, %v1291_v11  ;;  %v2041_v52 = vrot.slane %v2039_v39, 1  ;;  %v4967_v60 = vcombine.low %v4679_v7, %v5500_v5 }
 0x17a   :  { %v8028_v50 = vpop.permute.xlu0 %1571 }
 0x17b   :  { %v2340_v53 = vpop.permute.xlu1 %2339  ;;  %v2042_v63 = vsel %vm657_vm0, %v2037_v31, %v2041_v52  ;;  %v3527_v39 = vsel %vm3477_vm4, %v3462_v42, %v8028_v50  ;;  %v4458_v50 = vld [vmem:[%s8973_s0 + $0xb4] sm:$0xf] }
 0x17c   :  { %2603 = vrot.lane.b32.xlu0 %v4906_v37, %s5522_s21  ;;  %v9014_v37 = vld [vmem:[#allocation15_spill] sm:$0xff]  ;;  %v8179_v31 = vcombine.low %v4458_v50, %v8150_v26 }
 0x17d   :  { %1100 = vrot.lane.b32.xlu1 %v1017_v19, %s5516_s15  ;;  %v3365_v23 = vsel %vm3347_vm2, %v9015_v48, %v9014_v37  ;;  %v3280_v19 = vsel %vm1202_vm1, %v3278_v15, %v3279_v59  ;;  %v8137_v37 = vld [vmem:[%s8973_s0 + $0xbc] ss:$0 sps:$4 sm:$0x11]   ;;  %v8163_v59 = vld [vmem:[%s8975_s2] ss:$0 sm:$0xff] }
 0x17e   :  { %v2116_v2 = vpop.permute.xlu0 %2115  ;;  %v3430_v61 = vsel %vm3412_vm3, %v3365_v23, %v7960_v47  ;;  %v1844_v47 = vrot.slane %v1842_v1, 1  ;;  %v8123_v1 = vld [vmem:[%s8973_s0 + $0x184] sm:$0xf]  ;;  %v1854_v42 = vshll.u32 %v8179_v31, 16 }
 0x17f   :  { %v2564_v0 = vpop.permute.xlu1 %2563  ;;  %v3495_v55 = vsel %vm3477_vm4, %v3430_v61, %v1540_v29  ;;  %v3592_v48 = vsel %vm3542_vm5, %v3527_v39, %v2116_v2  ;;  %v8157_v61 = vcombine.low %v75_v36, %v8123_v1  ;;  %v141_v36 = vld [vmem:[%s8973_s0 + $0x180] sm:$0xe]  ;;  %v4490_v39 = vld [vmem:[%s8973_s0 + $0x18c] sm:$0xf] }
 0x180   :  { %3147 = vrot.lane.b32.xlu0 %v3054_v38, %s5523_s6  ;;  %v3560_v54 = vsel %vm3542_vm5, %v3495_v55, %v2084_v62  ;;  %v8089_v62 = vld [vmem:[%s8973_s0 + $0xb8] sm:$0xf]  ;;  %v1845_v11 = vor.u32 %v1844_v47, %v1840_v51  ;;  %v3326_v38 = vrot.slane %v4967_v60, 1  ;;  %v3063_v55 = vshll.u32 %v8112_v6, 16 }
 0x181   :  { %1357 = vrot.lane.b32.xlu1 %v1292_v28, %s5517_s11  ;;  %v3625_v29 = vsel %vm3607_vm6, %v3560_v54, %v2340_v53  ;;  %v2314_v53 = vrot.slane %v4875_v16, 1  ;;  %v8107_v56 = vcombine.low %v4584_v44, %v8089_v62  ;;  %v125_v54 = vld [vmem:[%s8973_s0 + $0xa8] sm:$0xe]  ;;  %v1019_v41 = vshrl.u32 %v8157_v61, 16 }
 0x182   :  { %v2372_v22 = vpop.permute.xlu0 %2371  ;;  %v3690_v30 = vsel %vm3672_vm7, %v3625_v29, %v2564_v0  ;;  %v1850_v23 = vsel %vm657_vm0, %v1845_v11, %v1849_v14  ;;  %v3328_v51 = vsel %vm1202_vm1, %v3326_v38, %v3327_v4  ;;  %v2871_v29 = vshll.u32 %v8137_v37, 16 }
 0x183   :  { %v3108_v18 = vpop.permute.xlu1 %3107  ;;  %v2316_v28 = vsel %vm1202_vm1, %v2314_v53, %v2315_v27  ;;  %v3657_v8 = vsel %vm3607_vm6, %v3592_v48, %v2372_v22  ;;  %v2866_v2 = vshll.u32 %v8107_v56, 16  ;;  %v2864_v5 = vshrl.u32 %v8107_v56, 16 }
 0x184   :  { %1325 = vrot.lane.b32.xlu0 %v1244_v21, %s5517_s11  ;;  %v3763_v49 = vsel %vm3737_vm8, %v3690_v30, %v3108_v18  ;;  %v8176_v21 = vld [vmem:[%s8973_s0 + $0x188] ss:$0 sps:$4 sm:$0x11]   ;;  %v1021_v30 = vshll.u32 %v8157_v61, 16  ;;  %v4780_v50 = vcombine.low %v141_v36, %v8123_v1  ;;  %v4680_v1 = vld [vmem:[%s8973_s0 + $0x168] sm:$0xe] }
 0x185   :  { %1581 = vrot.lane.b32.xlu1 %v8000_v45, %s5518_s25  ;;  %4106 = vmatmul.mubr.bf16.gmra.mrb[32].mxu0 %v3763_v49  ;;  %v3058_v45 = vshll.u32 %v8081_v9, 16  ;;  %v2868_v60 = vrot.slane %v2866_v2, 1  ;;  %v5502_v49 = vld [vmem:[%s8973_s0 + $0xac] sm:$0xf] }
 0x186   :  { %v2596_v46 = vpop.permute.xlu0 %2595  ;;  %4993 = vmatprep.mubr.msk.bf16.mxu0 %vm3347_vm2, %v3280_v19  ;;  %v3065_v19 = vrot.slane %v3063_v55, 1  ;;  %v4764_v11 = vcombine.low %v125_v54, %v5502_v49  ;;  %v1023_v4 = vrot.slane %v1021_v30, 1  ;;  %v8235_v54 = vcombine.low %v4490_v39, %v8217_v57 }
 0x187   :  { %v8131_v20 = vpop.permute.xlu1 %1092  ;;  %v3722_v0 = vsel %vm3672_vm7, %v3657_v8, %v2596_v46  ;;  %v3060_v7 = vrot.slane %v3058_v45, 1  ;;  %v2873_v46 = vrot.slane %v2871_v29, 1  ;;  %v8206_v45 = vld [vmem:[%s8973_s0 + $0xbc] ss:$0 sps:$4 sm:$0x11]   ;;  %v2869_v38 = vor.u32 %v2868_v60, %v2864_v5 }
 0x188   :  { %1549 = vrot.lane.b32.xlu0 %v8016_v40, %s5518_s25  ;;  %v3056_v40 = vshrl.u32 %v8081_v9, 16  ;;  %v1024_v29 = vor.u32 %v1023_v4, %v1019_v41  ;;  %v1293_v30 = vrot.slane %v4780_v50, 1  ;;  %v2046_v36 = vshll.u32 %v8235_v54, 16  ;;  %v8292_v50 = vld [vmem:[%s8973_s0 + $0x190] sm:$0xf] }
 0x189   :  { %2125 = vrot.lane.b32.xlu1 %v2042_v63, %s5520_s7  ;;  %v1026_v63 = vshll.u32 %v8176_v21, 16 }
 0x18a   :  { %v3140_v15 = vpop.permute.xlu0 %3139  ;;  %v3061_v27 = vor.u32 %v3060_v7, %v3056_v40 }
 0x18b   :  { %v3811_v47 = vsel %vm3737_vm8, %v3722_v0, %v3140_v15  ;;  %v8168_v16 = vpop.permute.xlu1 %1349  ;;  %v1028_v2 = vrot.slane %v1026_v63, 1  ;;  %v1852_v0 = vshrl.u32 %v8179_v31, 16  ;;  %v1856_v15 = vrot.slane %v1854_v42, 1 }
 0x18c   :  { %2093 = vrot.lane.b32.xlu0 %v1850_v23, %s5520_s7  ;;  %4234 = vmatmul.mubr.bf16.gmra.mrb[32].mxu1 %v3811_v47  ;;  %v4043_v52 = vpop.f32.mrb[0].mxu0  ;;  %v3066_v23 = vsel %vm657_vm0, %v3061_v27, %v3065_v19  ;;  %v1859_v47 = vshll.u32 %v8206_v45, 16  ;;  %v8260_v27 = vld [vmem:[%s8973_s0 + $0xc4] sm:$0xf] }
 0x18d   :  { %v4044_v22 = vadd.f32 %v8163_v59, %v4043_v52  ;;  %2381 = vrot.lane.b32.xlu1 %v2316_v28, %s5521_s16  ;;  %v4045_v44 = vpop.f32.mrb[1].mxu0  ;;  %5009 = vmatprep.mubr.msk.bf16.mxu1 %vm3347_vm2, %v3328_v51  ;;  %v1245_v28 = vrot.slane %v4764_v11, 1  ;;  %v1294_v51 = vrot.slane %v8176_v21, 1  ;;  %v8248_v21 = vld [vmem:[%s8973_s0 + $0x194] ss:$0 sps:$4 sm:$0x11]   ;;  %v1857_v49 = vor.u32 %v1856_v15, %v1852_v0 }
 0x18e   :  { %v8189_v18 = vpop.permute.xlu0 %1317  ;;  %v4046_v14 = vpop.f32.mrb[2].mxu0  ;;  %v4664_v11 = vld [vmem:[%s8973_s0 + $0x90] sm:$0xe]  ;;  %v1029_v4 = vsel %vm657_vm0, %v1024_v29, %v1028_v2  ;;  %v2051_v39 = vshll.u32 %v8248_v21, 16  ;;  %v2270_v15 = vrot.slane %v8206_v45, 1 }
 0x18f   :  { %5339 = vtanh.f32 %v4044_v22  ;;  %v4047_v53 = vadd.f32 %v8163_v59, %v4046_v14  ;;  %v8195_v33 = vpop.permute.xlu1 %1573  ;;  %v4048_v35 = vpop.f32.mrb[3].mxu0  ;;  %v4586_v14 = vld [vmem:[%s8973_s0 + $0xc0] sm:$0xf] }
 0x190   :  { %2349 = vrot.lane.b32.xlu0 %v2268_v12, %s5521_s16  ;;  %v2874_v12 = vsel %vm657_vm0, %v2869_v38, %v2873_v46  ;;  %v1861_v35 = vrot.slane %v1859_v47, 1  ;;  %v9016_v46 = vld [vmem:[#allocation14_spill] sm:$0xff]  ;;  %v9017_v38 = vld [vmem:[#allocation4_spill] sm:$0xff] }
 0x191   :  { %5341 = vtanh.f32 %v4047_v53  ;;  %2605 = vrot.lane.b32.xlu1 %v8081_v9, %s5522_s21  ;;  %v5503_v9 = vld [vmem:[%s8973_s0 + $0xb0] ss:$0 sps:$4 sm:$0x11]   ;;  %v4968_v53 = vcombine.low %v4680_v1, %v7567_v32  ;;  %v3367_v41 = vsel %vm3347_vm2, %v9017_v38, %v9016_v46  ;;  %v8276_v32 = vcombine.low %v4586_v14, %v8260_v27 }
 0x192   :  { %v8219_v48 = vpop.permute.xlu0 %1541  ;;  %v1246_v34 = vrot.slane %v5503_v9, 1  ;;  %v2044_v9 = vshrl.u32 %v8235_v54, 16  ;;  %v1862_v47 = vsel %vm657_vm0, %v1857_v49, %v1861_v35 }
 0x193   :  { %v4171_v8 = vpop.f32.mrb[0].mxu1  ;;  %v8226_v40 = vpop.permute.xlu1 %2117  ;;  %v2878_v29 = vshll.u32 %v8276_v32, 16 }
 0x194   :  { %v4172_v7 = vadd.f32 %v8163_v59, %v4171_v8  ;;  %v4173_v55 = vpop.f32.mrb[1].mxu1  ;;  %2573 = vrot.lane.b32.xlu0 %v8107_v56, %s5522_s21  ;;  %v4540_v56 = vld [vmem:[%s8973_s0 + $0xb4] sm:$0xe]  ;;  %v1247_v60 = vsel %vm1202_vm1, %v1245_v28, %v1246_v34  ;;  %v1295_v28 = vsel %vm1202_vm1, %v1293_v30, %v1294_v51  ;;  %v77_v34 = vld [vmem:[%s8973_s0 + $0x18c] sm:$0xf] }
 0x195   :  { %v4174_v52 = vpop.f32.mrb[2].mxu1  ;;  %3149 = vrot.lane.b32.xlu1 %v3066_v23, %s5523_s6  ;;  %v4860_v63 = vcombine.low %v4540_v56, %v8150_v26  ;;  %v3399_v26 = vsel %vm3347_vm2, %v7193_v17, %v8131_v20  ;;  %v5504_v17 = vld [vmem:[%s8973_s0 + $0x94] sm:$0xf]  ;;  %v3330_v55 = vrot.slane %v7604_v24, 1  ;;  %v8314_v24 = vld [vmem:[%s8973_s0 + $0x19c] sm:$0xf]  ;;  %v8325_v56 = vcombine.low %v77_v34, %v8292_v50 }
 0x196   :  { %5343 = vtanh.f32 %v4172_v7  ;;  %v4175_v22 = vadd.f32 %v8163_v59, %v4174_v52  ;;  %v4176_v44 = vpop.f32.mrb[3].mxu1  ;;  %v8251_v5 = vpop.permute.xlu0 %2085  ;;  %v4952_v20 = vcombine.low %v4664_v11, %v5504_v17  ;;  %v3464_v2 = vsel %vm3412_vm3, %v3399_v26, %v8168_v16  ;;  %v4618_v16 = vld [vmem:[%s8973_s0 + $0x198] sm:$0xf] }
 0x197   :  { %v2374_v19 = vpop.permute.xlu1 %2373  ;;  %v3329_v7 = vrot.slane %v4968_v53, 1  ;;  %v3529_v51 = vsel %vm3477_vm4, %v3464_v2, %v8195_v33  ;;  %v2269_v1 = vrot.slane %v4860_v63, 1  ;;  %v2048_v52 = vrot.slane %v2046_v36, 1  ;;  %v5505_v30 = vld [vmem:[%s8973_s0 + $0x98] ss:$0 sps:$4 sm:$0x11]  }
 0x198   :  { %5345 = vtanh.f32 %v4175_v22  ;;  %3117 = vrot.lane.b32.xlu0 %v2874_v12, %s5523_s6  ;;  %v3594_v45 = vsel %vm3542_vm5, %v3529_v51, %v8226_v40  ;;  %v2053_v33 = vrot.slane %v2051_v39, 1  ;;  %v4556_v12 = vld [vmem:[%s8973_s0 + $0x18c] sm:$0xe]  ;;  %v3432_v22 = vsel %vm3412_vm3, %v3367_v41, %v8189_v18 }
 0x199   :  { %v5340_v42 = vpop.eup %5339  ;;  %1327 = vrot.lane.b32.xlu1 %v1247_v60, %s5517_s11  ;;  %v3659_v44 = vsel %vm3607_vm6, %v3594_v45, %v2374_v19  ;;  %v3281_v40 = vrot.slane %v4952_v20, 1  ;;  %v3282_v14 = vrot.slane %v5505_v30, 1  ;;  %v3497_v49 = vsel %vm3477_vm4, %v3432_v22, %v8219_v48  ;;  %v8353_v48 = vld [vmem:[%s8973_s0 + $0x194] ss:$0 sps:$4 sm:$0x11]  }
 0x19a   :  { %4362 = vst [vmem:[%s8976_s3] sm:$0xff] %v5340_v42  ;;  %v2342_v23 = vpop.permute.xlu0 %2341  ;;  %v8342_v19 = vcombine.low %v4618_v16, %v8314_v24  ;;  %v3331_v53 = vsel %vm1202_vm1, %v3329_v7, %v3330_v55  ;;  %v3562_v63 = vsel %vm3542_vm5, %v3497_v49, %v8251_v5  ;;  %v2271_v42 = vsel %vm1202_vm1, %v2269_v1, %v2270_v15  ;;  %v8382_v7 = vld [vmem:[%s8973_s0 + $0x1a0] ss:$0 sps:$4 sm:$0x11]   ;;  %v142_v30 = vld [vmem:[%s8973_s0 + $0x18c] sm:$0xe] }
 0x19b   :  { %v5342_v8 = vpop.eup %5341  ;;  %v2598_v0 = vpop.permute.xlu1 %2597  ;;  %v2049_v46 = vor.u32 %v2048_v52, %v2044_v9  ;;  %v3627_v38 = vsel %vm3607_vm6, %v3562_v63, %v2342_v23  ;;  %v4876_v5 = vcombine.low %v4556_v12, %v8217_v57  ;;  %v2876_v41 = vshrl.u32 %v8276_v32, 16  ;;  %v8396_v12 = vld [vmem:[%s8973_s0 + $0x19c] sm:$0xf]  ;;  %v4460_v63 = vld [vmem:[%s8973_s0 + $0xc0] sm:$0xf] }
 0x19c   :  { %4363 = vst [vmem:[%s8976_s3 + $0x8] sm:$0xff] %v5342_v8  ;;  %1102 = vrot.lane.b32.xlu0 %v1029_v4, %s5516_s15  ;;  %v3724_v11 = vsel %vm3672_vm7, %v3659_v44, %v2598_v0  ;;  %v1033_v4 = vshll.u32 %v8325_v56, 16  ;;  %v2880_v9 = vrot.slane %v2878_v29, 1  ;;  %v3283_v17 = vsel %vm1202_vm1, %v3281_v40, %v3282_v14 }
 0x19d   :  { %1551 = vrot.lane.b32.xlu1 %v8179_v31, %s5518_s25  ;;  %v8333_v31 = vld [vmem:[%s8973_s0 + $0xc8] ss:$0 sps:$4 sm:$0x11]   ;;  %v3070_v20 = vshll.u32 %v8342_v19, 16  ;;  %v2054_v2 = vsel %vm657_vm0, %v2049_v46, %v2053_v33  ;;  %v2318_v0 = vrot.slane %v8248_v21, 1  ;;  %v1038_v15 = vshll.u32 %v8353_v48, 16 }
 0x19e   :  { %v2566_v60 = vpop.permute.xlu0 %2565  ;;  %v2883_v34 = vshll.u32 %v8333_v31, 16  ;;  %v1035_v1 = vrot.slane %v1033_v4, 1  ;;  %v2881_v16 = vor.u32 %v2880_v9, %v2876_v41  ;;  %v4492_v33 = vld [vmem:[%s8973_s0 + $0x198] sm:$0xf]  ;;  %v3075_v49 = vshll.u32 %v8382_v7, 16 }
 0x19f   :  { %v3142_v18 = vpop.permute.xlu1 %3141  ;;  %v3692_v26 = vsel %vm3672_vm7, %v3627_v38, %v2566_v60  ;;  %v3068_v60 = vshrl.u32 %v8342_v19, 16  ;;  %v3072_v40 = vrot.slane %v3070_v20, 1  ;;  %v1040_v14 = vrot.slane %v1038_v15, 1  ;;  %v8444_v20 = vld [vmem:[%s8973_s0 + $0x1a0] ss:$0 sps:$4 sm:$0x11]  }
 0x1a0   :  { %v5344_v35 = vpop.eup %5343  ;;  %1359 = vrot.lane.b32.xlu0 %v1295_v28, %s5517_s11  ;;  %v3814_v36 = vsel %vm3737_vm8, %v3724_v11, %v3142_v18  ;;  %v2885_v45 = vrot.slane %v2883_v34, 1  ;;  %v4781_v46 = vcombine.low %v142_v30, %v8292_v50  ;;  %v4665_v50 = vld [vmem:[%s8973_s0 + $0x9c] sm:$0xe]  ;;  %v2063_v30 = vshll.u32 %v8444_v20, 16 }
 0x1a1   :  { %4394 = vst [vmem:[%s8976_s3 + $0x100] sm:$0xff] %v5344_v35  ;;  %2095 = vrot.lane.b32.xlu1 %v1862_v47, %s5520_s7  ;;  %4242 = vmatmul.mubr.bf16.gmra.mrb[36].mxu1 %v3814_v36  ;;  %v2317_v47 = vrot.slane %v4876_v5, 1  ;;  %v8414_v35 = vcombine.low %v4492_v33, %v8396_v12  ;;  %v8422_v36 = vld [vmem:[%s8973_s0 + $0xc4] sm:$0xf]  ;;  %v3073_v41 = vor.u32 %v3072_v40, %v3068_v60 }
 0x1a2   :  { %v5346_v39 = vpop.eup %5345  ;;  %v3110_v28 = vpop.permute.xlu0 %3109  ;;  %5010 = vmatprep.mubr.msk.bf16.mxu1 %vm3347_vm2, %v3331_v53  ;;  %v126_v53 = vld [vmem:[%s8973_s0 + $0xb4] sm:$0xe]  ;;  %v8434_v34 = vcombine.low %v4460_v63, %v8422_v36 }
 0x1a3   :  { %4395 = vst [vmem:[%s8976_s3 + $0x108] sm:$0xff] %v5346_v39  ;;  %v3766_v57 = vsel %vm3737_vm8, %v3692_v26, %v3110_v28  ;;  %v8371_v23 = vpop.permute.xlu1 %1319  ;;  %v2319_v11 = vsel %vm1202_vm1, %v2317_v47, %v2318_v0  ;;  %v3077_v26 = vrot.slane %v3075_v49, 1  ;;  %v5506_v28 = vld [vmem:[%s8973_s0 + $0xb8] sm:$0xf]  ;;  %v2056_v60 = vshrl.u32 %v8414_v35, 16  ;;  %v9019_v49 = vld [vmem:[#allocation7_spill] sm:$0xff] }
 0x1a4   :  { %1583 = vrot.lane.b32.xlu0 %v8235_v54, %s5518_s25  ;;  %4114 = vmatmul.mubr.bf16.gmra.mrb[36].mxu0 %v3766_v57  ;;  %v4051_v8 = vpop.f32.mrb[4].mxu0  ;;  %v1031_v54 = vshrl.u32 %v8325_v56, 16  ;;  %v4765_v9 = vcombine.low %v126_v53, %v5506_v28  ;;  %v8454_v47 = vld [vmem:[%s8973_s0 + $0xc8] ss:$0 sps:$4 sm:$0x11]  }
 0x1a5   :  { %v4052_v55 = vadd.f32 %v8163_v59, %v4051_v8  ;;  %2351 = vrot.lane.b32.xlu1 %v2271_v42, %s5521_s16  ;;  %v4053_v51 = vpop.f32.mrb[5].mxu0  ;;  %4994 = vmatprep.mubr.msk.bf16.mxu0 %vm3347_vm2, %v3283_v17  ;;  %v2886_v42 = vsel %vm657_vm0, %v2881_v16, %v2885_v45  ;;  %v2058_v8 = vshll.u32 %v8414_v35, 16  ;;  %v3078_v16 = vsel %vm657_vm0, %v3073_v41, %v3077_v26  ;;  %v5509_v26 = vld [vmem:[%s8973_s0 + $0xa4] ss:$0 sps:$4 sm:$0x11]  }
 0x1a6   :  { %v8388_v52 = vpop.permute.xlu0 %1094  ;;  %v4054_v21 = vpop.f32.mrb[6].mxu0  ;;  %v1036_v18 = vor.u32 %v1035_v1, %v1031_v54  ;;  %v1297_v51 = vrot.slane %v8353_v48, 1  ;;  %v5507_v1 = vld [vmem:[%s8973_s0 + $0xa0] sm:$0xf]  ;;  %v1248_v45 = vrot.slane %v4765_v9, 1  ;;  %v1866_v48 = vshll.u32 %v8434_v34, 16 }
 0x1a7   :  { %5347 = vtanh.f32 %v4052_v55  ;;  %v4055_v29 = vadd.f32 %v8163_v59, %v4054_v21  ;;  %v8399_v22 = vpop.permute.xlu1 %1543  ;;  %v4056_v44 = vpop.f32.mrb[7].mxu0  ;;  %v1296_v55 = vrot.slane %v4781_v46, 1  ;;  %v4953_v21 = vcombine.low %v4665_v50, %v5507_v1  ;;  %v4681_v9 = vld [vmem:[%s8973_s0 + $0x174] sm:$0xe] }
 0x1a8   :  { %2127 = vrot.lane.b32.xlu0 %v2054_v2, %s5520_s7  ;;  %v1041_v57 = vsel %vm657_vm0, %v1036_v18, %v1040_v14  ;;  %v2060_v40 = vrot.slane %v2058_v8, 1  ;;  %v9018_v14 = vld [vmem:[#allocation17_spill] sm:$0xff]  ;;  %v1871_v63 = vshll.u32 %v8454_v47, 16  ;;  %v3285_v28 = vrot.slane %v5509_v26, 1  ;;  %v4541_v8 = vld [vmem:[%s8973_s0 + $0xc0] sm:$0xe] }
 0x1a9   :  { %5349 = vtanh.f32 %v4055_v29  ;;  %2575 = vrot.lane.b32.xlu1 %v8276_v32, %s5522_s21  ;;  %v5508_v29 = vld [vmem:[%s8973_s0 + $0xbc] ss:$0 sps:$4 sm:$0x11]   ;;  %v1298_v53 = vsel %vm1202_vm1, %v1296_v55, %v1297_v51  ;;  %v1864_v50 = vshrl.u32 %v8434_v34, 16  ;;  %v2065_v51 = vrot.slane %v2063_v30, 1 }
 0x1aa   :  { %v8424_v32 = vpop.permute.xlu0 %1351  ;;  %v1249_v44 = vrot.slane %v5508_v29, 1  ;;  %v2061_v55 = vor.u32 %v2060_v40, %v2056_v60  ;;  %v4861_v29 = vcombine.low %v4541_v8, %v8422_v36 }
 0x1ab   :  { %v4179_v38 = vpop.f32.mrb[4].mxu1  ;;  %v2088_v5 = vpop.permute.xlu1 %2087 }
 0x1ac   :  { %v4180_v4 = vadd.f32 %v8163_v59, %v4179_v38  ;;  %v4181_v39 = vpop.f32.mrb[5].mxu1  ;;  %2383 = vrot.lane.b32.xlu0 %v2319_v11, %s5521_s16  ;;  %v3369_v11 = vsel %vm3347_vm2, %v9019_v49, %v9018_v14  ;;  %v2321_v14 = vrot.slane %v8444_v20, 1  ;;  %v3401_v49 = vsel %vm3347_vm2, %v7407_v25, %v8388_v52  ;;  %v8548_v25 = vld [vmem:[%s8973_s0 + $0x1ac] ss:$0 sps:$4 sm:$0x11]  }
 0x1ad   :  { %v4182_v17 = vpop.f32.mrb[6].mxu1  ;;  %3119 = vrot.lane.b32.xlu1 %v2886_v42, %s5523_s6  ;;  %v4620_v42 = vld [vmem:[%s8973_s0 + $0x1a4] sm:$0xf]  ;;  %v3434_v38 = vsel %vm3412_vm3, %v3369_v11, %v8371_v23  ;;  %v3284_v39 = vrot.slane %v4953_v21, 1  ;;  %v2066_v36 = vsel %vm657_vm0, %v2061_v55, %v2065_v51  ;;  %v3466_v20 = vsel %vm3412_vm3, %v3401_v49, %v8424_v32 }
 0x1ae   :  { %5351 = vtanh.f32 %v4180_v4  ;;  %v4183_v2 = vadd.f32 %v8163_v59, %v4182_v17  ;;  %v4184_v0 = vpop.f32.mrb[7].mxu1  ;;  %v8448_v15 = vpop.permute.xlu0 %1575  ;;  %v8488_v4 = vld [vmem:[%s8973_s0 + $0x1a8] sm:$0xf]  ;;  %v3499_v23 = vsel %vm3477_vm4, %v3434_v38, %v8399_v22  ;;  %v1868_v17 = vrot.slane %v1866_v48, 1 }
 0x1af   :  { %v2344_v54 = vpop.permute.xlu1 %2343  ;;  %v1250_v0 = vsel %vm1202_vm1, %v1248_v45, %v1249_v44  ;;  %v8512_v21 = vcombine.low %v4620_v42, %v8488_v4  ;;  %v3286_v44 = vsel %vm1202_vm1, %v3284_v39, %v3285_v28  ;;  %v5511_v42 = vld [vmem:[%s8973_s0 + $0x17c] ss:$0 sps:$4 sm:$0x11]   ;;  %v3531_v32 = vsel %vm3477_vm4, %v3466_v20, %v8448_v15 }
 0x1b0   :  { %5353 = vtanh.f32 %v4183_v2  ;;  %2607 = vrot.lane.b32.xlu0 %v8342_v19, %s5522_s21  ;;  %v4557_v19 = vld [vmem:[%s8973_s0 + $0x198] sm:$0xe]  ;;  %v3564_v2 = vsel %vm3542_vm5, %v3499_v23, %v2088_v5  ;;  %v8520_v5 = vld [vmem:[%s8973_s0 + $0xd0] sm:$0xf]  ;;  %v1869_v30 = vor.u32 %v1868_v17, %v1864_v50  ;;  %v2272_v23 = vrot.slane %v4861_v29, 1 }
 0x1b1   :  { %v5348_v33 = vpop.eup %5347  ;;  %1104 = vrot.lane.b32.xlu1 %v1041_v57, %s5516_s15  ;;  %v4877_v57 = vcombine.low %v4557_v19, %v8396_v12  ;;  %v3629_v22 = vsel %vm3607_vm6, %v3564_v2, %v2344_v54  ;;  %v4588_v12 = vld [vmem:[%s8973_s0 + $0xcc] sm:$0xf]  ;;  %v3082_v52 = vshll.u32 %v8512_v21, 16  ;;  %v3087_v55 = vshll.u32 %v8548_v25, 16 }
 0x1b2   :  { %4364 = vst [vmem:[%s8976_s3 + $0x10] sm:$0xff] %v5348_v33  ;;  %v2120_v18 = vpop.permute.xlu0 %2119  ;;  %v1873_v33 = vrot.slane %v1871_v63, 1  ;;  %v8541_v11 = vcombine.low %v4588_v12, %v8520_v5 }
 0x1b3   :  { %v5350_v46 = vpop.eup %5349  ;;  %v2568_v41 = vpop.permute.xlu1 %2567  ;;  %v2320_v19 = vrot.slane %v4877_v57, 1  ;;  %v3596_v39 = vsel %vm3542_vm5, %v3531_v32, %v2120_v18  ;;  %v8575_v18 = vld [vmem:[%s8973_s0 + $0xd4] ss:$0 sps:$4 sm:$0x11]  }
 0x1b4   :  { %4365 = vst [vmem:[%s8976_s3 + $0x18] sm:$0xff] %v5350_v46  ;;  %3151 = vrot.lane.b32.xlu0 %v3078_v16, %s5523_s6  ;;  %v5510_v16 = vld [vmem:[%s8973_s0 + $0x178] sm:$0xf]  ;;  %v3694_v54 = vsel %vm3672_vm7, %v3629_v22, %v2568_v41  ;;  %v3333_v46 = vrot.slane %v5511_v42, 1  ;;  %v2273_v41 = vrot.slane %v8454_v47, 1  ;;  %v1874_v28 = vsel %vm657_vm0, %v1869_v30, %v1873_v33 }
 0x1b5   :  { %1361 = vrot.lane.b32.xlu1 %v1298_v53, %s5517_s11  ;;  %v4969_v45 = vcombine.low %v4681_v9, %v5510_v16  ;;  %v2322_v9 = vsel %vm1202_vm1, %v2320_v19, %v2321_v14  ;;  %v3080_v47 = vshrl.u32 %v8512_v21, 16  ;;  %v2895_v33 = vshll.u32 %v8575_v18, 16 }
 0x1b6   :  { %v2376_v1 = vpop.permute.xlu0 %2375 }
 0x1b7   :  { %v3112_v48 = vpop.permute.xlu1 %3111  ;;  %v3661_v50 = vsel %vm3607_vm6, %v3596_v39, %v2376_v1 }
 0x1b8   :  { %v5352_v60 = vpop.eup %5351  ;;  %1329 = vrot.lane.b32.xlu0 %v1250_v0, %s5517_s11  ;;  %v3769_v40 = vsel %vm3737_vm8, %v3694_v54, %v3112_v48  ;;  %v3084_v0 = vrot.slane %v3082_v52, 1  ;;  %v2888_v54 = vshrl.u32 %v8541_v11, 16 }
 0x1b9   :  { %4396 = vst [vmem:[%s8976_s3 + $0x110] sm:$0xff] %v5352_v60  ;;  %1585 = vrot.lane.b32.xlu1 %v8414_v35, %s5518_s25  ;;  %4122 = vmatmul.mubr.bf16.gmra.mrb[40].mxu0 %v3769_v40  ;;  %v3332_v35 = vrot.slane %v4969_v45, 1  ;;  %v2274_v45 = vsel %vm1202_vm1, %v2272_v23, %v2273_v41  ;;  %v3089_v60 = vrot.slane %v3087_v55, 1  ;;  %v9020_v55 = vld [vmem:[#allocation16_spill] sm:$0xff] }
 0x1ba   :  { %v5354_v53 = vpop.eup %5353  ;;  %v2600_v63 = vpop.permute.xlu0 %2599  ;;  %4995 = vmatprep.mubr.msk.bf16.mxu0 %vm3347_vm2, %v3286_v44  ;;  %v3085_v44 = vor.u32 %v3084_v0, %v3080_v47 }
 0x1bb   :  { %4397 = vst [vmem:[%s8976_s3 + $0x118] sm:$0xff] %v5354_v53  ;;  %v8560_v38 = vpop.permute.xlu1 %1096  ;;  %v3726_v57 = vsel %vm3672_vm7, %v3661_v50, %v2600_v63  ;;  %v3334_v51 = vsel %vm1202_vm1, %v3332_v35, %v3333_v46  ;;  %v2897_v53 = vrot.slane %v2895_v33, 1  ;;  %v4682_v46 = vld [vmem:[%s8973_s0 + $0x180] sm:$0xe] }
 0x1bc   :  { %1553 = vrot.lane.b32.xlu0 %v8434_v34, %s5518_s25  ;;  %v4059_v26 = vpop.f32.mrb[8].mxu0  ;;  %v2890_v34 = vshll.u32 %v8541_v11, 16  ;;  %v3090_v35 = vsel %vm657_vm0, %v3085_v44, %v3089_v60  ;;  %v3403_v23 = vsel %vm3347_vm2, %v7556_v10, %v8560_v38 }
 0x1bd   :  { %v4060_v17 = vadd.f32 %v8163_v59, %v4059_v26  ;;  %2129 = vrot.lane.b32.xlu1 %v2066_v36, %s5520_s7  ;;  %v4061_v15 = vpop.f32.mrb[9].mxu0 }
 0x1be   :  { %v3144_v8 = vpop.permute.xlu0 %3143  ;;  %v4062_v2 = vpop.f32.mrb[10].mxu0  ;;  %v2892_v48 = vrot.slane %v2890_v34, 1 }
 0x1bf   :  { %5355 = vtanh.f32 %v4060_v17  ;;  %v3817_v22 = vsel %vm3737_vm8, %v3726_v57, %v3144_v8  ;;  %v4063_v1 = vadd.f32 %v8163_v59, %v4062_v2  ;;  %v1354_v12 = vpop.permute.xlu1 %1353  ;;  %v4064_v16 = vpop.f32.mrb[11].mxu0  ;;  %v5513_v17 = vld [vmem:[%s8973_s0 + $0xac] sm:$0xf]  ;;  %v3336_v8 = vrot.slane %v7968_v58, 1 }
 0x1c0   :  { %2097 = vrot.lane.b32.xlu0 %v1874_v28, %s5520_s7  ;;  %4250 = vmatmul.mubr.bf16.gmra.mrb[40].mxu1 %v3817_v22  ;;  %v2893_v36 = vor.u32 %v2892_v48, %v2888_v54  ;;  %v5512_v28 = vld [vmem:[%s8973_s0 + $0x184] sm:$0xf]  ;;  %v3468_v47 = vsel %vm3412_vm3, %v3403_v23, %v1354_v12 }
 0x1c1   :  { %5357 = vtanh.f32 %v4063_v1  ;;  %2385 = vrot.lane.b32.xlu1 %v2322_v9, %s5521_s16  ;;  %5011 = vmatprep.mubr.msk.bf16.mxu1 %vm3347_vm2, %v3334_v51  ;;  %v4970_v9 = vcombine.low %v4682_v46, %v5512_v28  ;;  %v9021_v51 = vld [vmem:[#allocation6_spill] sm:$0xff] }
 0x1c2   :  { %v1322_v29 = vpop.permute.xlu0 %1321  ;;  %v3371_v22 = vsel %vm3347_vm2, %v9021_v51, %v9020_v55 }
 0x1c3   :  { %v4187_v40 = vpop.f32.mrb[8].mxu1  ;;  %v1578_v30 = vpop.permute.xlu1 %1577  ;;  %v3335_v57 = vrot.slane %v4970_v9, 1  ;;  %v3436_v1 = vsel %vm3412_vm3, %v3371_v22, %v1322_v29 }
 0x1c4   :  { %v4188_v19 = vadd.f32 %v8163_v59, %v4187_v40  ;;  %v4189_v14 = vpop.f32.mrb[9].mxu1  ;;  %2353 = vrot.lane.b32.xlu0 %v2274_v45, %s5521_s16  ;;  %v3533_v0 = vsel %vm3477_vm4, %v3468_v47, %v1578_v30  ;;  %v5514_v45 = vld [vmem:[%s8973_s0 + $0xb0] ss:$0 sps:$4 sm:$0x11]  }
 0x1c5   :  { %v4190_v49 = vpop.f32.mrb[10].mxu1  ;;  %2609 = vrot.lane.b32.xlu1 %v8512_v21, %s5522_s21  ;;  %v2898_v21 = vsel %vm657_vm0, %v2893_v36, %v2897_v53  ;;  %v3288_v54 = vrot.slane %v5514_v45, 1  ;;  %v3337_v29 = vsel %vm1202_vm1, %v3335_v57, %v3336_v8  ;;  %v9022_v8 = vld [vmem:[#allocation19_spill] sm:$0xff] }
 0x1c6   :  { %5359 = vtanh.f32 %v4188_v19  ;;  %v4191_v20 = vadd.f32 %v8163_v59, %v4190_v49  ;;  %v4192_v63 = vpop.f32.mrb[11].mxu1  ;;  %v1546_v52 = vpop.permute.xlu0 %1545 }
 0x1c7   :  { %v2122_v42 = vpop.permute.xlu1 %2121  ;;  %v3501_v48 = vsel %vm3477_vm4, %v3436_v1, %v1546_v52  ;;  %v3291_v1 = vrot.slane %v8137_v37, 1 }
 0x1c8   :  { %5361 = vtanh.f32 %v4191_v20  ;;  %2577 = vrot.lane.b32.xlu0 %v8541_v11, %s5522_s21  ;;  %v4666_v11 = vld [vmem:[%s8973_s0 + $0xa8] sm:$0xe]  ;;  %v3598_v10 = vsel %vm3542_vm5, %v3533_v0, %v2122_v42 }
 0x1c9   :  { %v5356_v32 = vpop.eup %5355  ;;  %3153 = vrot.lane.b32.xlu1 %v3090_v35, %s5523_s6  ;;  %v4954_v15 = vcombine.low %v4666_v11, %v5513_v17  ;;  %v4667_v17 = vld [vmem:[%s8973_s0 + $0xb4] sm:$0xe] }
 0x1ca   :  { %4366 = vst [vmem:[%s8976_s3 + $0x20] sm:$0xff] %v5356_v32  ;;  %v2090_v41 = vpop.permute.xlu0 %2089 }
 0x1cb   :  { %v5358_v39 = vpop.eup %5357  ;;  %v2378_v26 = vpop.permute.xlu1 %2377  ;;  %v3287_v58 = vrot.slane %v4954_v15, 1  ;;  %v3566_v60 = vsel %vm3542_vm5, %v3501_v48, %v2090_v41 }
 0x1cc   :  { %4367 = vst [vmem:[%s8976_s3 + $0x28] sm:$0xff] %v5358_v39  ;;  %3121 = vrot.lane.b32.xlu0 %v2898_v21, %s5523_s6  ;;  %v3663_v12 = vsel %vm3607_vm6, %v3598_v10, %v2378_v26 }
 0x1cd   :  { %v3289_v49 = vsel %vm1202_vm1, %v3287_v58, %v3288_v54 }
 0x1ce   :  { %v2346_v50 = vpop.permute.xlu0 %2345 }
 0x1cf   :  { %v2602_v34 = vpop.permute.xlu1 %2601  ;;  %v3631_v30 = vsel %vm3607_vm6, %v3566_v60, %v2346_v50 }
 0x1d0   :  { %v5360_v2 = vpop.eup %5359  ;;  %v3728_v33 = vsel %vm3672_vm7, %v3663_v12, %v2602_v34  ;;  %v4955_v34 = vcombine.low %v4667_v17, %v8089_v62  ;;  %v4683_v62 = vld [vmem:[%s8973_s0 + $0x18c] sm:$0xe] }
 0x1d1   :  { %4398 = vst [vmem:[%s8976_s3 + $0x120] sm:$0xff] %v5360_v2  ;;  %v9023_v2 = vld [vmem:[#allocation9_spill] sm:$0xff]  ;;  %v4971_v48 = vcombine.low %v4683_v62, %v8063_v43 }
 0x1d2   :  { %v5362_v38 = vpop.eup %5361  ;;  %v2570_v16 = vpop.permute.xlu0 %2569  ;;  %v3373_v0 = vsel %vm3347_vm2, %v9023_v2, %v9022_v8 }
 0x1d3   :  { %4399 = vst [vmem:[%s8976_s3 + $0x128] sm:$0xff] %v5362_v38  ;;  %v3146_v44 = vpop.permute.xlu1 %3145  ;;  %v3696_v19 = vsel %vm3672_vm7, %v3631_v30, %v2570_v16  ;;  %v3290_v38 = vrot.slane %v4955_v34, 1  ;;  %v3338_v43 = vrot.slane %v4971_v48, 1 }
 0x1d4   :  { %v3820_v40 = vsel %vm3737_vm8, %v3728_v33, %v3146_v44 }
 0x1d5   :  { %4258 = vmatmul.mubr.bf16.gmra.mrb[44].mxu1 %v3820_v40 }
 0x1d6   :  { %v3114_v14 = vpop.permute.xlu0 %3113  ;;  %5012 = vmatprep.mubr.msk.bf16.mxu1 %vm3347_vm2, %v3337_v29  ;;  %v3292_v29 = vsel %vm1202_vm1, %v3290_v38, %v3291_v1 }
 0x1d7   :  { %v3772_v36 = vsel %vm3737_vm8, %v3696_v19, %v3114_v14  ;;  %v1324_v53 = vpop.permute.xlu1 %1323  ;;  %v3339_v14 = vrot.slane %v8112_v6, 1 }
 0x1d8   :  { %4130 = vmatmul.mubr.bf16.gmra.mrb[44].mxu0 %v3772_v36  ;;  %v4195_v20 = vpop.f32.mrb[12].mxu1  ;;  %v3438_v22 = vsel %vm3412_vm3, %v3373_v0, %v1324_v53 }
 0x1d9   :  { %v4196_v63 = vadd.f32 %v8163_v59, %v4195_v20  ;;  %v4197_v52 = vpop.f32.mrb[13].mxu1  ;;  %4996 = vmatprep.mubr.msk.bf16.mxu0 %vm3347_vm2, %v3289_v49 }
 0x1da   :  { %v1099_v35 = vpop.permute.xlu0 %1098  ;;  %v4198_v42 = vpop.f32.mrb[14].mxu1 }
 0x1db   :  { %v4067_v46 = vpop.f32.mrb[12].mxu0  ;;  %5363 = vtanh.f32 %v4196_v63  ;;  %v4199_v32 = vadd.f32 %v8163_v59, %v4198_v42  ;;  %v1548_v21 = vpop.permute.xlu1 %1547  ;;  %v3405_v40 = vsel %vm3347_vm2, %v7774_v3, %v1099_v35 }
 0x1dc   :  { %v4068_v41 = vadd.f32 %v8163_v59, %v4067_v46  ;;  %v4069_v39 = vpop.f32.mrb[13].mxu0  ;;  %v4200_v26 = vpop.f32.mrb[15].mxu1  ;;  %v3503_v16 = vsel %vm3477_vm4, %v3438_v22, %v1548_v21 }
 0x1dd   :  { %v4070_v11 = vpop.f32.mrb[14].mxu0  ;;  %5365 = vtanh.f32 %v4199_v32  ;;  %v3340_v32 = vsel %vm1202_vm1, %v3338_v43, %v3339_v14 }
 0x1de   :  { %5367 = vtanh.f32 %v4068_v41  ;;  %v4071_v28 = vadd.f32 %v8163_v59, %v4070_v11  ;;  %v4072_v9 = vpop.f32.mrb[15].mxu0  ;;  %v1356_v23 = vpop.permute.xlu0 %1355 }
 0x1df   :  { %v2092_v50 = vpop.permute.xlu1 %2091  ;;  %v3470_v30 = vsel %vm3412_vm3, %v3405_v40, %v1356_v23 }
 0x1e0   :  { %5369 = vtanh.f32 %v4071_v28  ;;  %v3568_v58 = vsel %vm3542_vm5, %v3503_v16, %v2092_v50  ;;  %v3342_v16 = vrot.slane %v8382_v7, 1 }
 0x1e2   :  { %v1580_v15 = vpop.permute.xlu0 %1579 }
 0x1e3   :  { %v2348_v47 = vpop.permute.xlu1 %2347  ;;  %v3535_v49 = vsel %vm3477_vm4, %v3470_v30, %v1580_v15 }
 0x1e4   :  { %v3633_v37 = vsel %vm3607_vm6, %v3568_v58, %v2348_v47 }
 0x1e5   :  { %v5364_v57 = vpop.eup %5363 }
 0x1e6   :  { %4400 = vst [vmem:[%s8976_s3 + $0x130] sm:$0xff] %v5364_v57  ;;  %v2124_v55 = vpop.permute.xlu0 %2123  ;;  %v4684_v57 = vld [vmem:[%s8973_s0 + $0x198] sm:$0xe] }
 0x1e7   :  { %v5366_v51 = vpop.eup %5365  ;;  %v2572_v10 = vpop.permute.xlu1 %2571  ;;  %v3600_v53 = vsel %vm3542_vm5, %v3535_v49, %v2124_v55 }
 0x1e8   :  { %v5368_v12 = vpop.eup %5367  ;;  %4401 = vst [vmem:[%s8976_s3 + $0x138] sm:$0xff] %v5366_v51  ;;  %v3698_v33 = vsel %vm3672_vm7, %v3633_v37, %v2572_v10  ;;  %v4972_v51 = vcombine.low %v4684_v57, %v8314_v24  ;;  %v9024_v24 = vld [vmem:[#allocation18_spill] sm:$0xff]  ;;  %v9025_v37 = vld [vmem:[#allocation8_spill] sm:$0xff] }
 0x1e9   :  { %4368 = vst [vmem:[%s8976_s3 + $0x30] sm:$0xff] %v5368_v12 }
 0x1ea   :  { %v5370_v45 = vpop.eup %5369  ;;  %v2380_v54 = vpop.permute.xlu0 %2379  ;;  %v3341_v12 = vrot.slane %v4972_v51, 1 }
 0x1eb   :  { %4369 = vst [vmem:[%s8976_s3 + $0x38] sm:$0xff] %v5370_v45  ;;  %v3116_v44 = vpop.permute.xlu1 %3115  ;;  %v3665_v63 = vsel %vm3607_vm6, %v3600_v53, %v2380_v54  ;;  %v3375_v54 = vsel %vm3347_vm2, %v9025_v37, %v9024_v24 }
 0x1ec   :  { %v3775_v60 = vsel %vm3737_vm8, %v3698_v33, %v3116_v44 }
 0x1ed   :  { %4138 = vmatmul.mubr.bf16.gmra.mrb[48].mxu0 %v3775_v60 }
 0x1ee   :  { %v2604_v19 = vpop.permute.xlu0 %2603  ;;  %4997 = vmatprep.mubr.msk.bf16.mxu0 %vm3347_vm2, %v3292_v29  ;;  %v3294_v29 = vrot.slane %v8333_v31, 1 }
 0x1ef   :  { %v1101_v36 = vpop.permute.xlu1 %1100  ;;  %v3730_v35 = vsel %vm3672_vm7, %v3665_v63, %v2604_v19  ;;  %v3343_v19 = vsel %vm1202_vm1, %v3341_v12, %v3342_v16 }
 0x1f0   :  { %v4075_v20 = vpop.f32.mrb[16].mxu0  ;;  %v3407_v22 = vsel %vm3347_vm2, %v7925_v13, %v1101_v36 }
 0x1f1   :  { %v4076_v52 = vadd.f32 %v8163_v59, %v4075_v20  ;;  %v4077_v3 = vpop.f32.mrb[17].mxu0 }
 0x1f2   :  { %v3148_v42 = vpop.permute.xlu0 %3147  ;;  %v4078_v46 = vpop.f32.mrb[18].mxu0  ;;  %v8746_v3 = vld [vmem:[%s8975_s2] ss:$0 sm:$0xff] }
 0x1f3   :  { %5371 = vtanh.f32 %v4076_v52  ;;  %v3823_v6 = vsel %vm3737_vm8, %v3730_v35, %v3148_v42  ;;  %v4079_v21 = vadd.f32 %v8163_v59, %v4078_v46  ;;  %v1358_v41 = vpop.permute.xlu1 %1357  ;;  %v4080_v39 = vpop.f32.mrb[19].mxu0 }
 0x1f4   :  { %4266 = vmatmul.mubr.bf16.gmra.mrb[48].mxu1 %v3823_v6  ;;  %v3472_v1 = vsel %vm3412_vm3, %v3407_v22, %v1358_v41 }
 0x1f5   :  { %5373 = vtanh.f32 %v4079_v21  ;;  %5013 = vmatprep.mubr.msk.bf16.mxu1 %vm3347_vm2, %v3340_v32 }
 0x1f6   :  { %v1326_v26 = vpop.permute.xlu0 %1325 }
 0x1f7   :  { %v4203_v11 = vpop.f32.mrb[16].mxu1  ;;  %v1582_v28 = vpop.permute.xlu1 %1581  ;;  %v3440_v48 = vsel %vm3412_vm3, %v3375_v54, %v1326_v26 }
 0x1f8   :  { %v4204_v9 = vadd.f32 %v8163_v59, %v4203_v11  ;;  %v4205_v23 = vpop.f32.mrb[17].mxu1  ;;  %v3537_v45 = vsel %vm3477_vm4, %v3472_v1, %v1582_v28  ;;  %v3297_v1 = vrot.slane %v8575_v18, 1 }
 0x1f9   :  { %v4206_v50 = vpop.f32.mrb[18].mxu1 }
 0x1fa   :  { %5375 = vtanh.f32 %v4204_v9  ;;  %v4207_v17 = vadd.f32 %v8163_v59, %v4206_v50  ;;  %v4208_v15 = vpop.f32.mrb[19].mxu1  ;;  %v1550_v47 = vpop.permute.xlu0 %1549  ;;  %v4668_v59 = vld [vmem:[%s8973_s0 + $0xc0] sm:$0xe] }
 0x1fb   :  { %v2126_v34 = vpop.permute.xlu1 %2125  ;;  %v4956_v38 = vcombine.low %v4668_v59, %v8260_v27  ;;  %v3505_v60 = vsel %vm3477_vm4, %v3440_v48, %v1550_v47  ;;  %v4669_v15 = vld [vmem:[%s8973_s0 + $0xcc] sm:$0xe] }
 0x1fc   :  { %5377 = vtanh.f32 %v4207_v17  ;;  %v3602_v13 = vsel %vm3542_vm5, %v3537_v45, %v2126_v34  ;;  %v4957_v57 = vcombine.low %v4669_v15, %v8520_v5  ;;  %v4685_v5 = vld [vmem:[%s8973_s0 + $0x1a4] sm:$0xe] }
 0x1fd   :  { %v5372_v8 = vpop.eup %5371  ;;  %v3293_v7 = vrot.slane %v4956_v38, 1  ;;  %v4973_v24 = vcombine.low %v4685_v5, %v8488_v4 }
 0x1fe   :  { %4370 = vst [vmem:[%s8976_s3 + $0x40] sm:$0xff] %v5372_v8  ;;  %v2094_v2 = vpop.permute.xlu0 %2093  ;;  %v3296_v38 = vrot.slane %v4957_v57, 1 }
 0x1ff   :  { %v5374_v0 = vpop.eup %5373  ;;  %v2382_v55 = vpop.permute.xlu1 %2381  ;;  %v3570_v43 = vsel %vm3542_vm5, %v3505_v60, %v2094_v2  ;;  %v3295_v53 = vsel %vm1202_vm1, %v3293_v7, %v3294_v29  ;;  %v9026_v2 = vld [vmem:[#allocation22_spill] sm:$0xff]  ;;  %v3344_v4 = vrot.slane %v4973_v24, 1  ;;  %v3345_v7 = vrot.slane %v8548_v25, 1 }
 0x200   :  { %4371 = vst [vmem:[%s8976_s3 + $0x48] sm:$0xff] %v5374_v0  ;;  %v3667_v33 = vsel %vm3607_vm6, %v3602_v13, %v2382_v55  ;;  %v9027_v0 = vld [vmem:[#allocation11_spill] sm:$0xff]  ;;  %v3298_v13 = vsel %vm1202_vm1, %v3296_v38, %v3297_v1 }
 0x201   :  { %v3377_v55 = vsel %vm3347_vm2, %v9027_v0, %v9026_v2  ;;  %v9029_v2 = vld [vmem:[#allocation10_spill] sm:$0xff] }
 0x202   :  { %v2350_v10 = vpop.permute.xlu0 %2349 }
 0x203   :  { %v2606_v62 = vpop.permute.xlu1 %2605  ;;  %v3635_v49 = vsel %vm3607_vm6, %v3570_v43, %v2350_v10 }
 0x204   :  { %v5376_v58 = vpop.eup %5375  ;;  %v3732_v40 = vsel %vm3672_vm7, %v3667_v33, %v2606_v62 }
 0x205   :  { %4402 = vst [vmem:[%s8976_s3 + $0x140] sm:$0xff] %v5376_v58 }
 0x206   :  { %v5378_v27 = vpop.eup %5377  ;;  %v2574_v44 = vpop.permute.xlu0 %2573 }
 0x207   :  { %4403 = vst [vmem:[%s8976_s3 + $0x148] sm:$0xff] %v5378_v27  ;;  %v3150_v30 = vpop.permute.xlu1 %3149  ;;  %v3700_v31 = vsel %vm3672_vm7, %v3635_v49, %v2574_v44 }
 0x208   :  { %v3826_v14 = vsel %vm3737_vm8, %v3732_v40, %v3150_v30 }
 0x209   :  { %4274 = vmatmul.mubr.bf16.gmra.mrb[52].mxu1 %v3826_v14 }
 0x20a   :  { %v3118_v36 = vpop.permute.xlu0 %3117  ;;  %5014 = vmatprep.mubr.msk.bf16.mxu1 %vm3347_vm2, %v3343_v19 }
 0x20b   :  { %v3778_v20 = vsel %vm3737_vm8, %v3700_v31, %v3118_v36  ;;  %v1328_v63 = vpop.permute.xlu1 %1327  ;;  %v3346_v36 = vsel %vm1202_vm1, %v3344_v4, %v3345_v7 }
 0x20c   :  { %4146 = vmatmul.mubr.bf16.gmra.mrb[52].mxu0 %v3778_v20  ;;  %v4211_v52 = vpop.f32.mrb[20].mxu1  ;;  %v3442_v22 = vsel %vm3412_vm3, %v3377_v55, %v1328_v63 }
 0x20d   :  { %v4212_v35 = vadd.f32 %v8746_v3, %v4211_v52  ;;  %v4213_v42 = vpop.f32.mrb[21].mxu1  ;;  %4998 = vmatprep.mubr.msk.bf16.mxu0 %vm3347_vm2, %v3295_v53 }
 0x20e   :  { %v1103_v46 = vpop.permute.xlu0 %1102  ;;  %v4214_v32 = vpop.f32.mrb[22].mxu1 }
 0x20f   :  { %v4083_v6 = vpop.f32.mrb[20].mxu0  ;;  %5379 = vtanh.f32 %v4212_v35  ;;  %v4215_v21 = vadd.f32 %v8746_v3, %v4214_v32  ;;  %v1552_v41 = vpop.permute.xlu1 %1551  ;;  %v3409_v48 = vsel %vm3347_vm2, %v8157_v61, %v1103_v46 }
 0x210   :  { %v4084_v39 = vadd.f32 %v8746_v3, %v4083_v6  ;;  %v4085_v26 = vpop.f32.mrb[21].mxu0  ;;  %v4216_v11 = vpop.f32.mrb[23].mxu1  ;;  %v3507_v12 = vsel %vm3477_vm4, %v3442_v22, %v1552_v41 }
 0x211   :  { %v4086_v28 = vpop.f32.mrb[22].mxu0  ;;  %5381 = vtanh.f32 %v4215_v21 }
 0x212   :  { %5383 = vtanh.f32 %v4084_v39  ;;  %v4087_v9 = vadd.f32 %v8746_v3, %v4086_v28  ;;  %v4088_v23 = vpop.f32.mrb[23].mxu0  ;;  %v1360_v50 = vpop.permute.xlu0 %1359 }
 0x213   :  { %v2096_v17 = vpop.permute.xlu1 %2095  ;;  %v3474_v33 = vsel %vm3412_vm3, %v3409_v48, %v1360_v50 }
 0x214   :  { %5385 = vtanh.f32 %v4087_v9  ;;  %v3572_v16 = vsel %vm3542_vm5, %v3507_v12, %v2096_v17 }
 0x216   :  { %v1584_v47 = vpop.permute.xlu0 %1583 }
 0x217   :  { %v2352_v34 = vpop.permute.xlu1 %2351  ;;  %v3539_v29 = vsel %vm3477_vm4, %v3474_v33, %v1584_v47 }
 0x218   :  { %v3637_v18 = vsel %vm3607_vm6, %v3572_v16, %v2352_v34 }
 0x219   :  { %v5380_v8 = vpop.eup %5379 }
 0x21a   :  { %4404 = vst [vmem:[%s8976_s3 + $0x150] sm:$0xff] %v5380_v8  ;;  %v2128_v59 = vpop.permute.xlu0 %2127  ;;  %v9028_v8 = vld [vmem:[#allocation20_spill] sm:$0xff] }
 0x21b   :  { %v5382_v51 = vpop.eup %5381  ;;  %v2576_v10 = vpop.permute.xlu1 %2575  ;;  %v3604_v40 = vsel %vm3542_vm5, %v3539_v29, %v2128_v59  ;;  %v3379_v0 = vsel %vm3347_vm2, %v9029_v2, %v9028_v8 }
 0x21c   :  { %v5384_v62 = vpop.eup %5383  ;;  %4405 = vst [vmem:[%s8976_s3 + $0x158] sm:$0xff] %v5382_v51  ;;  %v3702_v37 = vsel %vm3672_vm7, %v3637_v18, %v2576_v10 }
 0x21d   :  { %4372 = vst [vmem:[%s8976_s3 + $0x50] sm:$0xff] %v5384_v62 }
 0x21e   :  { %v5386_v58 = vpop.eup %5385  ;;  %v2384_v45 = vpop.permute.xlu0 %2383 }
 0x21f   :  { %4373 = vst [vmem:[%s8976_s3 + $0x58] sm:$0xff] %v5386_v58  ;;  %v3120_v54 = vpop.permute.xlu1 %3119  ;;  %v3669_v19 = vsel %vm3607_vm6, %v3604_v40, %v2384_v45 }
 0x220   :  { %v3781_v27 = vsel %vm3737_vm8, %v3702_v37, %v3120_v54 }
 0x221   :  { %4154 = vmatmul.mubr.bf16.gmra.mrb[56].mxu0 %v3781_v27 }
 0x222   :  { %v2608_v44 = vpop.permute.xlu0 %2607  ;;  %4999 = vmatprep.mubr.msk.bf16.mxu0 %vm3347_vm2, %v3298_v13 }
 0x223   :  { %v1105_v60 = vpop.permute.xlu1 %1104  ;;  %v3734_v14 = vsel %vm3672_vm7, %v3669_v19, %v2608_v44 }
 0x224   :  { %v4091_v30 = vpop.f32.mrb[24].mxu0  ;;  %v3411_v50 = vsel %vm3347_vm2, %v8325_v56, %v1105_v60 }
 0x225   :  { %v4092_v43 = vadd.f32 %v8746_v3, %v4091_v30  ;;  %v4093_v61 = vpop.f32.mrb[25].mxu0 }
 0x226   :  { %v3152_v49 = vpop.permute.xlu0 %3151  ;;  %v4094_v31 = vpop.f32.mrb[26].mxu0 }
 0x227   :  { %5387 = vtanh.f32 %v4092_v43  ;;  %v3829_v25 = vsel %vm3737_vm8, %v3734_v14, %v3152_v49  ;;  %v4095_v53 = vadd.f32 %v8746_v3, %v4094_v31  ;;  %v1362_v20 = vpop.permute.xlu1 %1361  ;;  %v4096_v63 = vpop.f32.mrb[27].mxu0 }
 0x228   :  { %4282 = vmatmul.mubr.bf16.gmra.mrb[56].mxu1 %v3829_v25  ;;  %v3476_v15 = vsel %vm3412_vm3, %v3411_v50, %v1362_v20 }
 0x229   :  { %5389 = vtanh.f32 %v4095_v53  ;;  %5015 = vmatprep.mubr.msk.bf16.mxu1 %vm3347_vm2, %v3346_v36 }
 0x22a   :  { %v1330_v52 = vpop.permute.xlu0 %1329 }
 0x22b   :  { %v4219_v35 = vpop.f32.mrb[24].mxu1  ;;  %v1586_v42 = vpop.permute.xlu1 %1585  ;;  %v3444_v56 = vsel %vm3412_vm3, %v3379_v0, %v1330_v52 }
 0x22c   :  { %v4220_v46 = vadd.f32 %v8746_v3, %v4219_v35  ;;  %v4221_v32 = vpop.f32.mrb[25].mxu1  ;;  %v3541_v57 = vsel %vm3477_vm4, %v3476_v15, %v1586_v42 }
 0x22d   :  { %v4222_v6 = vpop.f32.mrb[26].mxu1 }
 0x22e   :  { %5391 = vtanh.f32 %v4220_v46  ;;  %v4223_v21 = vadd.f32 %v8746_v3, %v4222_v6  ;;  %v4224_v41 = vpop.f32.mrb[27].mxu1  ;;  %v1554_v39 = vpop.permute.xlu0 %1553 }
 0x22f   :  { %v2130_v26 = vpop.permute.xlu1 %2129  ;;  %v3509_v10 = vsel %vm3477_vm4, %v3444_v56, %v1554_v39 }
 0x230   :  { %5393 = vtanh.f32 %v4223_v21  ;;  %v3606_v55 = vsel %vm3542_vm5, %v3541_v57, %v2130_v26 }
 0x231   :  { %v5388_v11 = vpop.eup %5387 }
 0x232   :  { %4374 = vst [vmem:[%s8976_s3 + $0x60] sm:$0xff] %v5388_v11  ;;  %v2098_v28 = vpop.permute.xlu0 %2097 }
 0x233   :  { %v5390_v9 = vpop.eup %5389  ;;  %v2386_v23 = vpop.permute.xlu1 %2385  ;;  %v3574_v5 = vsel %vm3542_vm5, %v3509_v10, %v2098_v28 }
 0x234   :  { %4375 = vst [vmem:[%s8976_s3 + $0x68] sm:$0xff] %v5390_v9  ;;  %v3671_v51 = vsel %vm3607_vm6, %v3606_v55, %v2386_v23 }
 0x236   :  { %v2354_v17 = vpop.permute.xlu0 %2353 }
 0x237   :  { %v2610_v47 = vpop.permute.xlu1 %2609  ;;  %v3639_v12 = vsel %vm3607_vm6, %v3574_v5, %v2354_v17 }
 0x238   :  { %v5392_v34 = vpop.eup %5391  ;;  %v3736_v38 = vsel %vm3672_vm7, %v3671_v51, %v2610_v47 }
 0x239   :  { %4406 = vst [vmem:[%s8976_s3 + $0x160] sm:$0xff] %v5392_v34 }
 0x23a   :  { %v5394_v59 = vpop.eup %5393  ;;  %v2578_v22 = vpop.permute.xlu0 %2577 }
 0x23b   :  { %4407 = vst [vmem:[%s8976_s3 + $0x168] sm:$0xff] %v5394_v59  ;;  %v3154_v1 = vpop.permute.xlu1 %3153  ;;  %v3704_v16 = vsel %vm3672_vm7, %v3639_v12, %v2578_v22 }
 0x23c   :  { %v3832_v62 = vsel %vm3737_vm8, %v3736_v38, %v3154_v1 }
 0x23d   :  { %4290 = vmatmul.mubr.bf16.gmra.mrb[60].mxu1 %v3832_v62 }
 0x23e   :  { %v3122_v58 = vpop.permute.xlu0 %3121 }
 0x23f   :  { %v3784_v18 = vsel %vm3737_vm8, %v3704_v16, %v3122_v58 }
 0x240   :  { %4162 = vmatmul.mubr.bf16.gmra.mrb[60].mxu0 %v3784_v18  ;;  %v4227_v45 = vpop.f32.mrb[28].mxu1 }
 0x241   :  { %v4228_v24 = vadd.f32 %v8746_v3, %v4227_v45  ;;  %v4229_v37 = vpop.f32.mrb[29].mxu1 }
 0x242   :  { %v4230_v54 = vpop.f32.mrb[30].mxu1 }
 0x243   :  { %v4099_v13 = vpop.f32.mrb[28].mxu0  ;;  %5395 = vtanh.f32 %v4228_v24  ;;  %v4231_v27 = vadd.f32 %v8746_v3, %v4230_v54  ;;  %v4232_v48 = vpop.f32.mrb[31].mxu1 }
 0x244   :  { %v4100_v33 = vadd.f32 %v8746_v3, %v4099_v13  ;;  %v4101_v44 = vpop.f32.mrb[29].mxu0 }
 0x245   :  { %v4102_v4 = vpop.f32.mrb[30].mxu0  ;;  %5397 = vtanh.f32 %v4231_v27 }
 0x246   :  { %5399 = vtanh.f32 %v4100_v33  ;;  %v4103_v7 = vadd.f32 %v8746_v3, %v4102_v4  ;;  %v4104_v29 = vpop.f32.mrb[31].mxu0 }
 0x248   :  { %5401 = vtanh.f32 %v4103_v7 }
 0x24d   :  { %v5396_v60 = vpop.eup %5395 }
 0x24e   :  { %4408 = vst [vmem:[%s8976_s3 + $0x170] sm:$0xff] %v5396_v60 }
 0x24f   :  { %v5398_v40 = vpop.eup %5397 }
 0x250   :  { %v5400_v30 = vpop.eup %5399  ;;  %4409 = vst [vmem:[%s8976_s3 + $0x178] sm:$0xff] %v5398_v40 }
 0x251   :  { %4376 = vst [vmem:[%s8976_s3 + $0x70] sm:$0xff] %v5400_v30 }
 0x252   :  { %v5402_v19 = vpop.eup %5401 }
 0x253   :  { %4377 = vst [vmem:[%s8976_s3 + $0x78] sm:$0xff] %v5402_v19 }
 0x258   :  { %v4107_v43 = vpop.f32.mrb[32].mxu0 }
 0x259   :  { %v4108_v61 = vadd.f32 %v8746_v3, %v4107_v43  ;;  %v4109_v14 = vpop.f32.mrb[33].mxu0 }
 0x25a   :  { %v4110_v49 = vpop.f32.mrb[34].mxu0 }
 0x25b   :  { %5403 = vtanh.f32 %v4108_v61  ;;  %v4111_v31 = vadd.f32 %v8746_v3, %v4110_v49  ;;  %v4112_v36 = vpop.f32.mrb[35].mxu0 }
 0x25d   :  { %5405 = vtanh.f32 %v4111_v31 }
 0x25f   :  { %v4235_v25 = vpop.f32.mrb[32].mxu1 }
 0x260   :  { %v4236_v53 = vadd.f32 %v8746_v3, %v4235_v25  ;;  %v4237_v20 = vpop.f32.mrb[33].mxu1 }
 0x261   :  { %v4238_v63 = vpop.f32.mrb[34].mxu1 }
 0x262   :  { %5407 = vtanh.f32 %v4236_v53  ;;  %v4239_v52 = vadd.f32 %v8746_v3, %v4238_v63  ;;  %v4240_v35 = vpop.f32.mrb[35].mxu1 }
 0x264   :  { %5409 = vtanh.f32 %v4239_v52 }
 0x265   :  { %v5404_v42 = vpop.eup %5403 }
 0x266   :  { %4378 = vst [vmem:[%s8976_s3 + $0x80] sm:$0xff] %v5404_v42 }
 0x267   :  { %v5406_v46 = vpop.eup %5405 }
 0x268   :  { %4379 = vst [vmem:[%s8976_s3 + $0x88] sm:$0xff] %v5406_v46 }
 0x26c   :  { %v5408_v32 = vpop.eup %5407 }
 0x26d   :  { %4410 = vst [vmem:[%s8976_s3 + $0x180] sm:$0xff] %v5408_v32 }
 0x26e   :  { %v5410_v6 = vpop.eup %5409 }
 0x26f   :  { %4411 = vst [vmem:[%s8976_s3 + $0x188] sm:$0xff] %v5410_v6 }
 0x274   :  { %v4243_v21 = vpop.f32.mrb[36].mxu1 }
 0x275   :  { %v4244_v41 = vadd.f32 %v8746_v3, %v4243_v21  ;;  %v4245_v39 = vpop.f32.mrb[37].mxu1 }
 0x276   :  { %v4246_v26 = vpop.f32.mrb[38].mxu1 }
 0x277   :  { %v4115_v11 = vpop.f32.mrb[36].mxu0  ;;  %5411 = vtanh.f32 %v4244_v41  ;;  %v4247_v28 = vadd.f32 %v8746_v3, %v4246_v26  ;;  %v4248_v9 = vpop.f32.mrb[39].mxu1 }
 0x278   :  { %v4116_v23 = vadd.f32 %v8746_v3, %v4115_v11  ;;  %v4117_v50 = vpop.f32.mrb[37].mxu0 }
 0x279   :  { %v4118_v17 = vpop.f32.mrb[38].mxu0  ;;  %5413 = vtanh.f32 %v4247_v28 }
 0x27a   :  { %5415 = vtanh.f32 %v4116_v23  ;;  %v4119_v15 = vadd.f32 %v8746_v3, %v4118_v17  ;;  %v4120_v47 = vpop.f32.mrb[39].mxu0 }
 0x27c   :  { %5417 = vtanh.f32 %v4119_v15 }
 0x281   :  { %v5412_v34 = vpop.eup %5411 }
 0x282   :  { %4412 = vst [vmem:[%s8976_s3 + $0x190] sm:$0xff] %v5412_v34 }
 0x283   :  { %v5414_v57 = vpop.eup %5413 }
 0x284   :  { %v5416_v8 = vpop.eup %5415  ;;  %4413 = vst [vmem:[%s8976_s3 + $0x198] sm:$0xff] %v5414_v57 }
 0x285   :  { %4380 = vst [vmem:[%s8976_s3 + $0x90] sm:$0xff] %v5416_v8 }
 0x286   :  { %v5418_v2 = vpop.eup %5417 }
 0x287   :  { %4381 = vst [vmem:[%s8976_s3 + $0x98] sm:$0xff] %v5418_v2 }
 0x28c   :  { %v4123_v0 = vpop.f32.mrb[40].mxu0 }
 0x28d   :  { %v4124_v55 = vadd.f32 %v8746_v3, %v4123_v0  ;;  %v4125_v59 = vpop.f32.mrb[41].mxu0 }
 0x28e   :  { %v4126_v56 = vpop.f32.mrb[42].mxu0 }
 0x28f   :  { %5419 = vtanh.f32 %v4124_v55  ;;  %v4127_v51 = vadd.f32 %v8746_v3, %v4126_v56  ;;  %v4128_v22 = vpop.f32.mrb[43].mxu0 }
 0x291   :  { %5421 = vtanh.f32 %v4127_v51 }
 0x293   :  { %v4251_v10 = vpop.f32.mrb[40].mxu1 }
 0x294   :  { %v4252_v38 = vadd.f32 %v8746_v3, %v4251_v10  ;;  %v4253_v1 = vpop.f32.mrb[41].mxu1 }
 0x295   :  { %v4254_v5 = vpop.f32.mrb[42].mxu1 }
 0x296   :  { %5423 = vtanh.f32 %v4252_v38  ;;  %v4255_v62 = vadd.f32 %v8746_v3, %v4254_v5  ;;  %v4256_v12 = vpop.f32.mrb[43].mxu1 }
 0x298   :  { %5425 = vtanh.f32 %v4255_v62 }
 0x299   :  { %v5420_v16 = vpop.eup %5419 }
 0x29a   :  { %4382 = vst [vmem:[%s8976_s3 + $0xa0] sm:$0xff] %v5420_v16 }
 0x29b   :  { %v5422_v58 = vpop.eup %5421 }
 0x29c   :  { %4383 = vst [vmem:[%s8976_s3 + $0xa8] sm:$0xff] %v5422_v58 }
 0x2a0   :  { %v5424_v18 = vpop.eup %5423 }
 0x2a1   :  { %4414 = vst [vmem:[%s8976_s3 + $0x1a0] sm:$0xff] %v5424_v18 }
 0x2a2   :  { %v5426_v45 = vpop.eup %5425 }
 0x2a3   :  { %4415 = vst [vmem:[%s8976_s3 + $0x1a8] sm:$0xff] %v5426_v45 }
 0x2a8   :  { %v4259_v24 = vpop.f32.mrb[44].mxu1 }
 0x2a9   :  { %v4260_v37 = vadd.f32 %v8746_v3, %v4259_v24  ;;  %v4261_v54 = vpop.f32.mrb[45].mxu1 }
 0x2aa   :  { %v4262_v13 = vpop.f32.mrb[46].mxu1 }
 0x2ab   :  { %v4131_v27 = vpop.f32.mrb[44].mxu0  ;;  %5427 = vtanh.f32 %v4260_v37  ;;  %v4263_v48 = vadd.f32 %v8746_v3, %v4262_v13  ;;  %v4264_v33 = vpop.f32.mrb[47].mxu1 }
 0x2ac   :  { %v4132_v44 = vadd.f32 %v8746_v3, %v4131_v27  ;;  %v4133_v4 = vpop.f32.mrb[45].mxu0 }
 0x2ad   :  { %v4134_v7 = vpop.f32.mrb[46].mxu0  ;;  %5429 = vtanh.f32 %v4263_v48 }
 0x2ae   :  { %5431 = vtanh.f32 %v4132_v44  ;;  %v4135_v29 = vadd.f32 %v8746_v3, %v4134_v7  ;;  %v4136_v60 = vpop.f32.mrb[47].mxu0 }
 0x2b0   :  { %5433 = vtanh.f32 %v4135_v29 }
 0x2b5   :  { %v5428_v40 = vpop.eup %5427 }
 0x2b6   :  { %4416 = vst [vmem:[%s8976_s3 + $0x1b0] sm:$0xff] %v5428_v40 }
 0x2b7   :  { %v5430_v30 = vpop.eup %5429 }
 0x2b8   :  { %v5432_v19 = vpop.eup %5431  ;;  %4417 = vst [vmem:[%s8976_s3 + $0x1b8] sm:$0xff] %v5430_v30 }
 0x2b9   :  { %4384 = vst [vmem:[%s8976_s3 + $0xb0] sm:$0xff] %v5432_v19 }
 0x2ba   :  { %v5434_v43 = vpop.eup %5433 }
 0x2bb   :  { %4385 = vst [vmem:[%s8976_s3 + $0xb8] sm:$0xff] %v5434_v43 }
 0x2c0   :  { %v4139_v61 = vpop.f32.mrb[48].mxu0 }
 0x2c1   :  { %v4140_v14 = vadd.f32 %v8746_v3, %v4139_v61  ;;  %v4141_v49 = vpop.f32.mrb[49].mxu0 }
 0x2c2   :  { %v4142_v31 = vpop.f32.mrb[50].mxu0 }
 0x2c3   :  { %5435 = vtanh.f32 %v4140_v14  ;;  %v4143_v36 = vadd.f32 %v8746_v3, %v4142_v31  ;;  %v4144_v25 = vpop.f32.mrb[51].mxu0 }
 0x2c5   :  { %5437 = vtanh.f32 %v4143_v36 }
 0x2c7   :  { %v4267_v53 = vpop.f32.mrb[48].mxu1 }
 0x2c8   :  { %v4268_v20 = vadd.f32 %v8746_v3, %v4267_v53  ;;  %v4269_v63 = vpop.f32.mrb[49].mxu1 }
 0x2c9   :  { %v4270_v52 = vpop.f32.mrb[50].mxu1 }
 0x2ca   :  { %5439 = vtanh.f32 %v4268_v20  ;;  %v4271_v35 = vadd.f32 %v8746_v3, %v4270_v52  ;;  %v4272_v42 = vpop.f32.mrb[51].mxu1 }
 0x2cc   :  { %5441 = vtanh.f32 %v4271_v35 }
 0x2cd   :  { %v5436_v46 = vpop.eup %5435 }
 0x2ce   :  { %4386 = vst [vmem:[%s8976_s3 + $0xc0] sm:$0xff] %v5436_v46 }
 0x2cf   :  { %v5438_v32 = vpop.eup %5437 }
 0x2d0   :  { %4387 = vst [vmem:[%s8976_s3 + $0xc8] sm:$0xff] %v5438_v32 }
 0x2d4   :  { %v5440_v6 = vpop.eup %5439 }
 0x2d5   :  { %4418 = vst [vmem:[%s8976_s3 + $0x1c0] sm:$0xff] %v5440_v6 }
 0x2d6   :  { %v5442_v21 = vpop.eup %5441 }
 0x2d7   :  { %4419 = vst [vmem:[%s8976_s3 + $0x1c8] sm:$0xff] %v5442_v21 }
 0x2dc   :  { %v4275_v41 = vpop.f32.mrb[52].mxu1 }
 0x2dd   :  { %v4276_v39 = vadd.f32 %v8746_v3, %v4275_v41  ;;  %v4277_v26 = vpop.f32.mrb[53].mxu1 }
 0x2de   :  { %v4278_v11 = vpop.f32.mrb[54].mxu1 }
 0x2df   :  { %v4147_v28 = vpop.f32.mrb[52].mxu0  ;;  %5443 = vtanh.f32 %v4276_v39  ;;  %v4279_v9 = vadd.f32 %v8746_v3, %v4278_v11  ;;  %v4280_v23 = vpop.f32.mrb[55].mxu1 }
 0x2e0   :  { %v4148_v50 = vadd.f32 %v8746_v3, %v4147_v28  ;;  %v4149_v17 = vpop.f32.mrb[53].mxu0 }
 0x2e1   :  { %v4150_v15 = vpop.f32.mrb[54].mxu0  ;;  %5445 = vtanh.f32 %v4279_v9 }
 0x2e2   :  { %5447 = vtanh.f32 %v4148_v50  ;;  %v4151_v47 = vadd.f32 %v8746_v3, %v4150_v15  ;;  %v4152_v34 = vpop.f32.mrb[55].mxu0 }
 0x2e4   :  { %5449 = vtanh.f32 %v4151_v47 }
 0x2e9   :  { %v5444_v57 = vpop.eup %5443 }
 0x2ea   :  { %4420 = vst [vmem:[%s8976_s3 + $0x1d0] sm:$0xff] %v5444_v57 }
 0x2eb   :  { %v5446_v8 = vpop.eup %5445 }
 0x2ec   :  { %v5448_v2 = vpop.eup %5447  ;;  %4421 = vst [vmem:[%s8976_s3 + $0x1d8] sm:$0xff] %v5446_v8 }
 0x2ed   :  { %4388 = vst [vmem:[%s8976_s3 + $0xd0] sm:$0xff] %v5448_v2 }
 0x2ee   :  { %v5450_v0 = vpop.eup %5449 }
 0x2ef   :  { %4389 = vst [vmem:[%s8976_s3 + $0xd8] sm:$0xff] %v5450_v0 }
 0x2f4   :  { %v4155_v55 = vpop.f32.mrb[56].mxu0 }
 0x2f5   :  { %v4156_v59 = vadd.f32 %v8746_v3, %v4155_v55  ;;  %v4157_v56 = vpop.f32.mrb[57].mxu0 }
 0x2f6   :  { %v4158_v51 = vpop.f32.mrb[58].mxu0 }
 0x2f7   :  { %5451 = vtanh.f32 %v4156_v59  ;;  %v4159_v22 = vadd.f32 %v8746_v3, %v4158_v51  ;;  %v4160_v10 = vpop.f32.mrb[59].mxu0 }
 0x2f9   :  { %5453 = vtanh.f32 %v4159_v22 }
 0x2fb   :  { %v4283_v38 = vpop.f32.mrb[56].mxu1 }
 0x2fc   :  { %v4284_v1 = vadd.f32 %v8746_v3, %v4283_v38  ;;  %v4285_v5 = vpop.f32.mrb[57].mxu1 }
 0x2fd   :  { %v4286_v62 = vpop.f32.mrb[58].mxu1 }
 0x2fe   :  { %5455 = vtanh.f32 %v4284_v1  ;;  %v4287_v12 = vadd.f32 %v8746_v3, %v4286_v62  ;;  %v4288_v16 = vpop.f32.mrb[59].mxu1 }
 0x300   :  { %5457 = vtanh.f32 %v4287_v12 }
 0x301   :  { %v5452_v58 = vpop.eup %5451 }
 0x302   :  { %4390 = vst [vmem:[%s8976_s3 + $0xe0] sm:$0xff] %v5452_v58 }
 0x303   :  { %v5454_v18 = vpop.eup %5453 }
 0x304   :  { %4391 = vst [vmem:[%s8976_s3 + $0xe8] sm:$0xff] %v5454_v18 }
 0x308   :  { %v5456_v45 = vpop.eup %5455 }
 0x309   :  { %4422 = vst [vmem:[%s8976_s3 + $0x1e0] sm:$0xff] %v5456_v45 }
 0x30a   :  { %v5458_v24 = vpop.eup %5457 }
 0x30b   :  { %4423 = vst [vmem:[%s8976_s3 + $0x1e8] sm:$0xff] %v5458_v24 }
 0x310   :  { %v4291_v37 = vpop.f32.mrb[60].mxu1 }
 0x311   :  { %v4292_v54 = vadd.f32 %v8746_v3, %v4291_v37  ;;  %v4293_v13 = vpop.f32.mrb[61].mxu1 }
 0x312   :  { %v4294_v27 = vpop.f32.mrb[62].mxu1 }
 0x313   :  { %v4163_v48 = vpop.f32.mrb[60].mxu0  ;;  %5459 = vtanh.f32 %v4292_v54  ;;  %v4295_v33 = vadd.f32 %v8746_v3, %v4294_v27  ;;  %v4296_v44 = vpop.f32.mrb[63].mxu1 }
 0x314   :  { %v4164_v4 = vadd.f32 %v8746_v3, %v4163_v48  ;;  %v4165_v7 = vpop.f32.mrb[61].mxu0 }
 0x315   :  { %v4166_v29 = vpop.f32.mrb[62].mxu0  ;;  %5461 = vtanh.f32 %v4295_v33 }
 0x316   :  { %5463 = vtanh.f32 %v4164_v4  ;;  %v4167_v60 = vadd.f32 %v8746_v3, %v4166_v29  ;;  %v4168_v40 = vpop.f32.mrb[63].mxu0 }
 0x318   :  { %5465 = vtanh.f32 %v4167_v60 }
 0x31d   :  { %v5460_v30 = vpop.eup %5459 }
 0x31e   :  { %4424 = vst [vmem:[%s8976_s3 + $0x1f0] sm:$0xff] %v5460_v30 }
 0x31f   :  { %v5462_v19 = vpop.eup %5461 }
 0x320   :  { %v5464_v43 = vpop.eup %5463  ;;  %4425 = vst [vmem:[%s8976_s3 + $0x1f8] sm:$0xff] %v5462_v19 }
 0x321   :  { %4392 = vst [vmem:[%s8976_s3 + $0xf0] sm:$0xff] %v5464_v43 }
 0x322   :  { %v5466_v61 = vpop.eup %5465 }
 0x323   :  { %4393 = vst [vmem:[%s8976_s3 + $0xf8] sm:$0xff] %v5466_v61 }

</bundles_post_ra>
